<compile_context>
chip_gen: v5e
topology: v5e:2x2
jax: 0.10.0
libtpu: 0.0.40
codegen_flags: <defaults>
</compile_context>

<pallas_src>
import math

import jax
import jax.numpy as jnp
from jax import lax
from jax.experimental import pallas as pl
from jax.experimental.pallas import tpu as pltpu

# Full-precision f32 matmuls on BOTH the kernel and the pure-JAX reference so
# the comparison is apples-to-apples (TPU default f32 matmul may use bf16 passes).
PRECISION = lax.Precision.HIGHEST

LANE = 128


def _round_up(x, m):
    return (x + m - 1) // m * m


# ----------------------------------------------------------------------------
# Fused Pallas kernel: prologue stage + all GraphConv layers, tiled node rows
# ----------------------------------------------------------------------------
def _make_fused_gcn_kernel(num_layers, batch, tile_n, dpad, douts):
    L = num_layers
    B = batch

    def kernel(nn_ref, adj_ref, x_ref, w_ref, b_ref, o_ref, h_ref):
        # grid = (L + 1, num_node_tiles)
        l = pl.program_id(0)                       # 0 = prologue, 1..L = layers
        i = pl.program_id(1)                       # node-row tile index
        row0 = pl.multiple_of(i * tile_n, tile_n)  # aligned dynamic-slice start

        write_slot = l % 2                          # activation scratch ping-pong
        read_slot = (l + 1) % 2                     # == (l - 1) % 2 for l >= 1

        @pl.when(l == 0)
        def _prologue():
            # Stage the (zero-padded) node features into the activation scratch.
            h_ref[write_slot, :, pl.ds(row0, tile_n), :] = x_ref[...]

        @pl.when(l > 0)
        def _layer():
            lyr = l - 1
            w = w_ref[lyr]                          # (DPAD, DPAD)  zero-padded
            b = b_ref[lyr]                          # (1, DPAD)     zero-padded

            adj = adj_ref[...].astype(jnp.float32)  # bf16 0/1 -> exact f32
            h_all = h_ref[read_slot]                # (B, N_pad, DPAD), full node set

            # Aggregation first, exactly like torch: y = (adj @ h) @ W + b.
            agg = jnp.einsum("btn,bnd->btd", adj, h_all,
                             preferred_element_type=jnp.float32,
                             precision=PRECISION)
            y = jnp.dot(agg.reshape(B * tile_n, dpad), w,
                        preferred_element_type=jnp.float32,
                        precision=PRECISION)
            y = y.reshape(B, tile_n, dpad) + b

            # F.normalize(p=2, dim=2): y / max(||y||, 1e-12) as a single rsqrt.
            ss = jnp.sum(y * y, axis=-1, keepdims=True)
            y = y * lax.rsqrt(jnp.maximum(ss, 1e-24))

            # nn.ReLU()
            y = jnp.maximum(y, 0.0)

            # BatchNorm1d(num_nodes), training mode: per-node stats over
            # (batch, feature), single pass (sum + sum-of-squares).  Padded
            # feature columns are zero, so the sums are unaffected; divide by
            # the layer's true feature width.
            d_true = jnp.float32(douts[0])
            for li in range(1, L):
                d_true = jnp.where(lyr == li, jnp.float32(douts[li]), d_true)
            inv = 1.0 / (B * d_true)
            s1 = jnp.sum(jnp.sum(y, axis=2, keepdims=True),
                         axis=0, keepdims=True) * inv            # mean  (1,T,1)
            s2 = jnp.sum(jnp.sum(y * y, axis=2, keepdims=True),
                         axis=0, keepdims=True) * inv            # E[y^2]
            var = jnp.maximum(s2 - s1 * s1, 0.0)
            h_bn = (y - s1) * lax.rsqrt(var + 1e-5)

            # Persist the (unmasked) activation for the next layer.
            h_ref[write_slot, :, pl.ds(row0, tile_n), :] = h_bn

            # Node-validity mask built from SMEM batch_num_nodes (iota+compare).
            rows = lax.broadcasted_iota(jnp.int32, (B, tile_n, 1), 1) + row0
            bidx = lax.broadcasted_iota(jnp.int32, (B, tile_n, 1), 0)
            limit = jnp.zeros((B, tile_n, 1), jnp.int32)
            for bb in range(B):
                limit = jnp.where(bidx == bb, nn_ref[bb], limit)
            mask = (rows < limit).astype(jnp.float32)

            # Lane-dense 128-wide store of this layer's slab for this tile.
            o_ref[...] = h_bn * mask

    return kernel


# ----------------------------------------------------------------------------
# Wrapper: pad/pack operands, build the grid, unpad + concat the slabs
# ----------------------------------------------------------------------------
def gcn_forward_fused(x, adj, batch_num_nodes, params):
    """conv_first -> conv_block* -> conv_last (each + ReLU + BN), concat, mask."""
    B, N, Din = x.shape
    L = len(params)
    douts = tuple(int(p["w"].shape[1]) for p in params)

    dpad = _round_up(max((Din,) + douts), LANE)
    tile_n = 128 if N >= 128 else _round_up(N, 8)
    n_pad = _round_up(N, tile_n)
    nt = n_pad // tile_n

    # ---- pad & pack operands -------------------------------------------------
    x_p = jnp.zeros((B, n_pad, dpad), jnp.float32).at[:, :N, :Din].set(x)
    adj_p = (jnp.zeros((B, n_pad, n_pad), jnp.float32)
             .at[:, :N, :N].set(adj)
             .astype(jnp.bfloat16))                       # 0/1 -> exact in bf16
    w_stack = jnp.zeros((L, dpad, dpad), jnp.float32)
    b_stack = jnp.zeros((L, 1, dpad), jnp.float32)
    for li, p in enumerate(params):
        di, do = p["w"].shape
        w_stack = w_stack.at[li, :di, :do].set(p["w"])
        b_stack = b_stack.at[li, 0, :do].set(p["b"])

    kernel = _make_fused_gcn_kernel(L, B, tile_n, dpad, douts)

    grid_spec = pltpu.PrefetchScalarGridSpec(
        num_scalar_prefetch=1,                 # batch_num_nodes -> SMEM
        grid=(L + 1, nt),
        in_specs=[
            # adj node-row tiles; pinned to tile 0 during the prologue stage so
            # no bandwidth is wasted there.
            pl.BlockSpec((B, tile_n, n_pad),
                         lambda l, i, nn: (0, jnp.where(l == 0, 0, i), 0)),
            # x tiles are only consumed at stage 0; pinned afterwards.
            pl.BlockSpec((B, tile_n, dpad),
                         lambda l, i, nn: (0, jnp.where(l == 0, i, 0), 0)),
            # packed weights / biases: whole-array resident (DMA'd once).
            pl.BlockSpec((L, dpad, dpad), lambda l, i, nn: (0, 0, 0)),
            pl.BlockSpec((L, 1, dpad), lambda l, i, nn: (0, 0, 0)),
        ],
        # One lane-dense (B, TILE_N, DPAD) slab per (layer, tile); during the
        # prologue the block is pinned to the slab that stage 1/tile 0 writes
        # next, so no garbage ever reaches HBM.
        out_specs=pl.BlockSpec(
            (None, B, tile_n, dpad),
            lambda l, i, nn: (jnp.maximum(l - 1, 0), 0,
                              jnp.where(l == 0, 0, i), 0)),
        scratch_shapes=[
            # double-buffered activation scratch (layer l-1 read / layer l write)
            pltpu.VMEM((2, B, n_pad, dpad), jnp.float32),
        ],
    )

    out = pl.pallas_call(
        kernel,
        grid_spec=grid_spec,
        out_shape=jax.ShapeDtypeStruct((L, B, n_pad, dpad), jnp.float32),
        compiler_params=pltpu.CompilerParams(
            # Layer stage must be sequential; node tiles feed a shared scratch
            # that later layers read across tiles, so it is sequential too.
            dimension_semantics=("arbitrary", "arbitrary"),
            vmem_limit_bytes=32 * 1024 * 1024,
        ),
    )(batch_num_nodes.astype(jnp.int32), adj_p, x_p, w_stack, b_stack)

    # Unpad + feature-dim concat of the per-layer slabs (tiny, fused by XLA).
    slabs = [out[li, :, :N, :douts[li]] for li in range(L)]
    return jnp.concatenate(slabs, axis=-1)


# ----------------------------------------------------------------------------
# Model glue (plain JAX): parameter init, stage-0 forward
# ----------------------------------------------------------------------------
def xavier_relu(key, fan_in, fan_out):
    gain = math.sqrt(2.0)                       # calculate_gain('relu')
    limit = gain * math.sqrt(6.0 / (fan_in + fan_out))
    return jax.random.uniform(key, (fan_in, fan_out), jnp.float32, -limit, limit)


def init_gcn_params(key, input_dim, hidden_dim, embedding_dim, num_layers):
    keys = jax.random.split(key, num_layers)
    dims = [(input_dim, hidden_dim)] \
        + [(hidden_dim, hidden_dim)] * (num_layers - 2) \
        + [(hidden_dim, embedding_dim)]
    return [{"w": xavier_relu(k, di, do), "b": jnp.zeros((do,), jnp.float32)}
            for k, (di, do) in zip(keys, dims)]


@jax.jit
def mip_gcn_encoder_stage0(x, adj, batch_num_nodes, params):
    """Stage-0 embedding tensor of MipGcnEncoder.forward (the defined part)."""
    return gcn_forward_fused(x, adj, batch_num_nodes, params)


# ----------------------------------------------------------------------------
# Pure-JAX reference (mirrors the PyTorch op order) for correctness checking
# ----------------------------------------------------------------------------
def _conv_ref(x, adj, w, b):
    y = jnp.einsum("bij,bjd->bid", adj, x, precision=PRECISION)
    y = jnp.einsum("bid,de->bie", y, w, precision=PRECISION) + b
    n = jnp.sqrt(jnp.sum(y * y, axis=-1, keepdims=True))
    y = y / jnp.maximum(n, 1e-12)
    return jnp.maximum(y, 0.0)


def _bn_ref(x):
    mean = jnp.mean(x, axis=(0, 2), keepdims=True)
    var = jnp.mean((x - mean) ** 2, axis=(0, 2), keepdims=True)
    return (x - mean) / jnp.sqrt(var + 1e-5)


def _ref(x, adj, batch_num_nodes, params):
    N = adj.shape[1]
    mask = (jnp.arange(N)[None, :] < batch_num_nodes[:, None]
            ).astype(jnp.float32)[:, :, None]
    h, outs = x, []
    for p in params:
        h = _bn_ref(_conv_ref(h, adj, p["w"], p["b"]))
        outs.append(h)
    return jnp.concatenate(outs, axis=2) * mask


# ----------------------------------------------------------------------------
if __name__ == "__main__":
    # Small shapes consistent with the module (2 node-row tiles -> real grid).
    B, N = 2, 256                   # batch, max_num_nodes
    input_dim, hidden_dim, embedding_dim = 8, 16, 32
    num_layers = 3

    key = jax.random.PRNGKey(0)
    kx, kadj, kp = jax.random.split(key, 3)

    x = jax.random.normal(kx, (B, N, input_dim), jnp.float32)
    a = jax.random.uniform(kadj, (B, N, N), jnp.float32)
    adj = ((a + jnp.swapaxes(a, 1, 2)) * 0.5 > 0.5).astype(jnp.float32)
    batch_num_nodes = jnp.array([200, 256], dtype=jnp.int32)

    params = init_gcn_params(kp, input_dim, hidden_dim, embedding_dim, num_layers)

    out = mip_gcn_encoder_stage0(x, adj, batch_num_nodes, params)
    out = jax.block_until_ready(out)

    ref = _ref(x, adj, batch_num_nodes, params)
    assert out.shape == (B, N, hidden_dim * (num_layers - 1) + embedding_dim)
    err = float(jnp.max(jnp.abs(out - ref)))
    assert jnp.allclose(out, ref, atol=2e-3, rtol=2e-3), \
        f"mismatch vs reference, max |err| = {err}"

    print("KERNEL_OK")
</pallas_src>

<mosaic_0001>
module attributes {stable_mosaic.version = 11 : i64} {
  func.func @kernel(%arg0: i32, %arg1: i32, %arg2: memref<2xi32, #tpu.memory_space<smem>>, %arg3: memref<2x128x256xbf16, #tpu.memory_space<vmem>>, %arg4: memref<2x128x128xf32, #tpu.memory_space<vmem>>, %arg5: memref<3x128x128xf32, #tpu.memory_space<vmem>>, %arg6: memref<3x1x128xf32, #tpu.memory_space<vmem>>, %arg7: memref<1x2x128x128xf32, #tpu.memory_space<vmem>>, %arg8: memref<2x2x256x128xf32, #tpu.memory_space<vmem>>) attributes {dimension_semantics = [#tpu.dimension_semantics<arbitrary>, #tpu.dimension_semantics<arbitrary>], iteration_bounds = array<i64: 4, 2>, scalar_prefetch = 1 : i64, scratch_operands = 1 : i64, tpu.core_type = #tpu.core_type<tc>, window_params = [{transform_indices = @transform_0, window_bounds = array<i64: 2, 128, 256>}, {transform_indices = @transform_1, window_bounds = array<i64: 2, 128, 128>}, {pipeline_mode = #tpu.pipeline_mode<synchronous>, transform_indices = @transform_2, window_bounds = array<i64: 3, 128, 128>}, {pipeline_mode = #tpu.pipeline_mode<synchronous>, transform_indices = @transform_3, window_bounds = array<i64: 3, 1, 128>}, {transform_indices = @transform_4, window_bounds = array<i64: 1, 2, 128, 128>}]} {
    %c128_i32 = arith.constant 128 : i32
    %0 = arith.muli %arg1, %c128_i32 : i32
    %1 = tpu.assume_multiple %0, 128 : i32
    %c2_i32 = arith.constant 2 : i32
    %c0_i32 = arith.constant 0 : i32
    %2 = arith.cmpi eq, %c2_i32, %c0_i32 : i32
    %c1_i32 = arith.constant 1 : i32
    %3 = arith.select %2, %c1_i32, %c2_i32 : i32
    %4 = arith.remsi %arg0, %3 : i32
    %c0_i32_0 = arith.constant 0 : i32
    %5 = arith.cmpi ne, %4, %c0_i32_0 : i32
    %c0_i32_1 = arith.constant 0 : i32
    %6 = arith.cmpi slt, %4, %c0_i32_1 : i32
    %c0_i32_2 = arith.constant 0 : i32
    %7 = arith.cmpi slt, %3, %c0_i32_2 : i32
    %8 = arith.xori %6, %7 : i1
    %9 = arith.andi %8, %5 : i1
    %10 = arith.addi %4, %3 : i32
    %11 = arith.select %9, %10, %4 : i32
    %c1_i32_3 = arith.constant 1 : i32
    %12 = arith.addi %arg0, %c1_i32_3 : i32
    %c2_i32_4 = arith.constant 2 : i32
    %c0_i32_5 = arith.constant 0 : i32
    %13 = arith.cmpi eq, %c2_i32_4, %c0_i32_5 : i32
    %c1_i32_6 = arith.constant 1 : i32
    %14 = arith.select %13, %c1_i32_6, %c2_i32_4 : i32
    %15 = arith.remsi %12, %14 : i32
    %c0_i32_7 = arith.constant 0 : i32
    %16 = arith.cmpi ne, %15, %c0_i32_7 : i32
    %c0_i32_8 = arith.constant 0 : i32
    %17 = arith.cmpi slt, %15, %c0_i32_8 : i32
    %c0_i32_9 = arith.constant 0 : i32
    %18 = arith.cmpi slt, %14, %c0_i32_9 : i32
    %19 = arith.xori %17, %18 : i1
    %20 = arith.andi %19, %16 : i1
    %21 = arith.addi %15, %14 : i32
    %22 = arith.select %20, %21, %15 : i32
    %c0_i32_10 = arith.constant 0 : i32
    %23 = arith.cmpi eq, %arg0, %c0_i32_10 : i32
    %24 = arith.extui %23 : i1 to i32
    %c0_i32_11 = arith.constant 0 : i32
    %25 = arith.cmpi ne, %24, %c0_i32_11 : i32
    scf.if %25 {
      %c0 = arith.constant 0 : index
      %c0_14 = arith.constant 0 : index
      %c0_15 = arith.constant 0 : index
      %29 = vector.load %arg4[%c0, %c0_14, %c0_15] : memref<2x128x128xf32, #tpu.memory_space<vmem>>, vector<2x128x128xf32>
      %30 = arith.index_cast %11 : i32 to index
      %c0_16 = arith.constant 0 : index
      %31 = arith.index_cast %1 : i32 to index
      %c0_17 = arith.constant 0 : index
      %32 = vector.load %arg8[%30, %c0_16, %31, %c0_17] : memref<2x2x256x128xf32, #tpu.memory_space<vmem>>, vector<1x2x128x128xf32>
      %33 = vector.shape_cast %32 : vector<1x2x128x128xf32> to vector<2x128x128xf32>
      %34 = vector.shape_cast %29 : vector<2x128x128xf32> to vector<1x2x128x128xf32>
      tpu.vector_store %arg8[%30, %c0_16, %31, %c0_17], %34 {strides = array<i32>} : memref<2x2x256x128xf32, #tpu.memory_space<vmem>>, vector<1x2x128x128xf32>,
    } else {
    }
    %c0_i32_12 = arith.constant 0 : i32
    %26 = arith.cmpi sgt, %arg0, %c0_i32_12 : i32
    %27 = arith.extui %26 : i1 to i32
    %c0_i32_13 = arith.constant 0 : i32
    %28 = arith.cmpi ne, %27, %c0_i32_13 : i32
    scf.if %28 {
      %c1_i32_14 = arith.constant 1 : i32
      %29 = arith.subi %arg0, %c1_i32_14 : i32
      %30 = arith.index_cast %29 : i32 to index
      %c0 = arith.constant 0 : index
      %c0_15 = arith.constant 0 : index
      %31 = vector.load %arg5[%30, %c0, %c0_15] : memref<3x128x128xf32, #tpu.memory_space<vmem>>, vector<1x128x128xf32>
      %32 = vector.shape_cast %31 : vector<1x128x128xf32> to vector<128x128xf32>
      %33 = arith.index_cast %29 : i32 to index
      %c0_16 = arith.constant 0 : index
      %c0_17 = arith.constant 0 : index
      %34 = vector.load %arg6[%33, %c0_16, %c0_17] : memref<3x1x128xf32, #tpu.memory_space<vmem>>, vector<1x1x128xf32>
      %35 = vector.shape_cast %34 : vector<1x1x128xf32> to vector<1x128xf32>
      %c0_18 = arith.constant 0 : index
      %c0_19 = arith.constant 0 : index
      %c0_20 = arith.constant 0 : index
      %36 = vector.load %arg3[%c0_18, %c0_19, %c0_20] : memref<2x128x256xbf16, #tpu.memory_space<vmem>>, vector<2x128x256xbf16>
      %37 = arith.extf %36 : vector<2x128x256xbf16> to vector<2x128x256xf32>
      %38 = arith.index_cast %22 : i32 to index
      %c0_21 = arith.constant 0 : index
      %c0_22 = arith.constant 0 : index
      %c0_23 = arith.constant 0 : index
      %39 = vector.load %arg8[%38, %c0_21, %c0_22, %c0_23] : memref<2x2x256x128xf32, #tpu.memory_space<vmem>>, vector<1x2x256x128xf32>
      %40 = vector.shape_cast %39 : vector<1x2x256x128xf32> to vector<2x256x128xf32>
      "tpu.trace_start"() <{level = 10 : i32, message = "btn,bnd->btd"}> : () -> ()
      %cst = arith.constant dense<0.000000e+00> : vector<2x128x128xf32>
      %41 = tpu.matmul %37, %40, %cst {dimension_numbers = #tpu.dot_dimension_numbers<[2], [1], [1], [2], [0, 0, 0, 1, 1, 2], [0], [0]>, precision = #tpu.contract_precision<fp32>} : vector<2x128x256xf32>, vector<2x256x128xf32>, vector<2x128x128xf32> -> vector<2x128x128xf32>
      "tpu.trace_stop"() : () -> ()
      %42 = vector.shape_cast %41 : vector<2x128x128xf32> to vector<256x128xf32>
      %cst_24 = arith.constant dense<0.000000e+00> : vector<256x128xf32>
      %43 = tpu.matmul %42, %32, %cst_24 {dimension_numbers = #tpu.dot_dimension_numbers<[1], [0], [0], [1], [0, 0, 1, 1], [], []>, precision = #tpu.contract_precision<fp32>} : vector<256x128xf32>, vector<128x128xf32>, vector<256x128xf32> -> vector<256x128xf32>
      %44 = vector.shape_cast %43 : vector<256x128xf32> to vector<2x128x128xf32>
      %45 = vector.shape_cast %35 : vector<1x128xf32> to vector<1x1x128xf32>
      %46 = vector.broadcast %45 : vector<1x1x128xf32> to vector<2x128x128xf32>
      %47 = arith.addf %44, %46 : vector<2x128x128xf32>
      %48 = arith.mulf %47, %47 : vector<2x128x128xf32>
      %cst_25 = arith.constant dense<0.000000e+00> : vector<2x128xf32>
      %49 = vector.multi_reduction <add>, %48, %cst_25 [2] : vector<2x128x128xf32> to vector<2x128xf32>
      %50 = vector.shape_cast %49 : vector<2x128xf32> to vector<2x128x1xf32>
      %cst_26 = arith.constant 1.000000e-24 : f32
      %51 = vector.broadcast %cst_26 : f32 to vector<2x128x1xf32>
      %52 = arith.maximumf %50, %51 : vector<2x128x1xf32>
      %53 = math.rsqrt %52 : vector<2x128x1xf32>
      %54 = vector.broadcast %53 : vector<2x128x1xf32> to vector<2x128x128xf32>
      %55 = arith.mulf %47, %54 : vector<2x128x128xf32>
      %cst_27 = arith.constant 0.000000e+00 : f32
      %56 = vector.broadcast %cst_27 : f32 to vector<2x128x128xf32>
      %57 = arith.maximumf %55, %56 : vector<2x128x128xf32>
      %c1_i32_28 = arith.constant 1 : i32
      %58 = arith.cmpi eq, %29, %c1_i32_28 : i32
      %cst_29 = arith.constant 1.600000e+01 : f32
      %cst_30 = arith.constant 1.600000e+01 : f32
      %59 = arith.select %58, %cst_29, %cst_30 : f32
      %c2_i32_31 = arith.constant 2 : i32
      %60 = arith.cmpi eq, %29, %c2_i32_31 : i32
      %cst_32 = arith.constant 3.200000e+01 : f32
      %61 = arith.select %60, %cst_32, %59 : f32
      %cst_33 = arith.constant 2.000000e+00 : f32
      %62 = arith.mulf %cst_33, %61 : f32
      %cst_34 = arith.constant 1.000000e+00 : f32
      %63 = arith.divf %cst_34, %62 : f32
      %cst_35 = arith.constant dense<0.000000e+00> : vector<2x128xf32>
      %64 = vector.multi_reduction <add>, %57, %cst_35 [2] : vector<2x128x128xf32> to vector<2x128xf32>
      %65 = vector.shape_cast %64 : vector<2x128xf32> to vector<2x128x1xf32>
      %cst_36 = arith.constant dense<0.000000e+00> : vector<128x1xf32>
      %66 = vector.multi_reduction <add>, %65, %cst_36 [0] : vector<2x128x1xf32> to vector<128x1xf32>
      %67 = vector.shape_cast %66 : vector<128x1xf32> to vector<1x128x1xf32>
      %68 = vector.broadcast %63 : f32 to vector<1x128x1xf32>
      %69 = arith.mulf %67, %68 : vector<1x128x1xf32>
      %70 = arith.mulf %57, %57 : vector<2x128x128xf32>
      %cst_37 = arith.constant dense<0.000000e+00> : vector<2x128xf32>
      %71 = vector.multi_reduction <add>, %70, %cst_37 [2] : vector<2x128x128xf32> to vector<2x128xf32>
      %72 = vector.shape_cast %71 : vector<2x128xf32> to vector<2x128x1xf32>
      %cst_38 = arith.constant dense<0.000000e+00> : vector<128x1xf32>
      %73 = vector.multi_reduction <add>, %72, %cst_38 [0] : vector<2x128x1xf32> to vector<128x1xf32>
      %74 = vector.shape_cast %73 : vector<128x1xf32> to vector<1x128x1xf32>
      %75 = vector.broadcast %63 : f32 to vector<1x128x1xf32>
      %76 = arith.mulf %74, %75 : vector<1x128x1xf32>
      %77 = arith.mulf %69, %69 : vector<1x128x1xf32>
      %78 = arith.subf %76, %77 : vector<1x128x1xf32>
      %cst_39 = arith.constant 0.000000e+00 : f32
      %79 = vector.broadcast %cst_39 : f32 to vector<1x128x1xf32>
      %80 = arith.maximumf %78, %79 : vector<1x128x1xf32>
      %81 = vector.broadcast %69 : vector<1x128x1xf32> to vector<2x128x128xf32>
      %82 = arith.subf %57, %81 : vector<2x128x128xf32>
      %cst_40 = arith.constant 9.99999974E-6 : f32
      %83 = vector.broadcast %cst_40 : f32 to vector<1x128x1xf32>
      %84 = arith.addf %80, %83 : vector<1x128x1xf32>
      %85 = math.rsqrt %84 : vector<1x128x1xf32>
      %86 = vector.broadcast %85 : vector<1x128x1xf32> to vector<2x128x128xf32>
      %87 = arith.mulf %82, %86 : vector<2x128x128xf32>
      %88 = arith.index_cast %11 : i32 to index
      %c0_41 = arith.constant 0 : index
      %89 = arith.index_cast %1 : i32 to index
      %c0_42 = arith.constant 0 : index
      %90 = vector.load %arg8[%88, %c0_41, %89, %c0_42] : memref<2x2x256x128xf32, #tpu.memory_space<vmem>>, vector<1x2x128x128xf32>
      %91 = vector.shape_cast %90 : vector<1x2x128x128xf32> to vector<2x128x128xf32>
      %92 = vector.shape_cast %87 : vector<2x128x128xf32> to vector<1x2x128x128xf32>
      tpu.vector_store %arg8[%88, %c0_41, %89, %c0_42], %92 {strides = array<i32>} : memref<2x2x256x128xf32, #tpu.memory_space<vmem>>, vector<1x2x128x128xf32>,
      %93 = tpu.iota {dimensions = array<i32: 1>} : vector<2x128x1xi32>
      %94 = vector.broadcast %1 : i32 to vector<2x128x1xi32>
      %95 = arith.addi %93, %94 : vector<2x128x1xi32>
      %96 = tpu.iota {dimensions = array<i32: 0>} : vector<2x128x1xi32>
      %c0_i32_43 = arith.constant 0 : i32
      %97 = vector.broadcast %c0_i32_43 : i32 to vector<2x128x1xi32>
      %c0_i32_44 = arith.constant 0 : i32
      %98 = vector.broadcast %c0_i32_44 : i32 to vector<2x128x1xi32>
      %99 = arith.cmpi eq, %96, %98 : vector<2x128x1xi32>
      %c0_45 = arith.constant 0 : index
      %100 = memref.load %arg2[%c0_45] : memref<2xi32, #tpu.memory_space<smem>>
      %101 = vector.broadcast %100 : i32 to vector<2x128x1xi32>
      %102 = arith.select %99, %101, %97 : vector<2x128x1xi1>, vector<2x128x1xi32>
      %c1_i32_46 = arith.constant 1 : i32
      %103 = vector.broadcast %c1_i32_46 : i32 to vector<2x128x1xi32>
      %104 = arith.cmpi eq, %96, %103 : vector<2x128x1xi32>
      %c1 = arith.constant 1 : index
      %105 = memref.load %arg2[%c1] : memref<2xi32, #tpu.memory_space<smem>>
      %106 = vector.broadcast %105 : i32 to vector<2x128x1xi32>
      %107 = arith.select %104, %106, %102 : vector<2x128x1xi1>, vector<2x128x1xi32>
      %108 = arith.cmpi slt, %95, %107 : vector<2x128x1xi32>
      %109 = arith.extui %108 : vector<2x128x1xi1> to vector<2x128x1xi32>
      %110 = arith.sitofp %109 : vector<2x128x1xi32> to vector<2x128x1xf32>
      %111 = vector.broadcast %110 : vector<2x128x1xf32> to vector<2x128x128xf32>
      %112 = arith.mulf %87, %111 : vector<2x128x128xf32>
      %c0_47 = arith.constant 0 : index
      %c0_48 = arith.constant 0 : index
      %c0_49 = arith.constant 0 : index
      %c0_50 = arith.constant 0 : index
      %113 = vector.load %arg7[%c0_47, %c0_48, %c0_49, %c0_50] : memref<1x2x128x128xf32, #tpu.memory_space<vmem>>, vector<1x2x128x128xf32>
      %114 = vector.shape_cast %113 : vector<1x2x128x128xf32> to vector<2x128x128xf32>
      %115 = vector.shape_cast %112 : vector<2x128x128xf32> to vector<1x2x128x128xf32>
      tpu.vector_store %arg7[%c0_47, %c0_48, %c0_49, %c0_50], %115 {strides = array<i32>} : memref<1x2x128x128xf32, #tpu.memory_space<vmem>>, vector<1x2x128x128xf32>,
    } else {
    }
    return
  }
  func.func @transform_0(%arg0: i32, %arg1: i32, %arg2: memref<2xi32, #tpu.memory_space<smem>>) -> (i32, i32, i32) {
    %c0_i32 = arith.constant 0 : i32
    %0 = arith.cmpi eq, %arg0, %c0_i32 : i32
    %c0_i32_0 = arith.constant 0 : i32
    %1 = arith.select %0, %c0_i32_0, %arg1 : i32
    %c0_i32_1 = arith.constant 0 : i32
    %c0_i32_2 = arith.constant 0 : i32
    %c0_i32_3 = arith.constant 0 : i32
    return %c0_i32_1, %1, %c0_i32_2 : i32, i32, i32
  }
  func.func @transform_1(%arg0: i32, %arg1: i32, %arg2: memref<2xi32, #tpu.memory_space<smem>>) -> (i32, i32, i32) {
    %c0_i32 = arith.constant 0 : i32
    %0 = arith.cmpi eq, %arg0, %c0_i32 : i32
    %c0_i32_0 = arith.constant 0 : i32
    %1 = arith.select %0, %arg1, %c0_i32_0 : i32
    %c0_i32_1 = arith.constant 0 : i32
    %c0_i32_2 = arith.constant 0 : i32
    %c0_i32_3 = arith.constant 0 : i32
    return %c0_i32_1, %1, %c0_i32_2 : i32, i32, i32
  }
  func.func @transform_2(%arg0: i32, %arg1: i32, %arg2: memref<2xi32, #tpu.memory_space<smem>>) -> (i32, i32, i32) {
    %c0_i32 = arith.constant 0 : i32
    %c0_i32_0 = arith.constant 0 : i32
    %c0_i32_1 = arith.constant 0 : i32
    %c0_i32_2 = arith.constant 0 : i32
    return %c0_i32, %c0_i32_0, %c0_i32_1 : i32, i32, i32
  }
  func.func @transform_3(%arg0: i32, %arg1: i32, %arg2: memref<2xi32, #tpu.memory_space<smem>>) -> (i32, i32, i32) {
    %c0_i32 = arith.constant 0 : i32
    %c0_i32_0 = arith.constant 0 : i32
    %c0_i32_1 = arith.constant 0 : i32
    %c0_i32_2 = arith.constant 0 : i32
    return %c0_i32, %c0_i32_0, %c0_i32_1 : i32, i32, i32
  }
  func.func @transform_4(%arg0: i32, %arg1: i32, %arg2: memref<2xi32, #tpu.memory_space<smem>>) -> (i32, i32, i32, i32) {
    %c1_i32 = arith.constant 1 : i32
    %0 = arith.subi %arg0, %c1_i32 : i32
    %c0_i32 = arith.constant 0 : i32
    %1 = arith.maxsi %0, %c0_i32 : i32
    %c0_i32_0 = arith.constant 0 : i32
    %2 = arith.cmpi eq, %arg0, %c0_i32_0 : i32
    %c0_i32_1 = arith.constant 0 : i32
    %3 = arith.select %2, %c0_i32_1, %arg1 : i32
    %c0_i32_2 = arith.constant 0 : i32
    %c0_i32_3 = arith.constant 0 : i32
    %c0_i32_4 = arith.constant 0 : i32
    return %1, %c0_i32_2, %3, %c0_i32_3 : i32, i32, i32, i32
  }
}

</mosaic_0001>

<bundles_post_ra>
// kernel: mip_gcn_encoder_stage0.1
= control target key start
LH: loop header
LB: loop body
LE: loop exit
PB: predicated region body
PF: predicated region fallthrough
CT: control target
= control target key end

     0   :  { %s6988_s21 = smov [#allocation4]   ;;  %s12194_s0 = inlined_call_operand.vmem [shape: s32[2], index: 0, kind: input, shape index: {}]   ;;  %s12195_s1 = inlined_call_operand.vmem [shape: bf16[2,256,256], index: 1, kind: input, shape index: {}]   ;;  %s12196_s2 = inlined_call_operand.vmem [shape: f32[2,256,128], index: 2, kind: input, shape index: {}]   ;;  %s12197_s3 = inlined_call_operand.vmem [shape: f32[3,128,128], index: 3, kind: input, shape index: {}]   ;;  %s12198_s4 = inlined_call_operand.vmem [shape: f32[3,1,128], index: 4, kind: input, shape index: {}]   ;;  %s12199_s5 = inlined_call_operand.vmem [shape: f32[3,2,256,128], index: 5, kind: output, shape index: {}]  }
   0x1   :  { %12555 = sst [smem:[#allocation120_spill]] %s12199_s5  ;;  %s11_s20 = sshll.u32 %s12194_s0, 4  ;;  %s12_s20 = int_to_ptr.vmem [resolvable:$true] %s11_s20 }
   0x2   :  { %14 = dma.vmem_to_smem %s12_s20, 16, %s6988_s21, [#allocation3] }
   0x3   :  { %6942 = dma.done.wait [#allocation3], 16 }
   0x4   :  { %6943 = vsyncadd [#allocation3], 4294967280 }
   0x5   :  { %17 = sfence }
   0x6   :  { %s7023_s22 = smov 0   ;;  %s7025_s23 = smov 0  }
   0x7   :  { %s7027_s24 = smov 0   ;;  %s7029_s25 = smov 0  }
   0x8   :  { %s7031_s26 = smov 0   ;;  %s7033_s27 = smov 0  }
   0x9   :  { %s7035_s28 = smov 0   ;;  %s7037_s0 = smov 0  }
   0xa   :  { %s7039_s29 = smov 0   ;;  %s7041_s30 = smov 0  }
   0xb   :  { %s7043_s6 = smov 0  }
   0xc LB: > { %12556 = sst [smem:[#allocation9_spill]] %s6978_s29  ;;  %s32_s8 = sadd.s32 1, %s6978_s29  ;;  %s6986_s6 = sphi %s7043_s6, %s23_s6   ;;  %s6982_s30 = sphi %s7041_s30, %s13360_s30   ;;  %s6978_s29 = sphi %s7039_s29, %s13359_s29   ;;  %s6974_s0 = sphi %s7037_s0, %s13368_s0   ;;  %s6970_s28 = sphi %s7035_s28, %s13367_s28   ;;  %s6966_s27 = sphi %s7033_s27, %s13366_s27   ;;  %s6962_s26 = sphi %s7031_s26, %s13365_s26   ;;  %s6958_s25 = sphi %s7029_s25, %s13364_s25   ;;  %s6954_s24 = sphi %s7027_s24, %s13363_s24   ;;  %s6950_s23 = sphi %s7025_s23, %s13362_s23   ;;  %s6946_s22 = sphi %s7023_s22, %s13361_s22  }
   0xd   : > { %12557 = sst [smem:[#allocation10_spill]] %s6982_s30  ;;  %p33_p0 = scmp.ge.s32.totalorder %s32_s8, 2 }
   0xe   : > { %s35_s9 = sadd.s32 1, %s6982_s30  ;;  %p39_p1 = scmp.eq.s32.totalorder %s6982_s30, 0 }
   0xf   : > { %s46_s10 = sadd.s32 1, %s6966_s27  ;;  %s13370_s8 = smov (%p33_p0, %s32_s8), 0 }
  0x10   : > { %12558 = sst [smem:[#allocation11_spill]] %s13370_s8  ;;  %s13372_s9 = smov (!%p33_p0, %s35_s9), %s6982_s30 }
  0x11   : > { %s7089_s11 = scalar_select %p39_p1, 0, %s6978_s29 }
  0x12   : > { %p37_p2 = scmp.ge.s32.totalorder %s13372_s9, 4  ;;  %p53_p3 = scmp.ne.s32.totalorder %s6966_s27, %s6962_s26 }
  0x13   : > { %p54_p4 = scmp.eq.s32.totalorder %s6986_s6, 0  ;;  %s76_s12 = sadd.s32 1, %s6958_s25 }
  0x14   : > { %s13374_s9 = smov (%p37_p2, %s13372_s9), 0  ;;  %p83_p6 = scmp.ne.s32.totalorder %s6958_s25, %s6954_s24 }
  0x15   : > { %12559 = sst [smem:[#allocation12_spill]] %s13374_s9  ;;  %p7097_p5 = por %p54_p4, %p53_p3 }
  0x16   : > { %p41_p7 = scmp.eq.s32.totalorder %s13374_s9, 0  ;;  %s6606_s14 = sadd.s32 4294967295, %s6982_s30 }
  0x17   : > { %s7108_s15 = scalar_select %p39_p1, %s6978_s29, 0 }
  0x18   : > { %s42_s16 = scalar_select %p41_p7, 0, %s13370_s8 }
  0x19   : > { %s72_s17 = scalar_select %p41_p7, %s13370_s8, 0 }
  0x1a   : > { %s43_s18 = ssub.s32 %s7089_s11, %s42_s16  ;;  %p7113_p8 = por %p83_p6, %p54_p4 }
  0x1b   : > { %p44_p9 = scmp.eq.s32.totalorder %s43_s18, 0  ;;  %s73_s20 = ssub.s32 %s7108_s15, %s72_s17 }
  0x1c   : > { %p74_p10 = scmp.eq.s32.totalorder %s73_s20, 0  ;;  %p142_p11 = scmp.gt.s32.totalorder %s6606_s14, 0 }
  0x1d   : > { %s7119_s21 = scalar_select %p44_p9, %s6966_s27, %s46_s10  }
  0x1e   : > { %s7122_s7 = scalar_select %p74_p10, %s6958_s25, %s76_s12  }
  0x1f   : > { %12562 = sst [smem:[#allocation13_spill]] %s7119_s21  ;;  %s13376_s14 = smov (!%p142_p11, %s6606_s14), 0 }
  0x20   : > { %s6607_s30 = sadd.s32 4294967295, %s13374_s9  ;;  %p166_p13 = scmp.ne.s32.totalorder %s6950_s23, %s6946_s22 }
  0x21   : > { %p147_p12 = scmp.gt.s32.totalorder %s6607_s30, 0  ;;  %s12563_s8 = sadd.s32 4294967295, %s6986_s6  }
  0x22   : > { %p167_p0 = scmp.eq.s32.totalorder %s12563_s8, 7  ;;  %s156_s5 = sadd.s32 1, %s6950_s23 }
  0x23   : > { %s13378_s30 = smov (!%p147_p12, %s6607_s30), 0  ;;  %p6609_p3 = scmp.ge.s32.totalorder %s6986_s6, 8 }
  0x24   : > { %p7129_p1 = por %p167_p0, %p166_p13  ;;  %s151_s29 = ssub.s32 %s13376_s14, %s13378_s30 }
  0x25   : > { %s153_s17 = sor.u32 %s151_s29, %s43_s18  ;;  %195 = sbr.rel (%p6609_p3) target bundleno = 114 (0x72), region = 24 }
  0x26   : > { %p154_p2 = scmp.eq.s32.totalorder %s153_s17, 0 }
  0x28   : > { %s7135_s20 = scalar_select %p154_p2, %s6950_s23, %s156_s5  }
  0x2a   : > { %198 = sbr.rel (!%p7097_p5) target bundleno = 78 (0x4e), region = 28  ;;  %s200_s8 = sand.u32 (%p7097_p5), 1, %s6966_s27  }
  0x2b   : > { %s6676_s10 = sshll.u32 (%p7097_p5), %s7089_s11, 7  ;;  %s6610_s12 = sshll.u32 (%p7097_p5), %s200_s8, 8 }
  0x2c   : > { %s7145_s30 = scalar_lea.vmem (%p7097_p5), %s12195_s1, %s6676_s10  ;;  %s7150_s5 = scalar_lea.vmem (%p7097_p5), [#allocation5], %s6610_s12 }
  0x2d   : > { %v299_v0 = vld [vmem:[%s7145_s30] sm:$0xff] (%p7097_p5)  ;;  %v301_v1 = vld [vmem:[%s7145_s30 + $0x8] sm:$0xff] (%p7097_p5)  ;;  %v303_v2 = vld [vmem:[%s7145_s30 + $0x10] sm:$0xff] (%p7097_p5) }
  0x2e   : > { %300 = vst [vmem:[%s7150_s5] sm:$0xff] (%p7097_p5), %v299_v0  ;;  %v305_v3 = vld [vmem:[%s7145_s30 + $0x18] sm:$0xff] (%p7097_p5)  ;;  %v307_v4 = vld [vmem:[%s7145_s30 + $0x20] sm:$0xff] (%p7097_p5)  ;;  %v309_v5 = vld [vmem:[%s7145_s30 + $0x28] sm:$0xff] (%p7097_p5) }
  0x2f   : > { %302 = vst [vmem:[%s7150_s5 + $0x8] sm:$0xff] %v301_v1  ;;  %v311_v6 = vld [vmem:[%s7145_s30 + $0x30] sm:$0xff]  ;;  %v313_v7 = vld [vmem:[%s7145_s30 + $0x38] sm:$0xff]  ;;  %v315_v8 = vld [vmem:[%s7145_s30 + $0x40] sm:$0xff] }
  0x30   : > { %304 = vst [vmem:[%s7150_s5 + $0x10] sm:$0xff] %v303_v2  ;;  %v317_v9 = vld [vmem:[%s7145_s30 + $0x48] sm:$0xff]  ;;  %v319_v10 = vld [vmem:[%s7145_s30 + $0x50] sm:$0xff]  ;;  %v321_v11 = vld [vmem:[%s7145_s30 + $0x58] sm:$0xff] }
  0x31   : > { %306 = vst [vmem:[%s7150_s5 + $0x18] sm:$0xff] %v305_v3  ;;  %v323_v12 = vld [vmem:[%s7145_s30 + $0x60] sm:$0xff]  ;;  %v325_v13 = vld [vmem:[%s7145_s30 + $0x68] sm:$0xff]  ;;  %v327_v14 = vld [vmem:[%s7145_s30 + $0x70] sm:$0xff] }
  0x32   : > { %308 = vst [vmem:[%s7150_s5 + $0x20] sm:$0xff] %v307_v4  ;;  %v329_v15 = vld [vmem:[%s7145_s30 + $0x78] sm:$0xff]  ;;  %v331_v16 = vld [vmem:[%s7145_s30 + $0x100] sm:$0xff]  ;;  %v333_v17 = vld [vmem:[%s7145_s30 + $0x108] sm:$0xff] }
  0x33   : > { %310 = vst [vmem:[%s7150_s5 + $0x28] sm:$0xff] %v309_v5  ;;  %v335_v18 = vld [vmem:[%s7145_s30 + $0x110] sm:$0xff]  ;;  %v337_v19 = vld [vmem:[%s7145_s30 + $0x118] sm:$0xff]  ;;  %v339_v20 = vld [vmem:[%s7145_s30 + $0x120] sm:$0xff] }
  0x34   : > { %312 = vst [vmem:[%s7150_s5 + $0x30] sm:$0xff] %v311_v6  ;;  %v341_v21 = vld [vmem:[%s7145_s30 + $0x128] sm:$0xff]  ;;  %v343_v22 = vld [vmem:[%s7145_s30 + $0x130] sm:$0xff]  ;;  %v345_v23 = vld [vmem:[%s7145_s30 + $0x138] sm:$0xff] }
  0x35   : > { %314 = vst [vmem:[%s7150_s5 + $0x38] sm:$0xff] %v313_v7  ;;  %v347_v24 = vld [vmem:[%s7145_s30 + $0x140] sm:$0xff]  ;;  %v349_v25 = vld [vmem:[%s7145_s30 + $0x148] sm:$0xff]  ;;  %v351_v26 = vld [vmem:[%s7145_s30 + $0x150] sm:$0xff] }
  0x36   : > { %316 = vst [vmem:[%s7150_s5 + $0x40] sm:$0xff] %v315_v8  ;;  %v353_v27 = vld [vmem:[%s7145_s30 + $0x158] sm:$0xff]  ;;  %v355_v28 = vld [vmem:[%s7145_s30 + $0x160] sm:$0xff]  ;;  %v357_v29 = vld [vmem:[%s7145_s30 + $0x168] sm:$0xff] }
  0x37   : > { %318 = vst [vmem:[%s7150_s5 + $0x48] sm:$0xff] %v317_v9  ;;  %v359_v30 = vld [vmem:[%s7145_s30 + $0x170] sm:$0xff]  ;;  %v361_v31 = vld [vmem:[%s7145_s30 + $0x178] sm:$0xff] }
  0x38   : > { %320 = vst [vmem:[%s7150_s5 + $0x50] sm:$0xff] %v319_v10 }
  0x39   : > { %322 = vst [vmem:[%s7150_s5 + $0x58] sm:$0xff] %v321_v11 }
  0x3a   : > { %324 = vst [vmem:[%s7150_s5 + $0x60] sm:$0xff] %v323_v12 }
  0x3b   : > { %326 = vst [vmem:[%s7150_s5 + $0x68] sm:$0xff] %v325_v13 }
  0x3c   : > { %328 = vst [vmem:[%s7150_s5 + $0x70] sm:$0xff] %v327_v14 }
  0x3d   : > { %330 = vst [vmem:[%s7150_s5 + $0x78] sm:$0xff] %v329_v15 }
  0x3e   : > { %332 = vst [vmem:[%s7150_s5 + $0x80] sm:$0xff] %v331_v16 }
  0x3f   : > { %334 = vst [vmem:[%s7150_s5 + $0x88] sm:$0xff] %v333_v17 }
  0x40   : > { %336 = vst [vmem:[%s7150_s5 + $0x90] sm:$0xff] %v335_v18 }
  0x41   : > { %338 = vst [vmem:[%s7150_s5 + $0x98] sm:$0xff] %v337_v19 }
  0x42   : > { %340 = vst [vmem:[%s7150_s5 + $0xa0] sm:$0xff] %v339_v20 }
  0x43   : > { %342 = vst [vmem:[%s7150_s5 + $0xa8] sm:$0xff] %v341_v21 }
  0x44   : > { %344 = vst [vmem:[%s7150_s5 + $0xb0] sm:$0xff] %v343_v22 }
  0x45   : > { %346 = vst [vmem:[%s7150_s5 + $0xb8] sm:$0xff] %v345_v23 }
  0x46   : > { %348 = vst [vmem:[%s7150_s5 + $0xc0] sm:$0xff] %v347_v24 }
  0x47   : > { %350 = vst [vmem:[%s7150_s5 + $0xc8] sm:$0xff] %v349_v25 }
  0x48   : > { %352 = vst [vmem:[%s7150_s5 + $0xd0] sm:$0xff] %v351_v26 }
  0x49   : > { %354 = vst [vmem:[%s7150_s5 + $0xd8] sm:$0xff] %v353_v27 }
  0x4a   : > { %356 = vst [vmem:[%s7150_s5 + $0xe0] sm:$0xff] %v355_v28 }
  0x4b   : > { %358 = vst [vmem:[%s7150_s5 + $0xe8] sm:$0xff] %v357_v29 }
  0x4c   : > { %360 = vst [vmem:[%s7150_s5 + $0xf0] sm:$0xff] %v359_v30 }
  0x4d   : > { %362 = vst [vmem:[%s7150_s5 + $0xf8] sm:$0xff] %v361_v31 }
  0x4e PF: > { %368 = sbr.rel (!%p7113_p8) target bundleno = 114 (0x72), region = 66  ;;  %s370_s29 = sand.u32 (%p7113_p8), 1, %s6958_s25  }
  0x4f   : > { %s6677_s9 = sshll.u32 (%p7113_p8), %s7108_s15, 7  ;;  %s6614_s11 = sshll.u32 (%p7113_p8), %s370_s29, 8 }
  0x50   : > { %s7220_s18 = scalar_lea.vmem (%p7113_p8), %s12196_s2, %s6677_s9  ;;  %s7225_s15 = scalar_lea.vmem (%p7113_p8), [#allocation6], %s6614_s11 }
  0x51   : > { %v468_v32 = vld [vmem:[%s7220_s18] sm:$0xff] (%p7113_p8)  ;;  %v470_v33 = vld [vmem:[%s7220_s18 + $0x8] sm:$0xff] (%p7113_p8)  ;;  %v472_v34 = vld [vmem:[%s7220_s18 + $0x10] sm:$0xff] (%p7113_p8) }
  0x52   : > { %469 = vst [vmem:[%s7225_s15] sm:$0xff] (%p7113_p8), %v468_v32  ;;  %v474_v35 = vld [vmem:[%s7220_s18 + $0x18] sm:$0xff] (%p7113_p8)  ;;  %v476_v36 = vld [vmem:[%s7220_s18 + $0x20] sm:$0xff] (%p7113_p8)  ;;  %v478_v37 = vld [vmem:[%s7220_s18 + $0x28] sm:$0xff] (%p7113_p8) }
  0x53   : > { %471 = vst [vmem:[%s7225_s15 + $0x8] sm:$0xff] %v470_v33  ;;  %v480_v38 = vld [vmem:[%s7220_s18 + $0x30] sm:$0xff]  ;;  %v482_v39 = vld [vmem:[%s7220_s18 + $0x38] sm:$0xff]  ;;  %v484_v40 = vld [vmem:[%s7220_s18 + $0x40] sm:$0xff] }
  0x54   : > { %473 = vst [vmem:[%s7225_s15 + $0x10] sm:$0xff] %v472_v34  ;;  %v486_v41 = vld [vmem:[%s7220_s18 + $0x48] sm:$0xff]  ;;  %v488_v42 = vld [vmem:[%s7220_s18 + $0x50] sm:$0xff]  ;;  %v490_v43 = vld [vmem:[%s7220_s18 + $0x58] sm:$0xff] }
  0x55   : > { %475 = vst [vmem:[%s7225_s15 + $0x18] sm:$0xff] %v474_v35  ;;  %v492_v44 = vld [vmem:[%s7220_s18 + $0x60] sm:$0xff]  ;;  %v494_v45 = vld [vmem:[%s7220_s18 + $0x68] sm:$0xff]  ;;  %v496_v46 = vld [vmem:[%s7220_s18 + $0x70] sm:$0xff] }
  0x56   : > { %477 = vst [vmem:[%s7225_s15 + $0x20] sm:$0xff] %v476_v36  ;;  %v498_v47 = vld [vmem:[%s7220_s18 + $0x78] sm:$0xff]  ;;  %v500_v48 = vld [vmem:[%s7220_s18 + $0x100] sm:$0xff]  ;;  %v502_v49 = vld [vmem:[%s7220_s18 + $0x108] sm:$0xff] }
  0x57   : > { %479 = vst [vmem:[%s7225_s15 + $0x28] sm:$0xff] %v478_v37  ;;  %v504_v50 = vld [vmem:[%s7220_s18 + $0x110] sm:$0xff]  ;;  %v506_v51 = vld [vmem:[%s7220_s18 + $0x118] sm:$0xff]  ;;  %v508_v52 = vld [vmem:[%s7220_s18 + $0x120] sm:$0xff] }
  0x58   : > { %481 = vst [vmem:[%s7225_s15 + $0x30] sm:$0xff] %v480_v38  ;;  %v510_v53 = vld [vmem:[%s7220_s18 + $0x128] sm:$0xff]  ;;  %v512_v54 = vld [vmem:[%s7220_s18 + $0x130] sm:$0xff]  ;;  %v514_v55 = vld [vmem:[%s7220_s18 + $0x138] sm:$0xff] }
  0x59   : > { %483 = vst [vmem:[%s7225_s15 + $0x38] sm:$0xff] %v482_v39  ;;  %v516_v56 = vld [vmem:[%s7220_s18 + $0x140] sm:$0xff]  ;;  %v518_v57 = vld [vmem:[%s7220_s18 + $0x148] sm:$0xff]  ;;  %v520_v58 = vld [vmem:[%s7220_s18 + $0x150] sm:$0xff] }
  0x5a   : > { %485 = vst [vmem:[%s7225_s15 + $0x40] sm:$0xff] %v484_v40  ;;  %v522_v59 = vld [vmem:[%s7220_s18 + $0x158] sm:$0xff]  ;;  %v524_v60 = vld [vmem:[%s7220_s18 + $0x160] sm:$0xff]  ;;  %v526_v61 = vld [vmem:[%s7220_s18 + $0x168] sm:$0xff] }
  0x5b   : > { %487 = vst [vmem:[%s7225_s15 + $0x48] sm:$0xff] %v486_v41  ;;  %v528_v62 = vld [vmem:[%s7220_s18 + $0x170] sm:$0xff]  ;;  %v530_v63 = vld [vmem:[%s7220_s18 + $0x178] sm:$0xff] }
  0x5c   : > { %489 = vst [vmem:[%s7225_s15 + $0x50] sm:$0xff] %v488_v42 }
  0x5d   : > { %491 = vst [vmem:[%s7225_s15 + $0x58] sm:$0xff] %v490_v43 }
  0x5e   : > { %493 = vst [vmem:[%s7225_s15 + $0x60] sm:$0xff] %v492_v44 }
  0x5f   : > { %495 = vst [vmem:[%s7225_s15 + $0x68] sm:$0xff] %v494_v45 }
  0x60   : > { %497 = vst [vmem:[%s7225_s15 + $0x70] sm:$0xff] %v496_v46 }
  0x61   : > { %499 = vst [vmem:[%s7225_s15 + $0x78] sm:$0xff] %v498_v47 }
  0x62   : > { %501 = vst [vmem:[%s7225_s15 + $0x80] sm:$0xff] %v500_v48 }
  0x63   : > { %503 = vst [vmem:[%s7225_s15 + $0x88] sm:$0xff] %v502_v49 }
  0x64   : > { %505 = vst [vmem:[%s7225_s15 + $0x90] sm:$0xff] %v504_v50 }
  0x65   : > { %507 = vst [vmem:[%s7225_s15 + $0x98] sm:$0xff] %v506_v51 }
  0x66   : > { %509 = vst [vmem:[%s7225_s15 + $0xa0] sm:$0xff] %v508_v52 }
  0x67   : > { %511 = vst [vmem:[%s7225_s15 + $0xa8] sm:$0xff] %v510_v53 }
  0x68   : > { %513 = vst [vmem:[%s7225_s15 + $0xb0] sm:$0xff] %v512_v54 }
  0x69   : > { %515 = vst [vmem:[%s7225_s15 + $0xb8] sm:$0xff] %v514_v55 }
  0x6a   : > { %517 = vst [vmem:[%s7225_s15 + $0xc0] sm:$0xff] %v516_v56 }
  0x6b   : > { %519 = vst [vmem:[%s7225_s15 + $0xc8] sm:$0xff] %v518_v57 }
  0x6c   : > { %521 = vst [vmem:[%s7225_s15 + $0xd0] sm:$0xff] %v520_v58 }
  0x6d   : > { %523 = vst [vmem:[%s7225_s15 + $0xd8] sm:$0xff] %v522_v59 }
  0x6e   : > { %525 = vst [vmem:[%s7225_s15 + $0xe0] sm:$0xff] %v524_v60 }
  0x6f   : > { %527 = vst [vmem:[%s7225_s15 + $0xe8] sm:$0xff] %v526_v61 }
  0x70   : > { %529 = vst [vmem:[%s7225_s15 + $0xf0] sm:$0xff] %v528_v62 }
  0x71   : > { %531 = vst [vmem:[%s7225_s15 + $0xf8] sm:$0xff] %v530_v63 }
  0x72 PF: > { %p6617_p4 = scmp.ge.s32.totalorder %s6986_s6, 1  ;;  %p536_p5 = scmp.lt.s32.totalorder %s6986_s6, 9 }
  0x74   : > { %p537_p6 = pnand %p6617_p4, %p536_p5 }
  0x75   : > { %s543_s19 = sand.u32 (!%p537_p6), 1, %s6962_s26   ;;  %s550_s21 = sand.u32 (!%p537_p6), 1, %s6954_s24  }
  0x76   : > { %540 = sbr.rel (%p537_p6) target bundleno = 1987 (0x7c3), region = 104  ;;  %s6618_s17 = sshll.u32 (!%p537_p6), %s543_s19, 8 }
  0x77   : > { %s6619_s8 = sshll.u32 (!%p537_p6), %s550_s21, 8  ;;  %s575_s10 = sand.u32 (!%p537_p6), 1, %s6946_s22  }
  0x78   : > { %s7294_s12 = sshll.u32 (!%p537_p6), %s6970_s28, 7  ;;  %s6620_s30 = sshll.u32 (!%p537_p6), %s575_s10, 8 }
  0x79   : > { %p591_p7 = scmp.lt.s32.totalorder (!%p537_p6), %s6974_s0, 0  ;;  %s592_s5 = ssub.s32 (!%p537_p6), 0, %s6974_s0 }
  0x7a   : > { %s6622_s29 = smin.u32 (!%p537_p6), %s6974_s0, %s592_s5  ;;  %s603_s9 = sadd.s32 (!%p537_p6), 1, %s6974_s0 }
  0x7b   : > { %s594_s11 = sand.u32 1, %s6622_s29   ;;  %s605_s14 = ssub.s32 0, %s603_s9 }
  0x7c   : > { %s595_s13 = ssub.s32 0, %s594_s11  ;;  %p604_p8 = scmp.lt.s32.totalorder %s603_s9, 0 }
  0x7d   : > { %s13380_s13 = smov (!%p591_p7, %s595_s13), %s594_s11  ;;  %s6625_s18 = smin.u32 %s605_s14, %s603_s9 }
  0x7e   : > { %p6624_p9 = scmp.lt.s32.totalorder %s13380_s13, 0  ;;  %s601_s15 = sadd.s32 2, %s13380_s13 }
  0x7f   : > { %s607_s26 = sand.u32 1, %s6625_s18   ;;  %s7304_s19 = scalar_lea.vmem [#allocation5], %s6618_s17 }
  0x80   : > { %s13382_s15 = smov (!%p6624_p9, %s601_s15), %s13380_s13  ;;  %s608_s24 = ssub.s32 0, %s607_s26 }
  0x81   : > { %s13384_s24 = smov (!%p604_p8, %s608_s24), %s607_s26  ;;  %s7306_s21 = scalar_lea.vmem [#allocation6], %s6619_s8 }
  0x82   : > { %p6627_p10 = scmp.lt.s32.totalorder %s13384_s24, 0  ;;  %s614_s22 = sadd.s32 2, %s13384_s24 }
  0x83   : > { %s7308_s10 = scalar_lea.vmem [#allocation7], %s6620_s30  ;;  %p6628_p11 = scmp.ne.s32.totalorder %s6974_s0, 0 }
  0x84   : > { %s13386_s22 = smov (!%p6627_p10, %s614_s22), %s13384_s24  ;;  %s6629_s17 = sshll.u32 (!%p6628_p11), %s13382_s15, 9 }
  0x85   : > { %619 = sbr.rel (%p6628_p11) target bundleno = 171 (0xab), region = 116  ;;  %s653_s8 = sadd.s32 (!%p6628_p11), %s6629_s17, %s7294_s12 }
  0x86   : > { %s7316_s30 = scalar_lea.vmem (!%p6628_p11), [#allocation2], %s653_s8 }
  0x8a   : > { %v620_v0 = vld [vmem:[%s7306_s21] sm:$0xff]  ;;  %v621_v1 = vld [vmem:[%s7306_s21 + $0x8] sm:$0xff]  ;;  %v622_v2 = vld [vmem:[%s7306_s21 + $0x10] sm:$0xff] }
  0x8b   : > { %655 = vst [vmem:[%s7316_s30] sm:$0xff] %v620_v0  ;;  %v623_v3 = vld [vmem:[%s7306_s21 + $0x18] sm:$0xff]  ;;  %v624_v4 = vld [vmem:[%s7306_s21 + $0x20] sm:$0xff]  ;;  %v625_v5 = vld [vmem:[%s7306_s21 + $0x28] sm:$0xff] }
  0x8c   : > { %656 = vst [vmem:[%s7316_s30 + $0x8] sm:$0xff] %v621_v1  ;;  %v626_v6 = vld [vmem:[%s7306_s21 + $0x30] sm:$0xff]  ;;  %v627_v7 = vld [vmem:[%s7306_s21 + $0x38] sm:$0xff]  ;;  %v628_v8 = vld [vmem:[%s7306_s21 + $0x40] sm:$0xff] }
  0x8d   : > { %657 = vst [vmem:[%s7316_s30 + $0x10] sm:$0xff] %v622_v2  ;;  %v629_v9 = vld [vmem:[%s7306_s21 + $0x48] sm:$0xff]  ;;  %v630_v10 = vld [vmem:[%s7306_s21 + $0x50] sm:$0xff]  ;;  %v631_v11 = vld [vmem:[%s7306_s21 + $0x58] sm:$0xff] }
  0x8e   : > { %658 = vst [vmem:[%s7316_s30 + $0x18] sm:$0xff] %v623_v3  ;;  %v632_v12 = vld [vmem:[%s7306_s21 + $0x60] sm:$0xff]  ;;  %v633_v13 = vld [vmem:[%s7306_s21 + $0x68] sm:$0xff]  ;;  %v634_v14 = vld [vmem:[%s7306_s21 + $0x70] sm:$0xff] }
  0x8f   : > { %659 = vst [vmem:[%s7316_s30 + $0x20] sm:$0xff] %v624_v4  ;;  %v635_v15 = vld [vmem:[%s7306_s21 + $0x78] sm:$0xff]  ;;  %v636_v16 = vld [vmem:[%s7306_s21 + $0x80] sm:$0xff]  ;;  %v637_v17 = vld [vmem:[%s7306_s21 + $0x88] sm:$0xff] }
  0x90   : > { %660 = vst [vmem:[%s7316_s30 + $0x28] sm:$0xff] %v625_v5  ;;  %v638_v18 = vld [vmem:[%s7306_s21 + $0x90] sm:$0xff]  ;;  %v639_v19 = vld [vmem:[%s7306_s21 + $0x98] sm:$0xff]  ;;  %v640_v20 = vld [vmem:[%s7306_s21 + $0xa0] sm:$0xff] }
  0x91   : > { %661 = vst [vmem:[%s7316_s30 + $0x30] sm:$0xff] %v626_v6  ;;  %v641_v21 = vld [vmem:[%s7306_s21 + $0xa8] sm:$0xff]  ;;  %v642_v22 = vld [vmem:[%s7306_s21 + $0xb0] sm:$0xff]  ;;  %v643_v23 = vld [vmem:[%s7306_s21 + $0xb8] sm:$0xff] }
  0x92   : > { %662 = vst [vmem:[%s7316_s30 + $0x38] sm:$0xff] %v627_v7  ;;  %v644_v24 = vld [vmem:[%s7306_s21 + $0xc0] sm:$0xff]  ;;  %v645_v25 = vld [vmem:[%s7306_s21 + $0xc8] sm:$0xff]  ;;  %v646_v26 = vld [vmem:[%s7306_s21 + $0xd0] sm:$0xff] }
  0x93   : > { %663 = vst [vmem:[%s7316_s30 + $0x40] sm:$0xff] %v628_v8  ;;  %v647_v27 = vld [vmem:[%s7306_s21 + $0xd8] sm:$0xff]  ;;  %v648_v28 = vld [vmem:[%s7306_s21 + $0xe0] sm:$0xff]  ;;  %v649_v29 = vld [vmem:[%s7306_s21 + $0xe8] sm:$0xff] }
  0x94   : > { %664 = vst [vmem:[%s7316_s30 + $0x48] sm:$0xff] %v629_v9  ;;  %v650_v30 = vld [vmem:[%s7306_s21 + $0xf0] sm:$0xff]  ;;  %v651_v31 = vld [vmem:[%s7306_s21 + $0xf8] sm:$0xff] }
  0x95   : > { %665 = vst [vmem:[%s7316_s30 + $0x50] sm:$0xff] %v630_v10 }
  0x96   : > { %666 = vst [vmem:[%s7316_s30 + $0x58] sm:$0xff] %v631_v11 }
  0x97   : > { %667 = vst [vmem:[%s7316_s30 + $0x60] sm:$0xff] %v632_v12 }
  0x98   : > { %668 = vst [vmem:[%s7316_s30 + $0x68] sm:$0xff] %v633_v13 }
  0x99   : > { %669 = vst [vmem:[%s7316_s30 + $0x70] sm:$0xff] %v634_v14 }
  0x9a   : > { %670 = vst [vmem:[%s7316_s30 + $0x78] sm:$0xff] %v635_v15 }
  0x9b   : > { %671 = vst [vmem:[%s7316_s30 + $0x100] sm:$0xff] %v636_v16 }
  0x9c   : > { %672 = vst [vmem:[%s7316_s30 + $0x108] sm:$0xff] %v637_v17 }
  0x9d   : > { %673 = vst [vmem:[%s7316_s30 + $0x110] sm:$0xff] %v638_v18 }
  0x9e   : > { %674 = vst [vmem:[%s7316_s30 + $0x118] sm:$0xff] %v639_v19 }
  0x9f   : > { %675 = vst [vmem:[%s7316_s30 + $0x120] sm:$0xff] %v640_v20 }
  0xa0   : > { %676 = vst [vmem:[%s7316_s30 + $0x128] sm:$0xff] %v641_v21 }
  0xa1   : > { %677 = vst [vmem:[%s7316_s30 + $0x130] sm:$0xff] %v642_v22 }
  0xa2   : > { %678 = vst [vmem:[%s7316_s30 + $0x138] sm:$0xff] %v643_v23 }
  0xa3   : > { %679 = vst [vmem:[%s7316_s30 + $0x140] sm:$0xff] %v644_v24 }
  0xa4   : > { %680 = vst [vmem:[%s7316_s30 + $0x148] sm:$0xff] %v645_v25 }
  0xa5   : > { %681 = vst [vmem:[%s7316_s30 + $0x150] sm:$0xff] %v646_v26 }
  0xa6   : > { %682 = vst [vmem:[%s7316_s30 + $0x158] sm:$0xff] %v647_v27 }
  0xa7   : > { %683 = vst [vmem:[%s7316_s30 + $0x160] sm:$0xff] %v648_v28 }
  0xa8   : > { %684 = vst [vmem:[%s7316_s30 + $0x168] sm:$0xff] %v649_v29 }
  0xa9   : > { %685 = vst [vmem:[%s7316_s30 + $0x170] sm:$0xff] %v650_v30 }
  0xaa   : > { %686 = vst [vmem:[%s7316_s30 + $0x178] sm:$0xff] %v651_v31 }
  0xab PF: > { %p6630_p12 = scmp.le.s32.totalorder %s6974_s0, 0 }
  0xad   : > { %690 = sbr.rel (%p6630_p12) target bundleno = 1945 (0x799), region = 120 }
  0xb2   : > { %s6633_s5 = sshll.u32 %s13386_s22, 9  ;;  %v7466_v15 = vld [vmem:[%s7304_s19] sm:$0xff]  ;;  %s9244_s9 = sadd.s32 4294967295, %s6974_s0 }
  0xb3   : > { %s7381_s29 = scalar_lea.vmem [#allocation2], %s6633_s5  ;;  %v7480_v22 = vunpack.c.l.bf16 %v7466_v15  ;;  %s9252_s14 = scalar_lea.vmem %s12198_s4, %s9244_s9 }
  0xb4   : > { %v825_v32 = vld [vmem:[%s7381_s29 + $0x78] sm:$0xff]  ;;  %v824_v33 = vld [vmem:[%s7381_s29 + $0x70] sm:$0xff]  ;;  %v823_v34 = vld [vmem:[%s7381_s29 + $0x68] sm:$0xff]  ;;  %s6632_s18 = sshll.u32 %s9244_s9, 7  ;;  %p5563_p13 = scmp.eq.s32.totalorder %s9244_s9, 2 }
  0xb5   : > { %v7386_v35 = vand.u32 4294901760, %v825_v32  ;;  %v7388_v36 = vand.u32 4294901760, %v824_v33  ;;  %v7390_v37 = vand.u32 4294901760, %v823_v34  ;;  %v822_v38 = vld [vmem:[%s7381_s29 + $0x60] sm:$0xff]  ;;  %v821_v39 = vld [vmem:[%s7381_s29 + $0x58] sm:$0xff]  ;;  %v820_v40 = vld [vmem:[%s7381_s29 + $0x50] sm:$0xff]  ;;  %s9495_s22 = scalar_lea.vmem %s12197_s3, %s6632_s18 }
  0xb6   : > { %v7395_v41 = vand.u32 4294901760, %v822_v38  ;;  %v7397_v42 = vand.u32 4294901760, %v821_v39  ;;  %v7399_v43 = vand.u32 4294901760, %v820_v40  ;;  %v819_v44 = vld [vmem:[%s7381_s29 + $0x48] sm:$0xff]  ;;  %v818_v45 = vld [vmem:[%s7381_s29 + $0x40] sm:$0xff]  ;;  %v817_v53 = vld [vmem:[%s7381_s29 + $0x38] sm:$0xff] }
  0xb7   : > { %875 = vmatpush.msra.mxu2 %v7386_v35  ;;  %1504 = vmatpush.msra.mxu1 %v7386_v35  ;;  %v7406_v46 = vsub.f32 %v825_v32, %v7386_v35  ;;  %v7409_v47 = vsub.f32 %v824_v33, %v7388_v36  ;;  %v7412_v48 = vsub.f32 %v823_v34, %v7390_v37  ;;  %v7414_v49 = vand.u32 4294901760, %v819_v44  ;;  %v816_v58 = vld [vmem:[%s7381_s29 + $0x30] sm:$0xff]  ;;  %v815_v4 = vld [vmem:[%s7381_s29 + $0x28] sm:$0xff]  ;;  %v814_v10 = vld [vmem:[%s7381_s29 + $0x20] sm:$0xff]  ;;  %s6164_s8 = sld [smem:[#allocation4]]  ;;  %s6634_s5 = sshll.u32 %s13382_s15, 9 }
  0xb8   : > { %v7417_v50 = vsub.f32 %v822_v38, %v7395_v41  ;;  %v7420_v51 = vsub.f32 %v821_v39, %v7397_v42  ;;  %v7423_v52 = vsub.f32 %v820_v40, %v7399_v43  ;;  %v7431_v57 = vand.u32 4294901760, %v818_v45  ;;  %v813_v21 = vld [vmem:[%s7381_s29 + $0x18] sm:$0xff]  ;;  %v812_v27 = vld [vmem:[%s7381_s29 + $0x10] sm:$0xff]  ;;  %v811_v33 = vld [vmem:[%s7381_s29 + $0x8] sm:$0xff]  ;;  %s6635_s30 = sld [smem:[#allocation4 + $0x1]] }
  0xb9   : > { %877 = vmatpush.msra.mxu2 %v7388_v36  ;;  %1506 = vmatpush.msra.mxu1 %v7388_v36  ;;  %v1021_v54 = vand.u32 4294901760, %v7406_v46  ;;  %v1027_v55 = vand.u32 4294901760, %v7409_v47  ;;  %v1033_v56 = vand.u32 4294901760, %v7412_v48  ;;  %v7437_v61 = vsub.f32 %v819_v44, %v7414_v49  ;;  %v810_v44 = vld [vmem:[%s7381_s29] sm:$0xff] }
  0xba   : > { %v1039_v59 = vand.u32 4294901760, %v7417_v50  ;;  %v1045_v60 = vand.u32 4294901760, %v7420_v51  ;;  %v7443_v1 = vand.u32 4294901760, %v817_v53  ;;  %v1051_v2 = vand.u32 4294901760, %v7423_v52 }
  0xbb   : > { %879 = vmatpush.msra.mxu2 %v7390_v37  ;;  %1393 = vmatpush.msra.mxu0 %v1021_v54  ;;  %v1022_v62 = vsub.f32 %v7406_v46, %v1021_v54  ;;  %v1028_v63 = vsub.f32 %v7409_v47, %v1027_v55  ;;  %v1034_v0 = vsub.f32 %v7412_v48, %v1033_v56  ;;  %v7447_v3 = vand.u32 4294901760, %v816_v58 }
  0xbc   : > { %1508 = vmatpush.msra.mxu1 %v7390_v37  ;;  %v1040_v7 = vsub.f32 %v7417_v50, %v1039_v59  ;;  %v7453_v8 = vsub.f32 %v818_v45, %v7431_v57  ;;  %v1046_v9 = vsub.f32 %v7420_v51, %v1045_v60  ;;  %v1057_v12 = vand.u32 4294901760, %v7437_v61 }
  0xbd   : > { %881 = vmatpush.msra.mxu2 %v7395_v41  ;;  %1397 = vmatpush.msra.mxu0 %v1027_v55  ;;  %v1023_v5 = vand.u32 4294901760, %v1022_v62  ;;  %v1029_v6 = vand.u32 4294901760, %v1028_v63  ;;  %v1035_v11 = vand.u32 4294901760, %v1034_v0  ;;  %v7460_v13 = vand.u32 4294901760, %v815_v4  ;;  %v7517_v55 = vld [vmem:[%s7304_s19 + $0x8] sm:$0xff] }
  0xbe   : > { %1510 = vmatpush.msra.mxu1 %v7395_v41  ;;  %v7463_v14 = vsub.f32 %v817_v53, %v7443_v1  ;;  %v1052_v16 = vsub.f32 %v7423_v52, %v1051_v2  ;;  %v1041_v17 = vand.u32 4294901760, %v1040_v7  ;;  %v1063_v18 = vand.u32 4294901760, %v7453_v8 }
  0xbf   : > { %883 = vmatpush.msra.mxu2 %v7397_v42  ;;  %1024 = vmatpush.msra.mxu3 %v1023_v5  ;;  %v7472_v19 = vand.u32 4294901760, %v814_v10  ;;  %v7475_v20 = vsub.f32 %v816_v58, %v7447_v3  ;;  %v1047_v23 = vand.u32 4294901760, %v1046_v9  ;;  %v1058_v24 = vsub.f32 %v7437_v61, %v1057_v12 }
  0xc0   : > { %1401 = vmatpush.msra.mxu0 %v1033_v56  ;;  %1512 = vmatpush.msra.mxu1 %v7397_v42  ;;  %v1069_v25 = vand.u32 4294901760, %v7463_v14  ;;  %v7486_v26 = vsub.f32 %v815_v4, %v7460_v13  ;;  %v7490_v28 = vand.u32 4294901760, %v813_v21  ;;  %v1053_v29 = vand.u32 4294901760, %v1052_v16 }
  0xc1   : > { %885 = vmatpush.msra.mxu2 %v7399_v43  ;;  %1030 = vmatpush.msra.mxu3 %v1029_v6  ;;  %v1064_v30 = vsub.f32 %v7453_v8, %v1063_v18  ;;  %v1075_v31 = vand.u32 4294901760, %v7475_v20  ;;  %v7496_v32 = vsub.f32 %v814_v10, %v7472_v19  ;;  %v7500_v34 = vand.u32 4294901760, %v812_v27 }
  0xc2   : > { %1405 = vmatpush.msra.mxu0 %v1039_v59  ;;  %1514 = vmatpush.msra.mxu1 %v7399_v43  ;;  %v1059_v38 = vand.u32 4294901760, %v1058_v24  ;;  %v1070_v39 = vsub.f32 %v7463_v14, %v1069_v25  ;;  %v1081_v40 = vand.u32 4294901760, %v7486_v26  ;;  %v7508_v45 = vsub.f32 %v7480_v22, %v7480_v22 }
  0xc3   : > { %887 = vmatpush.msra.mxu2 %v7414_v49  ;;  %1036 = vmatpush.msra.mxu3 %v1035_v11  ;;  %v7511_v53 = vand.u32 4294901760, %v811_v33  ;;  %v7514_v54 = vsub.f32 %v813_v21, %v7490_v28  ;;  %v1065_v56 = vand.u32 4294901760, %v1064_v30  ;;  %v1076_v58 = vsub.f32 %v7475_v20, %v1075_v31 }
  0xc4   : > { %1409 = vmatpush.msra.mxu0 %v1045_v60  ;;  %1516 = vmatpush.msra.mxu1 %v7414_v49  ;;  %v1087_v59 = vand.u32 4294901760, %v7496_v32  ;;  %v7523_v60 = vand.u32 4294901760, %v810_v44  ;;  %v7526_v62 = vsub.f32 %v812_v27, %v7500_v34  ;;  %v1071_v63 = vand.u32 4294901760, %v1070_v39 }
  0xc5   : > { %889 = vmatpush.msra.mxu2 %v7431_v57  ;;  %1042 = vmatpush.msra.mxu3 %v1041_v17  ;;  %v1082_v0 = vsub.f32 %v7486_v26, %v1081_v40  ;;  %v7532_v4 = vunpack.c.l.bf16 %v7517_v55  ;;  %v1093_v5 = vand.u32 4294901760, %v7514_v54  ;;  %v7537_v6 = vsub.f32 %v811_v33, %v7511_v53 }
  0xc6   : > { %1413 = vmatpush.msra.mxu0 %v1051_v2  ;;  %1518 = vmatpush.msra.mxu1 %v7431_v57  ;;  %v12216_v2 = vand.u32 4294901760, %v7508_v45  ;;  %v1077_v7 = vand.u32 4294901760, %v1076_v58  ;;  %v1088_v9 = vsub.f32 %v7496_v32, %v1087_v59  ;;  %v1099_v10 = vand.u32 4294901760, %v7526_v62 }
  0xc7   : > { %891 = vmatpush.msra.mxu2 %v7443_v1  ;;  %1048 = vmatpush.msra.mxu3 %v1047_v23  ;;  %v7544_v11 = vsub.f32 %v810_v44, %v7523_v60  ;;  %v7552_v17 = vsub.f32 %v7532_v4, %v7532_v4  ;;  %v1105_v21 = vand.u32 4294901760, %v7537_v6  ;;  %v7558_v23 = vld [vmem:[%s7304_s19 + $0x10] sm:$0xff] }
  0xc8   : > { %1417 = vmatpush.msra.mxu0 %v1057_v12  ;;  %1520 = vmatpush.msra.mxu1 %v7443_v1  ;;  %v1083_v12 = vand.u32 4294901760, %v1082_v0  ;;  %v908_v16 = vsub.f32 %v7508_v45, %v12216_v2  ;;  %v1089_v24 = vand.u32 4294901760, %v1088_v9  ;;  %v7873_v2 = vunpack.c.h.bf16 %v7466_v15  ;;  %v826_v15 = vld [vmem:[%s7381_s29 + $0x80] sm:$0xff] }
  0xc9   : > { %893 = vmatpush.msra.mxu2 %v7447_v3  ;;  %1054 = vmatpush.msra.mxu3 %v1053_v29  ;;  %v1111_v27 = vand.u32 4294901760, %v7544_v11  ;;  %v12215_v30 = vand.u32 4294901760, %v7552_v17 }
  0xca   : > { %1421 = vmatpush.msra.mxu0 %v1063_v18  ;;  %1522 = vmatpush.msra.mxu1 %v7447_v3  ;;  %v1094_v18 = vsub.f32 %v7514_v54, %v1093_v5  ;;  %v909_v29 = vand.u32 4294901760, %v908_v16  ;;  %12576 = vst [vmem:[#allocation25_spill] sm:$0xff] %v7873_v2 }
  0xcb   : > { %895 = vmatpush.msra.mxu2 %v7460_v13  ;;  %1060 = vmatpush.msra.mxu3 %v1059_v38  ;;  %v1106_v38 = vsub.f32 %v7537_v6, %v1105_v21  ;;  %v915_v44 = vsub.f32 %v7552_v17, %v12215_v30  ;;  %v827_v30 = vld [vmem:[%s7381_s29 + $0x88] sm:$0xff] }
  0xcc   : > { %1425 = vmatpush.msra.mxu0 %v1069_v25  ;;  %1524 = vmatpush.msra.mxu1 %v7460_v13  ;;  %v1100_v25 = vsub.f32 %v7526_v62, %v1099_v10  ;;  %v1095_v33 = vand.u32 4294901760, %v1094_v18  ;;  %v7697_v18 = vld [vmem:[%s7304_s19 + $0x50] sm:$0xff] }
  0xcd   : > { %897 = vmatpush.msra.mxu2 %v7472_v19  ;;  %1066 = vmatpush.msra.mxu3 %v1065_v56  ;;  %v1107_v58 = vand.u32 4294901760, %v1106_v38  ;;  %v916_v0 = vand.u32 4294901760, %v915_v44  ;;  %v7714_v38 = vld [vmem:[%s7304_s19 + $0x58] sm:$0xff] }
  0xce   : > { %1429 = vmatpush.msra.mxu0 %v1075_v31  ;;  %1526 = vmatpush.msra.mxu1 %v7472_v19  ;;  %v7567_v31 = vunpack.c.l.bf16 %v7558_v23  ;;  %v1101_v39 = vand.u32 4294901760, %v1100_v25  ;;  %v7701_v25 = vunpack.c.l.bf16 %v7697_v18 }
  0xcf   : > { %899 = vmatpush.msra.mxu2 %v7490_v28  ;;  %1072 = vmatpush.msra.mxu3 %v1071_v63 }
  0xd0   : > { %1433 = vmatpush.msra.mxu0 %v1081_v40  ;;  %1528 = vmatpush.msra.mxu1 %v7490_v28  ;;  %v1112_v40 = vsub.f32 %v7544_v11, %v1111_v27  ;;  %v7580_v56 = vsub.f32 %v7567_v31, %v7567_v31 }
  0xd1   : > { %901 = vmatpush.msra.mxu2 %v7500_v34  ;;  %1078 = vmatpush.msra.mxu3 %v1077_v7 }
  0xd2   : > { %1437 = vmatpush.msra.mxu0 %v1087_v59  ;;  %1530 = vmatpush.msra.mxu1 %v7500_v34  ;;  %v7583_v59 = vld [vmem:[%s7304_s19 + $0x18] sm:$0xff]  ;;  %v1113_v63 = vand.u32 4294901760, %v1112_v40 }
  0xd3   : > { %903 = vmatpush.msra.mxu2 %v7511_v53  ;;  %1084 = vmatpush.msra.mxu3 %v1083_v12  ;;  %v750_v7 = vunpack.c.l.bf16 %v7583_v59 }
  0xd4   : > { %1441 = vmatpush.msra.mxu0 %v1093_v5  ;;  %1532 = vmatpush.msra.mxu1 %v7511_v53  ;;  %v12213_v5 = vand.u32 4294901760, %v7580_v56 }
  0xd5   : > { %905 = vmatpush.msra.mxu2 %v7523_v60  ;;  %1090 = vmatpush.msra.mxu3 %v1089_v24  ;;  %v7595_v9 = vsub.f32 %v750_v7, %v750_v7 }
  0xd6   : > { %1445 = vmatpush.msra.mxu0 %v1099_v10  ;;  %1534 = vmatpush.msra.mxu1 %v7523_v60 }
  0xd7   : > { %910 = vmatmul.f32.vlgmr.msra.gmra.mxu2 %v909_v29  ;;  %1535 = vmatmul.f32.vlgmr.msra.gmra.mxu1 %v7480_v22  ;;  %v841_v29 = vld [vmem:[%s7381_s29 + $0xf8] sm:$0xff] }
  0xd8   : > { %1096 = vmatpush.msra.mxu3 %v1095_v33  ;;  %1449 = vmatpush.msra.mxu0 %v1105_v21  ;;  %v7711_v33 = vand.u32 4294901760, %v841_v29 }
  0xd9   : > { %1166 = vmatpush.msrb.mxu2 %v7406_v46  ;;  %v922_v46 = vsub.f32 %v7580_v56, %v12213_v5  ;;  %v7857_v5 = vld [vmem:[%s7304_s19 + $0x70] sm:$0xff] }
  0xda   : > { %1102 = vmatpush.msra.mxu3 %v1101_v39  ;;  %1453 = vmatpush.msra.mxu0 %v1111_v27  ;;  %v840_v39 = vld [vmem:[%s7381_s29 + $0xf0] sm:$0xff] }
  0xdb   : > { %1454 = vmatmul.f32.vlgmr.msra.gmra.mxu0 %v7480_v22  ;;  %1169 = vmatpush.msrb.mxu2 %v7409_v47  ;;  %v7600_v47 = vld [vmem:[%s7304_s19 + $0x20] sm:$0xff]  ;;  %v7718_v40 = vand.u32 4294901760, %v840_v39 }
  0xdc   : > { %1108 = vmatpush.msra.mxu3 %v1107_v58  ;;  %v752_v10 = vunpack.c.l.bf16 %v7600_v47  ;;  %1988 = vmatpush.msrb.mxu1 %v7711_v33  ;;  %v839_v58 = vld [vmem:[%s7381_s29 + $0xe8] sm:$0xff] }
  0xdd   : > { %1172 = vmatpush.msrb.mxu2 %v7412_v48  ;;  %v923_v48 = vand.u32 4294901760, %v922_v46  ;;  %v7730_v46 = vand.u32 4294901760, %v839_v58 }
  0xde   : > { %1114 = vmatpush.msra.mxu3 %v1113_v63  ;;  %1990 = vmatpush.msrb.mxu1 %v7718_v40 }
  0xdf   : > { %917 = vmatmul.f32.gmra.mxu2 %v916_v0  ;;  %1115 = vmatmul.f32.vlgmr.msra.gmra.mxu3 %v7480_v22  ;;  %v12212_v22 = vand.u32 4294901760, %v7595_v9  ;;  %v7724_v0 = vunpack.c.l.bf16 %v7714_v38 }
  0xe0   : > { %1278 = vmatpush.msrb.mxu3 %v7386_v35  ;;  %1538 = vmatmul.f32.gmra.mxu1 %v7532_v4 }
  0xe1   : > { %1175 = vmatpush.msrb.mxu2 %v7417_v50  ;;  %v929_v35 = vsub.f32 %v7595_v9, %v12212_v22  ;;  %v7619_v50 = vld [vmem:[%s7304_s19 + $0x28] sm:$0xff]  ;;  %1992 = vmatpush.msrb.mxu1 %v7730_v46 }
  0xe2   : > { %1280 = vmatpush.msrb.mxu3 %v7388_v36  ;;  %v7615_v36 = vsub.f32 %v752_v10, %v752_v10 }
  0xe3   : > { %1457 = vmatmul.f32.gmra.mxu0 %v7532_v4  ;;  %1178 = vmatpush.msrb.mxu2 %v7420_v51  ;;  %v754_v51 = vunpack.c.l.bf16 %v7619_v50 }
  0xe4   : > { %1282 = vmatpush.msrb.mxu3 %v7390_v37  ;;  %v930_v37 = vand.u32 4294901760, %v929_v35 }
  0xe5   : > { %1181 = vmatpush.msrb.mxu2 %v7423_v52  ;;  %v7638_v52 = vld [vmem:[%s7304_s19 + $0x30] sm:$0xff] }
  0xe6   : > { %1284 = vmatpush.msrb.mxu3 %v7395_v41  ;;  %v12211_v41 = vand.u32 4294901760, %v7615_v36 }
  0xe7   : > { %924 = vmatmul.f32.gmra.mxu2 %v923_v48  ;;  %1118 = vmatmul.f32.gmra.mxu3 %v7532_v4  ;;  %v7683_v4 = vld [vmem:[%s7304_s19 + $0x48] sm:$0xff]  ;;  %v838_v48 = vld [vmem:[%s7381_s29 + $0xe0] sm:$0xff] }
  0xe8   : > { %1541 = vmatmul.f32.gmra.mxu1 %v7567_v31  ;;  %1286 = vmatpush.msrb.mxu3 %v7397_v42  ;;  %v936_v42 = vsub.f32 %v7615_v36, %v12211_v41  ;;  %v7739_v35 = vand.u32 4294901760, %v838_v48 }
  0xe9   : > { %1184 = vmatpush.msrb.mxu2 %v7437_v61  ;;  %v756_v61 = vunpack.c.l.bf16 %v7638_v52 }
  0xea   : > { %1288 = vmatpush.msrb.mxu3 %v7399_v43  ;;  %v7635_v43 = vsub.f32 %v754_v51, %v754_v51  ;;  %12565 = vst [vmem:[#allocation14_spill] sm:$0xff] %v7739_v35  ;;  %1994 = vmatpush.msrb.mxu1 %v7739_v35 }
  0xeb   : > { %1460 = vmatmul.f32.gmra.mxu0 %v7567_v31  ;;  %1187 = vmatpush.msrb.mxu2 %v7453_v8  ;;  %v7655_v8 = vld [vmem:[%s7304_s19 + $0x38] sm:$0xff] }
  0xec   : > { %1290 = vmatpush.msrb.mxu3 %v7414_v49  ;;  %v937_v49 = vand.u32 4294901760, %v936_v42  ;;  %v7748_v42 = vsub.f32 %v7724_v0, %v7724_v0 }
  0xed   : > { %1190 = vmatpush.msrb.mxu2 %v7463_v14 }
  0xee   : > { %1292 = vmatpush.msrb.mxu3 %v7431_v57  ;;  %v12210_v57 = vand.u32 4294901760, %v7635_v43 }
  0xef   : > { %931 = vmatmul.f32.gmra.mxu2 %v930_v37  ;;  %1121 = vmatmul.f32.gmra.mxu3 %v7567_v31  ;;  %v7709_v31 = vsub.f32 %v7701_v25, %v7701_v25  ;;  %v837_v37 = vld [vmem:[%s7381_s29 + $0xd8] sm:$0xff] }
  0xf0   : > { %1544 = vmatmul.f32.gmra.mxu1 %v750_v7  ;;  %1294 = vmatpush.msrb.mxu3 %v7443_v1  ;;  %v943_v1 = vsub.f32 %v7635_v43, %v12210_v57 }
  0xf1   : > { %1193 = vmatpush.msrb.mxu2 %v7475_v20  ;;  %v12205_v63 = vand.u32 4294901760, %v7709_v31 }
  0xf2   : > { %1296 = vmatpush.msrb.mxu3 %v7447_v3  ;;  %v7652_v3 = vsub.f32 %v756_v61, %v756_v61 }
  0xf3   : > { %1463 = vmatmul.f32.gmra.mxu0 %v750_v7  ;;  %1196 = vmatpush.msrb.mxu2 %v7486_v26 }
  0xf4   : > { %1298 = vmatpush.msrb.mxu3 %v7460_v13  ;;  %v944_v13 = vand.u32 4294901760, %v943_v1  ;;  %v12209_v14 = vand.u32 4294901760, %v7652_v3  ;;  %v7757_v1 = vld [vmem:[%s7304_s19 + $0x60] sm:$0xff] }
  0xf5   : > { %1199 = vmatpush.msrb.mxu2 %v7496_v32 }
  0xf6   : > { %1300 = vmatpush.msrb.mxu3 %v7472_v19  ;;  %v758_v19 = vunpack.c.l.bf16 %v7655_v8  ;;  %v950_v20 = vsub.f32 %v7652_v3, %v12209_v14 }
  0xf7   : > { %938 = vmatmul.f32.gmra.mxu2 %v937_v49  ;;  %1124 = vmatmul.f32.gmra.mxu3 %v750_v7  ;;  %v7728_v7 = vsub.f32 %v841_v29, %v7711_v33  ;;  %v7751_v49 = vsub.f32 %v839_v58, %v7730_v46 }
  0xf8   : > { %1547 = vmatmul.f32.gmra.mxu1 %v752_v10  ;;  %1202 = vmatpush.msrb.mxu2 %v7514_v54  ;;  %v7669_v26 = vsub.f32 %v758_v19, %v758_v19  ;;  %v951_v32 = vand.u32 4294901760, %v950_v20 }
  0xf9   : > { %1302 = vmatpush.msrb.mxu3 %v7490_v28  ;;  %v7672_v28 = vld [vmem:[%s7304_s19 + $0x40] sm:$0xff]  ;;  %1876 = vmatpush.msrb.mxu0 %v7728_v7 }
  0xfa   : > { %1205 = vmatpush.msrb.mxu2 %v7526_v62 }
  0xfb   : > { %1466 = vmatmul.f32.gmra.mxu0 %v752_v10  ;;  %1304 = vmatpush.msrb.mxu3 %v7500_v34  ;;  %v12208_v34 = vand.u32 4294901760, %v7669_v26 }
  0xfc   : > { %1208 = vmatpush.msrb.mxu2 %v7537_v6 }
  0xfd   : > { %1306 = vmatpush.msrb.mxu3 %v7511_v53  ;;  %v760_v53 = vunpack.c.l.bf16 %v7672_v28  ;;  %v957_v54 = vsub.f32 %v7669_v26, %v12208_v34  ;;  %v830_v34 = vld [vmem:[%s7381_s29 + $0xa0] sm:$0xff] }
  0xfe   : > { %1211 = vmatpush.msrb.mxu2 %v7544_v11  ;;  %v7840_v57 = vand.u32 4294901760, %v830_v34 }
  0xff   : > { %945 = vmatmul.f32.gmra.mxu2 %v944_v13  ;;  %1127 = vmatmul.f32.gmra.mxu3 %v752_v10  ;;  %v7680_v62 = vsub.f32 %v760_v53, %v760_v53  ;;  %v958_v6 = vand.u32 4294901760, %v957_v54  ;;  %v7734_v10 = vsub.f32 %v840_v39, %v7718_v40  ;;  %v7761_v13 = vsub.f32 %v838_v48, %v7739_v35 }
 0x100   : > { %1550 = vmatmul.f32.gmra.mxu1 %v754_v51  ;;  %1308 = vmatpush.msrb.mxu3 %v7523_v60  ;;  %v7686_v60 = vunpack.c.l.bf16 %v7683_v4  ;;  %v12204_v54 = vand.u32 4294901760, %v7748_v42  ;;  %12573 = vst [vmem:[#allocation22_spill] sm:$0xff] %v7840_v57 }
 0x101   : > { %v12207_v11 = vand.u32 4294901760, %v7680_v62  ;;  %1585 = vmatpush.msra.mxu2 %v7711_v33  ;;  %1879 = vmatpush.msrb.mxu0 %v7734_v10 }
 0x102   : > { %v7691_v12 = vsub.f32 %v7686_v60, %v7686_v60  ;;  %v985_v58 = vsub.f32 %v7748_v42, %v12204_v54  ;;  %v831_v54 = vld [vmem:[%s7381_s29 + $0xa8] sm:$0xff] }
 0x103   : > { %1469 = vmatmul.f32.gmra.mxu0 %v754_v51  ;;  %v964_v16 = vsub.f32 %v7680_v62, %v12207_v11  ;;  %1587 = vmatpush.msra.mxu2 %v7718_v40 }
 0x104   : > { %v12206_v21 = vand.u32 4294901760, %v7691_v12  ;;  %1882 = vmatpush.msrb.mxu0 %v7751_v49 }
 0x105   : > { %v965_v24 = vand.u32 4294901760, %v964_v16  ;;  %1589 = vmatpush.msra.mxu2 %v7730_v46 }
 0x106   : > { %v971_v27 = vsub.f32 %v7691_v12, %v12206_v21  ;;  %1885 = vmatpush.msrb.mxu0 %v7761_v13 }
 0x107   : > { %952 = vmatmul.f32.gmra.mxu2 %v951_v32  ;;  %1130 = vmatmul.f32.gmra.mxu3 %v754_v51  ;;  %v978_v51 = vsub.f32 %v7709_v31, %v12205_v63  ;;  %v835_v32 = vld [vmem:[%s7381_s29 + $0xc8] sm:$0xff]  ;;  %v986_v63 = vand.u32 4294901760, %v985_v58  ;;  %v7837_v58 = vand.u32 4294901760, %v831_v54 }
 0x108   : > { %1553 = vmatmul.f32.gmra.mxu1 %v756_v61  ;;  %v972_v44 = vand.u32 4294901760, %v971_v27  ;;  %1591 = vmatpush.msra.mxu2 %v7739_v35  ;;  %v7786_v29 = vand.u32 4294901760, %v835_v32 }
 0x109   : > { %12572 = vst [vmem:[#allocation21_spill] sm:$0xff] %v7837_v58  ;;  %v7853_v22 = vsub.f32 %v831_v54, %v7837_v58 }
 0x10a   : > { %12568 = vst [vmem:[#allocation17_spill] sm:$0xff] %v7786_v29 }
 0x10b   : > { %1472 = vmatmul.f32.gmra.mxu0 %v756_v61 }
 0x10f   : > { %959 = vmatmul.f32.gmra.mxu2 %v958_v6  ;;  %1133 = vmatmul.f32.gmra.mxu3 %v756_v61  ;;  %v7753_v61 = vand.u32 4294901760, %v837_v37  ;;  %v7773_v6 = vunpack.c.l.bf16 %v7757_v1 }
 0x110   : > { %1556 = vmatmul.f32.gmra.mxu1 %v758_v19 }
 0x111   : > { %12566 = vst [vmem:[#allocation15_spill] sm:$0xff] %v7753_v61  ;;  %1996 = vmatpush.msrb.mxu1 %v7753_v61  ;;  %v7777_v16 = vsub.f32 %v837_v37, %v7753_v61  ;;  %1593 = vmatpush.msra.mxu2 %v7753_v61  ;;  %v7799_v48 = vsub.f32 %v7773_v6, %v7773_v6 }
 0x112   : > { %v7802_v37 = vsub.f32 %v835_v32, %v7786_v29 }
 0x113   : > { %1475 = vmatmul.f32.gmra.mxu0 %v758_v19  ;;  %v12214_v21 = vand.u32 4294901760, %v7799_v48 }
 0x114   : > { %1888 = vmatpush.msrb.mxu0 %v7777_v16 }
 0x117   : > { %966 = vmatmul.f32.gmra.mxu2 %v965_v24  ;;  %1136 = vmatmul.f32.gmra.mxu3 %v758_v19  ;;  %v836_v19 = vld [vmem:[%s7381_s29 + $0xd0] sm:$0xff]  ;;  %v834_v24 = vld [vmem:[%s7381_s29 + $0xc0] sm:$0xff] }
 0x118   : > { %1559 = vmatmul.f32.gmra.mxu1 %v760_v53  ;;  %v7765_v20 = vand.u32 4294901760, %v836_v19  ;;  %v7789_v39 = vand.u32 4294901760, %v834_v24 }
 0x11a   : > { %12567 = vst [vmem:[#allocation16_spill] sm:$0xff] %v7765_v20  ;;  %v7782_v27 = vsub.f32 %v836_v19, %v7765_v20  ;;  %1998 = vmatpush.msrb.mxu1 %v7765_v20  ;;  %1595 = vmatpush.msra.mxu2 %v7765_v20  ;;  %v832_v19 = vld [vmem:[%s7381_s29 + $0xb0] sm:$0xff]  ;;  %v7908_v20 = vand.u32 4294901760, %v826_v15 }
 0x11b   : > { %1478 = vmatmul.f32.gmra.mxu0 %v760_v53  ;;  %12569 = vst [vmem:[#allocation18_spill] sm:$0xff] %v7789_v39  ;;  %v7818_v32 = vand.u32 4294901760, %v832_v19 }
 0x11c   : > { %1891 = vmatpush.msrb.mxu0 %v7782_v27  ;;  %2000 = vmatpush.msrb.mxu1 %v7786_v29  ;;  %12579 = vst [vmem:[#allocation27_spill] sm:$0xff] %v7908_v20 }
 0x11d   : > { %1597 = vmatpush.msra.mxu2 %v7786_v29  ;;  %12571 = vst [vmem:[#allocation20_spill] sm:$0xff] %v7818_v32  ;;  %v7833_v14 = vsub.f32 %v832_v19, %v7818_v32  ;;  %v992_v19 = vsub.f32 %v7799_v48, %v12214_v21 }
 0x11e   : > { %1894 = vmatpush.msrb.mxu0 %v7802_v37  ;;  %2002 = vmatpush.msrb.mxu1 %v7789_v39 }
 0x11f   : > { %973 = vmatmul.f32.gmra.mxu2 %v972_v44  ;;  %1139 = vmatmul.f32.gmra.mxu3 %v760_v53  ;;  %v979_v53 = vand.u32 4294901760, %v978_v51  ;;  %v833_v44 = vld [vmem:[%s7381_s29 + $0xb8] sm:$0xff]  ;;  %v7806_v51 = vld [vmem:[%s7304_s19 + $0x68] sm:$0xff] }
 0x120   : > { %1562 = vmatmul.f32.gmra.mxu1 %v7686_v60  ;;  %1599 = vmatpush.msra.mxu2 %v7789_v39 }
 0x123   : > { %1481 = vmatmul.f32.gmra.mxu0 %v7686_v60 }
 0x127   : > { %980 = vmatmul.f32.gmra.mxu2 %v979_v53  ;;  %1142 = vmatmul.f32.gmra.mxu3 %v7686_v60  ;;  %v7810_v60 = vsub.f32 %v834_v24, %v7789_v39  ;;  %v7814_v53 = vand.u32 4294901760, %v833_v44  ;;  %v7824_v24 = vunpack.c.l.bf16 %v7806_v51  ;;  %v7878_v39 = vunpack.c.l.bf16 %v7857_v5 }
 0x128   : > { %1565 = vmatmul.f32.gmra.mxu1 %v7701_v25 }
 0x129   : > { %12570 = vst [vmem:[#allocation19_spill] sm:$0xff] %v7814_v53  ;;  %v7828_v11 = vsub.f32 %v833_v44, %v7814_v53  ;;  %1897 = vmatpush.msrb.mxu0 %v7810_v60  ;;  %2004 = vmatpush.msrb.mxu1 %v7814_v53  ;;  %v829_v44 = vld [vmem:[%s7381_s29 + $0x98] sm:$0xff]  ;;  %v7850_v41 = vsub.f32 %v7824_v24, %v7824_v24 }
 0x12a   : > { %1601 = vmatpush.msra.mxu2 %v7814_v53  ;;  %v7865_v21 = vand.u32 4294901760, %v829_v44  ;;  %v7895_v53 = vand.u32 4294901760, %v827_v30 }
 0x12b   : > { %1484 = vmatmul.f32.gmra.mxu0 %v7701_v25  ;;  %2006 = vmatpush.msrb.mxu1 %v7818_v32 }
 0x12c   : > { %1900 = vmatpush.msrb.mxu0 %v7828_v11  ;;  %12574 = vst [vmem:[#allocation23_spill] sm:$0xff] %v7865_v21  ;;  %1603 = vmatpush.msra.mxu2 %v7818_v32  ;;  %v7882_v32 = vsub.f32 %v829_v44, %v7865_v21  ;;  %v7911_v61 = vsub.f32 %v827_v30, %v7895_v53  ;;  %v7915_v44 = vld [vmem:[%s7304_s19 + $0x78] sm:$0xff]  ;;  %v7930_v30 = vunpack.c.h.bf16 %v7517_v55 }
 0x12d   : > { %2008 = vmatpush.msrb.mxu1 %v7837_v58  ;;  %12577 = vst [vmem:[#allocation26_spill] sm:$0xff] %v7895_v53 }
 0x12e   : > { %1903 = vmatpush.msrb.mxu0 %v7833_v14  ;;  %1605 = vmatpush.msra.mxu2 %v7837_v58  ;;  %v7906_v58 = vsub.f32 %v7878_v39, %v7878_v39  ;;  %12582 = vst [vmem:[#allocation29_spill] sm:$0xff] %v7930_v30 }
 0x12f   : > { %987 = vmatmul.f32.gmra.mxu2 %v986_v63  ;;  %1145 = vmatmul.f32.gmra.mxu3 %v7701_v25  ;;  %v7861_v63 = vsub.f32 %v830_v34, %v7840_v57  ;;  %v828_v25 = vld [vmem:[%s7381_s29 + $0x90] sm:$0xff]  ;;  %v993_v34 = vand.u32 4294901760, %v992_v19  ;;  %v7891_v19 = vsub.f32 %v7873_v2, %v7873_v2 }
 0x130   : > { %1568 = vmatmul.f32.gmra.mxu1 %v7724_v0  ;;  %1906 = vmatpush.msrb.mxu0 %v7853_v22  ;;  %v7869_v54 = vand.u32 4294901760, %v828_v25 }
 0x131   : > { %2010 = vmatpush.msrb.mxu1 %v7840_v57  ;;  %1607 = vmatpush.msra.mxu2 %v7840_v57  ;;  %v1731_v57 = vand.u32 4294901760, %v7728_v7 }
 0x132   : > { %12575 = vst [vmem:[#allocation24_spill] sm:$0xff] %v7869_v54  ;;  %1909 = vmatpush.msrb.mxu0 %v7861_v63  ;;  %v7886_v29 = vsub.f32 %v828_v25, %v7869_v54  ;;  %v12578_v25 = vand.u32 4294901760, %v7850_v41 }
 0x133   : > { %1487 = vmatmul.f32.gmra.mxu0 %v7724_v0  ;;  %2012 = vmatpush.msrb.mxu1 %v7865_v21 }
 0x134   : > { %1912 = vmatpush.msrb.mxu0 %v7882_v32  ;;  %v999_v2 = vsub.f32 %v7850_v41, %v12578_v25  ;;  %v7925_v25 = vsub.f32 %v826_v15, %v7908_v20  ;;  %1609 = vmatpush.msra.mxu2 %v7865_v21  ;;  %v7940_v15 = vsub.f32 %v7930_v30, %v7930_v30 }
 0x135   : > { %2014 = vmatpush.msrb.mxu1 %v7869_v54  ;;  %v1732_v30 = vsub.f32 %v7728_v7, %v1731_v57 }
 0x136   : > { %1915 = vmatpush.msrb.mxu0 %v7886_v29  ;;  %v1000_v35 = vand.u32 4294901760, %v999_v2  ;;  %1611 = vmatpush.msra.mxu2 %v7869_v54  ;;  %v12234_v55 = vand.u32 4294901760, %v7940_v15 }
 0x137   : > { %994 = vmatmul.f32.gmra.mxu2 %v993_v34  ;;  %1148 = vmatmul.f32.gmra.mxu3 %v7724_v0  ;;  %v12580_v0 = vand.u32 4294901760, %v7891_v19 }
 0x138   : > { %1571 = vmatmul.f32.gmra.mxu1 %v7773_v6  ;;  %1918 = vmatpush.msrb.mxu0 %v7911_v61  ;;  %v7957_v54 = vsub.f32 %v7940_v15, %v12234_v55 }
 0x139   : > { %v7921_v34 = vsub.f32 %v7891_v19, %v12580_v0  ;;  %v12232_v0 = vand.u32 4294901760, %v7906_v58  ;;  %2016 = vmatpush.msrb.mxu1 %v7895_v53  ;;  %1613 = vmatpush.msra.mxu2 %v7895_v53 }
 0x13a   : > { %1921 = vmatpush.msrb.mxu0 %v7925_v25 }
 0x13b   : > { %12581 = vst [vmem:[#allocation28_spill] sm:$0xff] %v7921_v34  ;;  %1490 = vmatmul.f32.gmra.mxu0 %v7773_v6  ;;  %v774_v34 = vunpack.c.l.bf16 %v7915_v44  ;;  %v1006_v2 = vsub.f32 %v7906_v58, %v12232_v0  ;;  %1615 = vmatpush.msra.mxu2 %v7908_v20 }
 0x13c   : > { %2018 = vmatpush.msrb.mxu1 %v7908_v20 }
 0x13d   : > { %v7950_v21 = vsub.f32 %v774_v34, %v774_v34  ;;  %v1007_v0 = vand.u32 4294901760, %v1006_v2 }
 0x13f   : > { %1001 = vmatmul.f32.gmra.mxu2 %v1000_v35  ;;  %1151 = vmatmul.f32.gmra.mxu3 %v7773_v6  ;;  %v1733_v35 = vand.u32 4294901760, %v1732_v30  ;;  %v7962_v6 = vunpack.c.h.bf16 %v7558_v23  ;;  %v12237_v7 = vand.u32 4294901760, %v7950_v21  ;;  %v1737_v30 = vand.u32 4294901760, %v7734_v10 }
 0x140   : > { %1574 = vmatmul.f32.gmra.mxu1 %v7824_v24 }
 0x141   : > { %12583 = vst [vmem:[#allocation30_spill] sm:$0xff] %v7962_v6  ;;  %1734 = vmatpush.msra.mxu3 %v1733_v35  ;;  %v7968_v53 = vsub.f32 %v7962_v6, %v7962_v6  ;;  %v1013_v23 = vsub.f32 %v7950_v21, %v12237_v7  ;;  %v1738_v35 = vsub.f32 %v7734_v10, %v1737_v30  ;;  %v7984_v6 = vunpack.c.h.bf16 %v7583_v59 }
 0x143   : > { %1493 = vmatmul.f32.gmra.mxu0 %v7824_v24  ;;  %v12239_v55 = vand.u32 4294901760, %v7968_v53  ;;  %12585 = vst [vmem:[#allocation32_spill] sm:$0xff] %v7984_v6  ;;  %v7989_v7 = vsub.f32 %v7984_v6, %v7984_v6 }
 0x145   : > { %v7980_v2 = vsub.f32 %v7968_v53, %v12239_v55  ;;  %v12240_v20 = vand.u32 4294901760, %v7989_v7  ;;  %v1743_v55 = vand.u32 4294901760, %v7751_v49 }
 0x147   : > { %1008 = vmatmul.f32.gmra.mxu2 %v1007_v0  ;;  %1154 = vmatmul.f32.gmra.mxu3 %v7824_v24  ;;  %12584 = vst [vmem:[#allocation31_spill] sm:$0xff] %v7980_v2  ;;  %v1014_v24 = vand.u32 4294901760, %v1013_v23  ;;  %v1739_v0 = vand.u32 4294901760, %v1738_v35  ;;  %v7997_v59 = vsub.f32 %v7989_v7, %v12240_v20  ;;  %v1744_v10 = vsub.f32 %v7751_v49, %v1743_v55 }
 0x148   : > { %1577 = vmatmul.f32.gmra.mxu1 %v7878_v39  ;;  %v8001_v23 = vunpack.c.h.bf16 %v7600_v47  ;;  %v1749_v20 = vand.u32 4294901760, %v7761_v13  ;;  %v12589_v49 = vand.u32 4294901760, %v7891_v19 }
 0x149   : > { %1740 = vmatpush.msra.mxu3 %v1739_v0  ;;  %12586 = vst [vmem:[#allocation33_spill] sm:$0xff] %v7997_v59  ;;  %v1745_v35 = vand.u32 4294901760, %v1744_v10 }
 0x14a   : > { %12587 = vst [vmem:[#allocation34_spill] sm:$0xff] %v8001_v23 }
 0x14b   : > { %1496 = vmatmul.f32.gmra.mxu0 %v7878_v39  ;;  %1746 = vmatpush.msra.mxu3 %v1745_v35  ;;  %v1750_v35 = vsub.f32 %v7761_v13, %v1749_v20  ;;  %v1755_v13 = vand.u32 4294901760, %v7777_v16 }
 0x14f   : > { %1015 = vmatmul.f32.gmra.mxu2 %v1014_v24  ;;  %1157 = vmatmul.f32.gmra.mxu3 %v7878_v39  ;;  %v8007_v39 = vsub.f32 %v8001_v23, %v8001_v23  ;;  %v1751_v23 = vand.u32 4294901760, %v1750_v35 }
 0x150   : > { %1580 = vmatmul.f32.gmra.mxu1 %v774_v34 }
 0x151   : > { %v12243_v24 = vand.u32 4294901760, %v8007_v39  ;;  %1752 = vmatpush.msra.mxu3 %v1751_v23  ;;  %v1756_v23 = vsub.f32 %v7777_v16, %v1755_v13 }
 0x153   : > { %1499 = vmatmul.f32.gmra.mxu0 %v774_v34  ;;  %v8019_v10 = vsub.f32 %v8007_v39, %v12243_v24 }
 0x154   : > { %v8003_v0 = vpop.f32.mrf.mxu1 }
 0x155   : > { %12588 = vst [vmem:[#allocation35_spill] sm:$0xff] %v8003_v0 }
 0x156   : > { %12591 = vst [vmem:[#allocation37_spill] sm:$0xff] %v8019_v10 }
 0x157   : > { %1160 = vmatmul.f32.gmra.mxu3 %v774_v34  ;;  %1213 = vmatmul.f32.vlgmr.msrb.gmra.mxu2 %v7508_v45  ;;  %v8023_v34 = vunpack.c.h.bf16 %v7619_v50  ;;  %v12594_v50 = vand.u32 4294901760, %v7508_v45  ;;  %v8048_v45 = vunpack.c.h.bf16 %v7638_v52  ;;  %v1761_v52 = vand.u32 4294901760, %v7782_v27 }
 0x158   : > { %2021 = vmatmul.f32.vlgmr.msrb.gmra.mxu1 %v12589_v49  ;;  %v8014_v47 = vpop.f32.mrf.mxu0  ;;  %2103 = vmatpush.msrb.mxu2 %v1731_v57 }
 0x159   : > { %12590 = vst [vmem:[#allocation36_spill] sm:$0xff] %v8014_v47  ;;  %v8028_v49 = vsub.f32 %v8023_v34, %v8023_v34  ;;  %v8055_v24 = vsub.f32 %v8048_v45, %v8048_v45 }
 0x15a   : > { %v911_v0 = vpop.f32.mrf.mxu2  ;;  %12592 = vst [vmem:[#allocation38_spill] sm:$0xff] %v8023_v34  ;;  %2107 = vmatpush.msrb.mxu2 %v1737_v30 }
 0x15b   : > { %1923 = vmatmul.f32.vlgmr.msrb.gmra.mxu0 %v7891_v19  ;;  %v12244_v57 = vand.u32 4294901760, %v8028_v49  ;;  %v12595_v19 = vand.u32 4294901760, %v7940_v15  ;;  %12598 = vst [vmem:[#allocation42_spill] sm:$0xff] %v8048_v45  ;;  %v12245_v16 = vand.u32 4294901760, %v8055_v24 }
 0x15c   : > { %2111 = vmatpush.msrb.mxu2 %v1743_v55 }
 0x15d   : > { %v8030_v47 = vpop.f32.mrf.mxu1  ;;  %v8044_v55 = vsub.f32 %v8028_v49, %v12244_v57 }
 0x15e   : > { %12593 = vst [vmem:[#allocation39_spill] sm:$0xff] %v8030_v47  ;;  %2115 = vmatpush.msrb.mxu2 %v1749_v20 }
 0x15f   : > { %1217 = vmatmul.f32.gmra.mxu2 %v7552_v17  ;;  %1311 = vmatmul.f32.vlgmr.msrb.gmra.mxu3 %v12594_v50  ;;  %12597 = vst [vmem:[#allocation41_spill] sm:$0xff] %v8044_v55 }
 0x160   : > { %2026 = vmatmul.f32.gmra.mxu1 %v12595_v19  ;;  %v8039_v30 = vpop.f32.mrf.mxu0  ;;  %2119 = vmatpush.msrb.mxu2 %v1755_v13  ;;  %v1757_v19 = vand.u32 4294901760, %v1756_v23  ;;  %v12600_v13 = vand.u32 4294901760, %v7552_v17  ;;  %v8071_v23 = vsub.f32 %v8055_v24, %v12245_v16  ;;  %v8075_v17 = vunpack.c.h.bf16 %v7655_v8 }
 0x161   : > { %12596 = vst [vmem:[#allocation40_spill] sm:$0xff] %v8039_v30  ;;  %v1767_v8 = vand.u32 4294901760, %v7802_v37 }
 0x162   : > { %v918_v20 = vpop.f32.mrf.mxu2  ;;  %v1116_v35 = vpop.f32.mrf.mxu3  ;;  %1758 = vmatpush.msra.mxu3 %v1757_v19  ;;  %12603 = vst [vmem:[#allocation45_spill] sm:$0xff] %v8071_v23  ;;  %2123 = vmatpush.msrb.mxu2 %v1761_v52 }
 0x163   : > { %v8050_v50 = vadd.f32 %v1116_v35, %v911_v0  ;;  %1927 = vmatmul.f32.gmra.mxu0 %v7940_v15  ;;  %v12601_v0 = vand.u32 4294901760, %v7968_v53  ;;  %v1762_v35 = vsub.f32 %v7782_v27, %v1761_v52  ;;  %12604 = vst [vmem:[#allocation46_spill] sm:$0xff] %v8075_v17  ;;  %v12606_v52 = vand.u32 4294901760, %v7580_v56 }
 0x164   : > { %2127 = vmatpush.msrb.mxu2 %v1767_v8 }
 0x165   : > { %v8057_v47 = vpop.f32.mrf.mxu1 }
 0x166   : > { %12599 = vst [vmem:[#allocation43_spill] sm:$0xff] %v8057_v47  ;;  %v8082_v47 = vsub.f32 %v8075_v17, %v8075_v17 }
 0x167   : > { %1221 = vmatmul.f32.gmra.mxu2 %v7580_v56  ;;  %1316 = vmatmul.f32.gmra.mxu3 %v12600_v13 }
 0x168   : > { %2031 = vmatmul.f32.gmra.mxu1 %v12601_v0  ;;  %v8066_v15 = vpop.f32.mrf.mxu0  ;;  %v1763_v0 = vand.u32 4294901760, %v1762_v35  ;;  %v12246_v27 = vand.u32 4294901760, %v8082_v47  ;;  %v1768_v35 = vsub.f32 %v7802_v37, %v1767_v8  ;;  %v12613_v37 = vand.u32 4294901760, %v8007_v39 }
 0x169   : > { %12602 = vst [vmem:[#allocation44_spill] sm:$0xff] %v8066_v15 }
 0x16a   : > { %v925_v19 = vpop.f32.mrf.mxu2  ;;  %v1119_v57 = vpop.f32.mrf.mxu3  ;;  %1764 = vmatpush.msra.mxu3 %v1763_v0  ;;  %v1769_v56 = vand.u32 4294901760, %v1768_v35 }
 0x16b   : > { %v8077_v13 = vadd.f32 %v1119_v57, %v918_v20  ;;  %1931 = vmatmul.f32.gmra.mxu0 %v7968_v53  ;;  %v12607_v57 = vand.u32 4294901760, %v7989_v7  ;;  %v8098_v20 = vsub.f32 %v8082_v47, %v12246_v27  ;;  %v1773_v27 = vand.u32 4294901760, %v7810_v60 }
 0x16c   : > { %1770 = vmatpush.msra.mxu3 %v1769_v56 }
 0x16d   : > { %v8084_v15 = vpop.f32.mrf.mxu1  ;;  %12609 = vst [vmem:[#allocation49_spill] sm:$0xff] %v8098_v20  ;;  %2131 = vmatpush.msrb.mxu2 %v1773_v27 }
 0x16e   : > { %12605 = vst [vmem:[#allocation47_spill] sm:$0xff] %v8084_v15 }
 0x16f   : > { %1225 = vmatmul.f32.gmra.mxu2 %v7595_v9  ;;  %1321 = vmatmul.f32.gmra.mxu3 %v12606_v52 }
 0x170   : > { %2036 = vmatmul.f32.gmra.mxu1 %v12607_v57  ;;  %v8093_v53 = vpop.f32.mrf.mxu0  ;;  %v12612_v57 = vand.u32 4294901760, %v7595_v9  ;;  %v12617_v9 = vand.u32 4294901760, %v7615_v36 }
 0x171   : > { %12608 = vst [vmem:[#allocation48_spill] sm:$0xff] %v8093_v53 }
 0x172   : > { %v932_v0 = vpop.f32.mrf.mxu2  ;;  %v1122_v16 = vpop.f32.mrf.mxu3 }
 0x173   : > { %v8101_v15 = vadd.f32 %v1122_v16, %v925_v19  ;;  %1935 = vmatmul.f32.gmra.mxu0 %v7989_v7  ;;  %v1774_v16 = vsub.f32 %v7810_v60, %v1773_v27  ;;  %v12618_v60 = vand.u32 4294901760, %v8028_v49 }
 0x175   : > { %12610 = vst [vmem:[#allocation50_spill] sm:$0xff] %v8101_v15  ;;  %v8104_v52 = vpop.f32.mrf.mxu1  ;;  %v1775_v56 = vand.u32 4294901760, %v1774_v16 }
 0x176   : > { %12611 = vst [vmem:[#allocation51_spill] sm:$0xff] %v8104_v52 }
 0x177   : > { %1229 = vmatmul.f32.gmra.mxu2 %v7615_v36  ;;  %1326 = vmatmul.f32.gmra.mxu3 %v12612_v57  ;;  %v1779_v57 = vand.u32 4294901760, %v7828_v11  ;;  %v12622_v36 = vand.u32 4294901760, %v7635_v43 }
 0x178   : > { %2041 = vmatmul.f32.gmra.mxu1 %v12613_v37  ;;  %v8112_v8 = vpop.f32.mrf.mxu0  ;;  %1776 = vmatpush.msra.mxu3 %v1775_v56 }
 0x179   : > { %12614 = vst [vmem:[#allocation52_spill] sm:$0xff] %v8112_v8  ;;  %2135 = vmatpush.msrb.mxu2 %v1779_v57 }
 0x17a   : > { %v939_v7 = vpop.f32.mrf.mxu2  ;;  %v1125_v19 = vpop.f32.mrf.mxu3 }
 0x17b   : > { %v8115_v35 = vadd.f32 %v1125_v19, %v932_v0  ;;  %1939 = vmatmul.f32.gmra.mxu0 %v8007_v39  ;;  %v1780_v0 = vsub.f32 %v7828_v11, %v1779_v57  ;;  %v12623_v11 = vand.u32 4294901760, %v8055_v24 }
 0x17d   : > { %12615 = vst [vmem:[#allocation53_spill] sm:$0xff] %v8115_v35  ;;  %v8118_v52 = vpop.f32.mrf.mxu1  ;;  %v1781_v19 = vand.u32 4294901760, %v1780_v0 }
 0x17e   : > { %12616 = vst [vmem:[#allocation54_spill] sm:$0xff] %v8118_v52  ;;  %v853_v52 = vld [vmem:[%s7381_s29 + $0x158] sm:$0xff] }
 0x17f   : > { %1233 = vmatmul.f32.gmra.mxu2 %v7635_v43  ;;  %1331 = vmatmul.f32.gmra.mxu3 %v12617_v9  ;;  %v1785_v9 = vand.u32 4294901760, %v7833_v14  ;;  %v8147_v43 = vunpack.c.h.bf16 %v7672_v28 }
 0x180   : > { %2046 = vmatmul.f32.gmra.mxu1 %v12618_v60  ;;  %v8126_v27 = vpop.f32.mrf.mxu0  ;;  %1782 = vmatpush.msra.mxu3 %v1781_v19 }
 0x181   : > { %12619 = vst [vmem:[#allocation55_spill] sm:$0xff] %v8126_v27  ;;  %2139 = vmatpush.msrb.mxu2 %v1785_v9  ;;  %v8164_v28 = vsub.f32 %v8147_v43, %v8147_v43 }
 0x182   : > { %v946_v39 = vpop.f32.mrf.mxu2  ;;  %v1128_v37 = vpop.f32.mrf.mxu3  ;;  %12626 = vst [vmem:[#allocation60_spill] sm:$0xff] %v8147_v43 }
 0x183   : > { %v8129_v16 = vadd.f32 %v1128_v37, %v939_v7  ;;  %1943 = vmatmul.f32.gmra.mxu0 %v8028_v49  ;;  %v1786_v7 = vsub.f32 %v7833_v14, %v1785_v9  ;;  %v12628_v14 = vand.u32 4294901760, %v7652_v3  ;;  %v1791_v9 = vand.u32 4294901760, %v7853_v22  ;;  %12631 = vst [vmem:[#allocation63_spill] sm:$0xff] %v8164_v28 }
 0x185   : > { %12620 = vst [vmem:[#allocation56_spill] sm:$0xff] %v8129_v16  ;;  %v8132_v56 = vpop.f32.mrf.mxu1  ;;  %v1787_v37 = vand.u32 4294901760, %v1786_v7  ;;  %v856_v7 = vld [vmem:[%s7381_s29 + $0x170] sm:$0xff]  ;;  %2143 = vmatpush.msrb.mxu2 %v1791_v9 }
 0x186   : > { %12621 = vst [vmem:[#allocation57_spill] sm:$0xff] %v8132_v56 }
 0x187   : > { %1237 = vmatmul.f32.gmra.mxu2 %v7652_v3  ;;  %1336 = vmatmul.f32.gmra.mxu3 %v12622_v36  ;;  %v857_v36 = vld [vmem:[%s7381_s29 + $0x178] sm:$0xff] }
 0x188   : > { %2051 = vmatmul.f32.gmra.mxu1 %v12623_v11  ;;  %v8140_v57 = vpop.f32.mrf.mxu0  ;;  %1788 = vmatpush.msra.mxu3 %v1787_v37  ;;  %v8171_v37 = vand.u32 4294901760, %v856_v7 }
 0x189   : > { %12624 = vst [vmem:[#allocation58_spill] sm:$0xff] %v8140_v57 }
 0x18a   : > { %v953_v49 = vpop.f32.mrf.mxu2  ;;  %v1131_v60 = vpop.f32.mrf.mxu3  ;;  %v8183_v57 = vsub.f32 %v856_v7, %v8171_v37 }
 0x18b   : > { %v8143_v0 = vadd.f32 %v1131_v60, %v946_v39  ;;  %1947 = vmatmul.f32.gmra.mxu0 %v8055_v24  ;;  %v8156_v39 = vand.u32 4294901760, %v857_v36  ;;  %v12629_v24 = vand.u32 4294901760, %v8082_v47  ;;  %v1792_v60 = vsub.f32 %v7853_v22, %v1791_v9 }
 0x18d   : > { %12625 = vst [vmem:[#allocation59_spill] sm:$0xff] %v8143_v0  ;;  %v8149_v19 = vpop.f32.mrf.mxu1  ;;  %v8169_v3 = vsub.f32 %v857_v36, %v8156_v39  ;;  %2295 = vmatpush.msra.mxu0 %v8156_v39  ;;  %v1793_v22 = vand.u32 4294901760, %v1792_v60 }
 0x18e   : > { %12627 = vst [vmem:[#allocation61_spill] sm:$0xff] %v8149_v19  ;;  %v8175_v19 = vunpack.c.h.bf16 %v7683_v4  ;;  %v854_v4 = vld [vmem:[%s7381_s29 + $0x160] sm:$0xff] }
 0x18f   : > { %1241 = vmatmul.f32.gmra.mxu2 %v7669_v26  ;;  %1341 = vmatmul.f32.gmra.mxu3 %v12628_v14  ;;  %v12247_v36 = vand.u32 4294901760, %v8169_v3  ;;  %v8196_v60 = vand.u32 4294901760, %v854_v4 }
 0x190   : > { %2056 = vmatmul.f32.gmra.mxu1 %v12629_v24  ;;  %v8160_v11 = vpop.f32.mrf.mxu0  ;;  %12632 = vst [vmem:[#allocation64_spill] sm:$0xff] %v8175_v19  ;;  %2297 = vmatpush.msra.mxu0 %v8171_v37  ;;  %v8200_v7 = vsub.f32 %v8175_v19, %v8175_v19 }
 0x191   : > { %12630 = vst [vmem:[#allocation62_spill] sm:$0xff] %v8160_v11  ;;  %v855_v11 = vld [vmem:[%s7381_s29 + $0x168] sm:$0xff]  ;;  %1794 = vmatpush.msra.mxu3 %v1793_v22  ;;  %v12636_v22 = vand.u32 4294901760, %v7669_v26  ;;  %v8215_v53 = vsub.f32 %v854_v4, %v8196_v60  ;;  %v8222_v26 = vand.u32 4294901760, %v853_v52 }
 0x192   : > { %v960_v14 = vpop.f32.mrf.mxu2  ;;  %v1134_v24 = vpop.f32.mrf.mxu3  ;;  %v8186_v9 = vand.u32 4294901760, %v855_v11  ;;  %12635 = vst [vmem:[#allocation67_spill] sm:$0xff] %v8200_v7 }
 0x193   : > { %v8178_v56 = vadd.f32 %v1134_v24, %v953_v49  ;;  %1951 = vmatmul.f32.gmra.mxu0 %v8082_v47  ;;  %v2442_v47 = vsub.f32 %v8169_v3, %v12247_v36  ;;  %v1797_v36 = vand.u32 4294901760, %v7861_v63  ;;  %v12257_v4 = vand.u32 4294901760, %v8215_v53 }
 0x194   : > { %v8203_v24 = vsub.f32 %v855_v11, %v8186_v9  ;;  %2299 = vmatpush.msra.mxu0 %v8186_v9  ;;  %v12638_v11 = vand.u32 4294901760, %v8164_v28 }
 0x195   : > { %12633 = vst [vmem:[#allocation65_spill] sm:$0xff] %v8178_v56  ;;  %v8190_v27 = vpop.f32.mrf.mxu1  ;;  %v2443_v49 = vand.u32 4294901760, %v2442_v47  ;;  %v852_v47 = vld [vmem:[%s7381_s29 + $0x150] sm:$0xff]  ;;  %2147 = vmatpush.msrb.mxu2 %v1797_v36  ;;  %v8235_v56 = vsub.f32 %v853_v52, %v8222_v26  ;;  %v8249_v52 = vunpack.c.h.bf16 %v7697_v18 }
 0x196   : > { %12634 = vst [vmem:[#allocation66_spill] sm:$0xff] %v8190_v27  ;;  %v12637_v27 = vand.u32 4294901760, %v8183_v57  ;;  %v12256_v19 = vand.u32 4294901760, %v8203_v24  ;;  %2301 = vmatpush.msra.mxu0 %v8196_v60  ;;  %v8228_v43 = vand.u32 4294901760, %v852_v47 }
 0x197   : > { %1245 = vmatmul.f32.gmra.mxu2 %v7680_v62  ;;  %1346 = vmatmul.f32.gmra.mxu3 %v12636_v22  ;;  %v1798_v22 = vsub.f32 %v7861_v63, %v1797_v36  ;;  %v851_v63 = vld [vmem:[%s7381_s29 + $0x148] sm:$0xff]  ;;  %12641 = vst [vmem:[#allocation70_spill] sm:$0xff] %v8249_v52  ;;  %v12258_v20 = vand.u32 4294901760, %v8235_v56 }
 0x198   : > { %v2448_v8 = vsub.f32 %v8183_v57, %v12637_v27  ;;  %2061 = vmatmul.f32.gmra.mxu1 %v12638_v11  ;;  %v8219_v30 = vpop.f32.mrf.mxu0  ;;  %v2454_v45 = vsub.f32 %v8203_v24, %v12256_v19  ;;  %2303 = vmatpush.msra.mxu0 %v8222_v26 }
 0x199   : > { %12639 = vst [vmem:[#allocation68_spill] sm:$0xff] %v8219_v30  ;;  %2444 = vmatpush.msra.mxu1 %v2443_v49  ;;  %v1799_v36 = vand.u32 4294901760, %v1798_v22  ;;  %v2460_v49 = vsub.f32 %v8215_v53, %v12257_v4  ;;  %v8246_v30 = vsub.f32 %v852_v47, %v8228_v43  ;;  %v2466_v18 = vsub.f32 %v8235_v56, %v12258_v20 }
 0x19a   : > { %v2449_v27 = vand.u32 4294901760, %v2448_v8  ;;  %v967_v11 = vpop.f32.mrf.mxu2  ;;  %v1137_v17 = vpop.f32.mrf.mxu3  ;;  %v2455_v19 = vand.u32 4294901760, %v2454_v45  ;;  %2305 = vmatpush.msra.mxu0 %v8228_v43 }
 0x19b   : > { %v8239_v8 = vadd.f32 %v1137_v17, %v960_v14  ;;  %1955 = vmatmul.f32.gmra.mxu0 %v8164_v28  ;;  %v8252_v17 = vand.u32 4294901760, %v851_v63  ;;  %v850_v14 = vld [vmem:[%s7381_s29 + $0x140] sm:$0xff]  ;;  %1800 = vmatpush.msra.mxu3 %v1799_v36  ;;  %v12263_v4 = vand.u32 4294901760, %v8246_v30  ;;  %v12643_v36 = vand.u32 4294901760, %v7680_v62 }
 0x19c   : > { %2450 = vmatpush.msra.mxu1 %v2449_v27  ;;  %v2461_v27 = vand.u32 4294901760, %v2460_v49  ;;  %v8259_v47 = vand.u32 4294901760, %v850_v14  ;;  %v1803_v49 = vand.u32 4294901760, %v7882_v32  ;;  %v8287_v62 = vsub.f32 %v8249_v52, %v8249_v52 }
 0x19d   : > { %12640 = vst [vmem:[#allocation69_spill] sm:$0xff] %v8239_v8  ;;  %v8256_v22 = vpop.f32.mrf.mxu1  ;;  %v8265_v45 = vsub.f32 %v851_v63, %v8252_v17  ;;  %2307 = vmatpush.msra.mxu0 %v8252_v17  ;;  %v849_v8 = vld [vmem:[%s7381_s29 + $0x138] sm:$0xff]  ;;  %v12644_v63 = vand.u32 4294901760, %v8200_v7 }
 0x19e   : > { %12642 = vst [vmem:[#allocation71_spill] sm:$0xff] %v8256_v22  ;;  %2456 = vmatpush.msra.mxu1 %v2455_v19  ;;  %v2472_v19 = vsub.f32 %v8246_v30, %v12263_v4  ;;  %v8277_v20 = vsub.f32 %v850_v14, %v8259_v47  ;;  %v8279_v22 = vand.u32 4294901760, %v849_v8  ;;  %v848_v4 = vld [vmem:[%s7381_s29 + $0x130] sm:$0xff]  ;;  %v1804_v14 = vsub.f32 %v7882_v32, %v1803_v49  ;;  %v847_v32 = vld [vmem:[%s7381_s29 + $0x128] sm:$0xff] }
 0x19f   : > { %1249 = vmatmul.f32.gmra.mxu2 %v7691_v12  ;;  %1351 = vmatmul.f32.gmra.mxu3 %v12643_v36  ;;  %12646 = vst [vmem:[#allocation73_spill] sm:$0xff] %v8287_v62  ;;  %v2467_v36 = vand.u32 4294901760, %v2466_v18  ;;  %v12266_v34 = vand.u32 4294901760, %v8265_v45  ;;  %v8298_v18 = vunpack.c.h.bf16 %v7714_v38  ;;  %v8318_v6 = vand.u32 4294901760, %v847_v32 }
 0x1a0   : > { %2066 = vmatmul.f32.gmra.mxu1 %v12644_v63  ;;  %v8283_v28 = vpop.f32.mrf.mxu0  ;;  %2309 = vmatpush.msra.mxu0 %v8259_v47  ;;  %v2473_v0 = vand.u32 4294901760, %v2472_v19  ;;  %v12269_v23 = vand.u32 4294901760, %v8277_v20  ;;  %v8295_v63 = vsub.f32 %v849_v8, %v8279_v22  ;;  %v1805_v8 = vand.u32 4294901760, %v1804_v14 }
 0x1a1   : > { %12645 = vst [vmem:[#allocation72_spill] sm:$0xff] %v8283_v28  ;;  %2462 = vmatpush.msra.mxu1 %v2461_v27  ;;  %2151 = vmatpush.msrb.mxu2 %v1803_v49  ;;  %v2478_v55 = vsub.f32 %v8265_v45, %v12266_v34  ;;  %v8303_v27 = vand.u32 4294901760, %v848_v4  ;;  %v12651_v34 = vand.u32 4294901760, %v8287_v62 }
 0x1a2   : > { %v974_v28 = vpop.f32.mrf.mxu2  ;;  %v1140_v52 = vpop.f32.mrf.mxu3  ;;  %12647 = vst [vmem:[#allocation74_spill] sm:$0xff] %v8298_v18  ;;  %2311 = vmatpush.msra.mxu0 %v8279_v22  ;;  %v2484_v38 = vsub.f32 %v8277_v20, %v12269_v23  ;;  %v12270_v49 = vand.u32 4294901760, %v8295_v63  ;;  %1806 = vmatpush.msra.mxu3 %v1805_v8 }
 0x1a3   : > { %v8307_v19 = vadd.f32 %v1140_v52, %v967_v11  ;;  %1959 = vmatmul.f32.gmra.mxu0 %v8200_v7  ;;  %2468 = vmatpush.msra.mxu1 %v2467_v36  ;;  %v8316_v16 = vsub.f32 %v848_v4, %v8303_v27  ;;  %v846_v11 = vld [vmem:[%s7381_s29 + $0x120] sm:$0xff]  ;;  %v2479_v36 = vand.u32 4294901760, %v2478_v55  ;;  %v8331_v4 = vsub.f32 %v8298_v18, %v8298_v18 }
 0x1a4   : > { %2313 = vmatpush.msra.mxu0 %v8303_v27  ;;  %v2490_v14 = vsub.f32 %v8295_v63, %v12270_v49  ;;  %v8327_v23 = vand.u32 4294901760, %v846_v11  ;;  %v12650_v55 = vand.u32 4294901760, %v7691_v12  ;;  %v2485_v8 = vand.u32 4294901760, %v2484_v38 }
 0x1a5   : > { %12648 = vst [vmem:[#allocation75_spill] sm:$0xff] %v8307_v19  ;;  %v8322_v52 = vpop.f32.mrf.mxu1  ;;  %2474 = vmatpush.msra.mxu1 %v2473_v0  ;;  %v8335_v19 = vsub.f32 %v847_v32, %v8318_v6  ;;  %v845_v0 = vld [vmem:[%s7381_s29 + $0x118] sm:$0xff]  ;;  %v1809_v49 = vand.u32 4294901760, %v7886_v29  ;;  %v12653_v10 = vand.u32 4294901760, %v8316_v16 }
 0x1a6   : > { %12649 = vst [vmem:[#allocation76_spill] sm:$0xff] %v8322_v52  ;;  %2315 = vmatpush.msra.mxu0 %v8318_v6  ;;  %v8344_v52 = vsub.f32 %v846_v11, %v8327_v23  ;;  %v8346_v18 = vand.u32 4294901760, %v845_v0  ;;  %v2491_v7 = vand.u32 4294901760, %v2490_v14 }
 0x1a7   : > { %1253 = vmatmul.f32.gmra.mxu2 %v7709_v31  ;;  %1356 = vmatmul.f32.gmra.mxu3 %v12650_v55  ;;  %v2496_v12 = vsub.f32 %v8316_v16, %v12653_v10  ;;  %v844_v55 = vld [vmem:[%s7381_s29 + $0x110] sm:$0xff]  ;;  %v1810_v11 = vsub.f32 %v7886_v29, %v1809_v49  ;;  %v843_v10 = vld [vmem:[%s7381_s29 + $0x108] sm:$0xff] }
 0x1a8   : > { %2071 = vmatmul.f32.gmra.mxu1 %v12651_v34  ;;  %v8350_v32 = vpop.f32.mrf.mxu0  ;;  %2317 = vmatpush.msra.mxu0 %v8327_v23  ;;  %v8361_v34 = vsub.f32 %v845_v0, %v8346_v18  ;;  %v8363_v59 = vand.u32 4294901760, %v844_v55  ;;  %v12655_v0 = vand.u32 4294901760, %v8335_v19  ;;  %v12657_v15 = vand.u32 4294901760, %v8344_v52 }
 0x1a9   : > { %12652 = vst [vmem:[#allocation77_spill] sm:$0xff] %v8350_v32  ;;  %2480 = vmatpush.msra.mxu1 %v2479_v36  ;;  %2155 = vmatpush.msrb.mxu2 %v1809_v49  ;;  %v1811_v36 = vand.u32 4294901760, %v1810_v11  ;;  %v8375_v49 = vunpack.c.h.bf16 %v7757_v1 }
 0x1aa   : > { %v981_v14 = vpop.f32.mrf.mxu2  ;;  %v1143_v32 = vpop.f32.mrf.mxu3  ;;  %2319 = vmatpush.msra.mxu0 %v8346_v18  ;;  %v2502_v35 = vsub.f32 %v8335_v19, %v12655_v0  ;;  %v2508_v2 = vsub.f32 %v8344_v52, %v12657_v15  ;;  %v2497_v0 = vand.u32 4294901760, %v2496_v12  ;;  %v12660_v15 = vand.u32 4294901760, %v7709_v31 }
 0x1ab   : > { %v8367_v38 = vadd.f32 %v1143_v32, %v974_v28  ;;  %1963 = vmatmul.f32.gmra.mxu0 %v8287_v62  ;;  %2486 = vmatpush.msra.mxu1 %v2485_v8  ;;  %12656 = vst [vmem:[#allocation79_spill] sm:$0xff] %v8375_v49  ;;  %v8381_v28 = vsub.f32 %v844_v55, %v8363_v59  ;;  %v8383_v32 = vand.u32 4294901760, %v843_v10  ;;  %v842_v8 = vld [vmem:[%s7381_s29 + $0x100] sm:$0xff]  ;;  %v12661_v12 = vand.u32 4294901760, %v8331_v4 }
 0x1ac   : > { %2321 = vmatpush.msra.mxu0 %v8363_v59  ;;  %1812 = vmatpush.msra.mxu3 %v1811_v36  ;;  %v8390_v29 = vand.u32 4294901760, %v842_v8  ;;  %v2503_v55 = vand.u32 4294901760, %v2502_v35  ;;  %v2509_v1 = vand.u32 4294901760, %v2508_v2  ;;  %v12663_v35 = vand.u32 4294901760, %v8361_v34 }
 0x1ad   : > { %12654 = vst [vmem:[#allocation78_spill] sm:$0xff] %v8367_v38  ;;  %v8387_v11 = vpop.f32.mrf.mxu1  ;;  %2492 = vmatpush.msra.mxu1 %v2491_v7  ;;  %v8393_v38 = vsub.f32 %v843_v10, %v8383_v32  ;;  %v8407_v10 = vsub.f32 %v8375_v49, %v8375_v49 }
 0x1ae   : > { %12658 = vst [vmem:[#allocation80_spill] sm:$0xff] %v8387_v11  ;;  %2323 = vmatpush.msra.mxu0 %v8383_v32  ;;  %v1815_v11 = vand.u32 4294901760, %v7911_v61 }
 0x1af   : > { %12659 = vst [vmem:[#allocation81_spill] sm:$0xff] %v8390_v29  ;;  %1257 = vmatmul.f32.gmra.mxu2 %v7748_v42  ;;  %1361 = vmatmul.f32.gmra.mxu3 %v12660_v15  ;;  %v2514_v15 = vsub.f32 %v8361_v34, %v12663_v35  ;;  %v12281_v7 = vand.u32 4294901760, %v8407_v10 }
 0x1b0   : > { %2076 = vmatmul.f32.gmra.mxu1 %v12661_v12  ;;  %v8403_v36 = vpop.f32.mrf.mxu0  ;;  %2325 = vmatpush.msra.mxu0 %v8390_v29  ;;  %v1816_v31 = vsub.f32 %v7911_v61, %v1815_v11  ;;  %v8416_v12 = vsub.f32 %v842_v8, %v8390_v29  ;;  %v8428_v8 = vunpack.c.h.bf16 %v7806_v51  ;;  %v12670_v51 = vand.u32 4294901760, %v7748_v42 }
 0x1b1   : > { %12662 = vst [vmem:[#allocation82_spill] sm:$0xff] %v8403_v36  ;;  %2498 = vmatpush.msra.mxu1 %v2497_v0  ;;  %v12664_v36 = vand.u32 4294901760, %v8169_v3  ;;  %2159 = vmatpush.msrb.mxu2 %v1815_v11  ;;  %v12665_v0 = vand.u32 4294901760, %v8381_v28 }
 0x1b2   : > { %v988_v49 = vpop.f32.mrf.mxu2  ;;  %v1146_v62 = vpop.f32.mrf.mxu3  ;;  %v1817_v61 = vand.u32 4294901760, %v1816_v31  ;;  %v12669_v31 = vand.u32 4294901760, %v8203_v24 }
 0x1b3   : > { %2813 = vmatpush.msrb.mxu0 %v12664_v36  ;;  %v8420_v2 = vadd.f32 %v1146_v62, %v981_v14  ;;  %2504 = vmatpush.msra.mxu1 %v2503_v55  ;;  %v2520_v35 = vsub.f32 %v8381_v28, %v12665_v0  ;;  %v12666_v36 = vand.u32 4294901760, %v8183_v57  ;;  %v2515_v62 = vand.u32 4294901760, %v2514_v15 }
 0x1b4   : > { %1967 = vmatmul.f32.gmra.mxu0 %v8331_v4  ;;  %1818 = vmatpush.msra.mxu3 %v1817_v61  ;;  %v12668_v14 = vand.u32 4294901760, %v8393_v38  ;;  %v12282_v55 = vand.u32 4294901760, %v8416_v12  ;;  %v8450_v15 = vsub.f32 %v8428_v8, %v8428_v8  ;;  %v12672_v61 = vand.u32 4294901760, %v8215_v53 }
 0x1b5   : > { %2817 = vmatpush.msrb.mxu0 %v12666_v36  ;;  %v8432_v29 = vpop.f32.mrf.mxu1  ;;  %2510 = vmatpush.msra.mxu1 %v2509_v1  ;;  %v2521_v0 = vand.u32 4294901760, %v2520_v35  ;;  %v1821_v36 = vand.u32 4294901760, %v7925_v25 }
 0x1b6   : > { %12667 = vst [vmem:[#allocation83_spill] sm:$0xff] %v8432_v29  ;;  %v2526_v11 = vsub.f32 %v8393_v38, %v12668_v14  ;;  %v2532_v42 = vsub.f32 %v8416_v12, %v12282_v55  ;;  %v12674_v55 = vand.u32 4294901760, %v8246_v30 }
 0x1b7   : > { %2821 = vmatpush.msrb.mxu0 %v12669_v31  ;;  %1261 = vmatmul.f32.gmra.mxu2 %v7799_v48  ;;  %v1822_v35 = vsub.f32 %v7925_v25, %v1821_v36 }
 0x1b8   : > { %1366 = vmatmul.f32.gmra.mxu3 %v12670_v51  ;;  %2081 = vmatmul.f32.gmra.mxu1 %v12281_v7  ;;  %v8446_v1 = vpop.f32.mrf.mxu0  ;;  %v2527_v14 = vand.u32 4294901760, %v2526_v11  ;;  %v12673_v7 = vand.u32 4294901760, %v8235_v56  ;;  %v8465_v11 = vunpack.c.h.bf16 %v7857_v5 }
 0x1b9   : > { %12671 = vst [vmem:[#allocation84_spill] sm:$0xff] %v8446_v1  ;;  %2825 = vmatpush.msrb.mxu0 %v12672_v61  ;;  %2516 = vmatpush.msra.mxu1 %v2515_v62  ;;  %v1823_v61 = vand.u32 4294901760, %v1822_v35  ;;  %v12284_v62 = vand.u32 4294901760, %v8450_v15  ;;  %v8495_v35 = vunpack.c.h.bf16 %v7915_v44  ;;  %v12684_v44 = vand.u32 4294901760, %v7850_v41 }
 0x1ba   : > { %2163 = vmatpush.msrb.mxu2 %v1821_v36  ;;  %v995_v31 = vpop.f32.mrf.mxu2  ;;  %v1149_v51 = vpop.f32.mrf.mxu3  ;;  %v2533_v36 = vand.u32 4294901760, %v2532_v42 }
 0x1bb   : > { %2829 = vmatpush.msrb.mxu0 %v12673_v7  ;;  %v8460_v29 = vadd.f32 %v1149_v51, %v988_v49  ;;  %2522 = vmatpush.msra.mxu1 %v2521_v0  ;;  %v12676_v49 = vand.u32 4294901760, %v8265_v45  ;;  %v12677_v7 = vand.u32 4294901760, %v7799_v48  ;;  %v12680_v51 = vld [vmem:[#allocation14_spill] sm:$0xff] }
 0x1bc   : > { %1971 = vmatmul.f32.gmra.mxu0 %v8407_v10  ;;  %1824 = vmatpush.msra.mxu3 %v1823_v61 }
 0x1bd   : > { %2833 = vmatpush.msrb.mxu0 %v12674_v55  ;;  %v8469_v25 = vpop.f32.mrf.mxu1  ;;  %2528 = vmatpush.msra.mxu1 %v2527_v14  ;;  %v8483_v55 = vsub.f32 %v8465_v11, %v8465_v11 }
 0x1be   : > { %12675 = vst [vmem:[#allocation85_spill] sm:$0xff] %v8469_v25  ;;  %2214 = vmatpush.msrb.mxu3 %v7711_v33  ;;  %v12679_v33 = vand.u32 4294901760, %v8277_v20  ;;  %v12704_v25 = vld [vmem:[#allocation22_spill] sm:$0xff] }
 0x1bf   : > { %2837 = vmatpush.msrb.mxu0 %v12676_v49  ;;  %1265 = vmatmul.f32.gmra.mxu2 %v7850_v41  ;;  %v12283_v42 = vand.u32 4294901760, %v8483_v55 }
 0x1c0   : > { %1371 = vmatmul.f32.gmra.mxu3 %v12677_v7  ;;  %2086 = vmatmul.f32.gmra.mxu1 %v12284_v62  ;;  %v8479_v5 = vpop.f32.mrf.mxu0  ;;  %v8517_v7 = vsub.f32 %v8495_v35, %v8495_v35 }
 0x1c1   : > { %12678 = vst [vmem:[#allocation86_spill] sm:$0xff] %v8479_v5  ;;  %2216 = vmatpush.msrb.mxu3 %v7718_v40  ;;  %2534 = vmatpush.msra.mxu1 %v2533_v36  ;;  %v728_v40 = vld [vmem:[%s7304_s19 + $0x80] sm:$0xff]  ;;  %v12683_v36 = vld [vmem:[#allocation15_spill] sm:$0xff]  ;;  %v12705_v5 = vand.u32 4294901760, %v8381_v28 }
 0x1c2   : > { %2841 = vmatpush.msrb.mxu0 %v12679_v33  ;;  %v1002_v0 = vpop.f32.mrf.mxu2  ;;  %v1152_v14 = vpop.f32.mrf.mxu3  ;;  %v12686_v33 = vld [vmem:[#allocation16_spill] sm:$0xff] }
 0x1c3   : > { %2218 = vmatpush.msrb.mxu3 %v7730_v46  ;;  %2924 = vmatpush.msrb.mxu1 %v8156_v39  ;;  %v8490_v48 = vadd.f32 %v1152_v14, %v995_v31  ;;  %v12682_v46 = vand.u32 4294901760, %v8295_v63  ;;  %v8509_v31 = vunpack.c.l.bf16 %v728_v40  ;;  %v12687_v14 = vand.u32 4294901760, %v8316_v16  ;;  %v12688_v40 = vld [vmem:[#allocation17_spill] sm:$0xff] }
 0x1c4   : > { %1975 = vmatmul.f32.gmra.mxu0 %v8450_v15 }
 0x1c5   : > { %2220 = vmatpush.msrb.mxu3 %v12680_v51  ;;  %2926 = vmatpush.msrb.mxu1 %v8171_v37  ;;  %v8500_v61 = vpop.f32.mrf.mxu1 }
 0x1c6   : > { %12681 = vst [vmem:[#allocation14_spill] sm:$0xff] %v8500_v61  ;;  %2845 = vmatpush.msrb.mxu0 %v12682_v46 }
 0x1c7   : > { %2222 = vmatpush.msrb.mxu3 %v12683_v36  ;;  %2928 = vmatpush.msrb.mxu1 %v8186_v9  ;;  %v8529_v36 = vsub.f32 %v8509_v31, %v8509_v31 }
 0x1c8   : > { %1269 = vmatmul.f32.gmra.mxu2 %v7906_v58  ;;  %1376 = vmatmul.f32.gmra.mxu3 %v12684_v44  ;;  %v8513_v49 = vpop.f32.mrf.mxu0  ;;  %v729_v44 = vld [vmem:[%s7304_s19 + $0x88] sm:$0xff] }
 0x1c9   : > { %2091 = vmatmul.f32.gmra.mxu1 %v12283_v42  ;;  %12685 = vst [vmem:[#allocation15_spill] sm:$0xff] %v8513_v49  ;;  %2224 = vmatpush.msrb.mxu3 %v12686_v33  ;;  %v12690_v42 = vld [vmem:[#allocation18_spill] sm:$0xff]  ;;  %v12695_v33 = vand.u32 4294901760, %v7906_v58 }
 0x1ca   : > { %2930 = vmatpush.msrb.mxu1 %v8196_v60  ;;  %2849 = vmatpush.msrb.mxu0 %v12687_v14  ;;  %v1009_v41 = vpop.f32.mrf.mxu2  ;;  %v1155_v51 = vpop.f32.mrf.mxu3  ;;  %12689 = vst [vmem:[#allocation16_spill] sm:$0xff] %v8529_v36  ;;  %v12691_v14 = vand.u32 4294901760, %v8335_v19 }
 0x1cb   : > { %2226 = vmatpush.msrb.mxu3 %v12688_v40  ;;  %v8524_v46 = vadd.f32 %v1155_v51, %v1002_v0  ;;  %v8540_v0 = vunpack.c.l.bf16 %v729_v44  ;;  %v12693_v51 = vld [vmem:[#allocation19_spill] sm:$0xff]  ;;  %v12694_v40 = vand.u32 4294901760, %v8344_v52  ;;  %v12698_v44 = vld [vmem:[#allocation20_spill] sm:$0xff] }
 0x1cc   : > { %1979 = vmatmul.f32.gmra.mxu0 %v8483_v55  ;;  %2932 = vmatpush.msrb.mxu1 %v8222_v26 }
 0x1cd   : > { %2228 = vmatpush.msrb.mxu3 %v12690_v42  ;;  %2853 = vmatpush.msrb.mxu0 %v12691_v14  ;;  %v8537_v62 = vpop.f32.mrf.mxu1  ;;  %v12696_v14 = vand.u32 4294901760, %v8517_v7  ;;  %v8559_v58 = vsub.f32 %v8540_v0, %v8540_v0  ;;  %v12702_v42 = vld [vmem:[#allocation28_spill] sm:$0xff] }
 0x1ce   : > { %12692 = vst [vmem:[#allocation17_spill] sm:$0xff] %v8537_v62  ;;  %2934 = vmatpush.msrb.mxu1 %v8228_v43  ;;  %v1619_v49 = vand.u32 4294901760, %v12702_v42  ;;  %v12708_v42 = vand.u32 4294901760, %v8393_v38 }
 0x1cf   : > { %2230 = vmatpush.msrb.mxu3 %v12693_v51  ;;  %2857 = vmatpush.msrb.mxu0 %v12694_v40  ;;  %v12699_v51 = vand.u32 4294901760, %v8361_v34  ;;  %12700 = vst [vmem:[#allocation19_spill] sm:$0xff] %v8559_v58 }
 0x1d0   : > { %1273 = vmatmul.f32.gmra.mxu2 %v7950_v21  ;;  %1381 = vmatmul.f32.gmra.mxu3 %v12695_v33  ;;  %v8551_v62 = vpop.f32.mrf.mxu0  ;;  %v12701_v33 = vld [vmem:[#allocation21_spill] sm:$0xff] }
 0x1d1   : > { %2096 = vmatmul.f32.gmra.mxu1 %v12696_v14  ;;  %12697 = vst [vmem:[#allocation18_spill] sm:$0xff] %v8551_v62  ;;  %2232 = vmatpush.msrb.mxu3 %v12698_v44  ;;  %v12703_v44 = vand.u32 4294901760, %v8529_v36 }
 0x1d2   : > { %2936 = vmatpush.msrb.mxu1 %v8252_v17  ;;  %2861 = vmatpush.msrb.mxu0 %v12699_v51  ;;  %v1016_v40 = vpop.f32.mrf.mxu2  ;;  %v1158_v61 = vpop.f32.mrf.mxu3  ;;  %v730_v51 = vld [vmem:[%s7304_s19 + $0x90] sm:$0xff] }
 0x1d3   : > { %2234 = vmatpush.msrb.mxu3 %v12701_v33  ;;  %v8563_v14 = vadd.f32 %v1158_v61, %v1009_v41  ;;  %v2328_v62 = vsub.f32 %v8529_v36, %v12703_v44  ;;  %v12707_v41 = vld [vmem:[#allocation23_spill] sm:$0xff]  ;;  %v12709_v33 = vand.u32 4294901760, %v7950_v21  ;;  %v12713_v21 = vand.u32 4294901760, %v8559_v58  ;;  %v731_v36 = vld [vmem:[%s7304_s19 + $0x98] sm:$0xff] }
 0x1d4   : > { %1983 = vmatmul.f32.gmra.mxu0 %v8517_v7  ;;  %2938 = vmatpush.msrb.mxu1 %v8259_v47 }
 0x1d5   : > { %2236 = vmatpush.msrb.mxu3 %v12704_v25  ;;  %2865 = vmatpush.msrb.mxu0 %v12705_v5  ;;  %v8574_v1 = vpop.f32.mrf.mxu1  ;;  %v2329_v44 = vand.u32 4294901760, %v2328_v62  ;;  %v8583_v25 = vunpack.c.l.bf16 %v730_v51  ;;  %v2335_v62 = vsub.f32 %v8559_v58, %v12713_v21 }
 0x1d6   : > { %12706 = vst [vmem:[#allocation20_spill] sm:$0xff] %v8574_v1  ;;  %2940 = vmatpush.msrb.mxu1 %v8279_v22  ;;  %v12711_v1 = vld [vmem:[#allocation24_spill] sm:$0xff] }
 0x1d7   : > { %2238 = vmatpush.msrb.mxu3 %v12707_v41  ;;  %2869 = vmatpush.msrb.mxu0 %v12708_v42  ;;  %v12712_v41 = vand.u32 4294901760, %v8416_v12 }
 0x1d8   : > { %1386 = vmatmul.f32.gmra.mxu3 %v12709_v33  ;;  %1620 = vmatmul.f32.vlgmr.msra.gmra.mxu2 %v1619_v49  ;;  %v8586_v5 = vpop.f32.mrf.mxu0  ;;  %v12714_v49 = vld [vmem:[#allocation26_spill] sm:$0xff] }
 0x1d9   : > { %2535 = vmatmul.f32.vlgmr.msra.gmra.mxu1 %v8509_v31  ;;  %12710 = vst [vmem:[#allocation21_spill] sm:$0xff] %v8586_v5  ;;  %2240 = vmatpush.msrb.mxu3 %v12711_v1  ;;  %v1626_v1 = vand.u32 4294901760, %v7957_v54  ;;  %v12716_v5 = vld [vmem:[#allocation27_spill] sm:$0xff]  ;;  %v12718_v54 = vld [vmem:[#allocation25_spill] sm:$0xff] }
 0x1da   : > { %2942 = vmatpush.msrb.mxu1 %v8303_v27  ;;  %2873 = vmatpush.msrb.mxu0 %v12712_v41  ;;  %v1161_v42 = vpop.f32.mrf.mxu3  ;;  %v1214_v61 = vpop.f32.mrf.mxu2  ;;  %v8603_v41 = vsub.f32 %v8583_v25, %v8583_v25 }
 0x1db   : > { %2242 = vmatpush.msrb.mxu3 %v12714_v49  ;;  %2586 = vmatpush.msra.mxu2 %v8169_v3  ;;  %v8597_v51 = vadd.f32 %v1161_v42, %v1016_v40  ;;  %v1215_v33 = vadd.f32 %v1214_v61, %v8050_v50  ;;  %v8612_v3 = vunpack.c.l.bf16 %v731_v36  ;;  %v2336_v50 = vand.u32 4294901760, %v2335_v62  ;;  %v12721_v42 = vld [vmem:[#allocation31_spill] sm:$0xff] }
 0x1dc   : > { %2330 = vmatmul.f32.vlgmr.msra.gmra.mxu0 %v2329_v44  ;;  %12715 = vst [vmem:[#allocation28_spill] sm:$0xff] %v8603_v41  ;;  %2944 = vmatpush.msrb.mxu1 %v8318_v6  ;;  %v12291_v40 = vand.u32 4294901760, %v8603_v41  ;;  %v1633_v62 = vand.u32 4294901760, %v12721_v42 }
 0x1dd   : > { %2244 = vmatpush.msrb.mxu3 %v12716_v5  ;;  %2589 = vmatpush.msra.mxu2 %v8183_v57  ;;  %v8609_v21 = vpop.f32.mrf.mxu1 }
 0x1de   : > { %12717 = vst [vmem:[#allocation22_spill] sm:$0xff] %v8609_v21  ;;  %2946 = vmatpush.msrb.mxu1 %v8327_v23 }
 0x1df   : > { %2592 = vmatpush.msra.mxu2 %v8203_v24  ;;  %v8625_v24 = vsub.f32 %v8612_v3, %v8612_v3 }
 0x1e0   : > { %1627 = vmatmul.f32.gmra.mxu2 %v1626_v1  ;;  %1825 = vmatmul.f32.vlgmr.msra.gmra.mxu3 %v12718_v54  ;;  %v8618_v61 = vpop.f32.mrf.mxu0 }
 0x1e1   : > { %2538 = vmatmul.f32.gmra.mxu1 %v8540_v0  ;;  %12719 = vst [vmem:[#allocation23_spill] sm:$0xff] %v8618_v61  ;;  %2698 = vmatpush.msra.mxu3 %v8156_v39  ;;  %v2342_v39 = vsub.f32 %v8603_v41, %v12291_v40  ;;  %v12751_v40 = vld [vmem:[#allocation65_spill] sm:$0xff] }
 0x1e2   : > { %2948 = vmatpush.msrb.mxu1 %v8346_v18  ;;  %2595 = vmatpush.msra.mxu2 %v8215_v53  ;;  %v1218_v57 = vpop.f32.mrf.mxu2  ;;  %v1312_v36 = vpop.f32.mrf.mxu3  ;;  %12720 = vst [vmem:[#allocation24_spill] sm:$0xff] %v8625_v24  ;;  %v732_v53 = vld [vmem:[%s7304_s19 + $0xa0] sm:$0xff] }
 0x1e3   : > { %2700 = vmatpush.msra.mxu3 %v8171_v37  ;;  %v1219_v44 = vadd.f32 %v1218_v57, %v8077_v13  ;;  %v8629_v5 = vadd.f32 %v1312_v36, %v1215_v33  ;;  %v12290_v13 = vand.u32 4294901760, %v8625_v24  ;;  %v12723_v37 = vld [vmem:[#allocation29_spill] sm:$0xff]  ;;  %v2343_v33 = vand.u32 4294901760, %v2342_v39  ;;  %v12726_v57 = vld [vmem:[#allocation50_spill] sm:$0xff] }
 0x1e4   : > { %2337 = vmatmul.f32.gmra.mxu0 %v2336_v50  ;;  %2950 = vmatpush.msrb.mxu1 %v8363_v59  ;;  %v8646_v1 = vunpack.c.l.bf16 %v732_v53 }
 0x1e5   : > { %2702 = vmatpush.msra.mxu3 %v8186_v9  ;;  %2598 = vmatpush.msra.mxu2 %v8235_v56  ;;  %v8639_v49 = vpop.f32.mrf.mxu1  ;;  %v12725_v9 = vld [vmem:[#allocation81_spill] sm:$0xff] }
 0x1e6   : > { %12722 = vst [vmem:[#allocation26_spill] sm:$0xff] %v8639_v49  ;;  %2952 = vmatpush.msrb.mxu1 %v8383_v32 }
 0x1e7   : > { %2704 = vmatpush.msra.mxu3 %v8196_v60  ;;  %2601 = vmatpush.msra.mxu2 %v8246_v30  ;;  %v2349_v30 = vsub.f32 %v8625_v24, %v12290_v13 }
 0x1e8   : > { %1634 = vmatmul.f32.gmra.mxu2 %v1633_v62  ;;  %1828 = vmatmul.f32.gmra.mxu3 %v12723_v37  ;;  %v8649_v56 = vpop.f32.mrf.mxu0  ;;  %v12727_v62 = vld [vmem:[#allocation33_spill] sm:$0xff] }
 0x1e9   : > { %2541 = vmatmul.f32.gmra.mxu1 %v8583_v25  ;;  %12724 = vst [vmem:[#allocation27_spill] sm:$0xff] %v8649_v56  ;;  %2706 = vmatpush.msra.mxu3 %v8222_v26  ;;  %v1640_v39 = vand.u32 4294901760, %v12727_v62  ;;  %v8664_v26 = vsub.f32 %v8646_v1, %v8646_v1  ;;  %v12734_v62 = vld [vmem:[#allocation37_spill] sm:$0xff] }
 0x1ea   : > { %2954 = vmatpush.msrb.mxu1 %v12725_v9  ;;  %2604 = vmatpush.msra.mxu2 %v8265_v45  ;;  %v1222_v60 = vpop.f32.mrf.mxu2  ;;  %v1317_v50 = vpop.f32.mrf.mxu3  ;;  %v733_v45 = vld [vmem:[%s7304_s19 + $0xa8] sm:$0xff] }
 0x1eb   : > { %2708 = vmatpush.msra.mxu3 %v8228_v43  ;;  %v1223_v36 = vadd.f32 %v1222_v60, %v12726_v57  ;;  %v8659_v42 = vadd.f32 %v1317_v50, %v1219_v44  ;;  %12728 = vst [vmem:[#allocation25_spill] sm:$0xff] %v8664_v26  ;;  %v8672_v43 = vunpack.c.l.bf16 %v733_v45  ;;  %v12730_v44 = vld [vmem:[#allocation30_spill] sm:$0xff]  ;;  %v12288_v60 = vand.u32 4294901760, %v8664_v26  ;;  %v12733_v50 = vld [vmem:[#allocation53_spill] sm:$0xff] }
 0x1ec   : > { %2344 = vmatmul.f32.gmra.mxu0 %v2343_v33  ;;  %2607 = vmatpush.msra.mxu2 %v8277_v20  ;;  %v2350_v33 = vand.u32 4294901760, %v2349_v30 }
 0x1ed   : > { %2710 = vmatpush.msra.mxu3 %v8252_v17  ;;  %v8669_v53 = vpop.f32.mrf.mxu1 }
 0x1ee   : > { %12729 = vst [vmem:[#allocation31_spill] sm:$0xff] %v8669_v53  ;;  %2610 = vmatpush.msra.mxu2 %v8295_v63 }
 0x1ef   : > { %2712 = vmatpush.msra.mxu3 %v8259_v47  ;;  %v8684_v47 = vsub.f32 %v8672_v43, %v8672_v43 }
 0x1f0   : > { %1641 = vmatmul.f32.gmra.mxu2 %v1640_v39  ;;  %1831 = vmatmul.f32.gmra.mxu3 %v12730_v44  ;;  %v8678_v20 = vpop.f32.mrf.mxu0  ;;  %v1647_v39 = vand.u32 4294901760, %v12734_v62 }
 0x1f1   : > { %2544 = vmatmul.f32.gmra.mxu1 %v8612_v3  ;;  %12731 = vst [vmem:[#allocation29_spill] sm:$0xff] %v8678_v20  ;;  %2714 = vmatpush.msra.mxu3 %v8279_v22  ;;  %v2356_v22 = vsub.f32 %v8664_v26, %v12288_v60  ;;  %v12772_v20 = vld [vmem:[#allocation78_spill] sm:$0xff] }
 0x1f2   : > { %2613 = vmatpush.msra.mxu2 %v8316_v16  ;;  %v1226_v17 = vpop.f32.mrf.mxu2  ;;  %v1322_v63 = vpop.f32.mrf.mxu3  ;;  %12732 = vst [vmem:[#allocation81_spill] sm:$0xff] %v8684_v47  ;;  %v734_v16 = vld [vmem:[%s7304_s19 + $0xb0] sm:$0xff] }
 0x1f3   : > { %2716 = vmatpush.msra.mxu3 %v8303_v27  ;;  %v1227_v30 = vadd.f32 %v1226_v17, %v12733_v50  ;;  %v8688_v57 = vadd.f32 %v1322_v63, %v1223_v36  ;;  %v12287_v27 = vand.u32 4294901760, %v8684_v47  ;;  %v12736_v36 = vld [vmem:[#allocation32_spill] sm:$0xff]  ;;  %v8703_v17 = vunpack.c.l.bf16 %v734_v16 }
 0x1f4   : > { %2351 = vmatmul.f32.gmra.mxu0 %v2350_v33  ;;  %2616 = vmatpush.msra.mxu2 %v8335_v19  ;;  %v2357_v33 = vand.u32 4294901760, %v2356_v22  ;;  %v12738_v63 = vld [vmem:[#allocation56_spill] sm:$0xff] }
 0x1f5   : > { %2718 = vmatpush.msra.mxu3 %v8318_v6  ;;  %v8697_v45 = vpop.f32.mrf.mxu1 }
 0x1f6   : > { %12735 = vst [vmem:[#allocation50_spill] sm:$0xff] %v8697_v45  ;;  %2619 = vmatpush.msra.mxu2 %v8344_v52 }
 0x1f7   : > { %2720 = vmatpush.msra.mxu3 %v8327_v23  ;;  %v2363_v23 = vsub.f32 %v8684_v47, %v12287_v27  ;;  %v736_v27 = vld [vmem:[%s7304_s19 + $0xc0] sm:$0xff] }
 0x1f8   : > { %1648 = vmatmul.f32.gmra.mxu2 %v1647_v39  ;;  %1834 = vmatmul.f32.gmra.mxu3 %v12736_v36  ;;  %v8706_v19 = vpop.f32.mrf.mxu0  ;;  %v12739_v39 = vld [vmem:[#allocation41_spill] sm:$0xff] }
 0x1f9   : > { %2547 = vmatmul.f32.gmra.mxu1 %v8646_v1  ;;  %12737 = vst [vmem:[#allocation33_spill] sm:$0xff] %v8706_v19  ;;  %2622 = vmatpush.msra.mxu2 %v8361_v34  ;;  %v1654_v22 = vand.u32 4294901760, %v12739_v39  ;;  %v8720_v34 = vsub.f32 %v8703_v17, %v8703_v17  ;;  %v12765_v19 = vld [vmem:[#allocation75_spill] sm:$0xff] }
 0x1fa   : > { %2722 = vmatpush.msra.mxu3 %v8346_v18  ;;  %v1230_v6 = vpop.f32.mrf.mxu2  ;;  %v1327_v52 = vpop.f32.mrf.mxu3  ;;  %v735_v18 = vld [vmem:[%s7304_s19 + $0xb8] sm:$0xff] }
 0x1fb   : > { %2625 = vmatpush.msra.mxu2 %v8381_v28  ;;  %v1231_v50 = vadd.f32 %v1230_v6, %v12738_v63  ;;  %v8715_v62 = vadd.f32 %v1327_v52, %v1227_v30  ;;  %12740 = vst [vmem:[#allocation30_spill] sm:$0xff] %v8720_v34  ;;  %v12742_v28 = vld [vmem:[#allocation34_spill] sm:$0xff]  ;;  %v2364_v30 = vand.u32 4294901760, %v2363_v23  ;;  %v8731_v6 = vunpack.c.l.bf16 %v735_v18 }
 0x1fc   : > { %2358 = vmatmul.f32.gmra.mxu0 %v2357_v33  ;;  %2724 = vmatpush.msra.mxu3 %v8363_v59  ;;  %v12289_v33 = vand.u32 4294901760, %v8720_v34 }
 0x1fd   : > { %2628 = vmatpush.msra.mxu2 %v8393_v38  ;;  %v8725_v16 = vpop.f32.mrf.mxu1  ;;  %v8746_v18 = vsub.f32 %v8731_v6, %v8731_v6 }
 0x1fe   : > { %12741 = vst [vmem:[#allocation53_spill] sm:$0xff] %v8725_v16  ;;  %2726 = vmatpush.msra.mxu3 %v8383_v32  ;;  %v12744_v32 = vld [vmem:[#allocation45_spill] sm:$0xff]  ;;  %v2370_v23 = vsub.f32 %v8720_v34, %v12289_v33 }
 0x1ff   : > { %2631 = vmatpush.msra.mxu2 %v8416_v12  ;;  %v1661_v63 = vand.u32 4294901760, %v12744_v32  ;;  %v12745_v12 = vld [vmem:[#allocation59_spill] sm:$0xff]  ;;  %12746 = vst [vmem:[#allocation32_spill] sm:$0xff] %v8746_v18  ;;  %v12750_v33 = vld [vmem:[#allocation49_spill] sm:$0xff] }
 0x200   : > { %1655 = vmatmul.f32.gmra.mxu2 %v1654_v22  ;;  %1837 = vmatmul.f32.gmra.mxu3 %v12742_v28  ;;  %v8734_v59 = vpop.f32.mrf.mxu0  ;;  %v2371_v32 = vand.u32 4294901760, %v2370_v23  ;;  %v1668_v13 = vand.u32 4294901760, %v12750_v33  ;;  %v737_v23 = vld [vmem:[%s7304_s19 + $0xc8] sm:$0xff] }
 0x201   : > { %2550 = vmatmul.f32.gmra.mxu1 %v8672_v43  ;;  %12743 = vst [vmem:[#allocation37_spill] sm:$0xff] %v8734_v59  ;;  %2728 = vmatpush.msra.mxu3 %v12725_v9  ;;  %v12748_v9 = vld [vmem:[#allocation38_spill] sm:$0xff]  ;;  %v12758_v59 = vld [vmem:[#allocation69_spill] sm:$0xff] }
 0x202   : > { %v1234_v38 = vpop.f32.mrf.mxu2  ;;  %v1332_v52 = vpop.f32.mrf.mxu3 }
 0x203   : > { %v1235_v39 = vadd.f32 %v1234_v38, %v12745_v12  ;;  %v8739_v22 = vadd.f32 %v1332_v52, %v1231_v50  ;;  %v12296_v50 = vand.u32 4294901760, %v8746_v18  ;;  %v8753_v38 = vunpack.c.l.bf16 %v736_v27 }
 0x204   : > { %2365 = vmatmul.f32.gmra.mxu0 %v2364_v30 }
 0x205   : > { %v8749_v60 = vpop.f32.mrf.mxu1  ;;  %v8767_v27 = vsub.f32 %v8753_v38, %v8753_v38 }
 0x206   : > { %12747 = vst [vmem:[#allocation56_spill] sm:$0xff] %v8749_v60 }
 0x207   : > { %12752 = vst [vmem:[#allocation34_spill] sm:$0xff] %v8767_v27 }
 0x208   : > { %1662 = vmatmul.f32.gmra.mxu2 %v1661_v63  ;;  %1840 = vmatmul.f32.gmra.mxu3 %v12748_v9  ;;  %v8756_v30 = vpop.f32.mrf.mxu0  ;;  %v2377_v63 = vsub.f32 %v8746_v18, %v12296_v50 }
 0x209   : > { %2553 = vmatmul.f32.gmra.mxu1 %v8703_v17  ;;  %12749 = vst [vmem:[#allocation41_spill] sm:$0xff] %v8756_v30  ;;  %v12754_v30 = vld [vmem:[#allocation63_spill] sm:$0xff] }
 0x20a   : > { %v1238_v52 = vpop.f32.mrf.mxu2  ;;  %v1337_v12 = vpop.f32.mrf.mxu3  ;;  %v12755_v47 = vand.u32 4294901760, %v12754_v30 }
 0x20b   : > { %v1239_v34 = vadd.f32 %v1238_v52, %v12751_v40  ;;  %v8760_v60 = vadd.f32 %v1337_v12, %v1235_v39  ;;  %v12756_v40 = vld [vmem:[#allocation42_spill] sm:$0xff]  ;;  %v2378_v39 = vand.u32 4294901760, %v2377_v63  ;;  %v8777_v52 = vunpack.c.l.bf16 %v737_v23  ;;  %v12761_v23 = vld [vmem:[#allocation67_spill] sm:$0xff] }
 0x20c   : > { %2372 = vmatmul.f32.gmra.mxu0 %v2371_v32  ;;  %v1674_v33 = vsub.f32 %v12754_v30, %v12755_v47  ;;  %v12301_v32 = vand.u32 4294901760, %v8767_v27  ;;  %v738_v30 = vld [vmem:[%s7304_s19 + $0xd0] sm:$0xff] }
 0x20d   : > { %v8770_v16 = vpop.f32.mrf.mxu1  ;;  %v8790_v47 = vsub.f32 %v8777_v52, %v8777_v52 }
 0x20e   : > { %12753 = vst [vmem:[#allocation45_spill] sm:$0xff] %v8770_v16  ;;  %v1675_v16 = vand.u32 4294901760, %v1674_v33 }
 0x20f   : > { %12759 = vst [vmem:[#allocation38_spill] sm:$0xff] %v8790_v47 }
 0x210   : > { %1669 = vmatmul.f32.gmra.mxu2 %v1668_v13  ;;  %1843 = vmatmul.f32.gmra.mxu3 %v12756_v40  ;;  %v8780_v12 = vpop.f32.mrf.mxu0  ;;  %v2384_v13 = vsub.f32 %v8767_v27, %v12301_v32 }
 0x211   : > { %2556 = vmatmul.f32.gmra.mxu1 %v8731_v6  ;;  %12757 = vst [vmem:[#allocation59_spill] sm:$0xff] %v8780_v12  ;;  %v12762_v12 = vand.u32 4294901760, %v12761_v23 }
 0x212   : > { %v1242_v50 = vpop.f32.mrf.mxu2  ;;  %v1342_v18 = vpop.f32.mrf.mxu3 }
 0x213   : > { %v1243_v45 = vadd.f32 %v1242_v50, %v12758_v59  ;;  %v8783_v26 = vadd.f32 %v1342_v18, %v1239_v34  ;;  %v1681_v33 = vsub.f32 %v12761_v23, %v12762_v12  ;;  %v12763_v34 = vld [vmem:[#allocation46_spill] sm:$0xff]  ;;  %v2385_v59 = vand.u32 4294901760, %v2384_v13  ;;  %v739_v13 = vld [vmem:[%s7304_s19 + $0xd8] sm:$0xff] }
 0x214   : > { %2379 = vmatmul.f32.gmra.mxu0 %v2378_v39  ;;  %v12306_v18 = vand.u32 4294901760, %v8790_v47  ;;  %v8800_v50 = vunpack.c.l.bf16 %v738_v30  ;;  %v12768_v23 = vld [vmem:[#allocation73_spill] sm:$0xff] }
 0x215   : > { %v8793_v63 = vpop.f32.mrf.mxu1 }
 0x216   : > { %12760 = vst [vmem:[#allocation49_spill] sm:$0xff] %v8793_v63  ;;  %v1682_v63 = vand.u32 4294901760, %v1681_v33  ;;  %v8813_v12 = vsub.f32 %v8800_v50, %v8800_v50 }
 0x218   : > { %1676 = vmatmul.f32.gmra.mxu2 %v1675_v16  ;;  %1846 = vmatmul.f32.gmra.mxu3 %v12763_v34  ;;  %v8803_v39 = vpop.f32.mrf.mxu0  ;;  %v2391_v16 = vsub.f32 %v8790_v47, %v12306_v18  ;;  %12766 = vst [vmem:[#allocation63_spill] sm:$0xff] %v8813_v12 }
 0x219   : > { %2559 = vmatmul.f32.gmra.mxu1 %v8753_v38  ;;  %12764 = vst [vmem:[#allocation65_spill] sm:$0xff] %v8803_v39  ;;  %v12769_v39 = vand.u32 4294901760, %v12768_v23 }
 0x21a   : > { %v1246_v32 = vpop.f32.mrf.mxu2  ;;  %v1347_v27 = vpop.f32.mrf.mxu3 }
 0x21b   : > { %v1247_v53 = vadd.f32 %v1246_v32, %v12765_v19  ;;  %v8806_v24 = vadd.f32 %v1347_v27, %v1243_v45  ;;  %v1688_v33 = vsub.f32 %v12768_v23, %v12769_v39  ;;  %v12770_v45 = vld [vmem:[#allocation60_spill] sm:$0xff]  ;;  %v2392_v19 = vand.u32 4294901760, %v2391_v16  ;;  %v740_v16 = vld [vmem:[%s7304_s19 + $0xe0] sm:$0xff] }
 0x21c   : > { %2386 = vmatmul.f32.gmra.mxu0 %v2385_v59  ;;  %v12311_v27 = vand.u32 4294901760, %v8813_v12  ;;  %v8823_v32 = vunpack.c.l.bf16 %v739_v13  ;;  %v12775_v23 = vand.u32 4294901760, %v8331_v4 }
 0x21d   : > { %v8816_v30 = vpop.f32.mrf.mxu1 }
 0x21e   : > { %12767 = vst [vmem:[#allocation42_spill] sm:$0xff] %v8816_v30  ;;  %v1689_v30 = vand.u32 4294901760, %v1688_v33  ;;  %v8836_v39 = vsub.f32 %v8823_v32, %v8823_v32  ;;  %v1695_v33 = vsub.f32 %v8331_v4, %v12775_v23  ;;  %v12780_v23 = vand.u32 4294901760, %v8407_v10 }
 0x220   : > { %1683 = vmatmul.f32.gmra.mxu2 %v1682_v63  ;;  %1849 = vmatmul.f32.gmra.mxu3 %v12770_v45  ;;  %v8826_v59 = vpop.f32.mrf.mxu0  ;;  %v2398_v63 = vsub.f32 %v8813_v12, %v12311_v27  ;;  %12773 = vst [vmem:[#allocation67_spill] sm:$0xff] %v8836_v39 }
 0x221   : > { %2562 = vmatmul.f32.gmra.mxu1 %v8777_v52  ;;  %12771 = vst [vmem:[#allocation69_spill] sm:$0xff] %v8826_v59 }
 0x222   : > { %v1250_v18 = vpop.f32.mrf.mxu2  ;;  %v1352_v47 = vpop.f32.mrf.mxu3 }
 0x223   : > { %v1251_v49 = vadd.f32 %v1250_v18, %v12772_v20  ;;  %v8829_v41 = vadd.f32 %v1352_v47, %v1247_v53  ;;  %v12776_v53 = vld [vmem:[#allocation64_spill] sm:$0xff]  ;;  %v2399_v20 = vand.u32 4294901760, %v2398_v63  ;;  %v12314_v47 = vand.u32 4294901760, %v8836_v39  ;;  %v741_v63 = vld [vmem:[%s7304_s19 + $0xe8] sm:$0xff] }
 0x224   : > { %2393 = vmatmul.f32.gmra.mxu0 %v2392_v19  ;;  %v8846_v18 = vunpack.c.l.bf16 %v740_v16 }
 0x225   : > { %v8839_v13 = vpop.f32.mrf.mxu1  ;;  %v2405_v4 = vsub.f32 %v8836_v39, %v12314_v47 }
 0x226   : > { %12774 = vst [vmem:[#allocation46_spill] sm:$0xff] %v8839_v13  ;;  %v1696_v13 = vand.u32 4294901760, %v1695_v33  ;;  %v1702_v33 = vsub.f32 %v8407_v10, %v12780_v23  ;;  %v12785_v23 = vand.u32 4294901760, %v8450_v15 }
 0x228   : > { %1690 = vmatmul.f32.gmra.mxu2 %v1689_v30  ;;  %1852 = vmatmul.f32.gmra.mxu3 %v12776_v53  ;;  %v8849_v19 = vpop.f32.mrf.mxu0  ;;  %v8859_v30 = vsub.f32 %v8846_v18, %v8846_v18 }
 0x229   : > { %2565 = vmatmul.f32.gmra.mxu1 %v8800_v50  ;;  %12777 = vst [vmem:[#allocation75_spill] sm:$0xff] %v8849_v19 }
 0x22a   : > { %v1254_v27 = vpop.f32.mrf.mxu2  ;;  %v1357_v12 = vpop.f32.mrf.mxu3  ;;  %12778 = vst [vmem:[#allocation73_spill] sm:$0xff] %v8859_v30 }
 0x22b   : > { %v1255_v59 = vadd.f32 %v1254_v27, %v8420_v2  ;;  %v8852_v56 = vadd.f32 %v1357_v12, %v1251_v49  ;;  %v12781_v2 = vld [vmem:[#allocation70_spill] sm:$0xff]  ;;  %v2406_v49 = vand.u32 4294901760, %v2405_v4  ;;  %v12317_v12 = vand.u32 4294901760, %v8859_v30  ;;  %v742_v4 = vld [vmem:[%s7304_s19 + $0xf0] sm:$0xff] }
 0x22c   : > { %2400 = vmatmul.f32.gmra.mxu0 %v2399_v20  ;;  %v8869_v27 = vunpack.c.l.bf16 %v741_v63 }
 0x22d   : > { %v8862_v16 = vpop.f32.mrf.mxu1  ;;  %v2412_v10 = vsub.f32 %v8859_v30, %v12317_v12 }
 0x22e   : > { %12779 = vst [vmem:[#allocation60_spill] sm:$0xff] %v8862_v16  ;;  %v1703_v16 = vand.u32 4294901760, %v1702_v33  ;;  %v1709_v33 = vsub.f32 %v8450_v15, %v12785_v23  ;;  %v12790_v23 = vand.u32 4294901760, %v8483_v55 }
 0x230   : > { %1697 = vmatmul.f32.gmra.mxu2 %v1696_v13  ;;  %1855 = vmatmul.f32.gmra.mxu3 %v12781_v2  ;;  %v8882_v13 = vsub.f32 %v8869_v27, %v8869_v27 }
 0x231   : > { %2568 = vmatmul.f32.gmra.mxu1 %v8823_v32  ;;  %v8872_v20 = vpop.f32.mrf.mxu0 }
 0x232   : > { %12782 = vst [vmem:[#allocation78_spill] sm:$0xff] %v8872_v20  ;;  %v1258_v47 = vpop.f32.mrf.mxu2  ;;  %v1362_v39 = vpop.f32.mrf.mxu3 }
 0x233   : > { %v1259_v19 = vadd.f32 %v1258_v47, %v8460_v29  ;;  %v8875_v21 = vadd.f32 %v1362_v39, %v1255_v59  ;;  %12783 = vst [vmem:[#allocation64_spill] sm:$0xff] %v8882_v13  ;;  %v12786_v29 = vld [vmem:[#allocation74_spill] sm:$0xff]  ;;  %v2413_v59 = vand.u32 4294901760, %v2412_v10  ;;  %v12322_v39 = vand.u32 4294901760, %v8882_v13  ;;  %v743_v10 = vld [vmem:[%s7304_s19 + $0xf8] sm:$0xff] }
 0x234   : > { %2407 = vmatmul.f32.gmra.mxu0 %v2406_v49  ;;  %v8892_v47 = vunpack.c.l.bf16 %v742_v4 }
 0x235   : > { %v8885_v63 = vpop.f32.mrf.mxu1  ;;  %v2419_v15 = vsub.f32 %v8882_v13, %v12322_v39 }
 0x236   : > { %12784 = vst [vmem:[#allocation70_spill] sm:$0xff] %v8885_v63  ;;  %v1710_v63 = vand.u32 4294901760, %v1709_v33  ;;  %v1716_v33 = vsub.f32 %v8483_v55, %v12790_v23  ;;  %v12794_v23 = vand.u32 4294901760, %v8517_v7 }
 0x238   : > { %1704 = vmatmul.f32.gmra.mxu2 %v1703_v16  ;;  %1858 = vmatmul.f32.gmra.mxu3 %v12786_v29  ;;  %v8905_v16 = vsub.f32 %v8892_v47, %v8892_v47 }
 0x239   : > { %2571 = vmatmul.f32.gmra.mxu1 %v8846_v18  ;;  %v8895_v49 = vpop.f32.mrf.mxu0 }
 0x23a   : > { %12787 = vst [vmem:[#allocation74_spill] sm:$0xff] %v8895_v49  ;;  %v1262_v12 = vpop.f32.mrf.mxu2  ;;  %v1717_v49 = vand.u32 4294901760, %v1716_v33 }
 0x23b   : > { %v1367_v30 = vpop.f32.mrf.mxu3  ;;  %v1263_v20 = vadd.f32 %v1262_v12, %v8490_v48  ;;  %12788 = vst [vmem:[#allocation87_spill] sm:$0xff] %v8905_v16  ;;  %v12791_v48 = vld [vmem:[#allocation79_spill] sm:$0xff]  ;;  %v8915_v12 = vunpack.c.l.bf16 %v743_v10 }
 0x23c   : > { %v8898_v58 = vadd.f32 %v1367_v30, %v1259_v19  ;;  %2414 = vmatmul.f32.gmra.mxu0 %v2413_v59  ;;  %v2420_v19 = vand.u32 4294901760, %v2419_v15  ;;  %v12325_v30 = vand.u32 4294901760, %v8905_v16 }
 0x23d   : > { %v8908_v4 = vpop.f32.mrf.mxu1 }
 0x23e   : > { %12789 = vst [vmem:[#allocation88_spill] sm:$0xff] %v8908_v4  ;;  %v2426_v55 = vsub.f32 %v8905_v16, %v12325_v30 }
 0x240   : > { %1711 = vmatmul.f32.gmra.mxu2 %v1710_v63  ;;  %1861 = vmatmul.f32.gmra.mxu3 %v12791_v48  ;;  %v8928_v63 = vsub.f32 %v8915_v12, %v8915_v12  ;;  %v2427_v10 = vand.u32 4294901760, %v2426_v55 }
 0x241   : > { %2574 = vmatmul.f32.gmra.mxu1 %v8869_v27  ;;  %v8918_v59 = vpop.f32.mrf.mxu0 }
 0x242   : > { %v1266_v39 = vpop.f32.mrf.mxu2  ;;  %12792 = vst [vmem:[#allocation79_spill] sm:$0xff] %v8928_v63 }
 0x243   : > { %v1372_v13 = vpop.f32.mrf.mxu3  ;;  %v1267_v4 = vadd.f32 %v1266_v39, %v8524_v46  ;;  %v1723_v46 = vsub.f32 %v8517_v7, %v12794_v23 }
 0x244   : > { %v8921_v61 = vadd.f32 %v1372_v13, %v1263_v20  ;;  %2421 = vmatmul.f32.gmra.mxu0 %v2420_v19  ;;  %v12328_v20 = vand.u32 4294901760, %v8928_v63 }
 0x246   : > { %v8930_v15 = vpop.f32.mrf.mxu1  ;;  %v2433_v55 = vsub.f32 %v8928_v63, %v12328_v20 }
 0x247   : > { %12793 = vst [vmem:[#allocation89_spill] sm:$0xff] %v8930_v15 }
 0x248   : > { %1718 = vmatmul.f32.gmra.mxu2 %v1717_v49  ;;  %1864 = vmatmul.f32.gmra.mxu3 %v8428_v8  ;;  %v1724_v49 = vand.u32 4294901760, %v1723_v46  ;;  %v2434_v7 = vand.u32 4294901760, %v2433_v55  ;;  %v12796_v46 = vld [vmem:[#allocation36_spill] sm:$0xff]  ;;  %v12799_v55 = vld [vmem:[#allocation35_spill] sm:$0xff] }
 0x249   : > { %2577 = vmatmul.f32.gmra.mxu1 %v8892_v47  ;;  %v8938_v13 = vpop.f32.mrf.mxu0 }
 0x24b   : > { %v1270_v39 = vpop.f32.mrf.mxu2  ;;  %v1377_v33 = vpop.f32.mrf.mxu3 }
 0x24c   : > { %v1271_v19 = vadd.f32 %v1270_v39, %v8563_v14  ;;  %v8941_v30 = vadd.f32 %v1377_v33, %v1267_v4  ;;  %2428 = vmatmul.f32.gmra.mxu0 %v2427_v10  ;;  %v1456_v39 = vadd.f32 %v12796_v46, %v8629_v5  ;;  %v12800_v5 = vld [vmem:[#allocation40_spill] sm:$0xff] }
 0x24e   : > { %v8946_v15 = vpop.f32.mrf.mxu1  ;;  %v1537_v20 = vadd.f32 %v12799_v55, %v1456_v39  ;;  %v12803_v39 = vld [vmem:[#allocation39_spill] sm:$0xff] }
 0x24f   : > { %12795 = vst [vmem:[#allocation90_spill] sm:$0xff] %v8946_v15 }
 0x250   : > { %1725 = vmatmul.f32.gmra.mxu2 %v1724_v49  ;;  %1867 = vmatmul.f32.gmra.mxu3 %v8465_v11 }
 0x251   : > { %2580 = vmatmul.f32.gmra.mxu1 %v8915_v12  ;;  %v8950_v23 = vpop.f32.mrf.mxu0 }
 0x253   : > { %v1274_v16 = vpop.f32.mrf.mxu2  ;;  %v1382_v14 = vpop.f32.mrf.mxu3 }
 0x254   : > { %v1275_v4 = vadd.f32 %v1274_v16, %v8597_v51  ;;  %v8953_v10 = vadd.f32 %v1382_v14, %v1271_v19  ;;  %2435 = vmatmul.f32.gmra.mxu0 %v2434_v7  ;;  %v1459_v7 = vadd.f32 %v12800_v5, %v8659_v42 }
 0x256   : > { %v8957_v33 = vpop.f32.mrf.mxu1  ;;  %v1540_v55 = vadd.f32 %v12803_v39, %v1459_v7  ;;  %v12807_v7 = vld [vmem:[#allocation43_spill] sm:$0xff] }
 0x257   : > { %12797 = vst [vmem:[#allocation36_spill] sm:$0xff] %v8957_v33 }
 0x258   : > { %1870 = vmatmul.f32.gmra.mxu3 %v8495_v35  ;;  %2164 = vmatmul.f32.vlgmr.msrb.gmra.mxu2 %v12718_v54 }
 0x259   : > { %2955 = vmatmul.f32.vlgmr.msrb.gmra.mxu1 %v8509_v31  ;;  %v8962_v49 = vpop.f32.mrf.mxu0 }
 0x25a   : > { %12798 = vst [vmem:[#allocation91_spill] sm:$0xff] %v8962_v49  ;;  %v859_v49 = vld [vmem:[%s7381_s29 + $0x188] sm:$0xff] }
 0x25b   : > { %v1387_v15 = vpop.f32.mrf.mxu3  ;;  %v1621_v51 = vpop.f32.mrf.mxu2 }
 0x25c   : > { %v8965_v16 = vadd.f32 %v1387_v15, %v1275_v4  ;;  %v1622_v19 = vadd.f32 %v1621_v51, %v1537_v20  ;;  %2874 = vmatmul.f32.vlgmr.msrb.gmra.mxu0 %v8509_v31  ;;  %v12804_v31 = vld [vmem:[#allocation44_spill] sm:$0xff] }
 0x25d   : > { %v1462_v42 = vadd.f32 %v12804_v31, %v8688_v57 }
 0x25e   : > { %v8970_v14 = vpop.f32.mrf.mxu1 }
 0x25f   : > { %12801 = vst [vmem:[#allocation35_spill] sm:$0xff] %v8970_v14  ;;  %v1543_v39 = vadd.f32 %v12807_v7, %v1462_v42  ;;  %v12811_v42 = vld [vmem:[#allocation47_spill] sm:$0xff] }
 0x260   : > { %2167 = vmatmul.f32.gmra.mxu2 %v12723_v37  ;;  %2245 = vmatmul.f32.vlgmr.msrb.gmra.mxu3 %v12718_v54 }
 0x261   : > { %2958 = vmatmul.f32.gmra.mxu1 %v8540_v0  ;;  %v8975_v46 = vpop.f32.mrf.mxu0 }
 0x262   : > { %12802 = vst [vmem:[#allocation40_spill] sm:$0xff] %v8975_v46 }
 0x263   : > { %v1628_v15 = vpop.f32.mrf.mxu2  ;;  %v1826_v4 = vpop.f32.mrf.mxu3 }
 0x264   : > { %v1629_v20 = vadd.f32 %v1628_v15, %v1540_v55  ;;  %v8978_v51 = vadd.f32 %v1826_v4, %v1622_v19  ;;  %2877 = vmatmul.f32.gmra.mxu0 %v8540_v0  ;;  %v12808_v0 = vld [vmem:[#allocation48_spill] sm:$0xff] }
 0x265   : > { %v1465_v57 = vadd.f32 %v12808_v0, %v8715_v62 }
 0x266   : > { %v8983_v5 = vpop.f32.mrf.mxu1 }
 0x267   : > { %12805 = vst [vmem:[#allocation39_spill] sm:$0xff] %v8983_v5  ;;  %v1546_v7 = vadd.f32 %v12811_v42, %v1465_v57  ;;  %v12815_v57 = vld [vmem:[#allocation51_spill] sm:$0xff] }
 0x268   : > { %2170 = vmatmul.f32.gmra.mxu2 %v12730_v44  ;;  %2248 = vmatmul.f32.gmra.mxu3 %v12723_v37 }
 0x269   : > { %2961 = vmatmul.f32.gmra.mxu1 %v8583_v25  ;;  %v8988_v54 = vpop.f32.mrf.mxu0 }
 0x26a   : > { %12806 = vst [vmem:[#allocation44_spill] sm:$0xff] %v8988_v54  ;;  %v12840_v54 = vld [vmem:[#allocation82_spill] sm:$0xff] }
 0x26b   : > { %v1635_v55 = vpop.f32.mrf.mxu2  ;;  %v1829_v19 = vpop.f32.mrf.mxu3 }
 0x26c   : > { %v1636_v15 = vadd.f32 %v1635_v55, %v1543_v39  ;;  %v8991_v4 = vadd.f32 %v1829_v19, %v1629_v20  ;;  %2880 = vmatmul.f32.gmra.mxu0 %v8583_v25  ;;  %v12812_v25 = vld [vmem:[#allocation52_spill] sm:$0xff] }
 0x26d   : > { %v1468_v62 = vadd.f32 %v12812_v25, %v8739_v22 }
 0x26e   : > { %v8996_v31 = vpop.f32.mrf.mxu1 }
 0x26f   : > { %12809 = vst [vmem:[#allocation43_spill] sm:$0xff] %v8996_v31  ;;  %v1549_v42 = vadd.f32 %v12815_v57, %v1468_v62  ;;  %v12819_v62 = vld [vmem:[#allocation54_spill] sm:$0xff]  ;;  %v863_v31 = vld [vmem:[%s7381_s29 + $0x1a8] sm:$0xff] }
 0x270   : > { %2173 = vmatmul.f32.gmra.mxu2 %v12736_v36  ;;  %2251 = vmatmul.f32.gmra.mxu3 %v12730_v44 }
 0x271   : > { %2964 = vmatmul.f32.gmra.mxu1 %v8612_v3  ;;  %v9001_v37 = vpop.f32.mrf.mxu0 }
 0x272   : > { %12810 = vst [vmem:[#allocation48_spill] sm:$0xff] %v9001_v37 }
 0x273   : > { %v1642_v39 = vpop.f32.mrf.mxu2  ;;  %v1832_v20 = vpop.f32.mrf.mxu3 }
 0x274   : > { %v1643_v55 = vadd.f32 %v1642_v39, %v1546_v7  ;;  %v9004_v19 = vadd.f32 %v1832_v20, %v1636_v15  ;;  %2883 = vmatmul.f32.gmra.mxu0 %v8612_v3  ;;  %v12816_v3 = vld [vmem:[#allocation55_spill] sm:$0xff] }
 0x275   : > { %v1471_v22 = vadd.f32 %v12816_v3, %v8760_v60 }
 0x276   : > { %v9009_v0 = vpop.f32.mrf.mxu1 }
 0x277   : > { %12813 = vst [vmem:[#allocation47_spill] sm:$0xff] %v9009_v0  ;;  %v1552_v57 = vadd.f32 %v12819_v62, %v1471_v22  ;;  %v12823_v22 = vld [vmem:[#allocation57_spill] sm:$0xff] }
 0x278   : > { %2176 = vmatmul.f32.gmra.mxu2 %v12742_v28  ;;  %2254 = vmatmul.f32.gmra.mxu3 %v12736_v36  ;;  %v12835_v0 = vld [vmem:[#allocation77_spill] sm:$0xff] }
 0x279   : > { %2967 = vmatmul.f32.gmra.mxu1 %v8646_v1  ;;  %v9014_v44 = vpop.f32.mrf.mxu0 }
 0x27a   : > { %12814 = vst [vmem:[#allocation52_spill] sm:$0xff] %v9014_v44  ;;  %v1486_v44 = vadd.f32 %v12835_v0, %v8875_v21 }
 0x27b   : > { %v1649_v7 = vpop.f32.mrf.mxu2  ;;  %v1835_v15 = vpop.f32.mrf.mxu3 }
 0x27c   : > { %v1650_v39 = vadd.f32 %v1649_v7, %v1549_v42  ;;  %v9017_v20 = vadd.f32 %v1835_v15, %v1643_v55  ;;  %2886 = vmatmul.f32.gmra.mxu0 %v8646_v1  ;;  %v12820_v1 = vld [vmem:[#allocation58_spill] sm:$0xff] }
 0x27d   : > { %v1474_v60 = vadd.f32 %v12820_v1, %v8783_v26  ;;  %v12824_v26 = vld [vmem:[#allocation62_spill] sm:$0xff] }
 0x27e   : > { %v9022_v25 = vpop.f32.mrf.mxu1 }
 0x27f   : > { %12817 = vst [vmem:[#allocation51_spill] sm:$0xff] %v9022_v25  ;;  %v1555_v62 = vadd.f32 %v12823_v22, %v1474_v60 }
 0x280   : > { %2179 = vmatmul.f32.gmra.mxu2 %v12748_v9  ;;  %2257 = vmatmul.f32.gmra.mxu3 %v12742_v28 }
 0x281   : > { %2970 = vmatmul.f32.gmra.mxu1 %v8672_v43  ;;  %v9027_v36 = vpop.f32.mrf.mxu0 }
 0x282   : > { %12818 = vst [vmem:[#allocation55_spill] sm:$0xff] %v9027_v36 }
 0x283   : > { %v1656_v42 = vpop.f32.mrf.mxu2  ;;  %v1838_v55 = vpop.f32.mrf.mxu3 }
 0x284   : > { %v1657_v7 = vadd.f32 %v1656_v42, %v1552_v57  ;;  %v9030_v15 = vadd.f32 %v1838_v55, %v1650_v39  ;;  %2889 = vmatmul.f32.gmra.mxu0 %v8672_v43  ;;  %v1477_v55 = vadd.f32 %v12824_v26, %v8806_v24  ;;  %v12828_v24 = vld [vmem:[#allocation68_spill] sm:$0xff]  ;;  %v873_v26 = vld [vmem:[%s7381_s29 + $0x1f8] sm:$0xff] }
 0x286   : > { %v9035_v3 = vpop.f32.mrf.mxu1 }
 0x287   : > { %12821 = vst [vmem:[#allocation54_spill] sm:$0xff] %v9035_v3 }
 0x288   : > { %2182 = vmatmul.f32.gmra.mxu2 %v12756_v40  ;;  %2260 = vmatmul.f32.gmra.mxu3 %v12748_v9  ;;  %v12826_v9 = vld [vmem:[#allocation61_spill] sm:$0xff] }
 0x289   : > { %2973 = vmatmul.f32.gmra.mxu1 %v8703_v17  ;;  %v9040_v28 = vpop.f32.mrf.mxu0  ;;  %v1558_v60 = vadd.f32 %v12826_v9, %v1477_v55  ;;  %v872_v55 = vld [vmem:[%s7381_s29 + $0x1f0] sm:$0xff] }
 0x28a   : > { %12822 = vst [vmem:[#allocation58_spill] sm:$0xff] %v9040_v28  ;;  %v867_v28 = vld [vmem:[%s7381_s29 + $0x1c8] sm:$0xff] }
 0x28b   : > { %v1663_v57 = vpop.f32.mrf.mxu2  ;;  %v1841_v39 = vpop.f32.mrf.mxu3 }
 0x28c   : > { %v1664_v42 = vadd.f32 %v1663_v57, %v1555_v62  ;;  %v9043_v43 = vadd.f32 %v1841_v39, %v1657_v7  ;;  %2892 = vmatmul.f32.gmra.mxu0 %v8703_v17  ;;  %v1480_v39 = vadd.f32 %v12828_v24, %v8829_v41 }
 0x28e   : > { %v9048_v1 = vpop.f32.mrf.mxu1 }
 0x28f   : > { %12825 = vst [vmem:[#allocation57_spill] sm:$0xff] %v9048_v1  ;;  %v12831_v1 = vld [vmem:[#allocation72_spill] sm:$0xff] }
 0x290   : > { %2185 = vmatmul.f32.gmra.mxu2 %v12763_v34  ;;  %2263 = vmatmul.f32.gmra.mxu3 %v12756_v40  ;;  %v9064_v40 = vand.u32 4294901760, %v873_v26 }
 0x291   : > { %2976 = vmatmul.f32.gmra.mxu1 %v8731_v6  ;;  %v9054_v7 = vpop.f32.mrf.mxu0 }
 0x292   : > { %12827 = vst [vmem:[#allocation62_spill] sm:$0xff] %v9054_v7  ;;  %3408 = vmatpush.msra.mxu1 %v9064_v40  ;;  %3005 = vmatpush.msrb.mxu2 %v9064_v40  ;;  %v1483_v7 = vadd.f32 %v12831_v1, %v8852_v56 }
 0x293   : > { %v1670_v22 = vpop.f32.mrf.mxu2  ;;  %v1844_v62 = vpop.f32.mrf.mxu3 }
 0x294   : > { %v1671_v57 = vadd.f32 %v1670_v22, %v1558_v60  ;;  %v9056_v17 = vadd.f32 %v1844_v62, %v1664_v42  ;;  %2895 = vmatmul.f32.gmra.mxu0 %v8731_v6  ;;  %v12830_v42 = vld [vmem:[#allocation66_spill] sm:$0xff]  ;;  %v9072_v6 = vand.u32 4294901760, %v872_v55 }
 0x295   : > { %v1561_v60 = vadd.f32 %v12830_v42, %v1480_v39  ;;  %v870_v42 = vld [vmem:[%s7381_s29 + $0x1e0] sm:$0xff] }
 0x296   : > { %v9068_v9 = vpop.f32.mrf.mxu1  ;;  %3410 = vmatpush.msra.mxu1 %v9072_v6  ;;  %3007 = vmatpush.msrb.mxu2 %v9072_v6 }
 0x297   : > { %12829 = vst [vmem:[#allocation61_spill] sm:$0xff] %v9068_v9  ;;  %v9081_v9 = vsub.f32 %v873_v26, %v9064_v40  ;;  %v869_v26 = vld [vmem:[%s7381_s29 + $0x1d8] sm:$0xff] }
 0x298   : > { %2188 = vmatmul.f32.gmra.mxu2 %v12770_v45  ;;  %2266 = vmatmul.f32.gmra.mxu3 %v12763_v34  ;;  %v871_v34 = vld [vmem:[%s7381_s29 + $0x1e8] sm:$0xff]  ;;  %v9105_v1 = vand.u32 4294901760, %v869_v26 }
 0x299   : > { %2979 = vmatmul.f32.gmra.mxu1 %v8753_v38  ;;  %v9083_v39 = vand.u32 4294901760, %v871_v34  ;;  %v9089_v3 = vpop.f32.mrf.mxu0  ;;  %3296 = vmatpush.msra.mxu0 %v9081_v9 }
 0x29a   : > { %12832 = vst [vmem:[#allocation68_spill] sm:$0xff] %v9089_v3 }
 0x29b   : > { %v1677_v41 = vpop.f32.mrf.mxu2  ;;  %v1847_v22 = vpop.f32.mrf.mxu3  ;;  %3412 = vmatpush.msra.mxu1 %v9083_v39  ;;  %3009 = vmatpush.msrb.mxu2 %v9083_v39  ;;  %v9103_v56 = vsub.f32 %v871_v34, %v9083_v39 }
 0x29c   : > { %v1678_v62 = vadd.f32 %v1677_v41, %v1561_v60  ;;  %v9076_v24 = vadd.f32 %v1847_v22, %v1671_v57  ;;  %2898 = vmatmul.f32.gmra.mxu0 %v8753_v38  ;;  %v9094_v38 = vsub.f32 %v872_v55, %v9072_v6  ;;  %v9096_v57 = vand.u32 4294901760, %v870_v42  ;;  %v868_v55 = vld [vmem:[%s7381_s29 + $0x1d0] sm:$0xff]  ;;  %v12833_v60 = vld [vmem:[#allocation71_spill] sm:$0xff] }
 0x29d   : > { %v1564_v41 = vadd.f32 %v12833_v60, %v1483_v7  ;;  %v9115_v3 = vand.u32 4294901760, %v868_v55  ;;  %v866_v60 = vld [vmem:[%s7381_s29 + $0x1c0] sm:$0xff] }
 0x29e   : > { %3299 = vmatpush.msra.mxu0 %v9094_v38  ;;  %3414 = vmatpush.msra.mxu1 %v9096_v57  ;;  %v9113_v22 = vsub.f32 %v870_v42, %v9096_v57  ;;  %v9120_v25 = vpop.f32.mrf.mxu1  ;;  %v9127_v42 = vsub.f32 %v869_v26, %v9105_v1  ;;  %v865_v26 = vld [vmem:[%s7381_s29 + $0x1b8] sm:$0xff]  ;;  %v9147_v21 = vand.u32 4294901760, %v866_v60 }
 0x29f   : > { %3011 = vmatpush.msrb.mxu2 %v9096_v57  ;;  %12834 = vst [vmem:[#allocation66_spill] sm:$0xff] %v9120_v25  ;;  %v9157_v25 = vand.u32 4294901760, %v865_v26 }
 0x2a0   : > { %2191 = vmatmul.f32.gmra.mxu2 %v12776_v53  ;;  %2269 = vmatmul.f32.gmra.mxu3 %v12770_v45 }
 0x2a1   : > { %2982 = vmatmul.f32.gmra.mxu1 %v8777_v52  ;;  %3302 = vmatpush.msra.mxu0 %v9103_v56  ;;  %12838 = vst [vmem:[#allocation71_spill] sm:$0xff] %v9157_v25 }
 0x2a2   : > { %3416 = vmatpush.msra.mxu1 %v9105_v1  ;;  %3013 = vmatpush.msrb.mxu2 %v9105_v1 }
 0x2a3   : > { %v1684_v45 = vpop.f32.mrf.mxu2  ;;  %v1850_v34 = vpop.f32.mrf.mxu3  ;;  %3305 = vmatpush.msra.mxu0 %v9113_v22 }
 0x2a4   : > { %v1685_v36 = vadd.f32 %v1684_v45, %v1564_v41  ;;  %v9122_v7 = vadd.f32 %v1850_v34, %v1678_v62  ;;  %2901 = vmatmul.f32.gmra.mxu0 %v8777_v52  ;;  %3418 = vmatpush.msra.mxu1 %v9115_v3  ;;  %v9135_v62 = vand.u32 4294901760, %v867_v28  ;;  %v9138_v52 = vsub.f32 %v868_v55, %v9115_v3  ;;  %v9143_v41 = vpop.f32.mrf.mxu0  ;;  %v864_v55 = vld [vmem:[%s7381_s29 + $0x1b0] sm:$0xff] }
 0x2a5   : > { %3308 = vmatpush.msra.mxu0 %v9127_v42  ;;  %3015 = vmatpush.msrb.mxu2 %v9115_v3  ;;  %12836 = vst [vmem:[#allocation72_spill] sm:$0xff] %v9143_v41  ;;  %v12837_v45 = vld [vmem:[#allocation76_spill] sm:$0xff]  ;;  %v9160_v41 = vsub.f32 %v866_v60, %v9147_v21  ;;  %v9172_v60 = vsub.f32 %v865_v26, %v9157_v25  ;;  %v861_v26 = vld [vmem:[%s7381_s29 + $0x198] sm:$0xff] }
 0x2a6   : > { %v9150_v0 = vsub.f32 %v867_v28, %v9135_v62  ;;  %v1567_v34 = vadd.f32 %v12837_v45, %v1486_v44  ;;  %3420 = vmatpush.msra.mxu1 %v9135_v62  ;;  %v9169_v44 = vand.u32 4294901760, %v864_v55  ;;  %v862_v45 = vld [vmem:[%s7381_s29 + $0x1a0] sm:$0xff]  ;;  %v9204_v46 = vand.u32 4294901760, %v861_v26 }
 0x2a7   : > { %3311 = vmatpush.msra.mxu0 %v9138_v52  ;;  %3017 = vmatpush.msrb.mxu2 %v9135_v62 }
 0x2a8   : > { %2194 = vmatmul.f32.gmra.mxu2 %v12781_v2  ;;  %2272 = vmatmul.f32.gmra.mxu3 %v12776_v53  ;;  %12839 = vst [vmem:[#allocation77_spill] sm:$0xff] %v9169_v44 }
 0x2a9   : > { %2985 = vmatmul.f32.gmra.mxu1 %v8800_v50  ;;  %3314 = vmatpush.msra.mxu0 %v9150_v0 }
 0x2aa   : > { %3422 = vmatpush.msra.mxu1 %v9147_v21  ;;  %3019 = vmatpush.msrb.mxu2 %v9147_v21 }
 0x2ab   : > { %v1691_v53 = vpop.f32.mrf.mxu2  ;;  %v1853_v28 = vpop.f32.mrf.mxu3  ;;  %3317 = vmatpush.msra.mxu0 %v9160_v41 }
 0x2ac   : > { %v1692_v37 = vadd.f32 %v1691_v53, %v1567_v34  ;;  %v9165_v5 = vadd.f32 %v1853_v28, %v1685_v36  ;;  %2904 = vmatmul.f32.gmra.mxu0 %v8800_v50  ;;  %v1489_v34 = vadd.f32 %v12840_v54, %v8898_v58  ;;  %v9179_v36 = vpop.f32.mrf.mxu1  ;;  %3424 = vmatpush.msra.mxu1 %v9157_v25  ;;  %v9182_v50 = vand.u32 4294901760, %v863_v31  ;;  %v9200_v28 = vpop.f32.mrf.mxu0 }
 0x2ad   : > { %12841 = vst [vmem:[#allocation76_spill] sm:$0xff] %v9179_v36  ;;  %v9185_v53 = vsub.f32 %v864_v55, %v9169_v44  ;;  %3320 = vmatpush.msra.mxu0 %v9172_v60  ;;  %3021 = vmatpush.msrb.mxu2 %v9157_v25  ;;  %v9192_v58 = vand.u32 4294901760, %v862_v45  ;;  %v860_v55 = vld [vmem:[%s7381_s29 + $0x190] sm:$0xff] }
 0x2ae   : > { %12842 = vst [vmem:[#allocation82_spill] sm:$0xff] %v9182_v50  ;;  %v9195_v54 = vsub.f32 %v863_v31, %v9182_v50  ;;  %v12845_v36 = vld [vmem:[#allocation80_spill] sm:$0xff]  ;;  %3426 = vmatpush.msra.mxu1 %v9169_v44 }
 0x2af   : > { %12843 = vst [vmem:[#allocation92_spill] sm:$0xff] %v9192_v58  ;;  %3323 = vmatpush.msra.mxu0 %v9185_v53  ;;  %v1570_v14 = vadd.f32 %v12845_v36, %v1489_v34  ;;  %3023 = vmatpush.msrb.mxu2 %v9169_v44  ;;  %v9216_v34 = vand.u32 4294901760, %v860_v55  ;;  %v858_v36 = vld [vmem:[%s7381_s29 + $0x180] sm:$0xff]  ;;  %s6096_s29 = sadd.s32 %s6634_s5, %s7294_s12 }
 0x2b0   : > { %2197 = vmatmul.f32.gmra.mxu2 %v12786_v29  ;;  %2275 = vmatmul.f32.gmra.mxu3 %v12781_v2  ;;  %12844 = vst [vmem:[#allocation93_spill] sm:$0xff] %v9200_v28  ;;  %v9207_v2 = vsub.f32 %v862_v45, %v9192_v58  ;;  %v9219_v45 = vsub.f32 %v861_v26, %v9204_v46  ;;  %v12848_v28 = vld [vmem:[#allocation84_spill] sm:$0xff]  ;;  %v9238_v26 = vand.u32 4294901760, %v858_v36 }
 0x2b1   : > { %2988 = vmatmul.f32.gmra.mxu1 %v8823_v32  ;;  %12846 = vst [vmem:[#allocation80_spill] sm:$0xff] %v9204_v46  ;;  %3326 = vmatpush.msra.mxu0 %v9195_v54 }
 0x2b2   : > { %3428 = vmatpush.msra.mxu1 %v9182_v50  ;;  %12847 = vst [vmem:[#allocation94_spill] sm:$0xff] %v9216_v34  ;;  %3025 = vmatpush.msrb.mxu2 %v9182_v50 }
 0x2b3   : > { %v1698_v31 = vpop.f32.mrf.mxu2  ;;  %v1856_v33 = vpop.f32.mrf.mxu3  ;;  %3329 = vmatpush.msra.mxu0 %v9207_v2  ;;  %12851 = vst [vmem:[#allocation96_spill] sm:$0xff] %v9238_v26 }
 0x2b4   : > { %v1699_v63 = vadd.f32 %v1698_v31, %v1570_v14  ;;  %v9212_v25 = vadd.f32 %v1856_v33, %v1692_v37  ;;  %2907 = vmatmul.f32.gmra.mxu0 %v8823_v32  ;;  %v1492_v14 = vadd.f32 %v12848_v28, %v8921_v61  ;;  %3430 = vmatpush.msra.mxu1 %v9192_v58  ;;  %v9227_v33 = vand.u32 4294901760, %v859_v49  ;;  %v9234_v37 = vpop.f32.mrf.mxu1 }
 0x2b5   : > { %v9230_v32 = vsub.f32 %v860_v55, %v9216_v34  ;;  %3332 = vmatpush.msra.mxu0 %v9219_v45  ;;  %3027 = vmatpush.msrb.mxu2 %v9192_v58  ;;  %12850 = vst [vmem:[#allocation95_spill] sm:$0xff] %v9234_v37  ;;  %v12852_v55 = vld [vmem:[#allocation83_spill] sm:$0xff]  ;;  %v9261_v37 = vpop.f32.mrf.mxu0 }
 0x2b6   : > { %12849 = vst [vmem:[#allocation84_spill] sm:$0xff] %v9227_v33  ;;  %v9241_v61 = vsub.f32 %v859_v49, %v9227_v33  ;;  %v1573_v28 = vadd.f32 %v12852_v55, %v1492_v14  ;;  %3432 = vmatpush.msra.mxu1 %v9204_v46  ;;  %v12856_v55 = vld [vmem:[#allocation85_spill] sm:$0xff] }
 0x2b7   : > { %3335 = vmatpush.msra.mxu0 %v9230_v32  ;;  %3029 = vmatpush.msrb.mxu2 %v9204_v46  ;;  %12853 = vst [vmem:[#allocation83_spill] sm:$0xff] %v9261_v37 }
 0x2b8   : > { %2200 = vmatmul.f32.gmra.mxu2 %v12791_v48  ;;  %2278 = vmatmul.f32.gmra.mxu3 %v12786_v29  ;;  %v9257_v29 = vsub.f32 %v858_v36, %v9238_v26  ;;  %v12854_v36 = vld [vmem:[#allocation86_spill] sm:$0xff] }
 0x2b9   : > { %2991 = vmatmul.f32.gmra.mxu1 %v8846_v18  ;;  %3338 = vmatpush.msra.mxu0 %v9241_v61  ;;  %v1495_v14 = vadd.f32 %v12854_v36, %v8941_v30 }
 0x2ba   : > { %3434 = vmatpush.msra.mxu1 %v9216_v34  ;;  %3031 = vmatpush.msrb.mxu2 %v9216_v34 }
 0x2bb   : > { %v1705_v49 = vpop.f32.mrf.mxu2  ;;  %v1859_v31 = vpop.f32.mrf.mxu3  ;;  %3341 = vmatpush.msra.mxu0 %v9257_v29 }
 0x2bc   : > { %v1706_v58 = vadd.f32 %v1705_v49, %v1573_v28  ;;  %v9263_v50 = vadd.f32 %v1859_v31, %v1699_v63  ;;  %2910 = vmatmul.f32.gmra.mxu0 %v8846_v18  ;;  %3436 = vmatpush.msra.mxu1 %v9227_v33  ;;  %v3151_v63 = vand.u32 4294901760, %v9081_v9  ;;  %v9278_v18 = vpop.f32.mrf.mxu1  ;;  %v1576_v28 = vadd.f32 %v12856_v55, %v1495_v14 }
 0x2bd   : > { %3033 = vmatpush.msrb.mxu2 %v9227_v33  ;;  %12855 = vst [vmem:[#allocation86_spill] sm:$0xff] %v9278_v18  ;;  %v12857_v33 = vld [vmem:[#allocation15_spill] sm:$0xff]  ;;  %v9288_v46 = vpop.f32.mrf.mxu0 }
 0x2be   : > { %3438 = vmatpush.msra.mxu1 %v9238_v26  ;;  %v3152_v30 = vsub.f32 %v9081_v9, %v3151_v63  ;;  %v1498_v34 = vadd.f32 %v12857_v33, %v8953_v10  ;;  %12858 = vst [vmem:[#allocation85_spill] sm:$0xff] %v9288_v46  ;;  %v12859_v9 = vld [vmem:[#allocation14_spill] sm:$0xff]  ;;  %v12867_v46 = vld [vmem:[#allocation21_spill] sm:$0xff] }
 0x2bf   : > { %3035 = vmatpush.msrb.mxu2 %v9238_v26  ;;  %v6869_v10 = vld [vmem:[%s7304_s19 + $0x80] sm:$0xff] }
 0x2c0   : > { %2203 = vmatmul.f32.gmra.mxu2 %v8428_v8  ;;  %2281 = vmatmul.f32.gmra.mxu3 %v12791_v48  ;;  %v3153_v48 = vand.u32 4294901760, %v3152_v30  ;;  %v1579_v14 = vadd.f32 %v12859_v9, %v1498_v34  ;;  %v9300_v33 = vunpack.c.h.bf16 %v6869_v10 }
 0x2c1   : > { %2994 = vmatmul.f32.gmra.mxu1 %v8869_v27 }
 0x2c2   : > { %3154 = vmatpush.msrb.mxu3 %v3153_v48  ;;  %12861 = vst [vmem:[#allocation14_spill] sm:$0xff] %v9300_v33 }
 0x2c3   : > { %v1712_v49 = vpop.f32.mrf.mxu2  ;;  %v1862_v31 = vpop.f32.mrf.mxu3 }
 0x2c4   : > { %v1713_v36 = vadd.f32 %v1712_v49, %v1576_v28  ;;  %v9283_v37 = vadd.f32 %v1862_v31, %v1706_v58  ;;  %2913 = vmatmul.f32.gmra.mxu0 %v8869_v27  ;;  %v9294_v28 = vpop.f32.mrf.mxu1  ;;  %v12862_v49 = vld [vmem:[#allocation18_spill] sm:$0xff] }
 0x2c5   : > { %12860 = vst [vmem:[#allocation15_spill] sm:$0xff] %v9294_v28  ;;  %v1501_v31 = vadd.f32 %v12862_v49, %v8965_v16  ;;  %v9305_v48 = vpop.f32.mrf.mxu0  ;;  %v12865_v16 = vld [vmem:[#allocation17_spill] sm:$0xff] }
 0x2c6   : > { %12863 = vst [vmem:[#allocation18_spill] sm:$0xff] %v9305_v48 }
 0x2c7   : > { %v1582_v9 = vadd.f32 %v12865_v16, %v1501_v31  ;;  %v1925_v31 = vadd.f32 %v12867_v46, %v8978_v51  ;;  %v12872_v46 = vld [vmem:[#allocation20_spill] sm:$0xff] }
 0x2c8   : > { %2206 = vmatmul.f32.gmra.mxu2 %v8465_v11  ;;  %2284 = vmatmul.f32.gmra.mxu3 %v8428_v8  ;;  %v3157_v8 = vand.u32 4294901760, %v9094_v38 }
 0x2c9   : > { %2997 = vmatmul.f32.gmra.mxu1 %v8892_v47  ;;  %v2023_v51 = vadd.f32 %v12872_v46, %v1925_v31  ;;  %v3175_v46 = vand.u32 4294901760, %v9127_v42 }
 0x2ca   : > { %v3158_v34 = vsub.f32 %v9094_v38, %v3157_v8  ;;  %v6870_v38 = vld [vmem:[%s7304_s19 + $0x88] sm:$0xff] }
 0x2cb   : > { %v1719_v58 = vpop.f32.mrf.mxu2  ;;  %v1865_v55 = vpop.f32.mrf.mxu3  ;;  %v9322_v48 = vunpack.c.h.bf16 %v6870_v38 }
 0x2cc   : > { %v1720_v27 = vadd.f32 %v1719_v58, %v1579_v14  ;;  %v9296_v30 = vadd.f32 %v1865_v55, %v1713_v36  ;;  %2916 = vmatmul.f32.gmra.mxu0 %v8892_v47  ;;  %v3163_v36 = vand.u32 4294901760, %v9103_v56  ;;  %v9314_v47 = vsub.f32 %v9300_v33, %v9300_v33 }
 0x2cd   : > { %v3159_v14 = vand.u32 4294901760, %v3158_v34  ;;  %12866 = vst [vmem:[#allocation17_spill] sm:$0xff] %v9322_v48  ;;  %v9327_v34 = vpop.f32.mrf.mxu1  ;;  %v9338_v16 = vpop.f32.mrf.mxu0 }
 0x2ce   : > { %12864 = vst [vmem:[#allocation97_spill] sm:$0xff] %v9314_v47  ;;  %v3164_v58 = vsub.f32 %v9103_v56, %v3163_v36  ;;  %v12337_v18 = vand.u32 4294901760, %v9314_v47  ;;  %v12869_v56 = vld [vmem:[#allocation16_spill] sm:$0xff] }
 0x2cf   : > { %3160 = vmatpush.msrb.mxu3 %v3159_v14  ;;  %12868 = vst [vmem:[#allocation21_spill] sm:$0xff] %v9327_v34 }
 0x2d0   : > { %2209 = vmatmul.f32.gmra.mxu2 %v8495_v35  ;;  %2287 = vmatmul.f32.gmra.mxu3 %v8465_v11  ;;  %v3165_v11 = vand.u32 4294901760, %v3164_v58  ;;  %12871 = vst [vmem:[#allocation98_spill] sm:$0xff] %v9338_v16  ;;  %v12907_v16 = vld [vmem:[#allocation37_spill] sm:$0xff] }
 0x2d1   : > { %3000 = vmatmul.f32.gmra.mxu1 %v8915_v12 }
 0x2d2   : > { %3166 = vmatpush.msrb.mxu3 %v3165_v11  ;;  %v6871_v11 = vld [vmem:[%s7304_s19 + $0x90] sm:$0xff] }
 0x2d3   : > { %v1726_v55 = vpop.f32.mrf.mxu2  ;;  %v1868_v10 = vpop.f32.mrf.mxu3  ;;  %v9346_v38 = vunpack.c.h.bf16 %v6871_v11  ;;  %v6872_v11 = vld [vmem:[%s7304_s19 + $0x98] sm:$0xff] }
 0x2d4   : > { %v1727_v49 = vadd.f32 %v1726_v55, %v1582_v9  ;;  %v9318_v28 = vadd.f32 %v1868_v10, %v1720_v27  ;;  %2919 = vmatmul.f32.gmra.mxu0 %v8915_v12  ;;  %v3169_v12 = vand.u32 4294901760, %v9113_v22  ;;  %v9336_v27 = vsub.f32 %v9322_v48, %v9322_v48 }
 0x2d5   : > { %12873 = vst [vmem:[#allocation20_spill] sm:$0xff] %v9346_v38 }
 0x2d6   : > { %12870 = vst [vmem:[#allocation16_spill] sm:$0xff] %v9336_v27  ;;  %v3170_v9 = vsub.f32 %v9113_v22, %v3169_v12  ;;  %v9351_v22 = vpop.f32.mrf.mxu1 }
 0x2d8   : > { %2290 = vmatmul.f32.gmra.mxu3 %v8495_v35  ;;  %2633 = vmatmul.f32.vlgmr.msra.gmra.mxu2 %v12869_v56  ;;  %v3171_v10 = vand.u32 4294901760, %v3170_v9 }
 0x2d9   : > { %3441 = vmatmul.f32.vlgmr.msra.gmra.mxu1 %v12337_v18  ;;  %3523 = vmatpush.msra.mxu2 %v3151_v63  ;;  %v12338_v63 = vand.u32 4294901760, %v9336_v27  ;;  %v12874_v18 = vld [vmem:[#allocation23_spill] sm:$0xff] }
 0x2da   : > { %v1929_v31 = vadd.f32 %v12874_v18, %v8991_v4  ;;  %3172 = vmatpush.msrb.mxu3 %v3171_v10  ;;  %12875 = vst [vmem:[#allocation23_spill] sm:$0xff] %v9351_v22  ;;  %v12879_v4 = vld [vmem:[#allocation22_spill] sm:$0xff] }
 0x2db   : > { %v1871_v35 = vpop.f32.mrf.mxu3  ;;  %v2165_v14 = vpop.f32.mrf.mxu2  ;;  %3527 = vmatpush.msra.mxu2 %v3157_v8  ;;  %v12876_v8 = vld [vmem:[#allocation19_spill] sm:$0xff] }
 0x2dc   : > { %v9342_v58 = vadd.f32 %v1871_v35, %v1727_v49  ;;  %v2166_v55 = vadd.f32 %v2165_v14, %v2023_v51  ;;  %3343 = vmatmul.f32.vlgmr.msra.gmra.mxu0 %v9314_v47  ;;  %v12877_v49 = vand.u32 4294901760, %v12869_v56  ;;  %v2028_v18 = vadd.f32 %v12879_v4, %v1929_v31  ;;  %v9365_v35 = vpop.f32.mrf.mxu0  ;;  %v12882_v31 = vld [vmem:[#allocation27_spill] sm:$0xff] }
 0x2dd   : > { %3531 = vmatpush.msra.mxu2 %v3163_v36  ;;  %v9361_v36 = vsub.f32 %v9346_v38, %v9346_v38  ;;  %12880 = vst [vmem:[#allocation22_spill] sm:$0xff] %v9365_v35  ;;  %v1933_v4 = vadd.f32 %v12882_v31, %v9004_v19 }
 0x2df   : > { %3535 = vmatpush.msra.mxu2 %v3169_v12  ;;  %12878 = vst [vmem:[#allocation19_spill] sm:$0xff] %v9361_v36  ;;  %v3176_v12 = vsub.f32 %v9127_v42, %v3175_v46  ;;  %v12883_v42 = vld [vmem:[#allocation28_spill] sm:$0xff] }
 0x2e0   : > { %2637 = vmatmul.f32.gmra.mxu2 %v12876_v8  ;;  %2731 = vmatmul.f32.vlgmr.msra.gmra.mxu3 %v12877_v49  ;;  %v9371_v49 = vunpack.c.h.bf16 %v6872_v11 }
 0x2e1   : > { %3446 = vmatmul.f32.gmra.mxu1 %v12338_v63  ;;  %3539 = vmatpush.msra.mxu2 %v3175_v46  ;;  %v3177_v10 = vand.u32 4294901760, %v3176_v12  ;;  %v12339_v63 = vand.u32 4294901760, %v9361_v36  ;;  %v12884_v46 = vand.u32 4294901760, %v12876_v8  ;;  %v9386_v12 = vpop.f32.mrf.mxu1 }
 0x2e2   : > { %12881 = vst [vmem:[#allocation99_spill] sm:$0xff] %v9371_v49 }
 0x2e3   : > { %v2168_v51 = vpop.f32.mrf.mxu2  ;;  %v2246_v9 = vpop.f32.mrf.mxu3  ;;  %3178 = vmatpush.msrb.mxu3 %v3177_v10  ;;  %12886 = vst [vmem:[#allocation28_spill] sm:$0xff] %v9386_v12  ;;  %v12890_v12 = vld [vmem:[#allocation29_spill] sm:$0xff] }
 0x2e4   : > { %v2169_v56 = vadd.f32 %v2168_v51, %v2028_v18  ;;  %v9367_v14 = vadd.f32 %v2246_v9, %v2166_v55  ;;  %3347 = vmatmul.f32.gmra.mxu0 %v9336_v27  ;;  %v3181_v55 = vand.u32 4294901760, %v9138_v52  ;;  %v9384_v18 = vsub.f32 %v9371_v49, %v9371_v49  ;;  %v12887_v51 = vld [vmem:[#allocation26_spill] sm:$0xff] }
 0x2e5   : > { %v2033_v19 = vadd.f32 %v12887_v51, %v1933_v4  ;;  %v1937_v34 = vadd.f32 %v12890_v12, %v9017_v20  ;;  %v9399_v4 = vpop.f32.mrf.mxu0  ;;  %v12895_v51 = vld [vmem:[#allocation31_spill] sm:$0xff] }
 0x2e6   : > { %12885 = vst [vmem:[#allocation27_spill] sm:$0xff] %v9384_v18  ;;  %v3182_v9 = vsub.f32 %v9138_v52, %v3181_v55  ;;  %3543 = vmatpush.msra.mxu2 %v3181_v55  ;;  %v12340_v35 = vand.u32 4294901760, %v9384_v18  ;;  %v12892_v52 = vld [vmem:[#allocation24_spill] sm:$0xff]  ;;  %v3187_v55 = vand.u32 4294901760, %v9150_v0 }
 0x2e7   : > { %12891 = vst [vmem:[#allocation29_spill] sm:$0xff] %v9399_v4  ;;  %v2038_v20 = vadd.f32 %v12895_v51, %v1937_v34  ;;  %v12899_v34 = vld [vmem:[#allocation33_spill] sm:$0xff] }
 0x2e8   : > { %2641 = vmatmul.f32.gmra.mxu2 %v12883_v42  ;;  %2736 = vmatmul.f32.gmra.mxu3 %v12884_v46  ;;  %v3183_v46 = vand.u32 4294901760, %v3182_v9  ;;  %v3188_v12 = vsub.f32 %v9150_v0, %v3187_v55  ;;  %v1941_v51 = vadd.f32 %v12899_v34, %v9030_v15 }
 0x2e9   : > { %3451 = vmatmul.f32.gmra.mxu1 %v12339_v63  ;;  %v6873_v63 = vld [vmem:[%s7304_s19 + $0xa0] sm:$0xff]  ;;  %3547 = vmatpush.msra.mxu2 %v3187_v55  ;;  %v12901_v55 = vld [vmem:[#allocation25_spill] sm:$0xff] }
 0x2ea   : > { %v9394_v22 = vunpack.c.h.bf16 %v6873_v63  ;;  %3184 = vmatpush.msrb.mxu3 %v3183_v46  ;;  %v3189_v46 = vand.u32 4294901760, %v3188_v12 }
 0x2eb   : > { %v2171_v10 = vpop.f32.mrf.mxu2  ;;  %v2249_v11 = vpop.f32.mrf.mxu3 }
 0x2ec   : > { %v2172_v8 = vadd.f32 %v2171_v10, %v2033_v19  ;;  %v9390_v31 = vadd.f32 %v2249_v11, %v2169_v56  ;;  %3351 = vmatmul.f32.gmra.mxu0 %v9361_v36  ;;  %12889 = vst [vmem:[#allocation100_spill] sm:$0xff] %v9394_v22  ;;  %v12893_v56 = vand.u32 4294901760, %v12883_v42  ;;  %v9409_v63 = vsub.f32 %v9394_v22, %v9394_v22  ;;  %v9413_v10 = vpop.f32.mrf.mxu1 }
 0x2ed   : > { %12896 = vst [vmem:[#allocation31_spill] sm:$0xff] %v9413_v10  ;;  %3190 = vmatpush.msrb.mxu3 %v3189_v46  ;;  %v9424_v0 = vpop.f32.mrf.mxu0 }
 0x2ee   : > { %12888 = vst [vmem:[#allocation26_spill] sm:$0xff] %v9390_v31  ;;  %v12341_v4 = vand.u32 4294901760, %v9409_v63 }
 0x2ef   : > { %12894 = vst [vmem:[#allocation24_spill] sm:$0xff] %v9409_v63 }
 0x2f0   : > { %2645 = vmatmul.f32.gmra.mxu2 %v12892_v52  ;;  %2741 = vmatmul.f32.gmra.mxu3 %v12893_v56  ;;  %v6874_v56 = vld [vmem:[%s7304_s19 + $0xa8] sm:$0xff]  ;;  %12900 = vst [vmem:[#allocation33_spill] sm:$0xff] %v9424_v0 }
 0x2f1   : > { %3456 = vmatmul.f32.gmra.mxu1 %v12340_v35  ;;  %v9419_v35 = vunpack.c.h.bf16 %v6874_v56 }
 0x2f3   : > { %v2174_v19 = vpop.f32.mrf.mxu2  ;;  %v2252_v9 = vpop.f32.mrf.mxu3  ;;  %12898 = vst [vmem:[#allocation102_spill] sm:$0xff] %v9419_v35  ;;  %v9434_v12 = vsub.f32 %v9419_v35, %v9419_v35  ;;  %v1945_v35 = vadd.f32 %v12907_v16, %v9043_v43  ;;  %v12913_v43 = vld [vmem:[#allocation53_spill] sm:$0xff] }
 0x2f4   : > { %v2175_v42 = vadd.f32 %v2174_v19, %v2038_v20  ;;  %v9415_v11 = vadd.f32 %v2252_v9, %v2172_v8  ;;  %3355 = vmatmul.f32.gmra.mxu0 %v9384_v18  ;;  %v12902_v8 = vand.u32 4294901760, %v12892_v52  ;;  %v3193_v20 = vand.u32 4294901760, %v9160_v41  ;;  %v12904_v19 = vld [vmem:[#allocation50_spill] sm:$0xff] }
 0x2f5   : > { %12903 = vst [vmem:[#allocation25_spill] sm:$0xff] %v9434_v12  ;;  %v2043_v15 = vadd.f32 %v12904_v19, %v1941_v51  ;;  %v9447_v51 = vpop.f32.mrf.mxu1  ;;  %v2048_v16 = vadd.f32 %v12913_v43, %v1945_v35 }
 0x2f6   : > { %12897 = vst [vmem:[#allocation101_spill] sm:$0xff] %v9415_v11  ;;  %v3194_v9 = vsub.f32 %v9160_v41, %v3193_v20  ;;  %3551 = vmatpush.msra.mxu2 %v3193_v20  ;;  %v12909_v41 = vld [vmem:[#allocation81_spill] sm:$0xff]  ;;  %v3199_v20 = vand.u32 4294901760, %v9172_v60 }
 0x2f7   : > { %12908 = vst [vmem:[#allocation37_spill] sm:$0xff] %v9447_v51  ;;  %v12919_v43 = vand.u32 4294901760, %v12909_v41 }
 0x2f8   : > { %2649 = vmatmul.f32.gmra.mxu2 %v12901_v55  ;;  %2746 = vmatmul.f32.gmra.mxu3 %v12902_v8  ;;  %v3195_v52 = vand.u32 4294901760, %v3194_v9  ;;  %v6875_v8 = vld [vmem:[%s7304_s19 + $0xb0] sm:$0xff]  ;;  %v3200_v9 = vsub.f32 %v9172_v60, %v3199_v20 }
 0x2f9   : > { %3461 = vmatmul.f32.gmra.mxu1 %v12341_v4  ;;  %v9442_v0 = vunpack.c.h.bf16 %v6875_v8  ;;  %v12344_v4 = vand.u32 4294901760, %v9434_v12  ;;  %3555 = vmatpush.msra.mxu2 %v3199_v20  ;;  %v12918_v20 = vld [vmem:[#allocation30_spill] sm:$0xff] }
 0x2fa   : > { %3196 = vmatpush.msrb.mxu3 %v3195_v52  ;;  %v3201_v8 = vand.u32 4294901760, %v3200_v9 }
 0x2fb   : > { %v2177_v46 = vpop.f32.mrf.mxu2  ;;  %v2255_v56 = vpop.f32.mrf.mxu3  ;;  %12906 = vst [vmem:[#allocation103_spill] sm:$0xff] %v9442_v0  ;;  %v9457_v19 = vsub.f32 %v9442_v0, %v9442_v0 }
 0x2fc   : > { %v2178_v34 = vadd.f32 %v2177_v46, %v2043_v15  ;;  %v9438_v10 = vadd.f32 %v2255_v56, %v2175_v42  ;;  %3359 = vmatmul.f32.gmra.mxu0 %v9409_v63  ;;  %v12910_v42 = vand.u32 4294901760, %v12901_v55  ;;  %v9459_v15 = vpop.f32.mrf.mxu0  ;;  %3202 = vmatpush.msrb.mxu3 %v3201_v8 }
 0x2fd   : > { %12911 = vst [vmem:[#allocation81_spill] sm:$0xff] %v9457_v19  ;;  %v12345_v51 = vand.u32 4294901760, %v9457_v19  ;;  %v9472_v60 = vpop.f32.mrf.mxu1 }
 0x2fe   : > { %12905 = vst [vmem:[#allocation50_spill] sm:$0xff] %v9438_v10 }
 0x2ff   : > { %12912 = vst [vmem:[#allocation104_spill] sm:$0xff] %v9459_v15  ;;  %v12916_v15 = vld [vmem:[#allocation41_spill] sm:$0xff] }
 0x300   : > { %2653 = vmatmul.f32.gmra.mxu2 %v12909_v41  ;;  %2751 = vmatmul.f32.gmra.mxu3 %v12910_v42  ;;  %v6876_v42 = vld [vmem:[%s7304_s19 + $0xb8] sm:$0xff]  ;;  %v1949_v35 = vadd.f32 %v12916_v15, %v9056_v17  ;;  %12917 = vst [vmem:[#allocation41_spill] sm:$0xff] %v9472_v60  ;;  %v12921_v17 = vld [vmem:[#allocation56_spill] sm:$0xff] }
 0x301   : > { %3466 = vmatmul.f32.gmra.mxu1 %v12344_v4  ;;  %v9467_v4 = vunpack.c.h.bf16 %v6876_v42 }
 0x302   : > { %v2053_v15 = vadd.f32 %v12921_v17, %v1949_v35  ;;  %v6877_v35 = vld [vmem:[%s7304_s19 + $0xc0] sm:$0xff]  ;;  %v12925_v17 = vld [vmem:[#allocation59_spill] sm:$0xff] }
 0x303   : > { %v2180_v46 = vpop.f32.mrf.mxu2  ;;  %v2258_v56 = vpop.f32.mrf.mxu3  ;;  %12915 = vst [vmem:[#allocation105_spill] sm:$0xff] %v9467_v4 }
 0x304   : > { %v2181_v55 = vadd.f32 %v2180_v46, %v2048_v16  ;;  %v9463_v52 = vadd.f32 %v2258_v56, %v2178_v34  ;;  %3363 = vmatmul.f32.gmra.mxu0 %v9434_v12  ;;  %v3205_v34 = vand.u32 4294901760, %v9185_v53  ;;  %v9482_v16 = vsub.f32 %v9467_v4, %v9467_v4  ;;  %v9487_v41 = vpop.f32.mrf.mxu0  ;;  %v707_v4 = vld [vmem:[%s9495_s22 + $0x68] sm:$0xff] }
 0x305   : > { %12922 = vst [vmem:[#allocation56_spill] sm:$0xff] %v9487_v41  ;;  %v9539_v22 = vand.u32 4294901760, %v707_v4 }
 0x306   : > { %12914 = vst [vmem:[#allocation53_spill] sm:$0xff] %v9463_v52  ;;  %v3206_v9 = vsub.f32 %v9185_v53, %v3205_v34  ;;  %3559 = vmatpush.msra.mxu2 %v3205_v34  ;;  %v9498_v53 = vunpack.c.h.bf16 %v6877_v35  ;;  %v12346_v34 = vand.u32 4294901760, %v9482_v16 }
 0x307   : > { %12920 = vst [vmem:[#allocation30_spill] sm:$0xff] %v9482_v16 }
 0x308   : > { %2657 = vmatmul.f32.gmra.mxu2 %v12918_v20  ;;  %2756 = vmatmul.f32.gmra.mxu3 %v12919_v43  ;;  %v3207_v43 = vand.u32 4294901760, %v3206_v9  ;;  %12924 = vst [vmem:[#allocation107_spill] sm:$0xff] %v9498_v53  ;;  %v12927_v9 = vand.u32 4294901760, %v12918_v20  ;;  %v9514_v35 = vsub.f32 %v9498_v53, %v9498_v53 }
 0x309   : > { %3471 = vmatmul.f32.gmra.mxu1 %v12345_v51 }
 0x30a   : > { %3208 = vmatpush.msrb.mxu3 %v3207_v43  ;;  %12928 = vst [vmem:[#allocation59_spill] sm:$0xff] %v9514_v35  ;;  %v9517_v43 = vpop.f32.mrf.mxu1 }
 0x30b   : > { %v2183_v46 = vpop.f32.mrf.mxu2  ;;  %v2261_v56 = vpop.f32.mrf.mxu3 }
 0x30c   : > { %v2184_v8 = vadd.f32 %v2183_v46, %v2053_v15  ;;  %v9489_v42 = vadd.f32 %v2261_v56, %v2181_v55  ;;  %3367 = vmatmul.f32.gmra.mxu0 %v9457_v19  ;;  %v1953_v15 = vadd.f32 %v12925_v17, %v9076_v24  ;;  %v709_v55 = vld [vmem:[%s9495_s22 + $0x78] sm:$0xff]  ;;  %v12926_v46 = vld [vmem:[#allocation32_spill] sm:$0xff]  ;;  %v3211_v56 = vand.u32 4294901760, %v9195_v54 }
 0x30d   : > { %v9508_v51 = vand.u32 4294901760, %v709_v55  ;;  %v708_v24 = vld [vmem:[%s9495_s22 + $0x70] sm:$0xff]  ;;  %12929 = vst [vmem:[#allocation32_spill] sm:$0xff] %v9517_v43  ;;  %v12930_v17 = vld [vmem:[#allocation45_spill] sm:$0xff]  ;;  %v9554_v43 = vsub.f32 %v707_v4, %v9539_v22  ;;  %v12938_v4 = vand.u32 4294901760, %v9514_v35 }
 0x30e   : > { %12923 = vst [vmem:[#allocation106_spill] sm:$0xff] %v9489_v42  ;;  %v2058_v60 = vadd.f32 %v12930_v17, %v1953_v15  ;;  %v3212_v20 = vsub.f32 %v9195_v54, %v3211_v56  ;;  %v9524_v41 = vand.u32 4294901760, %v708_v24  ;;  %3563 = vmatpush.msra.mxu2 %v3211_v56 }
 0x30f   : > { %3715 = vmatpush.msrb.mxu0 %v9508_v51  ;;  %v12943_v48 = vand.u32 4294901760, %v9554_v43 }
 0x310   : > { %2661 = vmatmul.f32.gmra.mxu2 %v12926_v46  ;;  %2761 = vmatmul.f32.gmra.mxu3 %v12927_v9  ;;  %v9522_v9 = vsub.f32 %v709_v55, %v9508_v51  ;;  %v3213_v15 = vand.u32 4294901760, %v3212_v20  ;;  %v6878_v55 = vld [vmem:[%s7304_s19 + $0xc8] sm:$0xff]  ;;  %v9537_v56 = vsub.f32 %v708_v24, %v9524_v41 }
 0x311   : > { %3476 = vmatmul.f32.gmra.mxu1 %v12346_v34  ;;  %v9533_v17 = vunpack.c.h.bf16 %v6878_v55  ;;  %3717 = vmatpush.msrb.mxu0 %v9524_v41  ;;  %v4018_v10 = vsub.f32 %v9554_v43, %v12943_v48 }
 0x312   : > { %v12360_v54 = vand.u32 4294901760, %v9522_v9  ;;  %3214 = vmatpush.msrb.mxu3 %v3213_v15  ;;  %v12937_v15 = vand.u32 4294901760, %v12926_v46 }
 0x313   : > { %v2186_v34 = vpop.f32.mrf.mxu2  ;;  %v2264_v53 = vpop.f32.mrf.mxu3  ;;  %12932 = vst [vmem:[#allocation108_spill] sm:$0xff] %v9533_v17  ;;  %3719 = vmatpush.msrb.mxu0 %v9539_v22  ;;  %v9572_v12 = vsub.f32 %v9533_v17, %v9533_v17 }
 0x314   : > { %v2187_v0 = vadd.f32 %v2186_v34, %v2058_v60  ;;  %v9528_v19 = vadd.f32 %v2264_v53, %v2184_v8  ;;  %3371 = vmatmul.f32.gmra.mxu0 %v9482_v16  ;;  %v706_v60 = vld [vmem:[%s9495_s22 + $0x60] sm:$0xff]  ;;  %v12933_v8 = vld [vmem:[#allocation65_spill] sm:$0xff]  ;;  %v9545_v34 = vpop.f32.mrf.mxu0  ;;  %v4006_v20 = vsub.f32 %v9522_v9, %v12360_v54  ;;  %v3217_v54 = vand.u32 4294901760, %v9207_v2 }
 0x315   : > { %v1957_v53 = vadd.f32 %v12933_v8, %v9122_v7  ;;  %12934 = vst [vmem:[#allocation65_spill] sm:$0xff] %v9545_v34  ;;  %v9550_v55 = vand.u32 4294901760, %v706_v60  ;;  %v705_v16 = vld [vmem:[%s9495_s22 + $0x58] sm:$0xff]  ;;  %v12936_v8 = vld [vmem:[#allocation34_spill] sm:$0xff] }
 0x316   : > { %12931 = vst [vmem:[#allocation45_spill] sm:$0xff] %v9528_v19  ;;  %v6879_v19 = vld [vmem:[%s7304_s19 + $0xd0] sm:$0xff]  ;;  %v4007_v34 = vand.u32 4294901760, %v4006_v20  ;;  %v12941_v20 = vld [vmem:[#allocation49_spill] sm:$0xff]  ;;  %3567 = vmatpush.msra.mxu2 %v3217_v54 }
 0x317   : > { %v9559_v7 = vunpack.c.h.bf16 %v6879_v19  ;;  %v9566_v24 = vsub.f32 %v706_v60, %v9550_v55  ;;  %12939 = vst [vmem:[#allocation34_spill] sm:$0xff] %v9572_v12  ;;  %v12940_v19 = vand.u32 4294901760, %v9537_v56  ;;  %3721 = vmatpush.msrb.mxu0 %v9550_v55  ;;  %v704_v60 = vld [vmem:[%s9495_s22 + $0x50] sm:$0xff]  ;;  %v2063_v42 = vadd.f32 %v12941_v20, %v1957_v53 }
 0x318   : > { %2665 = vmatmul.f32.gmra.mxu2 %v12936_v8  ;;  %2766 = vmatmul.f32.gmra.mxu3 %v12937_v15  ;;  %v9578_v15 = vand.u32 4294901760, %v705_v16  ;;  %v9585_v63 = vand.u32 4294901760, %v704_v60 }
 0x319   : > { %12935 = vst [vmem:[#allocation109_spill] sm:$0xff] %v9559_v7  ;;  %3481 = vmatmul.f32.gmra.mxu1 %v12938_v4  ;;  %v4012_v49 = vsub.f32 %v9537_v56, %v12940_v19  ;;  %v3218_v4 = vsub.f32 %v9207_v2, %v3217_v54  ;;  %v12380_v17 = vand.u32 4294901760, %v9566_v24  ;;  %v12942_v19 = vld [vmem:[#allocation69_spill] sm:$0xff]  ;;  %v703_v2 = vld [vmem:[%s9495_s22 + $0x48] sm:$0xff] }
 0x31a   : > { %4008 = vmatpush.msrb.mxu1 %v4007_v34  ;;  %v1961_v38 = vadd.f32 %v12942_v19, %v9165_v5  ;;  %v9593_v53 = vsub.f32 %v705_v16, %v9578_v15  ;;  %3723 = vmatpush.msrb.mxu0 %v9578_v15  ;;  %v9597_v34 = vpop.f32.mrf.mxu1  ;;  %v4019_v16 = vand.u32 4294901760, %v4018_v10  ;;  %v9608_v36 = vsub.f32 %v704_v60, %v9585_v63 }
 0x31b   : > { %v2189_v46 = vpop.f32.mrf.mxu2  ;;  %v2267_v52 = vpop.f32.mrf.mxu3  ;;  %v4013_v18 = vand.u32 4294901760, %v4012_v49  ;;  %12944 = vst [vmem:[#allocation49_spill] sm:$0xff] %v9597_v34  ;;  %v3219_v5 = vand.u32 4294901760, %v3218_v4  ;;  %v4024_v48 = vsub.f32 %v9566_v24, %v12380_v17  ;;  %v701_v4 = vld [vmem:[%s9495_s22 + $0x38] sm:$0xff]  ;;  %v12949_v17 = vld [vmem:[#allocation38_spill] sm:$0xff]  ;;  %v3223_v34 = vand.u32 4294901760, %v9219_v45 }
 0x31c   : > { %v2190_v54 = vadd.f32 %v2189_v46, %v2063_v42  ;;  %v9599_v20 = vadd.f32 %v2267_v52, %v2187_v0  ;;  %3375 = vmatmul.f32.gmra.mxu0 %v9514_v35  ;;  %v12381_v19 = vand.u32 4294901760, %v9593_v53  ;;  %v702_v0 = vld [vmem:[%s9495_s22 + $0x40] sm:$0xff]  ;;  %v9612_v42 = vand.u32 4294901760, %v703_v2  ;;  %v9621_v60 = vpop.f32.mrf.mxu0 }
 0x31d   : > { %4014 = vmatpush.msrb.mxu1 %v4013_v18  ;;  %3725 = vmatpush.msrb.mxu0 %v9585_v63  ;;  %v4025_v52 = vand.u32 4294901760, %v4024_v48  ;;  %v9614_v46 = vand.u32 4294901760, %v702_v0  ;;  %12948 = vst [vmem:[#allocation112_spill] sm:$0xff] %v9621_v60  ;;  %v12951_v48 = vld [vmem:[#allocation42_spill] sm:$0xff]  ;;  %v12952_v10 = vand.u32 4294901760, %v9572_v12  ;;  %v9638_v60 = vsub.f32 %v9559_v7, %v9559_v7 }
 0x31e   : > { %12945 = vst [vmem:[#allocation69_spill] sm:$0xff] %v9599_v20  ;;  %3220 = vmatpush.msrb.mxu3 %v3219_v5  ;;  %v4030_v18 = vsub.f32 %v9593_v53, %v12381_v19  ;;  %v12950_v5 = vand.u32 4294901760, %v12936_v8  ;;  %v2068_v49 = vadd.f32 %v12951_v48, %v1961_v38  ;;  %v9644_v48 = vand.u32 4294901760, %v701_v4  ;;  %3571 = vmatpush.msra.mxu2 %v3223_v34 }
 0x31f   : > { %12946 = vst [vmem:[#allocation110_spill] sm:$0xff] %v9612_v42  ;;  %4020 = vmatpush.msrb.mxu1 %v4019_v16  ;;  %v9629_v16 = vsub.f32 %v703_v2, %v9612_v42  ;;  %v9632_v19 = vsub.f32 %v702_v0, %v9614_v46  ;;  %3727 = vmatpush.msrb.mxu0 %v9612_v42  ;;  %v700_v2 = vld [vmem:[%s9495_s22 + $0x30] sm:$0xff] }
 0x320   : > { %12947 = vst [vmem:[#allocation111_spill] sm:$0xff] %v9614_v46  ;;  %2669 = vmatmul.f32.gmra.mxu2 %v12949_v17  ;;  %2771 = vmatmul.f32.gmra.mxu3 %v12950_v5  ;;  %v4031_v8 = vand.u32 4294901760, %v4030_v18  ;;  %v12954_v5 = vand.u32 4294901760, %v9608_v36  ;;  %v3224_v0 = vsub.f32 %v9219_v45, %v3223_v34  ;;  %v9650_v7 = vand.u32 4294901760, %v700_v2  ;;  %v6880_v18 = vld [vmem:[%s7304_s19 + $0xd8] sm:$0xff]  ;;  %v699_v45 = vld [vmem:[%s9495_s22 + $0x28] sm:$0xff] }
 0x321   : > { %3486 = vmatmul.f32.gmra.mxu1 %v12952_v10  ;;  %12953 = vst [vmem:[#allocation38_spill] sm:$0xff] %v9638_v60  ;;  %v9653_v20 = vunpack.c.h.bf16 %v6880_v18  ;;  %3729 = vmatpush.msrb.mxu0 %v9614_v46  ;;  %v12960_v18 = vand.u32 4294901760, %v9629_v16 }
 0x322   : > { %v4036_v38 = vsub.f32 %v9608_v36, %v12954_v5  ;;  %12955 = vst [vmem:[#allocation42_spill] sm:$0xff] %v9644_v48  ;;  %4026 = vmatpush.msrb.mxu1 %v4025_v52  ;;  %v12958_v5 = vld [vmem:[#allocation75_spill] sm:$0xff]  ;;  %v9658_v52 = vsub.f32 %v701_v4, %v9644_v48  ;;  %v3225_v34 = vand.u32 4294901760, %v3224_v0 }
 0x323   : > { %12956 = vst [vmem:[#allocation113_spill] sm:$0xff] %v9650_v7  ;;  %v1965_v33 = vadd.f32 %v12958_v5, %v9212_v25  ;;  %v2192_v26 = vpop.f32.mrf.mxu2  ;;  %v2270_v11 = vpop.f32.mrf.mxu3  ;;  %v4042_v25 = vsub.f32 %v9629_v16, %v12960_v18  ;;  %3731 = vmatpush.msrb.mxu0 %v9644_v48  ;;  %v12965_v18 = vld [vmem:[#allocation46_spill] sm:$0xff] }
 0x324   : > { %12957 = vst [vmem:[#allocation114_spill] sm:$0xff] %v9653_v20  ;;  %v4037_v27 = vand.u32 4294901760, %v4036_v38  ;;  %v2193_v35 = vadd.f32 %v2192_v26, %v2068_v49  ;;  %v9662_v10 = vadd.f32 %v2270_v11, %v2190_v54  ;;  %3379 = vmatmul.f32.gmra.mxu0 %v9572_v12  ;;  %4032 = vmatpush.msrb.mxu1 %v4031_v8  ;;  %v12961_v38 = vand.u32 4294901760, %v9632_v19  ;;  %v698_v11 = vld [vmem:[%s9495_s22 + $0x20] sm:$0xff]  ;;  %v9678_v54 = vpop.f32.mrf.mxu1  ;;  %v697_v12 = vld [vmem:[%s9495_s22 + $0x18] sm:$0xff] }
 0x325   : > { %v12397_v46 = vand.u32 4294901760, %v9658_v52  ;;  %v9674_v26 = vsub.f32 %v700_v2, %v9650_v7  ;;  %12962 = vst [vmem:[#allocation115_spill] sm:$0xff] %v9678_v54  ;;  %3226 = vmatpush.msrb.mxu3 %v3225_v34  ;;  %v4043_v49 = vand.u32 4294901760, %v4042_v25  ;;  %v9680_v8 = vand.u32 4294901760, %v699_v45  ;;  %3733 = vmatpush.msrb.mxu0 %v9650_v7  ;;  %v12966_v54 = vld [vmem:[#allocation63_spill] sm:$0xff]  ;;  %v6881_v48 = vld [vmem:[%s7304_s19 + $0xe0] sm:$0xff] }
 0x326   : > { %12959 = vst [vmem:[#allocation75_spill] sm:$0xff] %v9662_v10  ;;  %v4048_v4 = vsub.f32 %v9632_v19, %v12961_v38  ;;  %4038 = vmatpush.msrb.mxu1 %v4037_v27  ;;  %v9682_v0 = vand.u32 4294901760, %v698_v11  ;;  %v2073_v5 = vadd.f32 %v12965_v18, %v1965_v33  ;;  %v12967_v27 = vand.u32 4294901760, %v12949_v17 }
 0x327   : > { %12963 = vst [vmem:[#allocation116_spill] sm:$0xff] %v9680_v8  ;;  %v4054_v38 = vsub.f32 %v9658_v52, %v12397_v46  ;;  %v3229_v25 = vand.u32 4294901760, %v9230_v32  ;;  %v9696_v33 = vsub.f32 %v699_v45, %v9680_v8  ;;  %v12968_v46 = vand.u32 4294901760, %v9638_v60  ;;  %3735 = vmatpush.msrb.mxu0 %v9680_v8 }
 0x328   : > { %12964 = vst [vmem:[#allocation117_spill] sm:$0xff] %v9682_v0  ;;  %2673 = vmatmul.f32.gmra.mxu2 %v12966_v54  ;;  %2776 = vmatmul.f32.gmra.mxu3 %v12967_v27  ;;  %v4049_v34 = vand.u32 4294901760, %v4048_v4  ;;  %v9699_v18 = vsub.f32 %v698_v11, %v9682_v0  ;;  %v9705_v2 = vsub.f32 %v9653_v20, %v9653_v20  ;;  %v12970_v17 = vand.u32 4294901760, %v9674_v26  ;;  %v696_v27 = vld [vmem:[%s9495_s22 + $0x10] sm:$0xff]  ;;  %v9714_v11 = vpop.f32.mrf.mxu0 }
 0x329   : > { %3491 = vmatmul.f32.gmra.mxu1 %v12968_v46  ;;  %v4055_v10 = vand.u32 4294901760, %v4054_v38  ;;  %v9711_v45 = vand.u32 4294901760, %v697_v12  ;;  %12971 = vst [vmem:[#allocation63_spill] sm:$0xff] %v9714_v11  ;;  %v3230_v46 = vsub.f32 %v9230_v32, %v3229_v25  ;;  %v12415_v7 = vand.u32 4294901760, %v9696_v33  ;;  %3575 = vmatpush.msra.mxu2 %v3229_v25  ;;  %v12974_v25 = vld [vmem:[#allocation78_spill] sm:$0xff] }
 0x32a   : > { %12969 = vst [vmem:[#allocation46_spill] sm:$0xff] %v9705_v2  ;;  %v4060_v4 = vsub.f32 %v9674_v26, %v12970_v17  ;;  %4044 = vmatpush.msrb.mxu1 %v4043_v49  ;;  %v9719_v38 = vand.u32 4294901760, %v696_v27  ;;  %v9722_v17 = vunpack.c.h.bf16 %v6881_v48  ;;  %3737 = vmatpush.msrb.mxu0 %v9682_v0  ;;  %v695_v49 = vld [vmem:[%s9495_s22 + $0x8] sm:$0xff]  ;;  %v1969_v44 = vadd.f32 %v12974_v25, %v9263_v50 }
 0x32b   : > { %v2195_v8 = vpop.f32.mrf.mxu2  ;;  %v2273_v42 = vpop.f32.mrf.mxu3  ;;  %v9725_v31 = vsub.f32 %v697_v12, %v9711_v45  ;;  %v3231_v20 = vand.u32 4294901760, %v3230_v46  ;;  %v4066_v48 = vsub.f32 %v9696_v33, %v12415_v7  ;;  %v12418_v12 = vand.u32 4294901760, %v9705_v2  ;;  %v12979_v7 = vld [vmem:[#allocation60_spill] sm:$0xff] }
 0x32c   : > { %12972 = vst [vmem:[#allocation118_spill] sm:$0xff] %v9722_v17  ;;  %v2196_v32 = vadd.f32 %v2195_v8, %v2073_v5  ;;  %v9729_v11 = vadd.f32 %v2273_v42, %v2193_v35  ;;  %3383 = vmatmul.f32.gmra.mxu0 %v9638_v60  ;;  %4050 = vmatpush.msrb.mxu1 %v4049_v34  ;;  %v12975_v47 = vand.u32 4294901760, %v9699_v18  ;;  %v694_v42 = vld [vmem:[%s9495_s22] sm:$0xff]  ;;  %v4061_v5 = vand.u32 4294901760, %v4060_v4  ;;  %v9752_v46 = vpop.f32.mrf.mxu1 }
 0x32d   : > { %v9742_v35 = vsub.f32 %v696_v27, %v9719_v38  ;;  %3739 = vmatpush.msrb.mxu0 %v9711_v45  ;;  %3232 = vmatpush.msrb.mxu3 %v3231_v20  ;;  %v9747_v34 = vand.u32 4294901760, %v695_v49  ;;  %v9749_v50 = vand.u32 4294901760, %v694_v42  ;;  %12976 = vst [vmem:[#allocation78_spill] sm:$0xff] %v9752_v46  ;;  %v12978_v27 = vand.u32 4294901760, %v12966_v54 }
 0x32e   : > { %12973 = vst [vmem:[#allocation119_spill] sm:$0xff] %v9729_v11  ;;  %v4072_v0 = vsub.f32 %v9699_v18, %v12975_v47  ;;  %4056 = vmatpush.msrb.mxu1 %v4055_v10  ;;  %v12977_v47 = vld [vmem:[#allocation67_spill] sm:$0xff]  ;;  %v4067_v25 = vand.u32 4294901760, %v4066_v48  ;;  %v3235_v20 = vand.u32 4294901760, %v9241_v61  ;;  %v2078_v8 = vadd.f32 %v12979_v7, %v1969_v44 }
 0x32f   : > { %3741 = vmatpush.msrb.mxu0 %v9719_v38  ;;  %v9760_v4 = vsub.f32 %v695_v49, %v9747_v34  ;;  %v9767_v46 = vsub.f32 %v9722_v17, %v9722_v17  ;;  %v12980_v48 = vand.u32 4294901760, %v9725_v31  ;;  %v12984_v11 = vand.u32 4294901760, %v9522_v9 }
 0x330   : > { %2677 = vmatmul.f32.gmra.mxu2 %v12977_v47  ;;  %2781 = vmatmul.f32.gmra.mxu3 %v12978_v27  ;;  %v4073_v60 = vand.u32 4294901760, %v4072_v0  ;;  %v3236_v54 = vsub.f32 %v9241_v61, %v3235_v20  ;;  %v9779_v0 = vpop.f32.mrf.mxu0 }
 0x331   : > { %3496 = vmatmul.f32.gmra.mxu1 %v12418_v12  ;;  %3743 = vmatpush.msrb.mxu0 %v9747_v34  ;;  %v4078_v49 = vsub.f32 %v9725_v31, %v12980_v48  ;;  %v9776_v12 = vsub.f32 %v694_v42, %v9749_v50  ;;  %12981 = vst [vmem:[#allocation67_spill] sm:$0xff] %v9779_v0  ;;  %v12982_v48 = vand.u32 4294901760, %v9742_v35  ;;  %v6882_v42 = vld [vmem:[%s7304_s19 + $0xe8] sm:$0xff] }
 0x332   : > { %4062 = vmatpush.msrb.mxu1 %v4061_v5  ;;  %3579 = vmatpush.msra.mxu2 %v3235_v20  ;;  %v3237_v61 = vand.u32 4294901760, %v3236_v54  ;;  %v9788_v17 = vunpack.c.h.bf16 %v6882_v42  ;;  %v12988_v42 = vld [vmem:[#allocation73_spill] sm:$0xff]  ;;  %v12989_v20 = vand.u32 4294901760, %v12977_v47 }
 0x333   : > { %v2198_v44 = vpop.f32.mrf.mxu2  ;;  %v2276_v7 = vpop.f32.mrf.mxu3  ;;  %3745 = vmatpush.msrb.mxu0 %v9749_v50  ;;  %v4084_v27 = vsub.f32 %v9742_v35, %v12982_v48  ;;  %v12987_v48 = vand.u32 4294901760, %v9537_v56 }
 0x334   : > { %v2199_v5 = vadd.f32 %v2198_v44, %v2078_v8  ;;  %v9781_v10 = vadd.f32 %v2276_v7, %v2196_v32  ;;  %3387 = vmatmul.f32.gmra.mxu0 %v9705_v2  ;;  %4068 = vmatpush.msrb.mxu1 %v4067_v25  ;;  %12983 = vst [vmem:[#allocation60_spill] sm:$0xff] %v9788_v17  ;;  %v12985_v8 = vld [vmem:[#allocation74_spill] sm:$0xff]  ;;  %v4079_v44 = vand.u32 4294901760, %v4078_v49  ;;  %v12986_v25 = vand.u32 4294901760, %v9760_v4 }
 0x335   : > { %4665 = vmatpush.msra.mxu0 %v12984_v11  ;;  %v1973_v32 = vadd.f32 %v12985_v8, %v9283_v37  ;;  %3238 = vmatpush.msrb.mxu3 %v3237_v61  ;;  %v12426_v7 = vand.u32 4294901760, %v9776_v12  ;;  %v4085_v11 = vand.u32 4294901760, %v4084_v27  ;;  %v3241_v37 = vand.u32 4294901760, %v9257_v29  ;;  %v9813_v8 = vpop.f32.mrf.mxu1 }
 0x336   : > { %4074 = vmatpush.msrb.mxu1 %v4073_v60  ;;  %v4090_v54 = vsub.f32 %v9760_v4, %v12986_v25  ;;  %v12990_v60 = vand.u32 4294901760, %v9767_v46  ;;  %v9809_v49 = vsub.f32 %v9788_v17, %v9788_v17  ;;  %v12991_v61 = vand.u32 4294901760, %v9554_v43  ;;  %v12992_v25 = vld [vmem:[#allocation70_spill] sm:$0xff] }
 0x337   : > { %4669 = vmatpush.msra.mxu0 %v12987_v48  ;;  %v2083_v48 = vadd.f32 %v12992_v25, %v1973_v32  ;;  %v4096_v27 = vsub.f32 %v9776_v12, %v12426_v7  ;;  %3583 = vmatpush.msra.mxu2 %v3241_v37  ;;  %v12993_v17 = vand.u32 4294901760, %v9566_v24 }
 0x338   : > { %2681 = vmatmul.f32.gmra.mxu2 %v12988_v42  ;;  %2786 = vmatmul.f32.gmra.mxu3 %v12989_v20  ;;  %v4091_v47 = vand.u32 4294901760, %v4090_v54  ;;  %v3242_v20 = vsub.f32 %v9257_v29, %v3241_v37  ;;  %v12430_v25 = vand.u32 4294901760, %v9809_v49  ;;  %v12994_v29 = vand.u32 4294901760, %v9593_v53  ;;  %v9833_v7 = vpop.f32.mrf.mxu0 }
 0x339   : > { %3501 = vmatmul.f32.gmra.mxu1 %v12990_v60  ;;  %4673 = vmatpush.msra.mxu0 %v12991_v61  ;;  %v1977_v37 = vadd.f32 %v8918_v59, %v9296_v30  ;;  %v12998_v30 = vld [vmem:[#allocation88_spill] sm:$0xff] }
 0x33a   : > { %4080 = vmatpush.msrb.mxu1 %v4079_v44  ;;  %v3243_v32 = vand.u32 4294901760, %v3242_v20  ;;  %v6883_v44 = vld [vmem:[%s7304_s19 + $0xf0] sm:$0xff] }
 0x33b   : > { %v2201_v60 = vpop.f32.mrf.mxu2  ;;  %v2279_v0 = vpop.f32.mrf.mxu3  ;;  %4677 = vmatpush.msra.mxu0 %v12993_v17  ;;  %v9826_v54 = vunpack.c.h.bf16 %v6883_v44  ;;  %v4097_v17 = vand.u32 4294901760, %v4096_v27 }
 0x33c   : > { %v2202_v61 = vadd.f32 %v2201_v60, %v2083_v48  ;;  %v9822_v2 = vadd.f32 %v2279_v0, %v2199_v5  ;;  %3391 = vmatmul.f32.gmra.mxu0 %v9767_v46  ;;  %4086 = vmatpush.msrb.mxu1 %v4085_v11  ;;  %v12995_v0 = vand.u32 4294901760, %v9608_v36  ;;  %v12996_v5 = vld [vmem:[#allocation64_spill] sm:$0xff]  ;;  %v12997_v11 = vand.u32 4294901760, %v12988_v42 }
 0x33d   : > { %4681 = vmatpush.msra.mxu0 %v12994_v29  ;;  %3244 = vmatpush.msrb.mxu3 %v3243_v32  ;;  %v9845_v59 = vsub.f32 %v9826_v54, %v9826_v54  ;;  %v12999_v48 = vand.u32 4294901760, %v9629_v16  ;;  %v9853_v42 = vpop.f32.mrf.mxu1  ;;  %v13000_v29 = vand.u32 4294901760, %v9632_v19 }
 0x33e   : > { %4092 = vmatpush.msrb.mxu1 %v4091_v47 }
 0x33f   : > { %3634 = vmatpush.msra.mxu3 %v9064_v40  ;;  %4685 = vmatpush.msra.mxu0 %v12995_v0  ;;  %v2088_v40 = vadd.f32 %v12998_v30, %v1977_v37  ;;  %v12428_v44 = vand.u32 4294901760, %v9845_v59  ;;  %v13001_v37 = vld [vmem:[#allocation87_spill] sm:$0xff]  ;;  %v13005_v0 = vand.u32 4294901760, %v9658_v52 }
 0x340   : > { %2685 = vmatmul.f32.gmra.mxu2 %v12996_v5  ;;  %2791 = vmatmul.f32.gmra.mxu3 %v12997_v11 }
 0x341   : > { %3506 = vmatmul.f32.gmra.mxu1 %v12430_v25  ;;  %3636 = vmatpush.msra.mxu3 %v9072_v6  ;;  %v6884_v6 = vld [vmem:[%s7304_s19 + $0xf8] sm:$0xff]  ;;  %v13035_v25 = vld [vmem:[#allocation36_spill] sm:$0xff]  ;;  %s5564_s19 = scalar_select %p5563_p13, 32.0, 16.0 }
 0x342   : > { %4098 = vmatpush.msrb.mxu1 %v4097_v17  ;;  %4689 = vmatpush.msra.mxu0 %v12999_v48  ;;  %v9859_v32 = vunpack.c.h.bf16 %v6884_v6  ;;  %v13002_v17 = vand.u32 4294901760, %v12996_v5  ;;  %v13006_v48 = vand.u32 4294901760, %v9674_v26  ;;  %v13010_v6 = vand.u32 4294901760, %v9696_v33 }
 0x343   : > { %v2204_v47 = vpop.f32.mrf.mxu2  ;;  %v2282_v27 = vpop.f32.mrf.mxu3  ;;  %3638 = vmatpush.msra.mxu3 %v9083_v39  ;;  %v1981_v39 = vadd.f32 %v8938_v13, %v9318_v28  ;;  %s5565_s21 = smul.f32 2.0, %s5564_s19 }
 0x344   : > { %4856 = vmatpush.msra.mxu1 %v9508_v51  ;;  %v2205_v20 = vadd.f32 %v2204_v47, %v2088_v40  ;;  %v9855_v60 = vadd.f32 %v2282_v27, %v2202_v61  ;;  %3395 = vmatmul.f32.gmra.mxu0 %v9809_v49  ;;  %v9870_v61 = vpop.f32.mrf.mxu0  ;;  %v9879_v13 = vsub.f32 %v9859_v32, %v9859_v32 }
 0x345   : > { %3640 = vmatpush.msra.mxu3 %v9096_v57  ;;  %4693 = vmatpush.msra.mxu0 %v13000_v29  ;;  %v9883_v57 = vand.u32 4294901760, %v9367_v14  ;;  %v1985_v47 = vadd.f32 %v8950_v23, %v9342_v58  ;;  %v9904_v27 = vpop.f32.mrf.mxu1  ;;  %v13013_v29 = vld [vmem:[#allocation97_spill] sm:$0xff] }
 0x346   : > { %4858 = vmatpush.msra.mxu1 %v9524_v41  ;;  %13008 = vst [vmem:[#allocation70_spill] sm:$0xff] %v9904_v27  ;;  %v13014_v23 = vand.u32 4294901760, %v13013_v29  ;;  %v13036_v27 = vld [vmem:[#allocation101_spill] sm:$0xff] }
 0x347   : > { %3642 = vmatpush.msra.mxu3 %v9105_v1  ;;  %13003 = vst [vmem:[#allocation74_spill] sm:$0xff] %v9883_v57  ;;  %v13004_v1 = vld [vmem:[#allocation89_spill] sm:$0xff]  ;;  %4697 = vmatpush.msra.mxu0 %v13005_v0 }
 0x348   : > { %4860 = vmatpush.msra.mxu1 %v9539_v22  ;;  %2689 = vmatmul.f32.gmra.mxu2 %v13001_v37  ;;  %v2093_v28 = vadd.f32 %v13004_v1, %v1981_v39  ;;  %v13012_v39 = vand.u32 4294901760, %v13001_v37  ;;  %v3038_v58 = vsub.f32 %v13013_v29, %v13014_v23  ;;  %v13016_v1 = vld [vmem:[#allocation26_spill] sm:$0xff] }
 0x349   : > { %2796 = vmatmul.f32.gmra.mxu3 %v13002_v17  ;;  %3511 = vmatmul.f32.gmra.mxu1 %v12428_v44  ;;  %v13019_v37 = vld [vmem:[#allocation110_spill] sm:$0xff]  ;;  %v13023_v44 = vld [vmem:[#allocation92_spill] sm:$0xff] }
 0x34a   : > { %3644 = vmatpush.msra.mxu3 %v9115_v3  ;;  %4862 = vmatpush.msra.mxu1 %v9550_v55  ;;  %v12427_v3 = vand.u32 4294901760, %v9879_v13 }
 0x34b   : > { %v2207_v5 = vpop.f32.mrf.mxu2  ;;  %v2285_v11 = vpop.f32.mrf.mxu3  ;;  %4701 = vmatpush.msra.mxu0 %v13006_v48  ;;  %v13020_v48 = vand.u32 4294901760, %v9699_v18 }
 0x34c   : > { %3646 = vmatpush.msra.mxu3 %v9135_v62  ;;  %v2208_v30 = vadd.f32 %v2207_v5, %v2093_v28  ;;  %v9890_v40 = vadd.f32 %v2285_v11, %v2205_v20  ;;  %3399 = vmatmul.f32.gmra.mxu0 %v9845_v59  ;;  %v9902_v62 = vsub.f32 %v9367_v14, %v9883_v57  ;;  %v13009_v20 = vld [vmem:[#allocation71_spill] sm:$0xff]  ;;  %v13015_v14 = vld [vmem:[#allocation77_spill] sm:$0xff]  ;;  %v9921_v28 = vand.u32 4294901760, %v13016_v1  ;;  %v9923_v0 = vpop.f32.mrf.mxu0  ;;  %v13018_v5 = vld [vmem:[#allocation90_spill] sm:$0xff] }
 0x34d   : > { %4864 = vmatpush.msra.mxu1 %v9578_v15  ;;  %4705 = vmatpush.msra.mxu0 %v13010_v6  ;;  %v2098_v11 = vadd.f32 %v13018_v5, %v1985_v47  ;;  %v13024_v47 = vand.u32 4294901760, %v9725_v31 }
 0x34e   : > { %3648 = vmatpush.msra.mxu3 %v9147_v21  ;;  %13007 = vst [vmem:[#allocation73_spill] sm:$0xff] %v9902_v62  ;;  %v13011_v21 = vld [vmem:[#allocation79_spill] sm:$0xff]  ;;  %v12429_v17 = vand.u32 4294901760, %v9902_v62 }
 0x34f   : > { %4866 = vmatpush.msra.mxu1 %v9585_v63  ;;  %13017 = vst [vmem:[#allocation64_spill] sm:$0xff] %v9921_v28  ;;  %4709 = vmatpush.msra.mxu0 %v13020_v48  ;;  %v9942_v48 = vsub.f32 %v13016_v1, %v9921_v28  ;;  %v13033_v1 = vld [vmem:[#allocation94_spill] sm:$0xff] }
 0x350   : > { %3650 = vmatpush.msra.mxu3 %v13009_v20  ;;  %2693 = vmatmul.f32.gmra.mxu2 %v13011_v21  ;;  %v3749_v5 = vsub.f32 %v9902_v62, %v12429_v17  ;;  %v13034_v17 = vld [vmem:[#allocation91_spill] sm:$0xff] }
 0x351   : > { %2801 = vmatmul.f32.gmra.mxu3 %v13012_v39  ;;  %3516 = vmatmul.f32.gmra.mxu1 %v12427_v3  ;;  %v13021_v39 = vld [vmem:[#allocation82_spill] sm:$0xff]  ;;  %v13022_v3 = vld [vmem:[#allocation111_spill] sm:$0xff]  ;;  %13025 = vst [vmem:[#allocation88_spill] sm:$0xff] %v9942_v48 }
 0x352   : > { %3652 = vmatpush.msra.mxu3 %v13015_v14  ;;  %4868 = vmatpush.msra.mxu1 %v13019_v37  ;;  %v3039_v14 = vand.u32 4294901760, %v3038_v58  ;;  %v13028_v58 = vand.u32 4294901760, %v9742_v35  ;;  %v3750_v62 = vand.u32 4294901760, %v3749_v5 }
 0x353   : > { %v2210_v20 = vpop.f32.mrf.mxu2  ;;  %v2288_v6 = vpop.f32.mrf.mxu3  ;;  %4713 = vmatpush.msra.mxu0 %v13024_v47 }
 0x354   : > { %3654 = vmatpush.msra.mxu3 %v13021_v39  ;;  %v2211_v29 = vadd.f32 %v2210_v20, %v2098_v11  ;;  %v9930_v23 = vadd.f32 %v2288_v6, %v2208_v30  ;;  %3403 = vmatmul.f32.gmra.mxu0 %v9879_v13  ;;  %v13026_v30 = vld [vmem:[#allocation42_spill] sm:$0xff]  ;;  %v13027_v11 = vld [vmem:[#allocation80_spill] sm:$0xff]  ;;  %v9948_v20 = vpop.f32.mrf.mxu1 }
 0x355   : > { %4870 = vmatpush.msra.mxu1 %v13022_v3  ;;  %4717 = vmatpush.msra.mxu0 %v13028_v58  ;;  %13029 = vst [vmem:[#allocation87_spill] sm:$0xff] %v9948_v20  ;;  %v13031_v6 = vld [vmem:[#allocation16_spill] sm:$0xff]  ;;  %v9960_v58 = vand.u32 4294901760, %v13036_v27 }
 0x356   : > { %3656 = vmatpush.msra.mxu3 %v13023_v44  ;;  %v13030_v44 = vand.u32 4294901760, %v13011_v21  ;;  %v13032_v39 = vand.u32 4294901760, %v13031_v6  ;;  %v13038_v21 = vld [vmem:[#allocation113_spill] sm:$0xff]  ;;  %v13041_v20 = vld [vmem:[#allocation96_spill] sm:$0xff] }
 0x357   : > { %4872 = vmatpush.msra.mxu1 %v13026_v30  ;;  %13037 = vst [vmem:[#allocation89_spill] sm:$0xff] %v9960_v58 }
 0x358   : > { %3658 = vmatpush.msra.mxu3 %v13027_v11  ;;  %3040 = vmatmul.f32.vlgmr.msrb.gmra.mxu2 %v3039_v14  ;;  %v3045_v47 = vsub.f32 %v13031_v6, %v13032_v39  ;;  %v2537_v11 = vadd.f32 %v13035_v25, %v13034_v17  ;;  %v13039_v6 = vld [vmem:[#allocation84_spill] sm:$0xff]  ;;  %v13040_v39 = vand.u32 4294901760, %v9760_v4 }
 0x359   : > { %2806 = vmatmul.f32.gmra.mxu3 %v13030_v44  ;;  %4100 = vmatmul.f32.vlgmr.msrb.gmra.mxu1 %v9883_v57  ;;  %v9977_v57 = vsub.f32 %v13036_v27, %v9960_v58  ;;  %v13050_v27 = vld [vmem:[#allocation40_spill] sm:$0xff] }
 0x35a   : > { %3660 = vmatpush.msra.mxu3 %v13033_v1  ;;  %4230 = vmatpush.msrb.mxu2 %v9522_v9  ;;  %v9968_v1 = vpop.f32.mrf.mxu0  ;;  %v3046_v5 = vand.u32 4294901760, %v3045_v47  ;;  %v13042_v9 = vld [vmem:[#allocation116_spill] sm:$0xff] }
 0x35b   : > { %4874 = vmatpush.msra.mxu1 %v13038_v21  ;;  %v2291_v14 = vpop.f32.mrf.mxu3  ;;  %v2634_v44 = vpop.f32.mrf.mxu2  ;;  %4721 = vmatpush.msra.mxu0 %v13040_v39  ;;  %13043 = vst [vmem:[#allocation71_spill] sm:$0xff] %v9977_v57 }
 0x35c   : > { %3662 = vmatpush.msra.mxu3 %v13039_v6  ;;  %v9970_v25 = vadd.f32 %v2291_v14, %v2211_v29  ;;  %v2635_v17 = vadd.f32 %v2634_v44, %v2537_v11  ;;  %3751 = vmatmul.f32.vlgmr.msrb.gmra.mxu0 %v3750_v62  ;;  %v13044_v6 = vand.u32 4294901760, %v9942_v48  ;;  %v13045_v29 = vand.u32 4294901760, %v9776_v12  ;;  %v13046_v62 = vld [vmem:[#allocation117_spill] sm:$0xff]  ;;  %v13051_v14 = vld [vmem:[#allocation35_spill] sm:$0xff] }
 0x35d   : > { %4233 = vmatpush.msrb.mxu2 %v9537_v56  ;;  %4876 = vmatpush.msra.mxu1 %v13042_v9  ;;  %v13047_v56 = vld [vmem:[#allocation14_spill] sm:$0xff]  ;;  %v2540_v44 = vadd.f32 %v13051_v14, %v13050_v27  ;;  %v13059_v14 = vld [vmem:[#allocation39_spill] sm:$0xff] }
 0x35e   : > { %3664 = vmatpush.msra.mxu3 %v13041_v20  ;;  %v3757_v39 = vsub.f32 %v9942_v48, %v13044_v6  ;;  %4725 = vmatpush.msra.mxu0 %v13045_v29  ;;  %v13048_v20 = vld [vmem:[#allocation19_spill] sm:$0xff]  ;;  %v9997_v29 = vpop.f32.mrf.mxu1 }
 0x35f   : > { %4236 = vmatpush.msrb.mxu2 %v9554_v43  ;;  %4878 = vmatpush.msra.mxu1 %v13046_v62  ;;  %v13049_v47 = vand.u32 4294901760, %v13048_v20  ;;  %v13052_v43 = vld [vmem:[#allocation50_spill] sm:$0xff] }
 0x360   : > { %3047 = vmatmul.f32.gmra.mxu2 %v3046_v5  ;;  %v9995_v6 = vand.u32 4294901760, %v13052_v43  ;;  %v3758_v48 = vand.u32 4294901760, %v3757_v39  ;;  %v12443_v5 = vand.u32 4294901760, %v9977_v57 }
 0x361   : > { %3245 = vmatmul.f32.vlgmr.msrb.gmra.mxu3 %v13047_v56  ;;  %v3052_v11 = vsub.f32 %v13048_v20, %v13049_v47  ;;  %4104 = vmatmul.f32.gmra.mxu1 %v9921_v28 }
 0x362   : > { %4239 = vmatpush.msrb.mxu2 %v9566_v24  ;;  %13053 = vst [vmem:[#allocation79_spill] sm:$0xff] %v9995_v6  ;;  %4438 = vmatpush.msrb.mxu3 %v9508_v51  ;;  %v10010_v51 = vsub.f32 %v13052_v43, %v9995_v6  ;;  %v10012_v39 = vpop.f32.mrf.mxu0  ;;  %v13060_v43 = vld [vmem:[#allocation53_spill] sm:$0xff] }
 0x363   : > { %4880 = vmatpush.msra.mxu1 %v9711_v45  ;;  %v2638_v20 = vpop.f32.mrf.mxu2  ;;  %v2732_v47 = vpop.f32.mrf.mxu3  ;;  %v3053_v27 = vand.u32 4294901760, %v3052_v11  ;;  %v13058_v11 = vld [vmem:[#allocation44_spill] sm:$0xff] }
 0x364   : > { %4242 = vmatpush.msrb.mxu2 %v9593_v53  ;;  %v2639_v24 = vadd.f32 %v2638_v20, %v2540_v44  ;;  %v10003_v28 = vadd.f32 %v2732_v47, %v2635_v17  ;;  %3759 = vmatmul.f32.gmra.mxu0 %v3758_v48  ;;  %13054 = vst [vmem:[#allocation97_spill] sm:$0xff] %v10010_v51  ;;  %v12441_v20 = vand.u32 4294901760, %v10010_v51 }
 0x365   : > { %4440 = vmatpush.msrb.mxu3 %v9524_v41  ;;  %4882 = vmatpush.msra.mxu1 %v9719_v38  ;;  %v3765_v53 = vsub.f32 %v9977_v57, %v12443_v5  ;;  %v13056_v41 = vld [vmem:[#allocation27_spill] sm:$0xff]  ;;  %v2543_v44 = vadd.f32 %v13059_v14, %v13058_v11  ;;  %v13066_v14 = vld [vmem:[#allocation48_spill] sm:$0xff] }
 0x366   : > { %4245 = vmatpush.msrb.mxu2 %v9608_v36  ;;  %v13055_v36 = vld [vmem:[#allocation17_spill] sm:$0xff]  ;;  %v13057_v48 = vand.u32 4294901760, %v13056_v41 }
 0x367   : > { %4442 = vmatpush.msrb.mxu3 %v9539_v22  ;;  %4884 = vmatpush.msra.mxu1 %v9747_v34  ;;  %v10029_v22 = vand.u32 4294901760, %v13060_v43 }
 0x368   : > { %4248 = vmatpush.msrb.mxu2 %v9629_v16  ;;  %v3059_v17 = vsub.f32 %v13056_v41, %v13057_v48  ;;  %v3766_v16 = vand.u32 4294901760, %v3765_v53  ;;  %v10035_v41 = vpop.f32.mrf.mxu1  ;;  %v3773_v53 = vsub.f32 %v10010_v51, %v12441_v20 }
 0x369   : > { %3054 = vmatmul.f32.gmra.mxu2 %v3053_v27  ;;  %3248 = vmatmul.f32.gmra.mxu3 %v13055_v36  ;;  %13061 = vst [vmem:[#allocation77_spill] sm:$0xff] %v10029_v22 }
 0x36a   : > { %4108 = vmatmul.f32.gmra.mxu1 %v9960_v58  ;;  %4251 = vmatpush.msrb.mxu2 %v9632_v19  ;;  %v3060_v11 = vand.u32 4294901760, %v3059_v17 }
 0x36b   : > { %4444 = vmatpush.msrb.mxu3 %v9550_v55  ;;  %4886 = vmatpush.msra.mxu1 %v9749_v50  ;;  %v2642_v47 = vpop.f32.mrf.mxu2  ;;  %v2737_v27 = vpop.f32.mrf.mxu3  ;;  %v10043_v55 = vsub.f32 %v13060_v43, %v10029_v22 }
 0x36c   : > { %4254 = vmatpush.msrb.mxu2 %v9658_v52  ;;  %v2643_v19 = vadd.f32 %v2642_v47, %v2543_v44  ;;  %v10037_v48 = vadd.f32 %v2737_v27, %v2639_v24  ;;  %3767 = vmatmul.f32.gmra.mxu0 %v3766_v16  ;;  %v10050_v52 = vpop.f32.mrf.mxu0  ;;  %v13063_v24 = vld [vmem:[#allocation20_spill] sm:$0xff]  ;;  %v13067_v44 = vld [vmem:[#allocation43_spill] sm:$0xff]  ;;  %v13068_v16 = vld [vmem:[#allocation106_spill] sm:$0xff] }
 0x36d   : > { %4446 = vmatpush.msrb.mxu3 %v9578_v15  ;;  %13062 = vst [vmem:[#allocation26_spill] sm:$0xff] %v10043_v55  ;;  %v13064_v15 = vld [vmem:[#allocation24_spill] sm:$0xff]  ;;  %v2546_v43 = vadd.f32 %v13067_v44, %v13066_v14  ;;  %v12440_v47 = vand.u32 4294901760, %v10043_v55  ;;  %v13075_v44 = vld [vmem:[#allocation47_spill] sm:$0xff] }
 0x36e   : > { %4257 = vmatpush.msrb.mxu2 %v9674_v26  ;;  %v13065_v17 = vand.u32 4294901760, %v13064_v15 }
 0x36f   : > { %4448 = vmatpush.msrb.mxu3 %v9585_v63  ;;  %v10061_v63 = vand.u32 4294901760, %v13068_v16 }
 0x370   : > { %4260 = vmatpush.msrb.mxu2 %v9696_v33  ;;  %v3066_v26 = vsub.f32 %v13064_v15, %v13065_v17  ;;  %v3774_v33 = vand.u32 4294901760, %v3773_v53  ;;  %v10074_v14 = vpop.f32.mrf.mxu1 }
 0x371   : > { %3061 = vmatmul.f32.gmra.mxu2 %v3060_v11  ;;  %3251 = vmatmul.f32.gmra.mxu3 %v13063_v24  ;;  %13069 = vst [vmem:[#allocation90_spill] sm:$0xff] %v10061_v63  ;;  %v10072_v53 = vsub.f32 %v13068_v16, %v10061_v63  ;;  %v13076_v16 = vld [vmem:[#allocation45_spill] sm:$0xff] }
 0x372   : > { %4112 = vmatmul.f32.gmra.mxu1 %v9995_v6  ;;  %4450 = vmatpush.msrb.mxu3 %v13019_v37  ;;  %v3067_v37 = vand.u32 4294901760, %v3066_v26  ;;  %v13074_v26 = vld [vmem:[#allocation52_spill] sm:$0xff] }
 0x373   : > { %4263 = vmatpush.msrb.mxu2 %v9699_v18  ;;  %v2646_v27 = vpop.f32.mrf.mxu2  ;;  %v2742_v11 = vpop.f32.mrf.mxu3  ;;  %13070 = vst [vmem:[#allocation110_spill] sm:$0xff] %v10072_v53  ;;  %v3781_v18 = vsub.f32 %v10043_v55, %v12440_v47 }
 0x374   : > { %4452 = vmatpush.msrb.mxu3 %v13022_v3  ;;  %v2647_v15 = vadd.f32 %v2646_v27, %v2546_v43  ;;  %v10066_v17 = vadd.f32 %v2742_v11, %v2643_v19  ;;  %3775 = vmatmul.f32.gmra.mxu0 %v3774_v33  ;;  %v13071_v3 = vld [vmem:[#allocation99_spill] sm:$0xff]  ;;  %v2549_v43 = vadd.f32 %v13075_v44, %v13074_v26  ;;  %v10090_v33 = vand.u32 4294901760, %v13076_v16 }
 0x375   : > { %4266 = vmatpush.msrb.mxu2 %v9725_v31  ;;  %v13072_v31 = vld [vmem:[#allocation25_spill] sm:$0xff]  ;;  %v12439_v27 = vand.u32 4294901760, %v10072_v53 }
 0x376   : > { %4454 = vmatpush.msrb.mxu3 %v13026_v30  ;;  %v13073_v19 = vand.u32 4294901760, %v13072_v31  ;;  %13077 = vst [vmem:[#allocation82_spill] sm:$0xff] %v10090_v33  ;;  %v10102_v26 = vsub.f32 %v13076_v16, %v10090_v33 }
 0x377   : > { %4269 = vmatpush.msrb.mxu2 %v9742_v35  ;;  %v10092_v35 = vpop.f32.mrf.mxu0 }
 0x378   : > { %4456 = vmatpush.msrb.mxu3 %v13038_v21  ;;  %v3073_v30 = vsub.f32 %v13072_v31, %v13073_v19  ;;  %v3782_v21 = vand.u32 4294901760, %v3781_v18  ;;  %13078 = vst [vmem:[#allocation111_spill] sm:$0xff] %v10102_v26  ;;  %v3789_v18 = vsub.f32 %v10072_v53, %v12439_v27 }
 0x379   : > { %3068 = vmatmul.f32.gmra.mxu2 %v3067_v37  ;;  %3254 = vmatmul.f32.gmra.mxu3 %v13071_v3 }
 0x37a   : > { %4116 = vmatmul.f32.gmra.mxu1 %v10029_v22  ;;  %4272 = vmatpush.msrb.mxu2 %v9760_v4  ;;  %v3074_v4 = vand.u32 4294901760, %v3073_v30 }
 0x37b   : > { %4458 = vmatpush.msrb.mxu3 %v13042_v9  ;;  %v2650_v11 = vpop.f32.mrf.mxu2  ;;  %v2747_v37 = vpop.f32.mrf.mxu3 }
 0x37c   : > { %4275 = vmatpush.msrb.mxu2 %v9776_v12  ;;  %v2651_v31 = vadd.f32 %v2650_v11, %v2549_v43  ;;  %v10097_v19 = vadd.f32 %v2747_v37, %v2647_v15  ;;  %3783 = vmatmul.f32.gmra.mxu0 %v3782_v21  ;;  %v10108_v9 = vpop.f32.mrf.mxu1  ;;  %v13079_v12 = vld [vmem:[#allocation100_spill] sm:$0xff]  ;;  %v13080_v15 = vld [vmem:[#allocation81_spill] sm:$0xff]  ;;  %v13083_v43 = vld [vmem:[#allocation51_spill] sm:$0xff]  ;;  %v12442_v37 = vand.u32 4294901760, %v10102_v26 }
 0x37d   : > { %4460 = vmatpush.msrb.mxu3 %v13046_v62  ;;  %v13081_v44 = vand.u32 4294901760, %v13080_v15  ;;  %v13082_v62 = vld [vmem:[#allocation55_spill] sm:$0xff]  ;;  %v13084_v21 = vld [vmem:[#allocation69_spill] sm:$0xff] }
 0x37e   : > { %v2552_v16 = vadd.f32 %v13083_v43, %v13082_v62  ;;  %v10119_v11 = vand.u32 4294901760, %v13084_v21  ;;  %v13087_v43 = vld [vmem:[#allocation102_spill] sm:$0xff] }
 0x37f   : > { %4462 = vmatpush.msrb.mxu3 %v9711_v45  ;;  %v3080_v30 = vsub.f32 %v13080_v15, %v13081_v44  ;;  %v3790_v45 = vand.u32 4294901760, %v3789_v18  ;;  %v10123_v47 = vpop.f32.mrf.mxu0  ;;  %v3797_v18 = vsub.f32 %v10102_v26, %v12442_v37 }
 0x380   : > { %13085 = vst [vmem:[#allocation92_spill] sm:$0xff] %v10119_v11  ;;  %v10130_v62 = vsub.f32 %v13084_v21, %v10119_v11 }
 0x381   : > { %3075 = vmatmul.f32.gmra.mxu2 %v3074_v4  ;;  %3257 = vmatmul.f32.gmra.mxu3 %v13079_v12 }
 0x382   : > { %4120 = vmatmul.f32.gmra.mxu1 %v10061_v63  ;;  %4464 = vmatpush.msrb.mxu3 %v9719_v38  ;;  %v3081_v38 = vand.u32 4294901760, %v3080_v30  ;;  %13086 = vst [vmem:[#allocation42_spill] sm:$0xff] %v10130_v62  ;;  %v13091_v30 = vld [vmem:[#allocation54_spill] sm:$0xff]  ;;  %v12456_v37 = vand.u32 4294901760, %v10130_v62 }
 0x383   : > { %v2654_v4 = vpop.f32.mrf.mxu2  ;;  %v2752_v27 = vpop.f32.mrf.mxu3 }
 0x384   : > { %4466 = vmatpush.msrb.mxu3 %v9747_v34  ;;  %v2655_v15 = vadd.f32 %v2654_v4, %v2552_v16  ;;  %v10125_v44 = vadd.f32 %v2752_v27, %v2651_v31  ;;  %3791 = vmatmul.f32.gmra.mxu0 %v3790_v45  ;;  %v13088_v34 = vld [vmem:[#allocation30_spill] sm:$0xff]  ;;  %v13092_v16 = vld [vmem:[#allocation75_spill] sm:$0xff]  ;;  %v10145_v21 = vpop.f32.mrf.mxu1  ;;  %v3798_v4 = vand.u32 4294901760, %v3797_v18 }
 0x385   : > { %v13089_v20 = vand.u32 4294901760, %v13088_v34  ;;  %v13090_v31 = vld [vmem:[#allocation58_spill] sm:$0xff]  ;;  %v10143_v45 = vand.u32 4294901760, %v13092_v16  ;;  %13094 = vst [vmem:[#allocation16_spill] sm:$0xff] %v10145_v21  ;;  %v13096_v18 = vld [vmem:[#allocation103_spill] sm:$0xff] }
 0x386   : > { %4468 = vmatpush.msrb.mxu3 %v9749_v50  ;;  %v2555_v50 = vadd.f32 %v13091_v30, %v13090_v31  ;;  %v3805_v30 = vsub.f32 %v10130_v62, %v12456_v37 }
 0x387   : > { %v3087_v27 = vsub.f32 %v13088_v34, %v13089_v20  ;;  %13093 = vst [vmem:[#allocation80_spill] sm:$0xff] %v10143_v45  ;;  %v10152_v34 = vsub.f32 %v13092_v16, %v10143_v45  ;;  %v10154_v31 = vpop.f32.mrf.mxu0  ;;  %v13101_v16 = vld [vmem:[#allocation119_spill] sm:$0xff] }
 0x389   : > { %3082 = vmatmul.f32.gmra.mxu2 %v3081_v38  ;;  %3260 = vmatmul.f32.gmra.mxu3 %v13087_v43  ;;  %v3088_v20 = vand.u32 4294901760, %v3087_v27  ;;  %13095 = vst [vmem:[#allocation94_spill] sm:$0xff] %v10152_v34  ;;  %v13100_v27 = vld [vmem:[#allocation57_spill] sm:$0xff]  ;;  %v12465_v58 = vand.u32 4294901760, %v10152_v34 }
 0x38a   : > { %4124 = vmatmul.f32.gmra.mxu1 %v10090_v33  ;;  %v13097_v33 = vld [vmem:[#allocation59_spill] sm:$0xff] }
 0x38b   : > { %v2658_v38 = vpop.f32.mrf.mxu2  ;;  %v2757_v5 = vpop.f32.mrf.mxu3  ;;  %v13098_v6 = vand.u32 4294901760, %v13097_v33 }
 0x38c   : > { %v2659_v63 = vadd.f32 %v2658_v38, %v2555_v50  ;;  %v10148_v22 = vadd.f32 %v2757_v5, %v2655_v15  ;;  %3799 = vmatmul.f32.gmra.mxu0 %v3798_v4  ;;  %v13099_v15 = vld [vmem:[#allocation62_spill] sm:$0xff]  ;;  %v10167_v4 = vand.u32 4294901760, %v13101_v16  ;;  %v3806_v38 = vand.u32 4294901760, %v3805_v30 }
 0x38d   : > { %v3094_v5 = vsub.f32 %v13097_v33, %v13098_v6  ;;  %v2558_v50 = vadd.f32 %v13100_v27, %v13099_v15  ;;  %v3813_v15 = vsub.f32 %v10152_v34, %v12465_v58  ;;  %v13106_v27 = vld [vmem:[#allocation105_spill] sm:$0xff] }
 0x38e   : > { %13102 = vst [vmem:[#allocation91_spill] sm:$0xff] %v10167_v4  ;;  %v10176_v33 = vsub.f32 %v13101_v16, %v10167_v4 }
 0x38f   : > { %v3095_v6 = vand.u32 4294901760, %v3094_v5  ;;  %v10181_v30 = vpop.f32.mrf.mxu0  ;;  %v3814_v16 = vand.u32 4294901760, %v3813_v15  ;;  %v13114_v15 = vld [vmem:[#allocation107_spill] sm:$0xff] }
 0x390   : > { %13104 = vst [vmem:[#allocation101_spill] sm:$0xff] %v10176_v33 }
 0x391   : > { %3089 = vmatmul.f32.gmra.mxu2 %v3088_v20  ;;  %3263 = vmatmul.f32.gmra.mxu3 %v13096_v18  ;;  %v10170_v20 = vpop.f32.mrf.mxu1  ;;  %13105 = vst [vmem:[#allocation113_spill] sm:$0xff] %v10181_v30 }
 0x392   : > { %4128 = vmatmul.f32.gmra.mxu1 %v10119_v11  ;;  %13103 = vst [vmem:[#allocation36_spill] sm:$0xff] %v10170_v20  ;;  %v13107_v11 = vld [vmem:[#allocation34_spill] sm:$0xff] }
 0x393   : > { %v2662_v26 = vpop.f32.mrf.mxu2  ;;  %v2762_v37 = vpop.f32.mrf.mxu3  ;;  %v13108_v55 = vand.u32 4294901760, %v13107_v11 }
 0x394   : > { %v2663_v62 = vadd.f32 %v2662_v26, %v2558_v50  ;;  %v10172_v53 = vadd.f32 %v2762_v37, %v2659_v63  ;;  %3807 = vmatmul.f32.gmra.mxu0 %v3806_v38  ;;  %v13109_v26 = vld [vmem:[#allocation68_spill] sm:$0xff]  ;;  %v13110_v37 = vld [vmem:[#allocation61_spill] sm:$0xff]  ;;  %v10191_v50 = vand.u32 4294901760, %v9781_v10  ;;  %v12474_v38 = vand.u32 4294901760, %v10176_v33 }
 0x395   : > { %v3101_v63 = vsub.f32 %v13107_v11, %v13108_v55  ;;  %v2561_v5 = vadd.f32 %v13110_v37, %v13109_v26  ;;  %v13115_v37 = vld [vmem:[#allocation38_spill] sm:$0xff] }
 0x396   : > { %13111 = vst [vmem:[#allocation84_spill] sm:$0xff] %v10191_v50  ;;  %v10198_v55 = vsub.f32 %v9781_v10, %v10191_v50  ;;  %v3821_v26 = vsub.f32 %v10176_v33, %v12474_v38  ;;  %v10213_v10 = vand.u32 4294901760, %v9822_v2 }
 0x397   : > { %v3102_v57 = vand.u32 4294901760, %v3101_v63 }
 0x398   : > { %13112 = vst [vmem:[#allocation96_spill] sm:$0xff] %v10198_v55  ;;  %v12479_v38 = vand.u32 4294901760, %v10198_v55 }
 0x399   : > { %3096 = vmatmul.f32.gmra.mxu2 %v3095_v6  ;;  %3266 = vmatmul.f32.gmra.mxu3 %v13106_v27  ;;  %v10200_v11 = vpop.f32.mrf.mxu1  ;;  %13119 = vst [vmem:[#allocation117_spill] sm:$0xff] %v10213_v10 }
 0x39a   : > { %4132 = vmatmul.f32.gmra.mxu1 %v10143_v45  ;;  %13113 = vst [vmem:[#allocation116_spill] sm:$0xff] %v10200_v11  ;;  %v13116_v45 = vand.u32 4294901760, %v13115_v37 }
 0x39b   : > { %v2666_v58 = vpop.f32.mrf.mxu2  ;;  %v2767_v34 = vpop.f32.mrf.mxu3 }
 0x39c   : > { %v2667_v6 = vadd.f32 %v2666_v58, %v2561_v5  ;;  %v10194_v51 = vadd.f32 %v2767_v34, %v2663_v62  ;;  %3815 = vmatmul.f32.gmra.mxu0 %v3814_v16  ;;  %v3108_v58 = vsub.f32 %v13115_v37, %v13116_v45  ;;  %v13117_v62 = vld [vmem:[#allocation72_spill] sm:$0xff]  ;;  %v13118_v34 = vld [vmem:[#allocation66_spill] sm:$0xff]  ;;  %v10215_v5 = vpop.f32.mrf.mxu0  ;;  %v3822_v16 = vand.u32 4294901760, %v3821_v26 }
 0x39d   : > { %v2564_v63 = vadd.f32 %v13118_v34, %v13117_v62  ;;  %13120 = vst [vmem:[#allocation14_spill] sm:$0xff] %v10215_v5  ;;  %v10222_v37 = vsub.f32 %v9822_v2, %v10213_v10  ;;  %v3829_v62 = vsub.f32 %v10198_v55, %v12479_v38  ;;  %v13123_v26 = vld [vmem:[#allocation108_spill] sm:$0xff]  ;;  %v10237_v2 = vand.u32 4294901760, %v9855_v60 }
 0x39e   : > { %v3109_v45 = vand.u32 4294901760, %v3108_v58  ;;  %v13127_v58 = vld [vmem:[#allocation76_spill] sm:$0xff] }
 0x39f   : > { %13121 = vst [vmem:[#allocation19_spill] sm:$0xff] %v10222_v37 }
 0x3a0   : > { %13128 = vst [vmem:[#allocation35_spill] sm:$0xff] %v10237_v2 }
 0x3a1   : > { %3103 = vmatmul.f32.gmra.mxu2 %v3102_v57  ;;  %3269 = vmatmul.f32.gmra.mxu3 %v13114_v15  ;;  %v10227_v34 = vpop.f32.mrf.mxu1 }
 0x3a2   : > { %4136 = vmatmul.f32.gmra.mxu1 %v10167_v4  ;;  %13122 = vst [vmem:[#allocation40_spill] sm:$0xff] %v10227_v34  ;;  %v13124_v4 = vld [vmem:[#allocation46_spill] sm:$0xff] }
 0x3a3   : > { %v2670_v57 = vpop.f32.mrf.mxu2  ;;  %v2772_v33 = vpop.f32.mrf.mxu3  ;;  %v13125_v5 = vand.u32 4294901760, %v13124_v4 }
 0x3a4   : > { %v2671_v11 = vadd.f32 %v2670_v57, %v2564_v63  ;;  %v10218_v20 = vadd.f32 %v2772_v33, %v2667_v6  ;;  %3823 = vmatmul.f32.gmra.mxu0 %v3822_v16  ;;  %v13126_v6 = vld [vmem:[#allocation93_spill] sm:$0xff]  ;;  %v3830_v16 = vand.u32 4294901760, %v3829_v62  ;;  %v12484_v57 = vand.u32 4294901760, %v10222_v37 }
 0x3a5   : > { %v3115_v33 = vsub.f32 %v13124_v4, %v13125_v5  ;;  %v2567_v63 = vadd.f32 %v13127_v58, %v13126_v6  ;;  %v10246_v5 = vsub.f32 %v9855_v60, %v10237_v2  ;;  %v13131_v62 = vld [vmem:[#allocation109_spill] sm:$0xff]  ;;  %v13132_v58 = vand.u32 4294901760, %v9767_v46 }
 0x3a6   : > { %v3837_v6 = vsub.f32 %v10222_v37, %v12484_v57 }
 0x3a7   : > { %v3116_v4 = vand.u32 4294901760, %v3115_v33  ;;  %13130 = vst [vmem:[#allocation17_spill] sm:$0xff] %v10246_v5  ;;  %v10259_v33 = vand.u32 4294901760, %v9890_v40 }
 0x3a9   : > { %3110 = vmatmul.f32.gmra.mxu2 %v3109_v45  ;;  %3272 = vmatmul.f32.gmra.mxu3 %v13123_v26  ;;  %v10240_v45 = vpop.f32.mrf.mxu0  ;;  %13135 = vst [vmem:[#allocation27_spill] sm:$0xff] %v10259_v33  ;;  %v10261_v60 = vpop.f32.mrf.mxu1 }
 0x3aa   : > { %4140 = vmatmul.f32.gmra.mxu1 %v10191_v50  ;;  %13129 = vst [vmem:[#allocation50_spill] sm:$0xff] %v10240_v45  ;;  %v3122_v50 = vsub.f32 %v9767_v46, %v13132_v58  ;;  %v10268_v58 = vsub.f32 %v9890_v40, %v10259_v33  ;;  %v10283_v40 = vand.u32 4294901760, %v9930_v23 }
 0x3ab   : > { %v2674_v38 = vpop.f32.mrf.mxu2  ;;  %v2777_v55 = vpop.f32.mrf.mxu3  ;;  %13136 = vst [vmem:[#allocation44_spill] sm:$0xff] %v10261_v60 }
 0x3ac   : > { %v2675_v34 = vadd.f32 %v2674_v38, %v2567_v63  ;;  %v10242_v30 = vadd.f32 %v2777_v55, %v2671_v11  ;;  %3831 = vmatmul.f32.gmra.mxu0 %v3830_v16  ;;  %v13133_v38 = vld [vmem:[#allocation83_spill] sm:$0xff]  ;;  %v3838_v63 = vand.u32 4294901760, %v3837_v6  ;;  %v12489_v16 = vand.u32 4294901760, %v10246_v5  ;;  %13137 = vst [vmem:[#allocation39_spill] sm:$0xff] %v10268_v58  ;;  %v13139_v6 = vld [vmem:[#allocation114_spill] sm:$0xff] }
 0x3ad   : > { %v13134_v55 = vld [vmem:[#allocation95_spill] sm:$0xff]  ;;  %v3123_v46 = vand.u32 4294901760, %v3122_v50  ;;  %v13141_v50 = vld [vmem:[#allocation85_spill] sm:$0xff]  ;;  %13143 = vst [vmem:[#allocation20_spill] sm:$0xff] %v10283_v40 }
 0x3ae   : > { %v2570_v11 = vadd.f32 %v13134_v55, %v13133_v38  ;;  %v3845_v55 = vsub.f32 %v10246_v5, %v12489_v16 }
 0x3b1   : > { %3117 = vmatmul.f32.gmra.mxu2 %v3116_v4  ;;  %3275 = vmatmul.f32.gmra.mxu3 %v13131_v62  ;;  %v10270_v38 = vpop.f32.mrf.mxu0  ;;  %v10288_v21 = vpop.f32.mrf.mxu1 }
 0x3b2   : > { %4144 = vmatmul.f32.gmra.mxu1 %v10213_v10  ;;  %13138 = vst [vmem:[#allocation53_spill] sm:$0xff] %v10270_v38  ;;  %v13140_v10 = vand.u32 4294901760, %v9809_v49 }
 0x3b3   : > { %v2678_v4 = vpop.f32.mrf.mxu2  ;;  %v2782_v57 = vpop.f32.mrf.mxu3  ;;  %13144 = vst [vmem:[#allocation24_spill] sm:$0xff] %v10288_v21 }
 0x3b4   : > { %v2679_v37 = vadd.f32 %v2678_v4, %v2570_v11  ;;  %v10264_v45 = vadd.f32 %v2782_v57, %v2675_v34  ;;  %3839 = vmatmul.f32.gmra.mxu0 %v3838_v63  ;;  %v3129_v34 = vsub.f32 %v9809_v49, %v13140_v10  ;;  %v13142_v57 = vld [vmem:[#allocation86_spill] sm:$0xff]  ;;  %v3846_v63 = vand.u32 4294901760, %v3845_v55 }
 0x3b5   : > { %v2573_v11 = vadd.f32 %v13142_v57, %v13141_v50  ;;  %v12492_v4 = vand.u32 4294901760, %v10268_v58  ;;  %v10292_v49 = vsub.f32 %v9930_v23, %v10283_v40  ;;  %v13146_v50 = vld [vmem:[#allocation118_spill] sm:$0xff]  ;;  %v10307_v23 = vand.u32 4294901760, %v9970_v25 }
 0x3b6   : > { %v3130_v38 = vand.u32 4294901760, %v3129_v34  ;;  %v13149_v34 = vld [vmem:[#allocation15_spill] sm:$0xff] }
 0x3b7   : > { %13145 = vst [vmem:[#allocation48_spill] sm:$0xff] %v10292_v49  ;;  %v3853_v10 = vsub.f32 %v10268_v58, %v12492_v4 }
 0x3b8   : > { %13150 = vst [vmem:[#allocation43_spill] sm:$0xff] %v10307_v23 }
 0x3b9   : > { %3124 = vmatmul.f32.gmra.mxu2 %v3123_v46  ;;  %3278 = vmatmul.f32.gmra.mxu3 %v13139_v6  ;;  %v10297_v55 = vpop.f32.mrf.mxu0 }
 0x3ba   : > { %4148 = vmatmul.f32.gmra.mxu1 %v10237_v2 }
 0x3bb   : > { %v2682_v60 = vpop.f32.mrf.mxu2  ;;  %v2787_v16 = vpop.f32.mrf.mxu3 }
 0x3bc   : > { %v2683_v46 = vadd.f32 %v2682_v60, %v2573_v11  ;;  %v10286_v5 = vadd.f32 %v2787_v16, %v2679_v37  ;;  %3847 = vmatmul.f32.gmra.mxu0 %v3846_v63  ;;  %v13147_v37 = vand.u32 4294901760, %v9845_v59  ;;  %v13148_v16 = vld [vmem:[#allocation18_spill] sm:$0xff]  ;;  %v3854_v11 = vand.u32 4294901760, %v3853_v10  ;;  %v13153_v10 = vld [vmem:[#allocation60_spill] sm:$0xff] }
 0x3bd   : > { %v2576_v57 = vadd.f32 %v13149_v34, %v13148_v16  ;;  %v12497_v63 = vand.u32 4294901760, %v10292_v49  ;;  %v10319_v16 = vpop.f32.mrf.mxu1  ;;  %v13154_v34 = vand.u32 4294901760, %v9879_v13 }
 0x3be   : > { %v3136_v60 = vsub.f32 %v9845_v59, %v13147_v37  ;;  %v10314_v59 = vsub.f32 %v9970_v25, %v10307_v23  ;;  %13152 = vst [vmem:[#allocation99_spill] sm:$0xff] %v10319_v16 }
 0x3bf   : > { %v3861_v37 = vsub.f32 %v10292_v49, %v12497_v63 }
 0x3c0   : > { %v3137_v21 = vand.u32 4294901760, %v3136_v60  ;;  %13151 = vst [vmem:[#allocation106_spill] sm:$0xff] %v10314_v59 }
 0x3c1   : > { %3131 = vmatmul.f32.gmra.mxu2 %v3130_v38  ;;  %3281 = vmatmul.f32.gmra.mxu3 %v13146_v50  ;;  %v10328_v25 = vpop.f32.mrf.mxu0 }
 0x3c2   : > { %4152 = vmatmul.f32.gmra.mxu1 %v10259_v33 }
 0x3c3   : > { %v2686_v4 = vpop.f32.mrf.mxu2  ;;  %v2792_v2 = vpop.f32.mrf.mxu3 }
 0x3c4   : > { %v2687_v38 = vadd.f32 %v2686_v4, %v2576_v57  ;;  %v10310_v58 = vadd.f32 %v2792_v2, %v2683_v46  ;;  %3855 = vmatmul.f32.gmra.mxu0 %v3854_v11  ;;  %v3143_v2 = vsub.f32 %v9879_v13, %v13154_v34  ;;  %v13155_v4 = vld [vmem:[#allocation98_spill] sm:$0xff]  ;;  %v13156_v46 = vld [vmem:[#allocation21_spill] sm:$0xff]  ;;  %v3862_v57 = vand.u32 4294901760, %v3861_v37 }
 0x3c5   : > { %v2579_v60 = vadd.f32 %v13156_v46, %v13155_v4  ;;  %v12504_v11 = vand.u32 4294901760, %v10314_v59  ;;  %v10337_v34 = vpop.f32.mrf.mxu1  ;;  %v13158_v37 = vld [vmem:[#allocation22_spill] sm:$0xff]  ;;  %v13159_v4 = vld [vmem:[#allocation23_spill] sm:$0xff] }
 0x3c6   : > { %v3144_v16 = vand.u32 4294901760, %v3143_v2  ;;  %13157 = vst [vmem:[#allocation25_spill] sm:$0xff] %v10337_v34  ;;  %v2582_v46 = vadd.f32 %v13159_v4, %v13158_v37  ;;  %v13162_v34 = vld [vmem:[#allocation33_spill] sm:$0xff] }
 0x3c7   : > { %v3869_v13 = vsub.f32 %v10314_v59, %v12504_v11  ;;  %v13161_v11 = vld [vmem:[#allocation28_spill] sm:$0xff] }
 0x3c9   : > { %3138 = vmatmul.f32.gmra.mxu2 %v3137_v21  ;;  %3284 = vmatmul.f32.gmra.mxu3 %v13153_v10 }
 0x3ca   : > { %4156 = vmatmul.f32.gmra.mxu1 %v10283_v40  ;;  %v3870_v40 = vand.u32 4294901760, %v3869_v13 }
 0x3cb   : > { %v2690_v63 = vpop.f32.mrf.mxu2 }
 0x3cc   : > { %v2797_v33 = vpop.f32.mrf.mxu3  ;;  %v2691_v49 = vadd.f32 %v2690_v63, %v2579_v60  ;;  %3863 = vmatmul.f32.gmra.mxu0 %v3862_v57 }
 0x3cd   : > { %v10331_v21 = vadd.f32 %v2797_v33, %v2687_v38  ;;  %v10342_v38 = vpop.f32.mrf.mxu0 }
 0x3d1   : > { %3145 = vmatmul.f32.gmra.mxu2 %v3144_v16  ;;  %3287 = vmatmul.f32.gmra.mxu3 %v9826_v54  ;;  %v13160_v16 = vld [vmem:[#allocation29_spill] sm:$0xff] }
 0x3d2   : > { %4160 = vmatmul.f32.gmra.mxu1 %v10307_v23  ;;  %v2876_v57 = vadd.f32 %v13160_v16, %v10003_v28 }
 0x3d3   : > { %v2694_v63 = vpop.f32.mrf.mxu2 }
 0x3d4   : > { %v2802_v33 = vpop.f32.mrf.mxu3  ;;  %v2695_v2 = vadd.f32 %v2694_v63, %v2582_v46  ;;  %3871 = vmatmul.f32.gmra.mxu0 %v3870_v40  ;;  %v2957_v23 = vadd.f32 %v13161_v11, %v2876_v57  ;;  %v2879_v46 = vadd.f32 %v13162_v34, %v10037_v48  ;;  %v13163_v40 = vld [vmem:[#allocation31_spill] sm:$0xff]  ;;  %v13164_v11 = vld [vmem:[#allocation104_spill] sm:$0xff] }
 0x3d5   : > { %v10344_v60 = vadd.f32 %v2802_v33, %v2691_v49  ;;  %v2882_v57 = vadd.f32 %v13164_v11, %v10066_v17 }
 0x3d6   : > { %v2960_v28 = vadd.f32 %v13163_v40, %v2879_v46 }
 0x3d9   : > { %3290 = vmatmul.f32.gmra.mxu3 %v9859_v32  ;;  %3584 = vmatmul.f32.vlgmr.msra.gmra.mxu2 %v13047_v56 }
 0x3db   : > { %v3041_v37 = vpop.f32.mrf.mxu2 }
 0x3dc   : > { %v2807_v59 = vpop.f32.mrf.mxu3  ;;  %v3042_v4 = vadd.f32 %v3041_v37, %v2957_v23  ;;  %v13165_v23 = vld [vmem:[#allocation37_spill] sm:$0xff]  ;;  %v13166_v37 = vld [vmem:[#allocation56_spill] sm:$0xff] }
 0x3dd   : > { %v10351_v13 = vadd.f32 %v2807_v59, %v2695_v2  ;;  %v2963_v48 = vadd.f32 %v13165_v23, %v2882_v57  ;;  %v2885_v46 = vadd.f32 %v13166_v37, %v10097_v19  ;;  %v10376_v57 = vpop.f32.mrf.mxu1  ;;  %v13169_v19 = vld [vmem:[#allocation32_spill] sm:$0xff]  ;;  %v10385_v37 = vpop.f32.mrf.mxu0 }
 0x3e1   : > { %3587 = vmatmul.f32.gmra.mxu2 %v13055_v36  ;;  %3665 = vmatmul.f32.vlgmr.msra.gmra.mxu3 %v13047_v56 }
 0x3e3   : > { %v3048_v49 = vpop.f32.mrf.mxu2 }
 0x3e4   : > { %v3246_v63 = vpop.f32.mrf.mxu3  ;;  %v3049_v33 = vadd.f32 %v3048_v49, %v2960_v28 }
 0x3e5   : > { %v10358_v16 = vadd.f32 %v3246_v63, %v3042_v4  ;;  %v13167_v4 = vld [vmem:[#allocation41_spill] sm:$0xff] }
 0x3e6   : > { %v2966_v17 = vadd.f32 %v13167_v4, %v2885_v46  ;;  %v13168_v63 = vld [vmem:[#allocation65_spill] sm:$0xff]  ;;  %v10387_v46 = vpop.f32.mrf.mxu1 }
 0x3e7   : > { %v2888_v11 = vadd.f32 %v13168_v63, %v10125_v44  ;;  %v13171_v44 = vld [vmem:[#allocation49_spill] sm:$0xff] }
 0x3e9   : > { %3590 = vmatmul.f32.gmra.mxu2 %v13063_v24  ;;  %3668 = vmatmul.f32.gmra.mxu3 %v13055_v36 }
 0x3ec   : > { %v3055_v59 = vpop.f32.mrf.mxu2  ;;  %v3249_v34 = vpop.f32.mrf.mxu3 }
 0x3ed   : > { %v3056_v2 = vadd.f32 %v3055_v59, %v2963_v48  ;;  %v10365_v56 = vadd.f32 %v3249_v34, %v3049_v33  ;;  %v2969_v33 = vadd.f32 %v13169_v19, %v2888_v11  ;;  %v13170_v34 = vld [vmem:[#allocation112_spill] sm:$0xff]  ;;  %v10396_v11 = vpop.f32.mrf.mxu0  ;;  %v13173_v19 = vld [vmem:[#allocation115_spill] sm:$0xff] }
 0x3f1   : > { %3593 = vmatmul.f32.gmra.mxu2 %v13071_v3  ;;  %3671 = vmatmul.f32.gmra.mxu3 %v13063_v24 }
 0x3f4   : > { %v3062_v40 = vpop.f32.mrf.mxu2  ;;  %v3252_v28 = vpop.f32.mrf.mxu3 }
 0x3f5   : > { %v3063_v49 = vadd.f32 %v3062_v40, %v2966_v17  ;;  %v10372_v36 = vadd.f32 %v3252_v28, %v3056_v2  ;;  %v2891_v2 = vadd.f32 %v13170_v34, %v10148_v22  ;;  %v10400_v22 = vpop.f32.mrf.mxu1 }
 0x3f9   : > { %3596 = vmatmul.f32.gmra.mxu2 %v13079_v12  ;;  %3674 = vmatmul.f32.gmra.mxu3 %v13071_v3  ;;  %v2972_v3 = vadd.f32 %v13171_v44, %v2891_v2  ;;  %v13175_v44 = vld [vmem:[#allocation78_spill] sm:$0xff] }
 0x3fc   : > { %v3069_v23 = vpop.f32.mrf.mxu2  ;;  %v3255_v24 = vpop.f32.mrf.mxu3 }
 0x3fd   : > { %v3070_v48 = vadd.f32 %v3069_v23, %v2969_v33  ;;  %v10381_v59 = vadd.f32 %v3255_v24, %v3063_v49  ;;  %v13172_v49 = vld [vmem:[#allocation63_spill] sm:$0xff] }
 0x3fe   : > { %v2894_v63 = vadd.f32 %v13172_v49, %v10172_v53  ;;  %v10409_v53 = vpop.f32.mrf.mxu0 }
 0x401   : > { %3599 = vmatmul.f32.gmra.mxu2 %v13087_v43  ;;  %3677 = vmatmul.f32.gmra.mxu3 %v13079_v12  ;;  %v2975_v12 = vadd.f32 %v13173_v19, %v2894_v63 }
 0x404   : > { %v3076_v4 = vpop.f32.mrf.mxu2  ;;  %v3258_v17 = vpop.f32.mrf.mxu3 }
 0x405   : > { %v3077_v40 = vadd.f32 %v3076_v4, %v2972_v3  ;;  %v10392_v28 = vadd.f32 %v3258_v17, %v3070_v48  ;;  %v13174_v48 = vld [vmem:[#allocation67_spill] sm:$0xff]  ;;  %v10412_v17 = vpop.f32.mrf.mxu1 }
 0x406   : > { %v2897_v2 = vadd.f32 %v13174_v48, %v10194_v51 }
 0x409   : > { %3602 = vmatmul.f32.gmra.mxu2 %v13096_v18  ;;  %3680 = vmatmul.f32.gmra.mxu3 %v13087_v43  ;;  %v2978_v43 = vadd.f32 %v13175_v44, %v2897_v2  ;;  %v2906_v44 = vadd.f32 %v9923_v0, %v10264_v45  ;;  %v13177_v45 = vld [vmem:[#allocation87_spill] sm:$0xff] }
 0x40c   : > { %v3083_v33 = vpop.f32.mrf.mxu2  ;;  %v3261_v23 = vpop.f32.mrf.mxu3 }
 0x40d   : > { %v3084_v24 = vadd.f32 %v3083_v33, %v2975_v12  ;;  %v10403_v34 = vadd.f32 %v3261_v23, %v3077_v40  ;;  %v2900_v40 = vadd.f32 %v9833_v7, %v10218_v20  ;;  %v10421_v12 = vpop.f32.mrf.mxu0  ;;  %v10427_v48 = vpop.f32.mrf.mxu1 }
 0x40f   : > { %v2981_v51 = vadd.f32 %v9813_v8, %v2900_v40  ;;  %v2909_v40 = vadd.f32 %v9968_v1, %v10286_v5 }
 0x411   : > { %3605 = vmatmul.f32.gmra.mxu2 %v13106_v27  ;;  %3683 = vmatmul.f32.gmra.mxu3 %v13096_v18 }
 0x414   : > { %v3090_v3 = vpop.f32.mrf.mxu2  ;;  %v3264_v4 = vpop.f32.mrf.mxu3 }
 0x415   : > { %v3091_v49 = vadd.f32 %v3090_v3, %v2978_v43  ;;  %v10414_v63 = vadd.f32 %v3264_v4, %v3084_v24  ;;  %v2903_v24 = vadd.f32 %v9870_v61, %v10242_v30  ;;  %v10436_v43 = vpop.f32.mrf.mxu0  ;;  %v10438_v3 = vpop.f32.mrf.mxu1  ;;  %v13176_v61 = vld [vmem:[#allocation70_spill] sm:$0xff] }
 0x416   : > { %v2987_v30 = vadd.f32 %v13176_v61, %v2906_v44  ;;  %v2915_v61 = vadd.f32 %v10050_v52, %v10331_v21 }
 0x417   : > { %v2984_v7 = vadd.f32 %v9853_v42, %v2903_v24 }
 0x419   : > { %3608 = vmatmul.f32.gmra.mxu2 %v13114_v15  ;;  %3686 = vmatmul.f32.gmra.mxu3 %v13106_v27 }
 0x41c   : > { %v3097_v18 = vpop.f32.mrf.mxu2  ;;  %v3267_v19 = vpop.f32.mrf.mxu3 }
 0x41d   : > { %v3098_v33 = vadd.f32 %v3097_v18, %v2981_v51  ;;  %v10423_v23 = vadd.f32 %v3267_v19, %v3091_v49  ;;  %v10447_v51 = vpop.f32.mrf.mxu0  ;;  %v10451_v0 = vpop.f32.mrf.mxu1 }
 0x421   : > { %3611 = vmatmul.f32.gmra.mxu2 %v13123_v26  ;;  %3689 = vmatmul.f32.gmra.mxu3 %v13114_v15 }
 0x424   : > { %v3104_v20 = vpop.f32.mrf.mxu2  ;;  %v3270_v8 = vpop.f32.mrf.mxu3 }
 0x425   : > { %v3105_v27 = vadd.f32 %v3104_v20, %v2984_v7  ;;  %v10432_v2 = vadd.f32 %v3270_v8, %v3098_v33  ;;  %v2912_v7 = vadd.f32 %v10012_v39, %v10310_v58  ;;  %v10460_v1 = vpop.f32.mrf.mxu0  ;;  %v10463_v8 = vpop.f32.mrf.mxu1  ;;  %v2996_v39 = vadd.f32 %v10035_v41, %v2915_v61 }
 0x427   : > { %v2993_v5 = vadd.f32 %v9997_v29, %v2912_v7  ;;  %v13178_v7 = vld [vmem:[#allocation73_spill] sm:$0xff] }
 0x428   : > { %v13181_v61 = vand.u32 4294901760, %v13178_v7 }
 0x429   : > { %3614 = vmatmul.f32.gmra.mxu2 %v13131_v62  ;;  %3692 = vmatmul.f32.gmra.mxu3 %v13123_v26  ;;  %v2990_v26 = vadd.f32 %v13177_v45, %v2909_v40 }
 0x42c   : > { %v3111_v15 = vpop.f32.mrf.mxu2  ;;  %v3273_v42 = vpop.f32.mrf.mxu3 }
 0x42d   : > { %v3112_v4 = vadd.f32 %v3111_v15, %v2987_v30  ;;  %v10443_v49 = vadd.f32 %v3273_v42, %v3105_v27  ;;  %v10472_v30 = vpop.f32.mrf.mxu0  ;;  %v2918_v42 = vadd.f32 %v10092_v35, %v10344_v60 }
 0x42f   : > { %v2999_v52 = vadd.f32 %v10074_v14, %v2918_v42 }
 0x431   : > { %3617 = vmatmul.f32.gmra.mxu2 %v13139_v6  ;;  %3695 = vmatmul.f32.gmra.mxu3 %v13131_v62 }
 0x434   : > { %v3118_v18 = vpop.f32.mrf.mxu2  ;;  %v3276_v19 = vpop.f32.mrf.mxu3 }
 0x435   : > { %v3119_v33 = vadd.f32 %v3118_v18, %v2990_v26  ;;  %v10454_v24 = vadd.f32 %v3276_v19, %v3112_v4  ;;  %v10478_v4 = vpop.f32.mrf.mxu1  ;;  %v10485_v45 = vpop.f32.mrf.mxu0  ;;  %v2921_v26 = vadd.f32 %v10123_v47, %v10351_v13 }
 0x437   : > { %v3002_v35 = vadd.f32 %v10108_v9, %v2921_v26  ;;  %v13179_v9 = vld [vmem:[#allocation16_spill] sm:$0xff]  ;;  %v13184_v26 = vld [vmem:[#allocation71_spill] sm:$0xff] }
 0x439   : > { %3620 = vmatmul.f32.gmra.mxu2 %v13146_v50  ;;  %3698 = vmatmul.f32.gmra.mxu3 %v13139_v6 }
 0x43c   : > { %v3125_v62 = vpop.f32.mrf.mxu2  ;;  %v3279_v20 = vpop.f32.mrf.mxu3 }
 0x43d   : > { %v3126_v27 = vadd.f32 %v3125_v62, %v2993_v5  ;;  %v10465_v44 = vadd.f32 %v3279_v20, %v3119_v33  ;;  %v10489_v18 = vpop.f32.mrf.mxu1  ;;  %v10496_v33 = vpop.f32.mrf.mxu0 }
 0x441   : > { %3623 = vmatmul.f32.gmra.mxu2 %v13153_v10  ;;  %3701 = vmatmul.f32.gmra.mxu3 %v13146_v50 }
 0x444   : > { %v3132_v58 = vpop.f32.mrf.mxu2  ;;  %v3282_v6 = vpop.f32.mrf.mxu3 }
 0x445   : > { %v3133_v29 = vadd.f32 %v3132_v58, %v2996_v39  ;;  %v10474_v15 = vadd.f32 %v3282_v6, %v3126_v27  ;;  %v10500_v47 = vpop.f32.mrf.mxu1  ;;  %v13180_v27 = vld [vmem:[#allocation88_spill] sm:$0xff]  ;;  %v10510_v39 = vpop.f32.mrf.mxu0 }
 0x449   : > { %3626 = vmatmul.f32.gmra.mxu2 %v9826_v54  ;;  %3704 = vmatmul.f32.gmra.mxu3 %v13153_v10 }
 0x44c   : > { %v3139_v50 = vpop.f32.mrf.mxu2  ;;  %v3285_v41 = vpop.f32.mrf.mxu3 }
 0x44d   : > { %v3140_v21 = vadd.f32 %v3139_v50, %v2999_v52  ;;  %v10483_v40 = vadd.f32 %v3285_v41, %v3133_v29  ;;  %v13182_v29 = vld [vmem:[#allocation113_spill] sm:$0xff]  ;;  %v10514_v52 = vpop.f32.mrf.mxu1  ;;  %v13183_v50 = vld [vmem:[#allocation36_spill] sm:$0xff] }
 0x44e   : > { %v3349_v42 = vadd.f32 %v13182_v29, %v10365_v56  ;;  %v13189_v29 = vld [vmem:[#allocation97_spill] sm:$0xff] }
 0x450   : > { %v3448_v41 = vadd.f32 %v13183_v50, %v3349_v42 }
 0x451   : > { %3629 = vmatmul.f32.gmra.mxu2 %v9859_v32  ;;  %3707 = vmatmul.f32.gmra.mxu3 %v9826_v54  ;;  %v3345_v54 = vadd.f32 %v10154_v31, %v10358_v16 }
 0x453   : > { %v3443_v20 = vadd.f32 %v13179_v9, %v3345_v54 }
 0x454   : > { %v3146_v10 = vpop.f32.mrf.mxu2  ;;  %v3288_v14 = vpop.f32.mrf.mxu3 }
 0x455   : > { %v3147_v60 = vadd.f32 %v3146_v10, %v3002_v35  ;;  %v10494_v19 = vadd.f32 %v3288_v14, %v3140_v21  ;;  %v13185_v35 = vand.u32 4294901760, %v13180_v27 }
 0x459   : > { %3710 = vmatmul.f32.gmra.mxu3 %v9859_v32  ;;  %4278 = vmatmul.f32.vlgmr.msrb.gmra.mxu2 %v13178_v7  ;;  %v10527_v7 = vpop.f32.mrf.mxu0 }
 0x45c   : > { %v3291_v13 = vpop.f32.mrf.mxu3  ;;  %v3585_v5 = vpop.f32.mrf.mxu2 }
 0x45d   : > { %v10504_v62 = vadd.f32 %v3291_v13, %v3147_v60  ;;  %v3586_v32 = vadd.f32 %v3585_v5, %v3443_v20  ;;  %v13186_v13 = vld [vmem:[#allocation14_spill] sm:$0xff]  ;;  %v10534_v20 = vpop.f32.mrf.mxu1 }
 0x45e   : > { %v3353_v5 = vadd.f32 %v13186_v13, %v10372_v36  ;;  %v13190_v36 = vand.u32 4294901760, %v13184_v26 }
 0x461   : > { %4283 = vmatmul.f32.gmra.mxu2 %v13180_v27  ;;  %4472 = vmatmul.f32.vlgmr.msrb.gmra.mxu3 %v13181_v61 }
 0x464   : > { %v3588_v58 = vpop.f32.mrf.mxu2  ;;  %v3666_v6 = vpop.f32.mrf.mxu3 }
 0x465   : > { %v3667_v31 = vadd.f32 %v3666_v6, %v3586_v32  ;;  %v3589_v10 = vadd.f32 %v3588_v58, %v3448_v41  ;;  %v13188_v32 = vld [vmem:[#allocation116_spill] sm:$0xff] }
 0x466   : > { %v3453_v58 = vadd.f32 %v13188_v32, %v3353_v5  ;;  %v10552_v5 = vpop.f32.mrf.mxu0 }
 0x467   : > { %v10516_v16 = vand.u32 4294901760, %v3667_v31 }
 0x469   : > { %v10520_v21 = vsub.f32 %v3667_v31, %v10516_v16  ;;  %4164 = vmatmul.f32.gmra.mxu1 %v10516_v16  ;;  %4288 = vmatmul.f32.gmra.mxu2 %v13184_v26  ;;  %v10556_v26 = vpop.f32.mrf.mxu1 }
 0x46a   : > { %4478 = vmatmul.f32.gmra.mxu3 %v13185_v35  ;;  %v13191_v35 = vld [vmem:[#allocation50_spill] sm:$0xff] }
 0x46b   : > { %v12510_v56 = vand.u32 4294901760, %v10520_v21 }
 0x46c   : > { %v3591_v14 = vpop.f32.mrf.mxu2  ;;  %v3669_v60 = vpop.f32.mrf.mxu3 }
 0x46d   : > { %v3670_v54 = vadd.f32 %v3669_v60, %v3589_v10  ;;  %v3877_v9 = vsub.f32 %v10520_v21, %v12510_v56  ;;  %v3592_v42 = vadd.f32 %v3591_v14, %v3453_v58  ;;  %v3357_v10 = vadd.f32 %v13191_v35, %v10381_v59  ;;  %v13193_v14 = vld [vmem:[#allocation40_spill] sm:$0xff]  ;;  %v13194_v59 = vld [vmem:[#allocation26_spill] sm:$0xff] }
 0x46e   : > { %v13195_v58 = vand.u32 4294901760, %v13189_v29  ;;  %v10574_v56 = vpop.f32.mrf.mxu0 }
 0x46f   : > { %v10536_v61 = vand.u32 4294901760, %v3670_v54  ;;  %v3878_v27 = vand.u32 4294901760, %v3877_v9 }
 0x471   : > { %13187 = vst [vmem:[#allocation52_spill] sm:$0xff] %v10536_v61  ;;  %v10540_v6 = vsub.f32 %v3670_v54, %v10536_v61  ;;  %3879 = vmatmul.f32.gmra.mxu0 %v3878_v27  ;;  %4168 = vmatmul.f32.gmra.mxu1 %v10536_v61  ;;  %v3458_v27 = vadd.f32 %v13193_v14, %v3357_v10 }
 0x472   : > { %4293 = vmatmul.f32.gmra.mxu2 %v13189_v29  ;;  %4484 = vmatmul.f32.gmra.mxu3 %v13190_v36  ;;  %v13198_v29 = vld [vmem:[#allocation44_spill] sm:$0xff] }
 0x473   : > { %v12509_v31 = vand.u32 4294901760, %v10540_v6 }
 0x474   : > { %v3594_v50 = vpop.f32.mrf.mxu2  ;;  %v3672_v41 = vpop.f32.mrf.mxu3 }
 0x475   : > { %v3673_v60 = vadd.f32 %v3672_v41, %v3592_v42  ;;  %v3885_v13 = vsub.f32 %v10540_v6, %v12509_v31  ;;  %v3595_v36 = vadd.f32 %v3594_v50, %v3458_v27  ;;  %v13199_v27 = vld [vmem:[#allocation110_spill] sm:$0xff] }
 0x477   : > { %v10554_v54 = vand.u32 4294901760, %v3673_v60  ;;  %v3886_v9 = vand.u32 4294901760, %v3885_v13  ;;  %v13196_v13 = vld [vmem:[#allocation53_spill] sm:$0xff] }
 0x478   : > { %v3361_v31 = vadd.f32 %v13196_v13, %v10392_v28  ;;  %v13200_v28 = vand.u32 4294901760, %v13194_v59 }
 0x479   : > { %13192 = vst [vmem:[#allocation47_spill] sm:$0xff] %v10554_v54  ;;  %v10560_v32 = vsub.f32 %v3673_v60, %v10554_v54  ;;  %3887 = vmatmul.f32.gmra.mxu0 %v3886_v9  ;;  %4172 = vmatmul.f32.gmra.mxu1 %v10554_v54 }
 0x47a   : > { %4298 = vmatmul.f32.gmra.mxu2 %v13194_v59  ;;  %4490 = vmatmul.f32.gmra.mxu3 %v13195_v58  ;;  %v3463_v58 = vadd.f32 %v13198_v29, %v3361_v31  ;;  %v3365_v31 = vadd.f32 %v10297_v55, %v10403_v34  ;;  %v13202_v59 = vld [vmem:[#allocation24_spill] sm:$0xff]  ;;  %v13204_v55 = vand.u32 4294901760, %v13199_v27  ;;  %v10602_v34 = vpop.f32.mrf.mxu0 }
 0x47b   : > { %v12511_v42 = vand.u32 4294901760, %v10560_v32 }
 0x47c   : > { %v3597_v41 = vpop.f32.mrf.mxu2  ;;  %v3675_v35 = vpop.f32.mrf.mxu3 }
 0x47d   : > { %v3676_v10 = vadd.f32 %v3675_v35, %v3595_v36  ;;  %v3893_v60 = vsub.f32 %v10560_v32, %v12511_v42  ;;  %v10584_v36 = vpop.f32.mrf.mxu1  ;;  %v3598_v35 = vadd.f32 %v3597_v41, %v3463_v58  ;;  %v13203_v41 = vld [vmem:[#allocation111_spill] sm:$0xff] }
 0x47f   : > { %v10572_v9 = vand.u32 4294901760, %v3676_v10  ;;  %v3894_v14 = vand.u32 4294901760, %v3893_v60 }
 0x481   : > { %13197 = vst [vmem:[#allocation45_spill] sm:$0xff] %v10572_v9  ;;  %v10578_v50 = vsub.f32 %v3676_v10, %v10572_v9  ;;  %3895 = vmatmul.f32.gmra.mxu0 %v3894_v14  ;;  %4176 = vmatmul.f32.gmra.mxu1 %v10572_v9 }
 0x482   : > { %4303 = vmatmul.f32.gmra.mxu2 %v13199_v27  ;;  %4496 = vmatmul.f32.gmra.mxu3 %v13200_v28  ;;  %v3468_v28 = vadd.f32 %v13202_v59, %v3365_v31  ;;  %v3369_v31 = vadd.f32 %v10328_v25, %v10414_v63  ;;  %v13208_v25 = vand.u32 4294901760, %v13203_v41  ;;  %v10623_v61 = vpop.f32.mrf.mxu0 }
 0x483   : > { %v12516_v13 = vand.u32 4294901760, %v10578_v50 }
 0x484   : > { %v3600_v60 = vpop.f32.mrf.mxu2  ;;  %v3678_v42 = vpop.f32.mrf.mxu3 }
 0x485   : > { %v3679_v10 = vadd.f32 %v3678_v42, %v3598_v35  ;;  %v3901_v14 = vsub.f32 %v10578_v50, %v12516_v13  ;;  %v3601_v42 = vadd.f32 %v3600_v60, %v3468_v28  ;;  %v10605_v13 = vpop.f32.mrf.mxu1  ;;  %v13207_v28 = vld [vmem:[#allocation42_spill] sm:$0xff] }
 0x487   : > { %v10592_v29 = vand.u32 4294901760, %v3679_v10  ;;  %v3902_v9 = vand.u32 4294901760, %v3901_v14 }
 0x489   : > { %13201 = vst [vmem:[#allocation100_spill] sm:$0xff] %v10592_v29  ;;  %v10596_v54 = vsub.f32 %v3679_v10, %v10592_v29  ;;  %3903 = vmatmul.f32.gmra.mxu0 %v3902_v9  ;;  %4180 = vmatmul.f32.gmra.mxu1 %v10592_v29 }
 0x48a   : > { %4308 = vmatmul.f32.gmra.mxu2 %v13203_v41  ;;  %4502 = vmatmul.f32.gmra.mxu3 %v13204_v55  ;;  %v13206_v55 = vld [vmem:[#allocation99_spill] sm:$0xff] }
 0x48b   : > { %v12519_v58 = vand.u32 4294901760, %v10596_v54  ;;  %v3473_v29 = vadd.f32 %v13206_v55, %v3369_v31  ;;  %v3373_v31 = vadd.f32 %v10342_v38, %v10423_v23  ;;  %v13212_v38 = vand.u32 4294901760, %v13207_v28 }
 0x48c   : > { %v3603_v35 = vpop.f32.mrf.mxu2  ;;  %v3681_v14 = vpop.f32.mrf.mxu3 }
 0x48d   : > { %v3682_v9 = vadd.f32 %v3681_v14, %v3601_v42  ;;  %v3909_v10 = vsub.f32 %v10596_v54, %v12519_v58  ;;  %v3604_v63 = vadd.f32 %v3603_v35, %v3473_v29  ;;  %v13210_v29 = vld [vmem:[#allocation25_spill] sm:$0xff] }
 0x48e   : > { %v3478_v35 = vadd.f32 %v13210_v29, %v3373_v31 }
 0x48f   : > { %v10612_v59 = vand.u32 4294901760, %v3682_v9  ;;  %v3910_v27 = vand.u32 4294901760, %v3909_v10 }
 0x491   : > { %13205 = vst [vmem:[#allocation81_spill] sm:$0xff] %v10612_v59  ;;  %v10616_v60 = vsub.f32 %v3682_v9, %v10612_v59  ;;  %3911 = vmatmul.f32.gmra.mxu0 %v3910_v27  ;;  %4184 = vmatmul.f32.gmra.mxu1 %v10612_v59  ;;  %v10630_v27 = vpop.f32.mrf.mxu1  ;;  %v13211_v59 = vld [vmem:[#allocation94_spill] sm:$0xff] }
 0x492   : > { %4313 = vmatmul.f32.gmra.mxu2 %v13207_v28  ;;  %4508 = vmatmul.f32.gmra.mxu3 %v13208_v25  ;;  %13209 = vst [vmem:[#allocation55_spill] sm:$0xff] %v10630_v27 }
 0x493   : > { %v12524_v42 = vand.u32 4294901760, %v10616_v60 }
 0x494   : > { %v3606_v14 = vpop.f32.mrf.mxu2  ;;  %v3684_v58 = vpop.f32.mrf.mxu3 }
 0x495   : > { %v3685_v9 = vadd.f32 %v3684_v58, %v3604_v63  ;;  %v3917_v10 = vsub.f32 %v10616_v60, %v12524_v42  ;;  %v3607_v23 = vadd.f32 %v3606_v14, %v3478_v35 }
 0x497   : > { %v10632_v55 = vand.u32 4294901760, %v3685_v9  ;;  %v3918_v41 = vand.u32 4294901760, %v3917_v10  ;;  %v3377_v10 = vadd.f32 %v10385_v37, %v10432_v2  ;;  %v13214_v37 = vld [vmem:[#allocation101_spill] sm:$0xff]  ;;  %v13215_v2 = vand.u32 4294901760, %v13211_v59 }
 0x499   : > { %v10636_v25 = vsub.f32 %v3685_v9, %v10632_v55  ;;  %3919 = vmatmul.f32.gmra.mxu0 %v3918_v41  ;;  %4188 = vmatmul.f32.gmra.mxu1 %v10632_v55  ;;  %v10648_v41 = vpop.f32.mrf.mxu0  ;;  %v10652_v28 = vpop.f32.mrf.mxu1  ;;  %v3483_v14 = vadd.f32 %v10376_v57, %v3377_v10 }
 0x49a   : > { %4318 = vmatmul.f32.gmra.mxu2 %v13211_v59  ;;  %4514 = vmatmul.f32.gmra.mxu3 %v13212_v38  ;;  %13213 = vst [vmem:[#allocation51_spill] sm:$0xff] %v10652_v28 }
 0x49b   : > { %v12525_v58 = vand.u32 4294901760, %v10636_v25 }
 0x49c   : > { %v3609_v63 = vpop.f32.mrf.mxu2  ;;  %v3687_v42 = vpop.f32.mrf.mxu3 }
 0x49d   : > { %v3688_v31 = vadd.f32 %v3687_v42, %v3607_v23  ;;  %v3925_v9 = vsub.f32 %v10636_v25, %v12525_v58  ;;  %v3610_v42 = vadd.f32 %v3609_v63, %v3483_v14  ;;  %v3381_v58 = vadd.f32 %v10396_v11, %v10443_v49  ;;  %v13216_v14 = vld [vmem:[#allocation96_spill] sm:$0xff] }
 0x49e   : > { %v13217_v11 = vand.u32 4294901760, %v13214_v37 }
 0x49f   : > { %v10650_v29 = vand.u32 4294901760, %v3688_v31  ;;  %v3926_v27 = vand.u32 4294901760, %v3925_v9  ;;  %v3488_v59 = vadd.f32 %v10387_v46, %v3381_v58  ;;  %v3385_v46 = vadd.f32 %v10409_v53, %v10454_v24 }
 0x4a0   : > { %v13219_v53 = vand.u32 4294901760, %v13216_v14 }
 0x4a1   : > { %v10656_v35 = vsub.f32 %v3688_v31, %v10650_v29  ;;  %3927 = vmatmul.f32.gmra.mxu0 %v3926_v27  ;;  %4192 = vmatmul.f32.gmra.mxu1 %v10650_v29  ;;  %v10670_v28 = vpop.f32.mrf.mxu0  ;;  %v10680_v49 = vpop.f32.mrf.mxu1 }
 0x4a2   : > { %4323 = vmatmul.f32.gmra.mxu2 %v13214_v37  ;;  %4520 = vmatmul.f32.gmra.mxu3 %v13215_v2  ;;  %v3493_v37 = vadd.f32 %v10400_v22, %v3385_v46  ;;  %v3389_v22 = vadd.f32 %v10421_v12, %v10465_v44 }
 0x4a3   : > { %v12526_v38 = vand.u32 4294901760, %v10656_v35 }
 0x4a4   : > { %v3612_v23 = vpop.f32.mrf.mxu2  ;;  %v3690_v9 = vpop.f32.mrf.mxu3 }
 0x4a5   : > { %v3691_v57 = vadd.f32 %v3690_v9, %v3610_v42  ;;  %v3933_v27 = vsub.f32 %v10656_v35, %v12526_v38  ;;  %v3613_v2 = vadd.f32 %v3612_v23, %v3488_v59  ;;  %v13218_v23 = vld [vmem:[#allocation19_spill] sm:$0xff] }
 0x4a6   : > { %v13222_v12 = vand.u32 4294901760, %v13218_v23 }
 0x4a7   : > { %v10668_v10 = vand.u32 4294901760, %v3691_v57  ;;  %v3934_v31 = vand.u32 4294901760, %v3933_v27 }
 0x4a9   : > { %v10674_v63 = vsub.f32 %v3691_v57, %v10668_v10  ;;  %3935 = vmatmul.f32.gmra.mxu0 %v3934_v31  ;;  %4196 = vmatmul.f32.gmra.mxu1 %v10668_v10  ;;  %v10698_v24 = vpop.f32.mrf.mxu0 }
 0x4aa   : > { %4328 = vmatmul.f32.gmra.mxu2 %v13216_v14  ;;  %4526 = vmatmul.f32.gmra.mxu3 %v13217_v11 }
 0x4ab   : > { %v12527_v42 = vand.u32 4294901760, %v10674_v63 }
 0x4ac   : > { %v3615_v9 = vpop.f32.mrf.mxu2  ;;  %v3693_v27 = vpop.f32.mrf.mxu3 }
 0x4ad   : > { %v3694_v58 = vadd.f32 %v3693_v27, %v3613_v2  ;;  %v3941_v57 = vsub.f32 %v10674_v63, %v12527_v42  ;;  %v3616_v59 = vadd.f32 %v3615_v9, %v3493_v37  ;;  %v10701_v42 = vpop.f32.mrf.mxu1  ;;  %v13221_v37 = vld [vmem:[#allocation17_spill] sm:$0xff] }
 0x4ae   : > { %13220 = vst [vmem:[#allocation69_spill] sm:$0xff] %v10701_v42 }
 0x4af   : > { %v10688_v31 = vand.u32 4294901760, %v3694_v58  ;;  %v3942_v38 = vand.u32 4294901760, %v3941_v57 }
 0x4b1   : > { %v10692_v11 = vsub.f32 %v3694_v58, %v10688_v31  ;;  %3943 = vmatmul.f32.gmra.mxu0 %v3942_v38  ;;  %4200 = vmatmul.f32.gmra.mxu1 %v10688_v31  ;;  %v10719_v42 = vpop.f32.mrf.mxu0 }
 0x4b2   : > { %4333 = vmatmul.f32.gmra.mxu2 %v13218_v23  ;;  %4532 = vmatmul.f32.gmra.mxu3 %v13219_v53  ;;  %v3498_v53 = vadd.f32 %v10412_v17, %v3389_v22  ;;  %v3393_v17 = vadd.f32 %v10436_v43, %v10474_v15  ;;  %v13225_v43 = vand.u32 4294901760, %v13221_v37 }
 0x4b3   : > { %v12528_v2 = vand.u32 4294901760, %v10692_v11 }
 0x4b4   : > { %v3618_v27 = vpop.f32.mrf.mxu2  ;;  %v3696_v57 = vpop.f32.mrf.mxu3 }
 0x4b5   : > { %v3697_v38 = vadd.f32 %v3696_v57, %v3616_v59  ;;  %v3949_v46 = vsub.f32 %v10692_v11, %v12528_v2  ;;  %v3619_v44 = vadd.f32 %v3618_v27, %v3498_v53  ;;  %v3503_v27 = vadd.f32 %v10427_v48, %v3393_v17 }
 0x4b7   : > { %v10708_v58 = vand.u32 4294901760, %v3697_v38  ;;  %v3950_v14 = vand.u32 4294901760, %v3949_v46  ;;  %v10726_v46 = vpop.f32.mrf.mxu1 }
 0x4b8   : > { %13223 = vst [vmem:[#allocation102_spill] sm:$0xff] %v10726_v46 }
 0x4b9   : > { %v10712_v9 = vsub.f32 %v3697_v38, %v10708_v58  ;;  %3951 = vmatmul.f32.gmra.mxu0 %v3950_v14  ;;  %4204 = vmatmul.f32.gmra.mxu1 %v10708_v58 }
 0x4ba   : > { %4338 = vmatmul.f32.gmra.mxu2 %v13221_v37  ;;  %4538 = vmatmul.f32.gmra.mxu3 %v13222_v12  ;;  %v13224_v12 = vld [vmem:[#allocation39_spill] sm:$0xff] }
 0x4bb   : > { %v12529_v59 = vand.u32 4294901760, %v10712_v9 }
 0x4bc   : > { %v3621_v57 = vpop.f32.mrf.mxu2  ;;  %v3699_v2 = vpop.f32.mrf.mxu3 }
 0x4bd   : > { %v3700_v22 = vadd.f32 %v3699_v2, %v3619_v44  ;;  %v3957_v38 = vsub.f32 %v10712_v9, %v12529_v59  ;;  %v3622_v15 = vadd.f32 %v3621_v57, %v3503_v27 }
 0x4bf   : > { %v10728_v14 = vand.u32 4294901760, %v3700_v22  ;;  %v3958_v23 = vand.u32 4294901760, %v3957_v38  ;;  %v3397_v38 = vadd.f32 %v10447_v51, %v10483_v40  ;;  %v10748_v37 = vpop.f32.mrf.mxu1  ;;  %v13227_v51 = vld [vmem:[#allocation48_spill] sm:$0xff]  ;;  %v13228_v40 = vand.u32 4294901760, %v13224_v12 }
 0x4c0   : > { %13226 = vst [vmem:[#allocation30_spill] sm:$0xff] %v10748_v37 }
 0x4c1   : > { %v10732_v53 = vsub.f32 %v3700_v22, %v10728_v14  ;;  %3959 = vmatmul.f32.gmra.mxu0 %v3958_v23  ;;  %4208 = vmatmul.f32.gmra.mxu1 %v10728_v14  ;;  %v10744_v22 = vpop.f32.mrf.mxu0  ;;  %v3508_v57 = vadd.f32 %v10438_v3, %v3397_v38 }
 0x4c2   : > { %4343 = vmatmul.f32.gmra.mxu2 %v13224_v12  ;;  %4544 = vmatmul.f32.gmra.mxu3 %v13225_v43 }
 0x4c3   : > { %v12530_v2 = vand.u32 4294901760, %v10732_v53 }
 0x4c4   : > { %v3624_v44 = vpop.f32.mrf.mxu2  ;;  %v3702_v59 = vpop.f32.mrf.mxu3 }
 0x4c5   : > { %v3703_v48 = vadd.f32 %v3702_v59, %v3622_v15  ;;  %v3965_v17 = vsub.f32 %v10732_v53, %v12530_v2  ;;  %v3625_v59 = vadd.f32 %v3624_v44, %v3508_v57  ;;  %v3401_v2 = vadd.f32 %v10460_v1, %v10494_v19  ;;  %v13229_v57 = vld [vmem:[#allocation106_spill] sm:$0xff] }
 0x4c6   : > { %v13230_v1 = vand.u32 4294901760, %v13227_v51 }
 0x4c7   : > { %v10746_v23 = vand.u32 4294901760, %v3703_v48  ;;  %v3966_v46 = vand.u32 4294901760, %v3965_v17  ;;  %v3513_v12 = vadd.f32 %v10451_v0, %v3401_v2  ;;  %v10776_v19 = vpop.f32.mrf.mxu1  ;;  %v3405_v0 = vadd.f32 %v10472_v30, %v10504_v62 }
 0x4c8   : > { %v13231_v30 = vand.u32 4294901760, %v13229_v57 }
 0x4c9   : > { %v10752_v27 = vsub.f32 %v3703_v48, %v10746_v23  ;;  %3967 = vmatmul.f32.gmra.mxu0 %v3966_v46  ;;  %4212 = vmatmul.f32.gmra.mxu1 %v10746_v23  ;;  %v10766_v37 = vpop.f32.mrf.mxu0 }
 0x4ca   : > { %4348 = vmatmul.f32.gmra.mxu2 %v13227_v51  ;;  %4550 = vmatmul.f32.gmra.mxu3 %v13228_v40  ;;  %v3518_v51 = vadd.f32 %v10463_v8, %v3405_v0 }
 0x4cb   : > { %v12531_v43 = vand.u32 4294901760, %v10752_v27 }
 0x4cc   : > { %v3627_v15 = vpop.f32.mrf.mxu2  ;;  %v3705_v17 = vpop.f32.mrf.mxu3 }
 0x4cd   : > { %v3706_v3 = vadd.f32 %v3705_v17, %v3625_v59  ;;  %v3973_v46 = vsub.f32 %v10752_v27, %v12531_v43  ;;  %v3628_v40 = vadd.f32 %v3627_v15, %v3513_v12 }
 0x4cf   : > { %v10764_v38 = vand.u32 4294901760, %v3706_v3  ;;  %v3974_v48 = vand.u32 4294901760, %v3973_v46 }
 0x4d1   : > { %v10770_v44 = vsub.f32 %v3706_v3, %v10764_v38  ;;  %3975 = vmatmul.f32.gmra.mxu0 %v3974_v48  ;;  %4216 = vmatmul.f32.gmra.mxu1 %v10764_v38  ;;  %v10794_v62 = vpop.f32.mrf.mxu0 }
 0x4d2   : > { %4353 = vmatmul.f32.gmra.mxu2 %v13229_v57  ;;  %4556 = vmatmul.f32.gmra.mxu3 %v13230_v1  ;;  %v4102_v57 = vadd.f32 %v10478_v4, %v10485_v45 }
 0x4d3   : > { %v12533_v59 = vand.u32 4294901760, %v10770_v44 }
 0x4d4   : > { %v3630_v17 = vpop.f32.mrf.mxu2  ;;  %v3708_v46 = vpop.f32.mrf.mxu3 }
 0x4d5   : > { %v3709_v2 = vadd.f32 %v3708_v46, %v3628_v40  ;;  %v3981_v3 = vsub.f32 %v10770_v44, %v12533_v59  ;;  %v3631_v15 = vadd.f32 %v3630_v17, %v3518_v51  ;;  %v13232_v17 = vand.u32 4294901760, %v10520_v21  ;;  %v13234_v59 = vld [vmem:[#allocation74_spill] sm:$0xff] }
 0x4d7   : > { %v10784_v48 = vand.u32 4294901760, %v3709_v2  ;;  %v3982_v43 = vand.u32 4294901760, %v3981_v3 }
 0x4d9   : > { %v10788_v1 = vsub.f32 %v3709_v2, %v10784_v48  ;;  %3983 = vmatmul.f32.gmra.mxu0 %v3982_v43  ;;  %4220 = vmatmul.f32.gmra.mxu1 %v10784_v48  ;;  %v10800_v43 = vpop.f32.mrf.mxu1  ;;  %v10819_v45 = vpop.f32.mrf.mxu0 }
 0x4da   : > { %4358 = vmatmul.f32.gmra.mxu2 %v10520_v21  ;;  %4562 = vmatmul.f32.gmra.mxu3 %v13231_v30  ;;  %v4106_v21 = vadd.f32 %v10489_v18, %v10496_v33  ;;  %v4110_v18 = vadd.f32 %v10500_v47, %v10510_v39  ;;  %v13237_v33 = vand.u32 4294901760, %v10560_v32  ;;  %v4114_v47 = vadd.f32 %v10514_v52, %v10527_v7 }
 0x4db   : > { %v12532_v12 = vand.u32 4294901760, %v10788_v1  ;;  %v13239_v39 = vand.u32 4294901760, %v10578_v50  ;;  %v4118_v52 = vadd.f32 %v10534_v20, %v10552_v5  ;;  %v13241_v7 = vand.u32 4294901760, %v10596_v54 }
 0x4dc   : > { %v3711_v40 = vpop.f32.mrf.mxu3  ;;  %v4279_v46 = vpop.f32.mrf.mxu2  ;;  %v4122_v20 = vadd.f32 %v10556_v26, %v10574_v56  ;;  %v13243_v5 = vand.u32 4294901760, %v10616_v60  ;;  %v4126_v56 = vadd.f32 %v10584_v36, %v10602_v34  ;;  %v13245_v26 = vand.u32 4294901760, %v10636_v25 }
 0x4dd   : > { %v3712_v3 = vadd.f32 %v3711_v40, %v3631_v15  ;;  %v3989_v8 = vsub.f32 %v10788_v1, %v12532_v12  ;;  %v4280_v51 = vadd.f32 %v4279_v46, %v4102_v57  ;;  %v4130_v36 = vadd.f32 %v10605_v13, %v10623_v61 }
 0x4de   : > { %v13247_v34 = vand.u32 4294901760, %v10656_v35  ;;  %v13250_v61 = vand.u32 4294901760, %v10674_v63 }
 0x4df   : > { %v10802_v0 = vand.u32 4294901760, %v3712_v3  ;;  %v3990_v2 = vand.u32 4294901760, %v3989_v8 }
 0x4e1   : > { %v10807_v30 = vsub.f32 %v3712_v3, %v10802_v0  ;;  %3991 = vmatmul.f32.gmra.mxu0 %v3990_v2  ;;  %4224 = vmatmul.f32.gmra.mxu1 %v10802_v0 }
 0x4e2   : > { %4363 = vmatmul.f32.gmra.mxu2 %v10540_v6  ;;  %4568 = vmatmul.f32.gmra.mxu3 %v13232_v17 }
 0x4e3   : > { %v12534_v15 = vand.u32 4294901760, %v10807_v30 }
 0x4e4   : > { %v4284_v40 = vpop.f32.mrf.mxu2  ;;  %v4473_v12 = vpop.f32.mrf.mxu3 }
 0x4e5   : > { %v10814_v8 = vadd.f32 %v4473_v12, %v4280_v51  ;;  %v3997_v4 = vsub.f32 %v10807_v30, %v12534_v15  ;;  %v13235_v12 = vand.u32 4294901760, %v10540_v6  ;;  %v4285_v46 = vadd.f32 %v4284_v40, %v4106_v21 }
 0x4e6   : > { %v10821_v3 = vpop.f32.mrf.mxu1 }
 0x4e7   : > { %13233 = vst [vmem:[#allocation58_spill] sm:$0xff] %v10821_v3  ;;  %v3998_v2 = vand.u32 4294901760, %v3997_v4  ;;  %v13236_v4 = vld [vmem:[#allocation64_spill] sm:$0xff] }
 0x4e9   : > { %3999 = vmatmul.f32.gmra.mxu0 %v3998_v2  ;;  %4888 = vmatmul.f32.vlgmr.msra.gmra.mxu1 %v13234_v59 }
 0x4ea   : > { %4368 = vmatmul.f32.gmra.mxu2 %v10560_v32  ;;  %4574 = vmatmul.f32.gmra.mxu3 %v13235_v12 }
 0x4ec   : > { %v4289_v57 = vpop.f32.mrf.mxu2 }
 0x4ed   : > { %v4479_v17 = vpop.f32.mrf.mxu3  ;;  %v4290_v6 = vadd.f32 %v4289_v57, %v4110_v18 }
 0x4ee   : > { %v10829_v51 = vadd.f32 %v4479_v17, %v4285_v46  ;;  %v10831_v15 = vpop.f32.mrf.mxu0  ;;  %v10833_v3 = vpop.f32.mrf.mxu1 }
 0x4f1   : > { %4727 = vmatmul.f32.vlgmr.msra.gmra.mxu0 %v13234_v59  ;;  %4892 = vmatmul.f32.gmra.mxu1 %v13236_v4  ;;  %v13238_v59 = vld [vmem:[#allocation89_spill] sm:$0xff] }
 0x4f2   : > { %4373 = vmatmul.f32.gmra.mxu2 %v10578_v50  ;;  %4580 = vmatmul.f32.gmra.mxu3 %v13237_v33 }
 0x4f5   : > { %v4294_v40 = vpop.f32.mrf.mxu2  ;;  %v4485_v2 = vpop.f32.mrf.mxu3 }
 0x4f6   : > { %v10842_v21 = vadd.f32 %v4485_v2, %v4290_v6  ;;  %v10844_v12 = vpop.f32.mrf.mxu0  ;;  %v10846_v46 = vpop.f32.mrf.mxu1  ;;  %v4295_v32 = vadd.f32 %v4294_v40, %v4114_v47 }
 0x4f9   : > { %4731 = vmatmul.f32.gmra.mxu0 %v13236_v4  ;;  %4896 = vmatmul.f32.gmra.mxu1 %v13238_v59  ;;  %v13240_v4 = vld [vmem:[#allocation79_spill] sm:$0xff] }
 0x4fa   : > { %4378 = vmatmul.f32.gmra.mxu2 %v10596_v54  ;;  %4586 = vmatmul.f32.gmra.mxu3 %v13239_v39 }
 0x4fd   : > { %v4299_v57 = vpop.f32.mrf.mxu2  ;;  %v4491_v17 = vpop.f32.mrf.mxu3 }
 0x4fe   : > { %v10855_v18 = vadd.f32 %v4491_v17, %v4295_v32  ;;  %v10857_v33 = vpop.f32.mrf.mxu0  ;;  %v10859_v6 = vpop.f32.mrf.mxu1  ;;  %v4300_v50 = vadd.f32 %v4299_v57, %v4118_v52 }
 0x501   : > { %4735 = vmatmul.f32.gmra.mxu0 %v13238_v59  ;;  %4900 = vmatmul.f32.gmra.mxu1 %v13240_v4  ;;  %v13242_v59 = vld [vmem:[#allocation77_spill] sm:$0xff] }
 0x502   : > { %4383 = vmatmul.f32.gmra.mxu2 %v10616_v60  ;;  %4592 = vmatmul.f32.gmra.mxu3 %v13241_v7 }
 0x505   : > { %v4304_v40 = vpop.f32.mrf.mxu2  ;;  %v4497_v2 = vpop.f32.mrf.mxu3 }
 0x506   : > { %v10868_v47 = vadd.f32 %v4497_v2, %v4300_v50  ;;  %v10870_v39 = vpop.f32.mrf.mxu0  ;;  %v10872_v32 = vpop.f32.mrf.mxu1  ;;  %v4305_v54 = vadd.f32 %v4304_v40, %v4122_v20 }
 0x509   : > { %4739 = vmatmul.f32.gmra.mxu0 %v13240_v4  ;;  %4904 = vmatmul.f32.gmra.mxu1 %v13242_v59  ;;  %v13244_v4 = vld [vmem:[#allocation90_spill] sm:$0xff] }
 0x50a   : > { %4388 = vmatmul.f32.gmra.mxu2 %v10636_v25  ;;  %4598 = vmatmul.f32.gmra.mxu3 %v13243_v5 }
 0x50d   : > { %v4503_v57 = vpop.f32.mrf.mxu3  ;;  %v4309_v50 = vpop.f32.mrf.mxu2 }
 0x50e   : > { %v10881_v17 = vadd.f32 %v4503_v57, %v4305_v54  ;;  %v10883_v52 = vpop.f32.mrf.mxu0  ;;  %v10885_v7 = vpop.f32.mrf.mxu1  ;;  %v4310_v60 = vadd.f32 %v4309_v50, %v4126_v56 }
 0x511   : > { %4743 = vmatmul.f32.gmra.mxu0 %v13242_v59  ;;  %4908 = vmatmul.f32.gmra.mxu1 %v13244_v4  ;;  %v13246_v59 = vld [vmem:[#allocation82_spill] sm:$0xff] }
 0x512   : > { %4393 = vmatmul.f32.gmra.mxu2 %v10656_v35  ;;  %4604 = vmatmul.f32.gmra.mxu3 %v13245_v26 }
 0x515   : > { %v4509_v40 = vpop.f32.mrf.mxu3  ;;  %v4314_v54 = vpop.f32.mrf.mxu2 }
 0x516   : > { %v10894_v2 = vadd.f32 %v4509_v40, %v4310_v60  ;;  %v10896_v20 = vpop.f32.mrf.mxu0  ;;  %v10898_v5 = vpop.f32.mrf.mxu1  ;;  %v4315_v25 = vadd.f32 %v4314_v54, %v4130_v36  ;;  %v13252_v60 = vld [vmem:[#allocation80_spill] sm:$0xff]  ;;  %v13253_v40 = vand.u32 4294901760, %v10692_v11  ;;  %v13257_v36 = vand.u32 4294901760, %v10712_v9 }
 0x519   : > { %4747 = vmatmul.f32.gmra.mxu0 %v13244_v4  ;;  %4912 = vmatmul.f32.gmra.mxu1 %v13246_v59  ;;  %v13249_v4 = vld [vmem:[#allocation92_spill] sm:$0xff] }
 0x51a   : > { %4398 = vmatmul.f32.gmra.mxu2 %v10674_v63  ;;  %4610 = vmatmul.f32.gmra.mxu3 %v13247_v34  ;;  %v13256_v63 = vld [vmem:[#allocation91_spill] sm:$0xff] }
 0x51d   : > { %v4515_v57 = vpop.f32.mrf.mxu3 }
 0x51e   : > { %v10907_v50 = vadd.f32 %v4515_v57, %v4315_v25  ;;  %v10909_v56 = vpop.f32.mrf.mxu0  ;;  %v10911_v26 = vpop.f32.mrf.mxu1  ;;  %v13261_v57 = vand.u32 4294901760, %v10732_v53 }
 0x51f   : > { %13248 = vst [vmem:[#allocation54_spill] sm:$0xff] %v10911_v26 }
 0x521   : > { %4751 = vmatmul.f32.gmra.mxu0 %v13246_v59  ;;  %4916 = vmatmul.f32.gmra.mxu1 %v13249_v4 }
 0x522   : > { %4403 = vmatmul.f32.gmra.mxu2 %v10692_v11  ;;  %4616 = vmatmul.f32.gmra.mxu3 %v13250_v61  ;;  %v13260_v11 = vld [vmem:[#allocation84_spill] sm:$0xff] }
 0x526   : > { %v10918_v13 = vpop.f32.mrf.mxu0  ;;  %v10920_v35 = vpop.f32.mrf.mxu1 }
 0x527   : > { %13251 = vst [vmem:[#allocation75_spill] sm:$0xff] %v10920_v35 }
 0x529   : > { %4755 = vmatmul.f32.gmra.mxu0 %v13249_v4  ;;  %4920 = vmatmul.f32.gmra.mxu1 %v13252_v60 }
 0x52a   : > { %4408 = vmatmul.f32.gmra.mxu2 %v10712_v9  ;;  %4622 = vmatmul.f32.gmra.mxu3 %v13253_v40  ;;  %v13264_v9 = vld [vmem:[#allocation117_spill] sm:$0xff] }
 0x52e   : > { %v10927_v54 = vpop.f32.mrf.mxu0  ;;  %v10929_v59 = vpop.f32.mrf.mxu1 }
 0x52f   : > { %13254 = vst [vmem:[#allocation103_spill] sm:$0xff] %v10927_v54 }
 0x530   : > { %13255 = vst [vmem:[#allocation59_spill] sm:$0xff] %v10929_v59 }
 0x531   : > { %4759 = vmatmul.f32.gmra.mxu0 %v13252_v60  ;;  %4924 = vmatmul.f32.gmra.mxu1 %v13256_v63  ;;  %v13265_v60 = vand.u32 4294901760, %v10752_v27 }
 0x532   : > { %4413 = vmatmul.f32.gmra.mxu2 %v10732_v53  ;;  %4628 = vmatmul.f32.gmra.mxu3 %v13257_v36  ;;  %v13268_v53 = vld [vmem:[#allocation35_spill] sm:$0xff]  ;;  %v13269_v36 = vand.u32 4294901760, %v10770_v44 }
 0x536   : > { %v10936_v34 = vpop.f32.mrf.mxu0  ;;  %v10938_v25 = vpop.f32.mrf.mxu1 }
 0x537   : > { %13258 = vst [vmem:[#allocation62_spill] sm:$0xff] %v10936_v34 }
 0x538   : > { %13259 = vst [vmem:[#allocation57_spill] sm:$0xff] %v10938_v25 }
 0x539   : > { %4763 = vmatmul.f32.gmra.mxu0 %v13256_v63  ;;  %4928 = vmatmul.f32.gmra.mxu1 %v13260_v11 }
 0x53a   : > { %4418 = vmatmul.f32.gmra.mxu2 %v10752_v27  ;;  %4634 = vmatmul.f32.gmra.mxu3 %v13261_v57  ;;  %v13272_v27 = vld [vmem:[#allocation27_spill] sm:$0xff] }
 0x53e   : > { %v10945_v4 = vpop.f32.mrf.mxu0  ;;  %v10947_v61 = vpop.f32.mrf.mxu1 }
 0x53f   : > { %13262 = vst [vmem:[#allocation119_spill] sm:$0xff] %v10945_v4 }
 0x540   : > { %13263 = vst [vmem:[#allocation105_spill] sm:$0xff] %v10947_v61 }
 0x541   : > { %4767 = vmatmul.f32.gmra.mxu0 %v13260_v11  ;;  %4932 = vmatmul.f32.gmra.mxu1 %v13264_v9 }
 0x542   : > { %4423 = vmatmul.f32.gmra.mxu2 %v10770_v44  ;;  %4640 = vmatmul.f32.gmra.mxu3 %v13265_v60  ;;  %v13273_v60 = vand.u32 4294901760, %v10788_v1  ;;  %v13276_v44 = vld [vmem:[#allocation20_spill] sm:$0xff] }
 0x546   : > { %v10954_v40 = vpop.f32.mrf.mxu0  ;;  %v10956_v63 = vpop.f32.mrf.mxu1 }
 0x547   : > { %13266 = vst [vmem:[#allocation34_spill] sm:$0xff] %v10954_v40  ;;  %v11002_v40 = vpop.f32.mrf.mxu2 }
 0x548   : > { %13267 = vst [vmem:[#allocation68_spill] sm:$0xff] %v10956_v63 }
 0x549   : > { %4771 = vmatmul.f32.gmra.mxu0 %v13264_v9  ;;  %4936 = vmatmul.f32.gmra.mxu1 %v13268_v53 }
 0x54a   : > { %4428 = vmatmul.f32.gmra.mxu2 %v10788_v1  ;;  %4646 = vmatmul.f32.gmra.mxu3 %v13269_v36  ;;  %v13277_v36 = vand.u32 4294901760, %v10807_v30  ;;  %v13280_v1 = vld [vmem:[#allocation43_spill] sm:$0xff] }
 0x54e   : > { %v10963_v11 = vpop.f32.mrf.mxu0  ;;  %v10965_v57 = vpop.f32.mrf.mxu1 }
 0x54f   : > { %13270 = vst [vmem:[#allocation61_spill] sm:$0xff] %v10963_v11  ;;  %v10991_v11 = vld [vmem:[%s9252_s14] ss:$0 sm:$0xff] }
 0x550   : > { %13271 = vst [vmem:[#allocation107_spill] sm:$0xff] %v10965_v57 }
 0x551   : > { %4775 = vmatmul.f32.gmra.mxu0 %v13268_v53  ;;  %4940 = vmatmul.f32.gmra.mxu1 %v13272_v27 }
 0x552   : > { %4433 = vmatmul.f32.gmra.mxu2 %v10807_v30  ;;  %4652 = vmatmul.f32.gmra.mxu3 %v13273_v60 }
 0x556   : > { %v10972_v9 = vpop.f32.mrf.mxu0  ;;  %v10974_v63 = vpop.f32.mrf.mxu1 }
 0x557   : > { %13274 = vst [vmem:[#allocation38_spill] sm:$0xff] %v10972_v9 }
 0x558   : > { %13275 = vst [vmem:[#allocation72_spill] sm:$0xff] %v10974_v63 }
 0x559   : > { %4779 = vmatmul.f32.gmra.mxu0 %v13272_v27  ;;  %4944 = vmatmul.f32.gmra.mxu1 %v13276_v44 }
 0x55a   : > { %4658 = vmatmul.f32.gmra.mxu3 %v13277_v36 }
 0x55e   : > { %v10980_v53 = vpop.f32.mrf.mxu0  ;;  %v10982_v57 = vpop.f32.mrf.mxu1 }
 0x55f   : > { %13278 = vst [vmem:[#allocation66_spill] sm:$0xff] %v10980_v53 }
 0x560   : > { %13279 = vst [vmem:[#allocation108_spill] sm:$0xff] %v10982_v57  ;;  %v13282_v57 = vld [vmem:[#allocation52_spill] sm:$0xff] }
 0x561   : > { %4783 = vmatmul.f32.gmra.mxu0 %v13276_v44  ;;  %4948 = vmatmul.f32.gmra.mxu1 %v13280_v1 }
 0x566   : > { %v10986_v60 = vpop.f32.mrf.mxu0  ;;  %v4889_v9 = vpop.f32.mrf.mxu1 }
 0x567   : > { %13281 = vst [vmem:[#allocation46_spill] sm:$0xff] %v10986_v60 }
 0x569   : > { %4787 = vmatmul.f32.gmra.mxu0 %v13280_v1  ;;  %4952 = vmatmul.f32.gmra.mxu1 %v10516_v16 }
 0x56e   : > { %v4728_v27 = vpop.f32.mrf.mxu0  ;;  %v4893_v63 = vpop.f32.mrf.mxu1 }
 0x56f   : > { %v4729_v30 = vadd.f32 %v4728_v27, %v10814_v8  ;;  %v13283_v8 = vld [vmem:[#allocation47_spill] sm:$0xff] }
 0x571   : > { %v4890_v36 = vadd.f32 %v4889_v9, %v4729_v30  ;;  %4791 = vmatmul.f32.gmra.mxu0 %v10516_v16  ;;  %4956 = vmatmul.f32.gmra.mxu1 %v13282_v57  ;;  %v11006_v16 = vpop.f32.mrf.mxu3 }
 0x573   : > { %v10997_v44 = vadd.f32 %v10991_v11, %v4890_v36 }
 0x575   : > { %v5051_v60 = vmul.f32 %v10997_v44, %v10997_v44 }
 0x576   : > { %v4732_v1 = vpop.f32.mrf.mxu0  ;;  %v4897_v53 = vpop.f32.mrf.mxu1 }
 0x577   : > { %v4733_v61 = vadd.f32 %v4732_v1, %v10829_v51  ;;  %5083 = vadd.xlane.f32.xlu0 %v5051_v60 }
 0x579   : > { %v4894_v25 = vadd.f32 %v4893_v63, %v4733_v61  ;;  %4795 = vmatmul.f32.gmra.mxu0 %v13282_v57  ;;  %4960 = vmatmul.f32.gmra.mxu1 %v13283_v8  ;;  %v13284_v61 = vld [vmem:[#allocation45_spill] sm:$0xff]  ;;  %v11016_v63 = vpop.f32.mrf.mxu2 }
 0x57b   : > { %v11009_v9 = vadd.f32 %v10991_v11, %v4894_v25  ;;  %v11021_v25 = vpop.f32.mrf.mxu3 }
 0x57d   : > { %v5052_v27 = vmul.f32 %v11009_v9, %v11009_v9 }
 0x57e   : > { %v4736_v30 = vpop.f32.mrf.mxu0  ;;  %v4901_v36 = vpop.f32.mrf.mxu1 }
 0x57f   : > { %v4737_v51 = vadd.f32 %v4736_v30, %v10842_v21  ;;  %5085 = vadd.xlane.f32.xlu0 %v5052_v27 }
 0x581   : > { %v4898_v60 = vadd.f32 %v4897_v53, %v4737_v51  ;;  %4799 = vmatmul.f32.gmra.mxu0 %v13283_v8  ;;  %4964 = vmatmul.f32.gmra.mxu1 %v13284_v61  ;;  %v13285_v8 = vld [vmem:[#allocation100_spill] sm:$0xff]  ;;  %v11031_v30 = vpop.f32.mrf.mxu2 }
 0x583   : > { %v11019_v57 = vadd.f32 %v10991_v11, %v4898_v60  ;;  %v11035_v35 = vpop.f32.mrf.mxu3 }
 0x585   : > { %v5053_v1 = vmul.f32 %v11019_v57, %v11019_v57 }
 0x586   : > { %v4740_v4 = vpop.f32.mrf.mxu0  ;;  %v4905_v59 = vpop.f32.mrf.mxu1 }
 0x587   : > { %v4741_v21 = vadd.f32 %v4740_v4, %v10855_v18  ;;  %5087 = vadd.xlane.f32.xlu1 %v5053_v1 }
 0x589   : > { %v4902_v53 = vadd.f32 %v4901_v36, %v4741_v21  ;;  %4803 = vmatmul.f32.gmra.mxu0 %v13284_v61  ;;  %4968 = vmatmul.f32.gmra.mxu1 %v13285_v8  ;;  %v13286_v36 = vld [vmem:[#allocation81_spill] sm:$0xff]  ;;  %v11045_v54 = vpop.f32.mrf.mxu2 }
 0x58b   : > { %v11029_v27 = vadd.f32 %v10991_v11, %v4902_v53 }
 0x58d   : > { %v5054_v51 = vmul.f32 %v11029_v27, %v11029_v27 }
 0x58e   : > { %v4744_v60 = vpop.f32.mrf.mxu0  ;;  %v4909_v34 = vpop.f32.mrf.mxu1 }
 0x58f   : > { %v4745_v18 = vadd.f32 %v4744_v60, %v10868_v47  ;;  %5089 = vadd.xlane.f32.xlu1 %v5054_v51  ;;  %v11048_v47 = vpop.f32.mrf.mxu3 }
 0x591   : > { %v4906_v4 = vadd.f32 %v4905_v59, %v4745_v18  ;;  %4807 = vmatmul.f32.gmra.mxu0 %v13285_v8  ;;  %4972 = vmatmul.f32.gmra.mxu1 %v13286_v36 }
 0x593   : > { %v11041_v61 = vadd.f32 %v10991_v11, %v4906_v4 }
 0x595   : > { %v5055_v1 = vmul.f32 %v11041_v61, %v11041_v61 }
 0x596   : > { %v4748_v21 = vpop.f32.mrf.mxu0  ;;  %v4913_v53 = vpop.f32.mrf.mxu1 }
 0x597   : > { %v4749_v26 = vadd.f32 %v4748_v21, %v10881_v17  ;;  %5091 = vadd.xlane.f32.xlu2 %v5055_v1  ;;  %v11058_v17 = vpop.f32.mrf.mxu2 }
 0x599   : > { %v4910_v59 = vadd.f32 %v4909_v34, %v4749_v26  ;;  %4811 = vmatmul.f32.gmra.mxu0 %v13286_v36  ;;  %4976 = vmatmul.f32.gmra.mxu1 %v10632_v55  ;;  %v11062_v26 = vpop.f32.mrf.mxu3 }
 0x59b   : > { %v11053_v8 = vadd.f32 %v10991_v11, %v4910_v59 }
 0x59d   : > { %13287 = vst [vmem:[#allocation93_spill] sm:$0xff] %v11053_v8  ;;  %v5056_v51 = vmul.f32 %v11053_v8, %v11053_v8 }
 0x59e   : > { %v4752_v60 = vpop.f32.mrf.mxu0  ;;  %v4917_v18 = vpop.f32.mrf.mxu1 }
 0x59f   : > { %v4753_v4 = vadd.f32 %v4752_v60, %v10894_v2  ;;  %5093 = vadd.xlane.f32.xlu2 %v5056_v51  ;;  %v13289_v51 = vld [vmem:[#allocation55_spill] sm:$0xff] }
 0x5a1   : > { %v4914_v1 = vadd.f32 %v4913_v53, %v4753_v4  ;;  %4815 = vmatmul.f32.gmra.mxu0 %v10632_v55  ;;  %4980 = vmatmul.f32.gmra.mxu1 %v10650_v29  ;;  %v4134_v53 = vadd.f32 %v13289_v51, %v10648_v41  ;;  %v11075_v4 = vpop.f32.mrf.mxu2  ;;  %v11081_v8 = vpop.f32.mrf.mxu3 }
 0x5a3   : > { %v11065_v34 = vadd.f32 %v10991_v11, %v4914_v1  ;;  %v4320_v55 = vadd.f32 %v11002_v40, %v4134_v53 }
 0x5a5   : > { %13288 = vst [vmem:[#allocation76_spill] sm:$0xff] %v11065_v34  ;;  %v5057_v36 = vmul.f32 %v11065_v34, %v11065_v34  ;;  %v4522_v34 = vadd.f32 %v11006_v16, %v4320_v55 }
 0x5a6   : > { %v4756_v21 = vpop.f32.mrf.mxu0  ;;  %v4921_v59 = vpop.f32.mrf.mxu1 }
 0x5a7   : > { %v4757_v2 = vadd.f32 %v4756_v21, %v10907_v50  ;;  %5095 = vadd.xlane.f32.xlu0 %v5057_v36 }
 0x5a9   : > { %v4918_v60 = vadd.f32 %v4917_v18, %v4757_v2  ;;  %4819 = vmatmul.f32.gmra.mxu0 %v10650_v29  ;;  %4984 = vmatmul.f32.gmra.mxu1 %v10668_v10  ;;  %v13290_v29 = vld [vmem:[#allocation51_spill] sm:$0xff]  ;;  %v11094_v53 = vpop.f32.mrf.mxu2 }
 0x5aa   : > { %v4138_v21 = vadd.f32 %v13290_v29, %v10670_v28  ;;  %v11098_v28 = vpop.f32.mrf.mxu3 }
 0x5ab   : > { %v11078_v1 = vadd.f32 %v10991_v11, %v4918_v60 }
 0x5ac   : > { %v4325_v2 = vadd.f32 %v11016_v63, %v4138_v21 }
 0x5ad   : > { %v5058_v50 = vmul.f32 %v11078_v1, %v11078_v1 }
 0x5ae   : > { %v4760_v41 = vpop.f32.mrf.mxu0  ;;  %v4925_v18 = vpop.f32.mrf.mxu1  ;;  %v4528_v51 = vadd.f32 %v11021_v25, %v4325_v2 }
 0x5af   : > { %v4761_v36 = vadd.f32 %v4760_v41, %v4522_v34  ;;  %5097 = vadd.xlane.f32.xlu1 %v5058_v50 }
 0x5b1   : > { %v4922_v40 = vadd.f32 %v4921_v59, %v4761_v36  ;;  %4823 = vmatmul.f32.gmra.mxu0 %v10668_v10  ;;  %4988 = vmatmul.f32.gmra.mxu1 %v10688_v31  ;;  %v4142_v10 = vadd.f32 %v10680_v49, %v10698_v24  ;;  %v13291_v49 = vld [vmem:[#allocation69_spill] sm:$0xff] }
 0x5b2   : > { %v4563_v24 = vpop.f32.mrf.mxu3 }
 0x5b3   : > { %v11091_v16 = vadd.f32 %v10991_v11, %v4922_v40  ;;  %v4330_v25 = vadd.f32 %v11031_v30, %v4142_v10  ;;  %v4354_v40 = vpop.f32.mrf.mxu2 }
 0x5b5   : > { %v5059_v34 = vmul.f32 %v11091_v16, %v11091_v16  ;;  %v4534_v41 = vadd.f32 %v11035_v35, %v4330_v25 }
 0x5b6   : > { %v4764_v60 = vpop.f32.mrf.mxu0  ;;  %v4929_v55 = vpop.f32.mrf.mxu1 }
 0x5b7   : > { %v4765_v59 = vadd.f32 %v4764_v60, %v4528_v51  ;;  %5099 = vadd.xlane.f32.xlu2 %v5059_v34 }
 0x5b9   : > { %v4926_v63 = vadd.f32 %v4925_v18, %v4765_v59  ;;  %4827 = vmatmul.f32.gmra.mxu0 %v10688_v31  ;;  %4992 = vmatmul.f32.gmra.mxu1 %v10708_v58  ;;  %v4146_v31 = vadd.f32 %v13291_v49, %v10719_v42  ;;  %v13292_v42 = vld [vmem:[#allocation102_spill] sm:$0xff] }
 0x5ba   : > { %v4569_v25 = vpop.f32.mrf.mxu3 }
 0x5bb   : > { %v11106_v50 = vadd.f32 %v10991_v11, %v4926_v63  ;;  %v4335_v30 = vadd.f32 %v11045_v54, %v4146_v31 }
 0x5bd   : > { %v5060_v36 = vmul.f32 %v11106_v50, %v11106_v50  ;;  %v4540_v51 = vadd.f32 %v11048_v47, %v4335_v30 }
 0x5be   : > { %v4768_v29 = vpop.f32.mrf.mxu0  ;;  %v4933_v21 = vpop.f32.mrf.mxu1 }
 0x5bf   : > { %v4769_v2 = vadd.f32 %v4768_v29, %v4534_v41  ;;  %5101 = vadd.xlane.f32.xlu0 %v5060_v36 }
 0x5c1   : > { %v4930_v18 = vadd.f32 %v4929_v55, %v4769_v2  ;;  %4831 = vmatmul.f32.gmra.mxu0 %v10708_v58  ;;  %4996 = vmatmul.f32.gmra.mxu1 %v10728_v14  ;;  %v4150_v55 = vadd.f32 %v13292_v42, %v10744_v22  ;;  %v4359_v58 = vpop.f32.mrf.mxu2 }
 0x5c2   : > { %v4575_v30 = vpop.f32.mrf.mxu3 }
 0x5c3   : > { %v11117_v35 = vadd.f32 %v10991_v11, %v4930_v18  ;;  %v4340_v54 = vadd.f32 %v11058_v17, %v4150_v55 }
 0x5c5   : > { %v5061_v34 = vmul.f32 %v11117_v35, %v11117_v35  ;;  %v4546_v41 = vadd.f32 %v11062_v26, %v4340_v54 }
 0x5c6   : > { %v4772_v60 = vpop.f32.mrf.mxu0  ;;  %v4937_v59 = vpop.f32.mrf.mxu1 }
 0x5c7   : > { %v4773_v10 = vadd.f32 %v4772_v60, %v4540_v51  ;;  %5103 = vadd.xlane.f32.xlu1 %v5061_v34 }
 0x5c9   : > { %v4934_v63 = vadd.f32 %v4933_v21, %v4773_v10  ;;  %4835 = vmatmul.f32.gmra.mxu0 %v10728_v14  ;;  %5000 = vmatmul.f32.gmra.mxu1 %v10746_v23  ;;  %v13293_v21 = vld [vmem:[#allocation30_spill] sm:$0xff]  ;;  %v4364_v31 = vpop.f32.mrf.mxu2 }
 0x5ca   : > { %v4154_v14 = vadd.f32 %v13293_v21, %v10766_v37 }
 0x5cb   : > { %v11128_v47 = vadd.f32 %v10991_v11, %v4934_v63 }
 0x5cc   : > { %v4345_v17 = vadd.f32 %v11075_v4, %v4154_v14 }
 0x5cd   : > { %v5062_v36 = vmul.f32 %v11128_v47, %v11128_v47 }
 0x5ce   : > { %v4776_v29 = vpop.f32.mrf.mxu0  ;;  %v4941_v2 = vpop.f32.mrf.mxu1  ;;  %v4552_v18 = vadd.f32 %v11081_v8, %v4345_v17 }
 0x5cf   : > { %v4777_v22 = vadd.f32 %v4776_v29, %v4546_v41  ;;  %5105 = vadd.xlane.f32.xlu2 %v5062_v36  ;;  %v11155_v41 = vpop.f32.mrf.mxu3 }
 0x5d1   : > { %v4938_v49 = vadd.f32 %v4937_v59, %v4777_v22  ;;  %4839 = vmatmul.f32.gmra.mxu0 %v10746_v23  ;;  %5004 = vmatmul.f32.gmra.mxu1 %v10764_v38  ;;  %v4158_v23 = vadd.f32 %v10776_v19, %v10794_v62  ;;  %v4369_v42 = vpop.f32.mrf.mxu2 }
 0x5d3   : > { %v11139_v26 = vadd.f32 %v10991_v11, %v4938_v49  ;;  %v4350_v4 = vadd.f32 %v11094_v53, %v4158_v23 }
 0x5d5   : > { %v5063_v51 = vmul.f32 %v11139_v26, %v11139_v26  ;;  %v4558_v10 = vadd.f32 %v11098_v28, %v4350_v4 }
 0x5d6   : > { %v4780_v34 = vpop.f32.mrf.mxu0  ;;  %v4945_v60 = vpop.f32.mrf.mxu1 }
 0x5d7   : > { %v4781_v37 = vadd.f32 %v4780_v34, %v4552_v18  ;;  %5107 = vadd.xlane.f32.xlu0 %v5063_v51 }
 0x5d9   : > { %v4942_v59 = vadd.f32 %v4941_v2, %v4781_v37  ;;  %4843 = vmatmul.f32.gmra.mxu0 %v10764_v38  ;;  %5008 = vmatmul.f32.gmra.mxu1 %v10784_v48  ;;  %v4162_v38 = vadd.f32 %v10800_v43, %v10819_v45  ;;  %v11166_v21 = vpop.f32.mrf.mxu2  ;;  %v13294_v43 = vld [vmem:[#allocation58_spill] sm:$0xff] }
 0x5da   : > { %v4166_v45 = vadd.f32 %v13294_v43, %v10831_v15  ;;  %v4170_v15 = vadd.f32 %v10833_v3, %v10844_v12 }
 0x5db   : > { %v11150_v8 = vadd.f32 %v10991_v11, %v4942_v59  ;;  %v4355_v53 = vadd.f32 %v4354_v40, %v4162_v38 }
 0x5dc   : > { %v4360_v17 = vadd.f32 %v4359_v58, %v4166_v45 }
 0x5dd   : > { %v5064_v55 = vmul.f32 %v11150_v8, %v11150_v8  ;;  %v4564_v36 = vadd.f32 %v4563_v24, %v4355_v53 }
 0x5de   : > { %v4784_v63 = vpop.f32.mrf.mxu0  ;;  %v4949_v54 = vpop.f32.mrf.mxu1  ;;  %v4570_v51 = vadd.f32 %v4569_v25, %v4360_v17 }
 0x5df   : > { %v4785_v19 = vadd.f32 %v4784_v63, %v4558_v10  ;;  %5109 = vadd.xlane.f32.xlu1 %v5064_v55  ;;  %v4365_v10 = vadd.f32 %v4364_v31, %v4170_v15  ;;  %v4174_v31 = vadd.f32 %v10846_v46, %v10857_v33 }
 0x5e1   : > { %v4946_v62 = vadd.f32 %v4945_v60, %v4785_v19  ;;  %4847 = vmatmul.f32.gmra.mxu0 %v10784_v48  ;;  %5012 = vmatmul.f32.gmra.mxu1 %v10802_v0  ;;  %v11170_v48 = vpop.f32.mrf.mxu3  ;;  %v11180_v59 = vpop.f32.mrf.mxu2  ;;  %v4576_v19 = vadd.f32 %v4575_v30, %v4365_v10  ;;  %v4370_v43 = vadd.f32 %v4369_v42, %v4174_v31 }
 0x5e3   : > { %v11162_v28 = vadd.f32 %v10991_v11, %v4946_v62 }
 0x5e5   : > { %v5065_v29 = vmul.f32 %v11162_v28, %v11162_v28 }
 0x5e6   : > { %v4788_v2 = vpop.f32.mrf.mxu0  ;;  %v4953_v22 = vpop.f32.mrf.mxu1 }
 0x5e7   : > { %v4789_v14 = vadd.f32 %v4788_v2, %v4564_v36  ;;  %5111 = vadd.xlane.f32.xlu2 %v5065_v29 }
 0x5e9   : > { %v4950_v49 = vadd.f32 %v4949_v54, %v4789_v14  ;;  %4851 = vmatmul.f32.gmra.mxu0 %v10802_v0  ;;  %v11182_v55 = vpop.f32.mrf.mxu3  ;;  %v11191_v30 = vpop.f32.mrf.mxu2 }
 0x5ea   : > { %v5084_v40 = vpop.xlane.xlu0 %5083 }
 0x5eb   : > { %v5147_v24 = vmax.f32 %v5084_v40, 1e-24  ;;  %v11174_v18 = vadd.f32 %v10991_v11, %v4950_v49 }
 0x5ed   : > { %6771 = vrsqrt.f32 %v5147_v24  ;;  %v5066_v34 = vmul.f32 %v11174_v18, %v11174_v18  ;;  %vm5185_vm1 = vweird.f32 %v5147_v24 }
 0x5ee   : > { %v4792_v60 = vpop.f32.mrf.mxu0  ;;  %v4957_v37 = vpop.f32.mrf.mxu1 }
 0x5ef   : > { %v4793_v23 = vadd.f32 %v4792_v60, %v4570_v51  ;;  %5113 = vadd.xlane.f32.xlu0 %v5066_v34  ;;  %v4582_v51 = vadd.f32 %v11155_v41, %v4370_v43  ;;  %v4182_v43 = vadd.f32 %v10872_v32, %v10883_v52 }
 0x5f1   : > { %v4954_v0 = vadd.f32 %v4953_v22, %v4793_v23  ;;  %v11197_v34 = vpop.f32.mrf.mxu3 }
 0x5f2   : > { %v5086_v58 = vpop.xlane.xlu0 %5085 }
 0x5f3   : > { %v6772_v4 = vpop.eup %6771  ;;  %v5148_v25 = vmax.f32 %v5086_v58, 1e-24  ;;  %v11185_v63 = vadd.f32 %v10991_v11, %v4954_v0 }
 0x5f4   : > { %v5180_v54 = vmul.f32 %v6772_v4, %v5147_v24  ;;  %vm5186_vm0 = vweird.f32 %v6772_v4  ;;  %v4178_v24 = vadd.f32 %v10859_v6, %v10870_v39 }
 0x5f5   : > { %6773 = vrsqrt.f32 %v5148_v25  ;;  %v5067_v38 = vmul.f32 %v11185_v63, %v11185_v63  ;;  %vm5187_vm2 = vmor %vm5185_vm1, %vm5186_vm0  ;;  %vm5195_vm4 = vweird.f32 %v5148_v25 }
 0x5f6   : > { %v5181_v62 = vmul.f32 %v6772_v4, %v5180_v54  ;;  %v4796_v3 = vpop.f32.mrf.mxu0  ;;  %v4961_v12 = vpop.f32.mrf.mxu1 }
 0x5f7   : > { %v4797_v53 = vadd.f32 %v4796_v3, %v4576_v19  ;;  %5115 = vadd.xlane.f32.xlu1 %v5067_v38  ;;  %v4375_v38 = vadd.f32 %v11166_v21, %v4178_v24 }
 0x5f8   : > { %v5182_v36 = vmul.f32 0.5, %v5181_v62 }
 0x5f9   : > { %v4958_v29 = vadd.f32 %v4957_v37, %v4797_v53  ;;  %v4588_v39 = vadd.f32 %v11170_v48, %v4375_v38 }
 0x5fa   : > { %v5183_v2 = vsub.f32 1.5, %v5182_v36  ;;  %v5088_v22 = vpop.xlane.xlu1 %5087 }
 0x5fb   : > { %v6774_v14 = vpop.eup %6773  ;;  %v5149_v45 = vmax.f32 %v5088_v22, 1e-24  ;;  %v11194_v49 = vadd.f32 %v10991_v11, %v4958_v29 }
 0x5fc   : > { %v5184_v40 = vmul.f32 %v6772_v4, %v5183_v2  ;;  %v5190_v17 = vmul.f32 %v6774_v14, %v5148_v25  ;;  %vm5196_vm3 = vweird.f32 %v6774_v14  ;;  %v11220_v2 = vpop.f32.mrf.mxu3 }
 0x5fd   : > { %6775 = vrsqrt.f32 %v5149_v45  ;;  %v5068_v46 = vmul.f32 %v11194_v49, %v11194_v49  ;;  %vm5197_vm5 = vmor %vm5195_vm4, %vm5196_vm3  ;;  %vm5205_vm7 = vweird.f32 %v5149_v45 }
 0x5fe   : > { %v5191_v33 = vmul.f32 %v6774_v14, %v5190_v17  ;;  %v4800_v42 = vpop.f32.mrf.mxu0  ;;  %v4965_v60 = vpop.f32.mrf.mxu1  ;;  %v5188_v37 = vsel %vm5187_vm2, %v6772_v4, %v5184_v40 }
 0x5ff   : > { %v4801_v23 = vadd.f32 %v4800_v42, %v4582_v51  ;;  %5117 = vadd.xlane.f32.xlu2 %v5068_v46  ;;  %v5499_v15 = vmul.f32 %v5188_v37, %v10997_v44 }
 0x600   : > { %v5192_v0 = vmul.f32 0.5, %v5191_v33 }
 0x601   : > { %v4962_v41 = vadd.f32 %v4961_v12, %v4801_v23  ;;  %v11204_v58 = vmax.f32 %v5499_v15, 0.0  ;;  %v11215_v12 = vpop.f32.mrf.mxu2 }
 0x602   : > { %v5193_v10 = vsub.f32 1.5, %v5192_v0  ;;  %v5090_v54 = vpop.xlane.xlu1 %5089 }
 0x603   : > { %v6776_v19 = vpop.eup %6775  ;;  %v11207_v62 = vmax.f32 %v5090_v54, 1e-24  ;;  %v5679_v4 = vmul.f32 %v11204_v58, %v11204_v58  ;;  %v11212_v44 = vadd.f32 %v10991_v11, %v4962_v41  ;;  %v4186_v54 = vadd.f32 %v10885_v7, %v10896_v20 }
 0x604   : > { %v5200_v3 = vmul.f32 %v6776_v19, %v5149_v45  ;;  %v5194_v6 = vmul.f32 %v6774_v14, %v5193_v10  ;;  %vm5206_vm6 = vweird.f32 %v6776_v19  ;;  %v11247_v38 = vpop.f32.mrf.mxu3 }
 0x605   : > { %6777 = vrsqrt.f32 %v11207_v62  ;;  %5711 = vadd.xlane.f32.xlu1 %v5679_v4  ;;  %v5069_v21 = vmul.f32 %v11212_v44, %v11212_v44  ;;  %vm5207_vm8 = vmor %vm5205_vm7, %vm5206_vm6  ;;  %vm5215_vm10 = vweird.f32 %v11207_v62 }
 0x606   : > { %v5201_v53 = vmul.f32 %v6776_v19, %v5200_v3  ;;  %v4804_v36 = vpop.f32.mrf.mxu0  ;;  %v4969_v31 = vpop.f32.mrf.mxu1  ;;  %v5198_v29 = vsel %vm5197_vm5, %v6774_v14, %v5194_v6  ;;  %v4380_v14 = vadd.f32 %v11180_v59, %v4182_v43 }
 0x607   : > { %v4805_v25 = vadd.f32 %v4804_v36, %v4588_v39  ;;  %5119 = vadd.xlane.f32.xlu0 %v5069_v21  ;;  %5582 = vadd.xlane.f32.xlu2 %v11204_v58  ;;  %v5500_v48 = vmul.f32 %v5198_v29, %v11009_v9  ;;  %v4385_v21 = vadd.f32 %v11191_v30, %v4186_v54 }
 0x608   : > { %v5202_v22 = vmul.f32 0.5, %v5201_v53  ;;  %v4594_v32 = vadd.f32 %v11182_v55, %v4380_v14 }
 0x609   : > { %v4966_v40 = vadd.f32 %v4965_v60, %v4805_v25  ;;  %v11226_v46 = vmax.f32 %v5500_v48, 0.0  ;;  %v11241_v41 = vpop.f32.mrf.mxu2  ;;  %v4600_v20 = vadd.f32 %v11197_v34, %v4385_v21 }
 0x60a   : > { %v5203_v17 = vsub.f32 1.5, %v5202_v22  ;;  %v5092_v51 = vpop.xlane.xlu2 %5091 }
 0x60b   : > { %v6778_v33 = vpop.eup %6777  ;;  %v11229_v42 = vmax.f32 %v5092_v51, 1e-24  ;;  %v11232_v37 = vadd.f32 %v10991_v11, %v4966_v40  ;;  %v5680_v0 = vmul.f32 %v11226_v46, %v11226_v46  ;;  %v4190_v40 = vadd.f32 %v10898_v5, %v10909_v56 }
 0x60c   : > { %v5210_v9 = vmul.f32 %v6778_v33, %v11207_v62  ;;  %v5204_v23 = vmul.f32 %v6776_v19, %v5203_v17  ;;  %vm5216_vm9 = vweird.f32 %v6778_v33 }
 0x60d   : > { %6779 = vrsqrt.f32 %v11229_v42  ;;  %v5070_v52 = vmul.f32 %v11232_v37, %v11232_v37  ;;  %vm5217_vm11 = vmor %vm5215_vm10, %vm5216_vm9  ;;  %vm5225_vm13 = vweird.f32 %v11229_v42 }
 0x60e   : > { %v5211_v60 = vmul.f32 %v6778_v33, %v5210_v9  ;;  %v4808_v15 = vpop.f32.mrf.mxu0  ;;  %v4973_v59 = vpop.f32.mrf.mxu1  ;;  %v5208_v24 = vsel %vm5207_vm8, %v6776_v19, %v5204_v23 }
 0x60f   : > { %v4809_v45 = vadd.f32 %v4808_v15, %v4594_v32  ;;  %5121 = vadd.xlane.f32.xlu1 %v5070_v52  ;;  %5584 = vadd.xlane.f32.xlu0 %v11226_v46  ;;  %v5501_v55 = vmul.f32 %v5208_v24, %v11019_v57  ;;  %v4390_v32 = vadd.f32 %v11215_v12, %v4190_v40  ;;  %v11274_v52 = vpop.f32.mrf.mxu3  ;;  %v13296_v40 = vld [vmem:[#allocation93_spill] sm:$0xff] }
 0x610   : > { %v5212_v10 = vmul.f32 0.5, %v5211_v60  ;;  %5713 = vadd.xlane.f32.xlu2 %v5680_v0 }
 0x611   : > { %v4970_v4 = vadd.f32 %v4969_v31, %v4809_v45  ;;  %v11249_v3 = vmax.f32 %v5501_v55, 0.0  ;;  %v11269_v17 = vpop.f32.mrf.mxu2  ;;  %v4606_v15 = vadd.f32 %v11220_v2, %v4390_v32  ;;  %v13295_v2 = vld [vmem:[#allocation54_spill] sm:$0xff] }
 0x612   : > { %v5213_v6 = vsub.f32 1.5, %v5212_v10  ;;  %v5094_v19 = vpop.xlane.xlu2 %5093 }
 0x613   : > { %v6780_v39 = vpop.eup %6779  ;;  %v11252_v53 = vmax.f32 %v5094_v19, 1e-24  ;;  %v11255_v57 = vadd.f32 %v10991_v11, %v4970_v4  ;;  %v5681_v31 = vmul.f32 %v11249_v3, %v11249_v3  ;;  %v4194_v4 = vadd.f32 %v13295_v2, %v10918_v13 }
 0x614   : > { %v5214_v36 = vmul.f32 %v6778_v33, %v5213_v6  ;;  %v5220_v7 = vmul.f32 %v6780_v39, %v11229_v42  ;;  %vm5226_vm12 = vweird.f32 %v6780_v39 }
 0x615   : > { %6781 = vrsqrt.f32 %v11252_v53  ;;  %v5071_v30 = vmul.f32 %v11255_v57, %v11255_v57  ;;  %vm5227_vm14 = vmor %vm5225_vm13, %vm5226_vm12  ;;  %vm5235_vm0 = vweird.f32 %v11252_v53 }
 0x616   : > { %v5221_v29 = vmul.f32 %v6780_v39, %v5220_v7  ;;  %v4812_v25 = vpop.f32.mrf.mxu0  ;;  %v4977_v48 = vpop.f32.mrf.mxu1  ;;  %v5218_v22 = vsel %vm5217_vm11, %v6778_v33, %v5214_v36 }
 0x617   : > { %v4813_v43 = vadd.f32 %v4812_v25, %v4600_v20  ;;  %5586 = vadd.xlane.f32.xlu1 %v11249_v3  ;;  %5715 = vadd.xlane.f32.xlu0 %v5681_v31  ;;  %v5502_v62 = vmul.f32 %v5218_v22, %v11029_v27  ;;  %v4623_v25 = vpop.f32.mrf.mxu3 }
 0x618   : > { %v5222_v34 = vmul.f32 0.5, %v5221_v29  ;;  %5123 = vadd.xlane.f32.xlu2 %v5071_v30 }
 0x619   : > { %v4974_v51 = vadd.f32 %v4973_v59, %v4813_v43  ;;  %v11271_v14 = vmax.f32 %v5502_v62, 0.0  ;;  %v4404_v20 = vpop.f32.mrf.mxu2 }
 0x61a   : > { %v5223_v9 = vsub.f32 1.5, %v5222_v34  ;;  %v5096_v23 = vpop.xlane.xlu0 %5095 }
 0x61b   : > { %v6782_v33 = vpop.eup %6781  ;;  %v11276_v60 = vmax.f32 %v5096_v23, 1e-24  ;;  %v11279_v27 = vadd.f32 %v10991_v11, %v4974_v51  ;;  %v5682_v12 = vmul.f32 %v11271_v14, %v11271_v14  ;;  %v13298_v23 = vld [vmem:[#allocation75_spill] sm:$0xff] }
 0x61c   : > { %v5230_v5 = vmul.f32 %v6782_v33, %v11252_v53  ;;  %v5224_v56 = vmul.f32 %v6780_v39, %v5223_v9  ;;  %vm5236_vm15 = vweird.f32 %v6782_v33  ;;  %v13297_v9 = vld [vmem:[#allocation103_spill] sm:$0xff] }
 0x61d   : > { %6783 = vrsqrt.f32 %v11276_v60  ;;  %v5072_v59 = vmul.f32 %v11279_v27, %v11279_v27  ;;  %vm5237_vm1 = vmor %vm5235_vm0, %vm5236_vm15  ;;  %v4198_v32 = vadd.f32 %v13298_v23, %v13297_v9  ;;  %vm5245_vm3 = vweird.f32 %v11276_v60 }
 0x61e   : > { %v5231_v0 = vmul.f32 %v6782_v33, %v5230_v5  ;;  %v4816_v24 = vpop.f32.mrf.mxu0  ;;  %v4981_v45 = vpop.f32.mrf.mxu1  ;;  %v5228_v55 = vsel %vm5227_vm14, %v6780_v39, %v5224_v56  ;;  %v4395_v39 = vadd.f32 %v11241_v41, %v4194_v4 }
 0x61f   : > { %v4817_v10 = vadd.f32 %v4816_v24, %v4606_v15  ;;  %5717 = vadd.xlane.f32.xlu1 %v5682_v12  ;;  %5125 = vadd.xlane.f32.xlu0 %v5072_v59  ;;  %v5503_v42 = vmul.f32 %v5228_v55, %v11041_v61 }
 0x620   : > { %v5232_v54 = vmul.f32 0.5, %v5231_v0  ;;  %5588 = vadd.xlane.f32.xlu2 %v11271_v14  ;;  %v4612_v29 = vadd.f32 %v11247_v38, %v4395_v39  ;;  %v4629_v39 = vpop.f32.mrf.mxu3 }
 0x621   : > { %v4978_v6 = vadd.f32 %v4977_v48, %v4817_v10  ;;  %v11293_v36 = vmax.f32 %v5503_v42, 0.0  ;;  %v4409_v42 = vpop.f32.mrf.mxu2 }
 0x622   : > { %v5233_v19 = vsub.f32 1.5, %v5232_v54  ;;  %v5098_v21 = vpop.xlane.xlu1 %5097 }
 0x623   : > { %v6784_v7 = vpop.eup %6783  ;;  %v11296_v31 = vmax.f32 %v5098_v21, 1e-24  ;;  %v11299_v61 = vadd.f32 %v10991_v11, %v4978_v6  ;;  %v5683_v62 = vmul.f32 %v11293_v36, %v11293_v36  ;;  %v13299_v21 = vld [vmem:[#allocation76_spill] sm:$0xff] }
 0x624   : > { %v5240_v30 = vmul.f32 %v6784_v7, %v11276_v60  ;;  %v5234_v13 = vmul.f32 %v6782_v33, %v5233_v19  ;;  %vm5246_vm2 = vweird.f32 %v6784_v7 }
 0x625   : > { %6785 = vrsqrt.f32 %v11296_v31  ;;  %v5073_v41 = vmul.f32 %v11299_v61, %v11299_v61  ;;  %vm5247_vm4 = vmor %vm5245_vm3, %vm5246_vm2  ;;  %vm5255_vm6 = vweird.f32 %v11296_v31 }
 0x626   : > { %v5241_v48 = vmul.f32 %v6784_v7, %v5240_v30  ;;  %v4820_v22 = vpop.f32.mrf.mxu0  ;;  %v4985_v43 = vpop.f32.mrf.mxu1  ;;  %v5238_v34 = vsel %vm5237_vm1, %v6782_v33, %v5234_v13  ;;  %v4400_v33 = vadd.f32 %v11269_v17, %v4198_v32  ;;  %v13300_v13 = vld [vmem:[#allocation62_spill] sm:$0xff] }
 0x627   : > { %v4821_v53 = vadd.f32 %v4820_v22, %v4612_v29  ;;  %5127 = vadd.xlane.f32.xlu1 %v5073_v41  ;;  %5590 = vadd.xlane.f32.xlu0 %v11293_v36  ;;  %v5504_v38 = vmul.f32 %v5238_v34, %v13296_v40  ;;  %v13301_v29 = vld [vmem:[#allocation59_spill] sm:$0xff] }
 0x628   : > { %v5242_v51 = vmul.f32 0.5, %v5241_v48  ;;  %5719 = vadd.xlane.f32.xlu2 %v5683_v62  ;;  %v4202_v41 = vadd.f32 %v13301_v29, %v13300_v13 }
 0x629   : > { %v4982_v5 = vadd.f32 %v4981_v45, %v4821_v53  ;;  %v11313_v56 = vmax.f32 %v5504_v38, 0.0  ;;  %v4618_v45 = vadd.f32 %v11274_v52, %v4400_v33 }
 0x62a   : > { %v5243_v15 = vsub.f32 1.5, %v5242_v51  ;;  %v5100_v12 = vpop.xlane.xlu2 %5099 }
 0x62b   : > { %v6786_v59 = vpop.eup %6785  ;;  %v11316_v0 = vmax.f32 %v5100_v12, 1e-24  ;;  %v11319_v24 = vadd.f32 %v10991_v11, %v4982_v5  ;;  %v5684_v54 = vmul.f32 %v11313_v56, %v11313_v56 }
 0x62c   : > { %v5250_v55 = vmul.f32 %v6786_v59, %v11296_v31  ;;  %v5244_v10 = vmul.f32 %v6784_v7, %v5243_v15  ;;  %vm5256_vm5 = vweird.f32 %v6786_v59 }
 0x62d   : > { %6787 = vrsqrt.f32 %v11316_v0  ;;  %v5074_v17 = vmul.f32 %v11319_v24, %v11319_v24  ;;  %vm5257_vm7 = vmor %vm5255_vm6, %vm5256_vm5  ;;  %vm5265_vm9 = vweird.f32 %v11316_v0 }
 0x62e   : > { %v5251_v2 = vmul.f32 %v6786_v59, %v5250_v55  ;;  %v4824_v4 = vpop.f32.mrf.mxu0  ;;  %v4989_v6 = vpop.f32.mrf.mxu1  ;;  %v5248_v19 = vsel %vm5247_vm4, %v6784_v7, %v5244_v10  ;;  %v4405_v7 = vadd.f32 %v4404_v20, %v4202_v41  ;;  %v13302_v10 = vld [vmem:[#allocation119_spill] sm:$0xff] }
 0x62f   : > { %v4825_v60 = vadd.f32 %v4824_v4, %v4618_v45  ;;  %5592 = vadd.xlane.f32.xlu1 %v11313_v56  ;;  %5721 = vadd.xlane.f32.xlu0 %v5684_v54  ;;  %v5505_v52 = vmul.f32 %v5248_v19, %v13299_v21  ;;  %v4414_v55 = vpop.f32.mrf.mxu2  ;;  %v13303_v45 = vld [vmem:[#allocation57_spill] sm:$0xff] }
 0x630   : > { %v5252_v30 = vmul.f32 0.5, %v5251_v2  ;;  %5129 = vadd.xlane.f32.xlu2 %v5074_v17  ;;  %v4624_v23 = vadd.f32 %v4623_v25, %v4405_v7  ;;  %v4206_v54 = vadd.f32 %v13303_v45, %v13302_v10  ;;  %v4635_v2 = vpop.f32.mrf.mxu3 }
 0x631   : > { %v4986_v48 = vadd.f32 %v4985_v43, %v4825_v60  ;;  %v11333_v22 = vmax.f32 %v5505_v52, 0.0 }
 0x632   : > { %v5253_v62 = vsub.f32 1.5, %v5252_v30  ;;  %v5102_v34 = vpop.xlane.xlu0 %5101  ;;  %v4410_v21 = vadd.f32 %v4409_v42, %v4206_v54 }
 0x633   : > { %v6788_v53 = vpop.eup %6787  ;;  %v11335_v40 = vmax.f32 %v5102_v34, 1e-24  ;;  %v11338_v38 = vadd.f32 %v10991_v11, %v4986_v48  ;;  %v5685_v20 = vmul.f32 %v11333_v22, %v11333_v22 }
 0x634   : > { %v5260_v51 = vmul.f32 %v6788_v53, %v11316_v0  ;;  %v5254_v9 = vmul.f32 %v6786_v59, %v5253_v62  ;;  %vm5266_vm8 = vweird.f32 %v6788_v53  ;;  %v4630_v29 = vadd.f32 %v4629_v39, %v4410_v21  ;;  %v13307_v21 = vld [vmem:[#allocation61_spill] sm:$0xff] }
 0x635   : > { %6789 = vrsqrt.f32 %v11335_v40  ;;  %v5075_v43 = vmul.f32 %v11338_v38, %v11338_v38  ;;  %vm5267_vm10 = vmor %vm5265_vm9, %vm5266_vm8  ;;  %vm5275_vm12 = vweird.f32 %v11335_v40 }
 0x636   : > { %v5261_v32 = vmul.f32 %v6788_v53, %v5260_v51  ;;  %v4828_v5 = vpop.f32.mrf.mxu0  ;;  %v4993_v15 = vpop.f32.mrf.mxu1  ;;  %v5258_v12 = vsel %vm5257_vm7, %v6786_v59, %v5254_v9  ;;  %v13304_v51 = vld [vmem:[#allocation34_spill] sm:$0xff]  ;;  %v13305_v9 = vld [vmem:[#allocation105_spill] sm:$0xff] }
 0x637   : > { %v4829_v33 = vadd.f32 %v4828_v5, %v4624_v23  ;;  %5131 = vadd.xlane.f32.xlu0 %v5075_v43  ;;  %5723 = vadd.xlane.f32.xlu1 %v5685_v20  ;;  %v5506_v31 = vmul.f32 %v5258_v12, %v11078_v1  ;;  %v4210_v23 = vadd.f32 %v13305_v9, %v13304_v51 }
 0x638   : > { %v5262_v25 = vmul.f32 0.5, %v5261_v32  ;;  %5594 = vadd.xlane.f32.xlu2 %v11333_v22  ;;  %v4419_v32 = vpop.f32.mrf.mxu2 }
 0x639   : > { %v4990_v17 = vadd.f32 %v4989_v6, %v4829_v33  ;;  %v11351_v60 = vmax.f32 %v5506_v31, 0.0  ;;  %v4415_v33 = vadd.f32 %v4414_v55, %v4210_v23 }
 0x63a   : > { %v5263_v4 = vsub.f32 1.5, %v5262_v25  ;;  %v5104_v19 = vpop.xlane.xlu1 %5103 }
 0x63b   : > { %v6790_v59 = vpop.eup %6789  ;;  %v11353_v52 = vmax.f32 %v5104_v19, 1e-24  ;;  %v11356_v1 = vadd.f32 %v10991_v11, %v4990_v17  ;;  %v5686_v42 = vmul.f32 %v11351_v60, %v11351_v60 }
 0x63c   : > { %v5264_v30 = vmul.f32 %v6788_v53, %v5263_v4  ;;  %v5270_v13 = vmul.f32 %v6790_v59, %v11335_v40  ;;  %vm5276_vm11 = vweird.f32 %v6790_v59 }
 0x63d   : > { %6791 = vrsqrt.f32 %v11353_v52  ;;  %v5076_v6 = vmul.f32 %v11356_v1, %v11356_v1  ;;  %vm5277_vm13 = vmor %vm5275_vm12, %vm5276_vm11  ;;  %vm5285_vm15 = vweird.f32 %v11353_v52 }
 0x63e   : > { %v5271_v41 = vmul.f32 %v6790_v59, %v5270_v13  ;;  %v4832_v48 = vpop.f32.mrf.mxu0  ;;  %v5268_v62 = vsel %vm5267_vm10, %v6788_v53, %v5264_v30  ;;  %v4997_v39 = vpop.f32.mrf.mxu1  ;;  %v13308_v30 = vld [vmem:[#allocation68_spill] sm:$0xff] }
 0x63f   : > { %v4833_v34 = vadd.f32 %v4832_v48, %v4630_v29  ;;  %5596 = vadd.xlane.f32.xlu0 %v11351_v60  ;;  %5133 = vadd.xlane.f32.xlu1 %v5076_v6  ;;  %v5507_v0 = vmul.f32 %v5268_v62, %v11091_v16  ;;  %v4641_v16 = vpop.f32.mrf.mxu3  ;;  %v4214_v13 = vadd.f32 %v13308_v30, %v13307_v21 }
 0x640   : > { %v5272_v7 = vmul.f32 0.5, %v5271_v41  ;;  %5725 = vadd.xlane.f32.xlu2 %v5686_v42 }
 0x641   : > { %v4994_v43 = vadd.f32 %v4993_v15, %v4833_v34  ;;  %v11369_v20 = vmax.f32 %v5507_v0, 0.0  ;;  %v4636_v15 = vadd.f32 %v4635_v2, %v4415_v33  ;;  %v4420_v62 = vadd.f32 %v4419_v32, %v4214_v13  ;;  %v11392_v0 = vld [vmem:[%s9252_s14] ss:$0 sm:$0xff] }
 0x642   : > { %v5273_v5 = vsub.f32 1.5, %v5272_v7  ;;  %v5106_v12 = vpop.xlane.xlu2 %5105  ;;  %v4424_v7 = vpop.f32.mrf.mxu2 }
 0x643   : > { %13306 = vst [vmem:[#allocation109_spill] sm:$0xff] %v11369_v20  ;;  %v6792_v53 = vpop.eup %6791  ;;  %v11371_v31 = vmax.f32 %v5106_v12, 1e-24  ;;  %v11374_v25 = vadd.f32 %v10991_v11, %v4994_v43  ;;  %v5687_v54 = vmul.f32 %v11369_v20, %v11369_v20  ;;  %v4642_v9 = vadd.f32 %v4641_v16, %v4420_v62  ;;  %v13310_v16 = vld [vmem:[#allocation38_spill] sm:$0xff] }
 0x644   : > { %v5280_v10 = vmul.f32 %v6792_v53, %v11353_v52  ;;  %v5274_v45 = vmul.f32 %v6790_v59, %v5273_v5  ;;  %vm5286_vm14 = vweird.f32 %v6792_v53 }
 0x645   : > { %6793 = vrsqrt.f32 %v11371_v31  ;;  %v5077_v55 = vmul.f32 %v11374_v25, %v11374_v25  ;;  %vm5287_vm0 = vmor %vm5285_vm15, %vm5286_vm14  ;;  %vm5295_vm2 = vweird.f32 %v11371_v31 }
 0x646   : > { %v5281_v17 = vmul.f32 %v6792_v53, %v5280_v10  ;;  %v4836_v4 = vpop.f32.mrf.mxu0  ;;  %v5278_v11 = vsel %vm5277_vm13, %v6790_v59, %v5274_v45  ;;  %v5001_v48 = vpop.f32.mrf.mxu1 }
 0x647   : > { %v4837_v19 = vadd.f32 %v4836_v4, %v4636_v15  ;;  %5727 = vadd.xlane.f32.xlu0 %v5687_v54  ;;  %5598 = vadd.xlane.f32.xlu1 %v11369_v20  ;;  %v5508_v40 = vmul.f32 %v5278_v11, %v11106_v50  ;;  %v4647_v32 = vpop.f32.mrf.mxu3  ;;  %v13311_v15 = vld [vmem:[#allocation107_spill] sm:$0xff] }
 0x648   : > { %v5282_v2 = vmul.f32 0.5, %v5281_v17  ;;  %5135 = vadd.xlane.f32.xlu2 %v5077_v55  ;;  %v4218_v54 = vadd.f32 %v13311_v15, %v13310_v16 }
 0x649   : > { %v4998_v29 = vadd.f32 %v4997_v39, %v4837_v19  ;;  %v11387_v6 = vmax.f32 %v5508_v40, 0.0 }
 0x64a   : > { %v5283_v41 = vsub.f32 1.5, %v5282_v2  ;;  %v5108_v42 = vpop.xlane.xlu0 %5107  ;;  %v4425_v40 = vadd.f32 %v4424_v7, %v4218_v54 }
 0x64b   : > { %13309 = vst [vmem:[#allocation83_spill] sm:$0xff] %v11387_v6  ;;  %v6794_v59 = vpop.eup %6793  ;;  %v11389_v34 = vmax.f32 %v5108_v42, 1e-24  ;;  %v11395_v50 = vadd.f32 %v11392_v0, %v4998_v29  ;;  %v5688_v43 = vmul.f32 %v11387_v6, %v11387_v6 }
 0x64c   : > { %v5290_v39 = vmul.f32 %v6794_v59, %v11371_v31  ;;  %v5284_v51 = vmul.f32 %v6792_v53, %v5283_v41  ;;  %vm5296_vm1 = vweird.f32 %v6794_v59  ;;  %v4648_v13 = vadd.f32 %v4647_v32, %v4425_v40  ;;  %v4429_v41 = vpop.f32.mrf.mxu2 }
 0x64d   : > { %6795 = vrsqrt.f32 %v11389_v34  ;;  %v5078_v23 = vmul.f32 %v11395_v50, %v11395_v50  ;;  %vm5297_vm3 = vmor %vm5295_vm2, %vm5296_vm1  ;;  %vm5305_vm5 = vweird.f32 %v11389_v34 }
 0x64e   : > { %v5291_v5 = vmul.f32 %v6794_v59, %v5290_v39  ;;  %v4840_v12 = vpop.f32.mrf.mxu0  ;;  %v5288_v33 = vsel %vm5287_vm0, %v6792_v53, %v5284_v51  ;;  %v5005_v30 = vpop.f32.mrf.mxu1 }
 0x64f   : > { %v4841_v10 = vadd.f32 %v4840_v12, %v4642_v9  ;;  %5137 = vadd.xlane.f32.xlu0 %v5078_v23  ;;  %5729 = vadd.xlane.f32.xlu1 %v5688_v43  ;;  %v5509_v52 = vmul.f32 %v5288_v33, %v11117_v35  ;;  %v4653_v51 = vpop.f32.mrf.mxu3  ;;  %v13313_v23 = vld [vmem:[#allocation66_spill] sm:$0xff]  ;;  %v13314_v43 = vld [vmem:[#allocation72_spill] sm:$0xff] }
 0x650   : > { %v5292_v45 = vmul.f32 0.5, %v5291_v5  ;;  %5600 = vadd.xlane.f32.xlu2 %v11387_v6  ;;  %v4222_v32 = vadd.f32 %v13314_v43, %v13313_v23 }
 0x651   : > { %v5002_v55 = vadd.f32 %v5001_v48, %v4841_v10  ;;  %v11408_v11 = vmax.f32 %v5509_v52, 0.0 }
 0x652   : > { %v5293_v17 = vsub.f32 1.5, %v5292_v45  ;;  %v5110_v4 = vpop.xlane.xlu1 %5109 }
 0x653   : > { %13312 = vst [vmem:[#allocation95_spill] sm:$0xff] %v11408_v11  ;;  %v6796_v19 = vpop.eup %6795  ;;  %v11410_v53 = vmax.f32 %v5110_v4, 1e-24  ;;  %v11413_v2 = vadd.f32 %v11392_v0, %v5002_v55  ;;  %v5689_v62 = vmul.f32 %v11408_v11, %v11408_v11 }
 0x654   : > { %v5294_v35 = vmul.f32 %v6794_v59, %v5293_v17  ;;  %v5300_v21 = vmul.f32 %v6796_v19, %v11389_v34  ;;  %vm5306_vm4 = vweird.f32 %v6796_v19 }
 0x655   : > { %6797 = vrsqrt.f32 %v11410_v53  ;;  %v5079_v29 = vmul.f32 %v11413_v2, %v11413_v2  ;;  %vm5307_vm6 = vmor %vm5305_vm5, %vm5306_vm4  ;;  %vm5315_vm8 = vweird.f32 %v11410_v53 }
 0x656   : > { %v5301_v48 = vmul.f32 %v6796_v19, %v5300_v21  ;;  %v4844_v42 = vpop.f32.mrf.mxu0  ;;  %v5298_v7 = vsel %vm5297_vm3, %v6794_v59, %v5294_v35  ;;  %v4430_v59 = vadd.f32 %v4429_v41, %v4222_v32  ;;  %v5009_v40 = vpop.f32.mrf.mxu1  ;;  %v13316_v41 = vld [vmem:[#allocation46_spill] sm:$0xff] }
 0x657   : > { %v4845_v39 = vadd.f32 %v4844_v42, %v4648_v13  ;;  %5602 = vadd.xlane.f32.xlu0 %v11408_v11  ;;  %5139 = vadd.xlane.f32.xlu1 %v5079_v29  ;;  %v5510_v31 = vmul.f32 %v5298_v7, %v11128_v47  ;;  %v4434_v13 = vpop.f32.mrf.mxu2 }
 0x658   : > { %v5302_v9 = vmul.f32 0.5, %v5301_v48  ;;  %5731 = vadd.xlane.f32.xlu2 %v5689_v62  ;;  %v4654_v54 = vadd.f32 %v4653_v51, %v4430_v59  ;;  %v13317_v48 = vld [vmem:[#allocation108_spill] sm:$0xff] }
 0x659   : > { %v5006_v5 = vadd.f32 %v5005_v30, %v4845_v39  ;;  %v11426_v12 = vmax.f32 %v5510_v31, 0.0  ;;  %v4226_v42 = vadd.f32 %v13317_v48, %v13316_v41  ;;  %v4659_v39 = vpop.f32.mrf.mxu3 }
 0x65a   : > { %v5303_v33 = vsub.f32 1.5, %v5302_v9  ;;  %v5112_v10 = vpop.xlane.xlu2 %5111 }
 0x65b   : > { %13315 = vst [vmem:[#allocation114_spill] sm:$0xff] %v11426_v12  ;;  %v6798_v52 = vpop.eup %6797  ;;  %v5161_v45 = vmax.f32 %v5112_v10, 1e-24  ;;  %v11429_v16 = vadd.f32 %v11392_v0, %v5006_v5  ;;  %v5690_v55 = vmul.f32 %v11426_v12, %v11426_v12  ;;  %v4435_v9 = vadd.f32 %v4434_v13, %v4226_v42 }
 0x65c   : > { %v5310_v47 = vmul.f32 %v6798_v52, %v11410_v53  ;;  %v5304_v15 = vmul.f32 %v6796_v19, %v5303_v33  ;;  %vm5316_vm7 = vweird.f32 %v6798_v52 }
 0x65d   : > { %6799 = vrsqrt.f32 %v5161_v45  ;;  %v5080_v17 = vmul.f32 %v11429_v16, %v11429_v16  ;;  %v4660_v5 = vadd.f32 %v4659_v39, %v4435_v9  ;;  %vm5317_vm9 = vmor %vm5315_vm8, %vm5316_vm7  ;;  %vm5325_vm11 = vweird.f32 %v5161_v45 }
 0x65e   : > { %v5311_v4 = vmul.f32 %v6798_v52, %v5310_v47  ;;  %v4848_v35 = vpop.f32.mrf.mxu0  ;;  %v5308_v21 = vsel %vm5307_vm6, %v6796_v19, %v5304_v15 }
 0x65f   : > { %v4849_v30 = vadd.f32 %v4848_v35, %v4654_v54  ;;  %5733 = vadd.xlane.f32.xlu0 %v5690_v55  ;;  %5604 = vadd.xlane.f32.xlu1 %v11426_v12  ;;  %v5511_v34 = vmul.f32 %v5308_v21, %v11139_v26 }
 0x660   : > { %v5312_v29 = vmul.f32 0.5, %v5311_v4  ;;  %5141 = vadd.xlane.f32.xlu2 %v5080_v17  ;;  %v5013_v17 = vpop.f32.mrf.mxu1 }
 0x661   : > { %v5010_v62 = vadd.f32 %v5009_v40, %v4849_v30  ;;  %v11441_v7 = vmax.f32 %v5511_v34, 0.0 }
 0x662   : > { %v5313_v31 = vsub.f32 1.5, %v5312_v29  ;;  %v5114_v51 = vpop.xlane.xlu0 %5113 }
 0x663   : > { %13318 = vst [vmem:[#allocation85_spill] sm:$0xff] %v11441_v7  ;;  %v6800_v19 = vpop.eup %6799  ;;  %v5162_v23 = vmax.f32 %v5114_v51, 1e-24  ;;  %v11444_v43 = vadd.f32 %v11392_v0, %v5010_v62  ;;  %v5691_v10 = vmul.f32 %v11441_v7, %v11441_v7 }
 0x664   : > { %v5320_v26 = vmul.f32 %v6800_v19, %v5161_v45  ;;  %v5314_v32 = vmul.f32 %v6798_v52, %v5313_v31  ;;  %vm5326_vm10 = vweird.f32 %v6800_v19 }
 0x665   : > { %6801 = vrsqrt.f32 %v5162_v23  ;;  %v5081_v33 = vmul.f32 %v11444_v43, %v11444_v43  ;;  %vm5327_vm12 = vmor %vm5325_vm11, %vm5326_vm10  ;;  %vm5335_vm14 = vweird.f32 %v5162_v23 }
 0x666   : > { %v5321_v59 = vmul.f32 %v6800_v19, %v5320_v26  ;;  %v4852_v47 = vpop.f32.mrf.mxu0  ;;  %v5318_v15 = vsel %vm5317_vm9, %v6798_v52, %v5314_v32 }
 0x667   : > { %v4853_v54 = vadd.f32 %v4852_v47, %v4660_v5  ;;  %5143 = vadd.xlane.f32.xlu0 %v5081_v33  ;;  %5735 = vadd.xlane.f32.xlu1 %v5691_v10  ;;  %v5512_v55 = vmul.f32 %v5318_v15, %v11150_v8 }
 0x668   : > { %v5322_v53 = vmul.f32 0.5, %v5321_v59  ;;  %5606 = vadd.xlane.f32.xlu2 %v11441_v7 }
 0x669   : > { %v5014_v4 = vadd.f32 %v5013_v17, %v4853_v54  ;;  %v11453_v21 = vmax.f32 %v5512_v55, 0.0 }
 0x66a   : > { %v5323_v40 = vsub.f32 1.5, %v5322_v53  ;;  %v5116_v35 = vpop.xlane.xlu1 %5115 }
 0x66b   : > { %13319 = vst [vmem:[#allocation86_spill] sm:$0xff] %v11453_v21  ;;  %v6802_v30 = vpop.eup %6801  ;;  %v5163_v34 = vmax.f32 %v5116_v35, 1e-24  ;;  %v11456_v13 = vadd.f32 %v11392_v0, %v5014_v4  ;;  %v5692_v48 = vmul.f32 %v11453_v21, %v11453_v21 }
 0x66c   : > { %v5324_v52 = vmul.f32 %v6800_v19, %v5323_v40  ;;  %v5330_v29 = vmul.f32 %v6802_v30, %v5162_v23  ;;  %vm5336_vm13 = vweird.f32 %v6802_v30 }
 0x66d   : > { %6803 = vrsqrt.f32 %v5163_v34  ;;  %v5082_v8 = vmul.f32 %v11456_v13, %v11456_v13  ;;  %vm5337_vm15 = vmor %vm5335_vm14, %vm5336_vm13  ;;  %vm5345_vm1 = vweird.f32 %v5163_v34 }
 0x66e   : > { %v5331_v41 = vmul.f32 %v6802_v30, %v5330_v29  ;;  %v5328_v42 = vsel %vm5327_vm12, %v6800_v19, %v5324_v52 }
 0x66f   : > { %5608 = vadd.xlane.f32.xlu0 %v11453_v21  ;;  %5145 = vadd.xlane.f32.xlu1 %v5082_v8  ;;  %v5513_v62 = vmul.f32 %v5328_v42, %v11162_v28 }
 0x670   : > { %v5332_v0 = vmul.f32 0.5, %v5331_v41  ;;  %5737 = vadd.xlane.f32.xlu2 %v5692_v48 }
 0x671   : > { %v11464_v39 = vmax.f32 %v5513_v62, 0.0 }
 0x672   : > { %v5333_v45 = vsub.f32 1.5, %v5332_v0  ;;  %v5118_v31 = vpop.xlane.xlu2 %5117 }
 0x673   : > { %13320 = vst [vmem:[#allocation118_spill] sm:$0xff] %v11464_v39  ;;  %v6804_v51 = vpop.eup %6803  ;;  %v5164_v9 = vmax.f32 %v5118_v31, 1e-24  ;;  %v5693_v19 = vmul.f32 %v11464_v39, %v11464_v39 }
 0x674   : > { %v5340_v26 = vmul.f32 %v6804_v51, %v5163_v34  ;;  %v5334_v32 = vmul.f32 %v6802_v30, %v5333_v45  ;;  %vm5346_vm0 = vweird.f32 %v6804_v51 }
 0x675   : > { %6805 = vrsqrt.f32 %v5164_v9  ;;  %vm5347_vm2 = vmor %vm5345_vm1, %vm5346_vm0  ;;  %vm5355_vm4 = vweird.f32 %v5164_v9 }
 0x676   : > { %v5341_v5 = vmul.f32 %v6804_v51, %v5340_v26  ;;  %v5338_v33 = vsel %vm5337_vm15, %v6802_v30, %v5334_v32 }
 0x677   : > { %5739 = vadd.xlane.f32.xlu0 %v5693_v19  ;;  %5610 = vadd.xlane.f32.xlu1 %v11464_v39  ;;  %v5514_v28 = vmul.f32 %v5338_v33, %v11174_v18 }
 0x678   : > { %v5342_v10 = vmul.f32 0.5, %v5341_v5  ;;  %v11470_v59 = vpop.xlane.xlu1 %5711 }
 0x679   : > { %v11472_v47 = vmax.f32 %v5514_v28, 0.0 }
 0x67a   : > { %v5343_v23 = vsub.f32 1.5, %v5342_v10  ;;  %v11474_v15 = vpop.xlane.xlu2 %5582  ;;  %v5120_v54 = vpop.xlane.xlu0 %5119 }
 0x67b   : > { %13321 = vst [vmem:[#allocation18_spill] sm:$0xff] %v11472_v47  ;;  %v6806_v55 = vpop.eup %6805  ;;  %v5165_v53 = vmax.f32 %v5120_v54, 1e-24  ;;  %5612 = vadd.xlane.f32.xlu2 %v11472_v47  ;;  %v5694_v18 = vmul.f32 %v11472_v47, %v11472_v47 }
 0x67c   : > { %v5350_v17 = vmul.f32 %v6806_v55, %v5164_v9  ;;  %v5344_v4 = vmul.f32 %v6804_v51, %v5343_v23  ;;  %vm5356_vm3 = vweird.f32 %v6806_v55 }
 0x67d   : > { %6807 = vrsqrt.f32 %v5165_v53  ;;  %vm5357_vm5 = vmor %vm5355_vm4, %vm5356_vm3  ;;  %vm5365_vm7 = vweird.f32 %v5165_v53 }
 0x67e   : > { %v5351_v40 = vmul.f32 %v6806_v55, %v5350_v17  ;;  %v5348_v35 = vsel %vm5347_vm2, %v6804_v51, %v5344_v4 }
 0x67f   : > { %5741 = vadd.xlane.f32.xlu1 %v5694_v18  ;;  %v5515_v30 = vmul.f32 %v5348_v35, %v11185_v63 }
 0x680   : > { %v5352_v52 = vmul.f32 0.5, %v5351_v40 }
 0x681   : > { %v11480_v29 = vmax.f32 %v5515_v30, 0.0 }
 0x682   : > { %v5353_v8 = vsub.f32 1.5, %v5352_v52  ;;  %v5122_v41 = vpop.xlane.xlu1 %5121  ;;  %v11482_v48 = vpop.xlane.xlu0 %5584 }
 0x683   : > { %v6808_v34 = vpop.eup %6807  ;;  %v5166_v42 = vmax.f32 %v5122_v41, 1e-24  ;;  %v11484_v62 = vpop.xlane.xlu2 %5713  ;;  %5614 = vadd.xlane.f32.xlu0 %v11480_v29  ;;  %v5695_v0 = vmul.f32 %v11480_v29, %v11480_v29 }
 0x684   : > { %v5360_v45 = vmul.f32 %v6808_v34, %v5165_v53  ;;  %v5354_v63 = vmul.f32 %v6806_v55, %v5353_v8  ;;  %vm5366_vm6 = vweird.f32 %v6808_v34 }
 0x685   : > { %6809 = vrsqrt.f32 %v5166_v42  ;;  %5743 = vadd.xlane.f32.xlu2 %v5695_v0  ;;  %vm5367_vm8 = vmor %vm5365_vm7, %vm5366_vm6  ;;  %vm5375_vm10 = vweird.f32 %v5166_v42 }
 0x686   : > { %v5361_v31 = vmul.f32 %v6808_v34, %v5360_v45  ;;  %v5358_v51 = vsel %vm5357_vm5, %v6806_v55, %v5354_v63 }
 0x687   : > { %v5516_v26 = vmul.f32 %v5358_v51, %v11194_v49 }
 0x688   : > { %v5362_v32 = vmul.f32 0.5, %v5361_v31 }
 0x689   : > { %v11490_v19 = vmax.f32 %v5516_v26, 0.0 }
 0x68a   : > { %v5363_v5 = vsub.f32 1.5, %v5362_v32  ;;  %v11492_v33 = vpop.xlane.xlu1 %5586  ;;  %v11494_v28 = vpop.xlane.xlu0 %5715 }
 0x68b   : > { %v6810_v9 = vpop.eup %6809  ;;  %v5124_v10 = vpop.xlane.xlu2 %5123  ;;  %5616 = vadd.xlane.f32.xlu1 %v11490_v19  ;;  %v5696_v23 = vmul.f32 %v11490_v19, %v11490_v19 }
 0x68c   : > { %v5370_v54 = vmul.f32 %v6810_v9, %v5166_v42  ;;  %v5167_v49 = vmax.f32 %v5124_v10, 1e-24  ;;  %v5364_v55 = vmul.f32 %v6808_v34, %v5363_v5  ;;  %vm5376_vm9 = vweird.f32 %v6810_v9 }
 0x68d   : > { %5745 = vadd.xlane.f32.xlu0 %v5696_v23  ;;  %vm5377_vm11 = vmor %vm5375_vm10, %vm5376_vm9  ;;  %v5566_v5 = vstv %s5565_s21 }
 0x68e   : > { %v5371_v17 = vmul.f32 %v6810_v9, %v5370_v54  ;;  %6811 = vrsqrt.f32 %v5167_v49  ;;  %v5368_v4 = vsel %vm5367_vm8, %v6808_v34, %v5364_v55  ;;  %vm5385_vm13 = vweird.f32 %v5167_v49 }
 0x68f   : > { %v5517_v18 = vmul.f32 %v5368_v4, %v11212_v44  ;;  %vm5572_vm2 = vweird.f32 %v5566_v5 }
 0x690   : > { %v5372_v40 = vmul.f32 0.5, %v5371_v17 }
 0x691   : > { %v11501_v35 = vmax.f32 %v5517_v18, 0.0 }
 0x692   : > { %v5373_v30 = vsub.f32 1.5, %v5372_v40  ;;  %v11503_v52 = vpop.xlane.xlu1 %5717  ;;  %v5126_v53 = vpop.xlane.xlu0 %5125 }
 0x693   : > { %v11505_v8 = vpop.xlane.xlu2 %5588  ;;  %v5168_v41 = vmax.f32 %v5126_v53, 1e-24  ;;  %5618 = vadd.xlane.f32.xlu2 %v11501_v35  ;;  %v5697_v0 = vmul.f32 %v11501_v35, %v11501_v35 }
 0x694   : > { %v6812_v34 = vpop.eup %6811  ;;  %v5374_v44 = vmul.f32 %v6810_v9, %v5373_v30 }
 0x695   : > { %v5380_v45 = vmul.f32 %v6812_v34, %v5167_v49  ;;  %6813 = vrsqrt.f32 %v5168_v41  ;;  %5747 = vadd.xlane.f32.xlu1 %v5697_v0  ;;  %vm5386_vm12 = vweird.f32 %v6812_v34  ;;  %vm5395_vm0 = vweird.f32 %v5168_v41 }
 0x696   : > { %v5378_v63 = vsel %vm5377_vm11, %v6810_v9, %v5374_v44  ;;  %6815 = vrcp.f32 %v5566_v5  ;;  %vm5387_vm14 = vmor %vm5385_vm13, %vm5386_vm12 }
 0x697   : > { %v5381_v31 = vmul.f32 %v6812_v34, %v5380_v45  ;;  %v5518_v51 = vmul.f32 %v5378_v63, %v11232_v37 }
 0x699   : > { %v5382_v26 = vmul.f32 0.5, %v5381_v31  ;;  %v11511_v32 = vmax.f32 %v5518_v51, 0.0 }
 0x69a   : > { %v5128_v10 = vpop.xlane.xlu1 %5127  ;;  %v11513_v23 = vpop.xlane.xlu0 %5590 }
 0x69b   : > { %v6814_v54 = vpop.eup %6813  ;;  %v5383_v42 = vsub.f32 1.5, %v5382_v26  ;;  %v5169_v55 = vmax.f32 %v5128_v10, 1e-24  ;;  %v11515_v17 = vpop.xlane.xlu2 %5719  ;;  %5620 = vadd.xlane.f32.xlu0 %v11511_v32  ;;  %v5698_v9 = vmul.f32 %v11511_v32, %v11511_v32 }
 0x69c   : > { %v5390_v37 = vmul.f32 %v6814_v54, %v5168_v41  ;;  %v6816_v30 = vpop.eup %6815  ;;  %vm5396_vm15 = vweird.f32 %v6814_v54 }
 0x69d   : > { %6817 = vrsqrt.f32 %v5169_v55  ;;  %5749 = vadd.xlane.f32.xlu2 %v5698_v9  ;;  %v5384_v4 = vmul.f32 %v6812_v34, %v5383_v42  ;;  %v5568_v44 = vmul.f32 %v6816_v30, %v5566_v5  ;;  %vm5397_vm1 = vmor %vm5395_vm0, %vm5396_vm15  ;;  %vm5573_vm3 = vweird.f32 %v6816_v30 }
 0x69e   : > { %v5391_v18 = vmul.f32 %v6814_v54, %v5390_v37  ;;  %vm5574_vm4 = vmor %vm5572_vm2, %vm5573_vm3  ;;  %vm5405_vm7 = vweird.f32 %v5169_v55 }
 0x69f   : > { %v5388_v40 = vsel %vm5387_vm14, %v6812_v34, %v5384_v4  ;;  %v5569_v10 = vsub.f32 1.0, %v5568_v44 }
 0x6a0   : > { %v5392_v53 = vmul.f32 0.5, %v5391_v18  ;;  %v5519_v0 = vmul.f32 %v5388_v40, %v11255_v57  ;;  %v5578_v18 = vand.u32 2147483648, %v5566_v5 }
 0x6a1   : > { %v5570_v37 = vmul.f32 %v6816_v30, %v5569_v10 }
 0x6a2   : > { %v5393_v45 = vsub.f32 1.5, %v5392_v53  ;;  %v11521_v63 = vpop.xlane.xlu1 %5592  ;;  %v11523_v31 = vpop.xlane.xlu0 %5721  ;;  %v11525_v51 = vmax.f32 %v5519_v0, 0.0  ;;  %v5579_v21 = vor.u32 1.1754944e-38, %v5578_v18 }
 0x6a3   : > { %v6818_v26 = vpop.eup %6817  ;;  %v5130_v49 = vpop.xlane.xlu2 %5129  ;;  %v5571_v53 = vadd.f32 %v6816_v30, %v5570_v37 }
 0x6a4   : > { %v5400_v42 = vmul.f32 %v6818_v26, %v5169_v55  ;;  %v5170_v9 = vmax.f32 %v5130_v49, 1e-24  ;;  %5622 = vadd.xlane.f32.xlu1 %v11525_v51  ;;  %v5699_v34 = vmul.f32 %v11525_v51, %v11525_v51  ;;  %v5394_v57 = vmul.f32 %v6814_v54, %v5393_v45 }
 0x6a5   : > { %v5576_v49 = vand.u32 2147483647, %v5566_v5  ;;  %v5575_v47 = vsel %vm5574_vm4, %v6816_v30, %v5571_v53  ;;  %vm5406_vm5 = vweird.f32 %v6818_v26 }
 0x6a6   : > { %v5401_v4 = vmul.f32 %v6818_v26, %v5400_v42  ;;  %6819 = vrsqrt.f32 %v5170_v9  ;;  %5751 = vadd.xlane.f32.xlu0 %v5699_v34  ;;  %v5398_v40 = vsel %vm5397_vm1, %v6814_v54, %v5394_v57  ;;  %vm5407_vm8 = vmor %vm5405_vm7, %vm5406_vm5  ;;  %vm5415_vm10 = vweird.f32 %v5170_v9 }
 0x6a7   : > { %v5520_v44 = vmul.f32 %v5398_v40, %v11279_v27  ;;  %vm5577_vm6 = vcmp.eq.f32.partialorder %v5576_v49, 8.507059e+37 }
 0x6a8   : > { %v5402_v0 = vmul.f32 0.5, %v5401_v4  ;;  %v5580_v34 = vsel %vm5577_vm6, %v5579_v21, %v5575_v47 }
 0x6a9   : > { %v11533_v10 = vmax.f32 %v5520_v44, 0.0  ;;  %6678 = vpush %v5580_v34 }
 0x6aa   : > { %v5403_v39 = vsub.f32 1.5, %v5402_v0  ;;  %v11531_v41 = vpop.xlane.xlu1 %5723  ;;  %v5132_v45 = vpop.xlane.xlu0 %5131 }
 0x6ab   : > { %v11535_v42 = vpop.xlane.xlu2 %5594  ;;  %v5171_v54 = vmax.f32 %v5132_v45, 1e-24  ;;  %5624 = vadd.xlane.f32.xlu2 %v11533_v10  ;;  %v5700_v27 = vmul.f32 %v11533_v10, %v11533_v10 }
 0x6ac   : > { %v6820_v57 = vpop.eup %6819  ;;  %v5404_v5 = vmul.f32 %v6818_v26, %v5403_v39 }
 0x6ad   : > { %v5410_v30 = vmul.f32 %v6820_v57, %v5170_v9  ;;  %6821 = vrsqrt.f32 %v5171_v54  ;;  %5753 = vadd.xlane.f32.xlu1 %v5700_v27  ;;  %vm5416_vm9 = vweird.f32 %v6820_v57  ;;  %vm5425_vm13 = vweird.f32 %v5171_v54 }
 0x6ae   : > { %v5408_v37 = vsel %vm5407_vm8, %v6818_v26, %v5404_v5  ;;  %vm5417_vm11 = vmor %vm5415_vm10, %vm5416_vm9 }
 0x6af   : > { %v5411_v4 = vmul.f32 %v6820_v57, %v5410_v30  ;;  %v5521_v18 = vmul.f32 %v5408_v37, %v11299_v61 }
 0x6b1   : > { %v5412_v40 = vmul.f32 0.5, %v5411_v4  ;;  %v11541_v53 = vmax.f32 %v5521_v18, 0.0 }
 0x6b2   : > { %v5134_v21 = vpop.xlane.xlu1 %5133  ;;  %v11543_v47 = vpop.xlane.xlu0 %5596 }
 0x6b3   : > { %v6822_v55 = vpop.eup %6821  ;;  %v5413_v0 = vsub.f32 1.5, %v5412_v40  ;;  %v11545_v44 = vpop.xlane.xlu2 %5725  ;;  %v5172_v39 = vmax.f32 %v5134_v21, 1e-24  ;;  %5626 = vadd.xlane.f32.xlu0 %v11541_v53  ;;  %v5701_v26 = vmul.f32 %v11541_v53, %v11541_v53 }
 0x6b4   : > { %v5420_v49 = vmul.f32 %v6822_v55, %v5171_v54  ;;  %vm5426_vm12 = vweird.f32 %v6822_v55 }
 0x6b5   : > { %6823 = vrsqrt.f32 %v5172_v39  ;;  %5755 = vadd.xlane.f32.xlu2 %v5701_v26  ;;  %v5414_v61 = vmul.f32 %v6820_v57, %v5413_v0  ;;  %vm5427_vm14 = vmor %vm5425_vm13, %vm5426_vm12  ;;  %vm5435_vm0 = vweird.f32 %v5172_v39 }
 0x6b6   : > { %v5421_v45 = vmul.f32 %v6822_v55, %v5420_v49 }
 0x6b7   : > { %v5418_v34 = vsel %vm5417_vm11, %v6820_v57, %v5414_v61 }
 0x6b8   : > { %v5422_v27 = vmul.f32 0.5, %v5421_v45  ;;  %v5522_v5 = vmul.f32 %v5418_v34, %v11319_v24 }
 0x6ba   : > { %v5423_v30 = vsub.f32 1.5, %v5422_v27  ;;  %v11551_v37 = vpop.xlane.xlu1 %5598  ;;  %v11553_v4 = vpop.xlane.xlu0 %5727  ;;  %v11555_v18 = vmax.f32 %v5522_v5, 0.0 }
 0x6bb   : > { %v6824_v40 = vpop.eup %6823  ;;  %v5136_v21 = vpop.xlane.xlu2 %5135 }
 0x6bc   : > { %v5430_v9 = vmul.f32 %v6824_v40, %v5172_v39  ;;  %v5173_v7 = vmax.f32 %v5136_v21, 1e-24  ;;  %5628 = vadd.xlane.f32.xlu1 %v11555_v18  ;;  %v5702_v57 = vmul.f32 %v11555_v18, %v11555_v18  ;;  %v5424_v0 = vmul.f32 %v6822_v55, %v5423_v30 }
 0x6bd   : > { %vm5436_vm15 = vweird.f32 %v6824_v40 }
 0x6be   : > { %v5431_v24 = vmul.f32 %v6824_v40, %v5430_v9  ;;  %6825 = vrsqrt.f32 %v5173_v7  ;;  %5757 = vadd.xlane.f32.xlu0 %v5702_v57  ;;  %v5428_v26 = vsel %vm5427_vm14, %v6822_v55, %v5424_v0  ;;  %vm5437_vm1 = vmor %vm5435_vm0, %vm5436_vm15  ;;  %vm5445_vm3 = vweird.f32 %v5173_v7 }
 0x6bf   : > { %v5523_v61 = vmul.f32 %v5428_v26, %v11338_v38 }
 0x6c0   : > { %v5432_v49 = vmul.f32 0.5, %v5431_v24 }
 0x6c1   : > { %v11563_v5 = vmax.f32 %v5523_v61, 0.0 }
 0x6c2   : > { %v5433_v45 = vsub.f32 1.5, %v5432_v49  ;;  %v11561_v34 = vpop.xlane.xlu1 %5729  ;;  %v5138_v27 = vpop.xlane.xlu0 %5137 }
 0x6c3   : > { %13322 = vst [vmem:[#allocation15_spill] sm:$0xff] %v11563_v5  ;;  %v11565_v21 = vpop.xlane.xlu2 %5600  ;;  %v5174_v12 = vmax.f32 %v5138_v27, 1e-24  ;;  %5630 = vadd.xlane.f32.xlu2 %v11563_v5  ;;  %v5703_v55 = vmul.f32 %v11563_v5, %v11563_v5 }
 0x6c4   : > { %v6826_v54 = vpop.eup %6825  ;;  %v5434_v30 = vmul.f32 %v6824_v40, %v5433_v45 }
 0x6c5   : > { %v5440_v38 = vmul.f32 %v6826_v54, %v5173_v7  ;;  %6827 = vrsqrt.f32 %v5174_v12  ;;  %5759 = vadd.xlane.f32.xlu1 %v5703_v55  ;;  %vm5446_vm2 = vweird.f32 %v6826_v54  ;;  %vm5455_vm6 = vweird.f32 %v5174_v12 }
 0x6c6   : > { %v5438_v9 = vsel %vm5437_vm1, %v6824_v40, %v5434_v30  ;;  %vm5447_vm4 = vmor %vm5445_vm3, %vm5446_vm2 }
 0x6c7   : > { %v5441_v57 = vmul.f32 %v6826_v54, %v5440_v38  ;;  %v5524_v0 = vmul.f32 %v5438_v9, %v11356_v1 }
 0x6c9   : > { %v5442_v24 = vmul.f32 0.5, %v5441_v57  ;;  %v11571_v26 = vmax.f32 %v5524_v0, 0.0 }
 0x6ca   : > { %v5140_v49 = vpop.xlane.xlu1 %5139  ;;  %v11573_v61 = vpop.xlane.xlu0 %5602 }
 0x6cb   : > { %13323 = vst [vmem:[#allocation60_spill] sm:$0xff] %v11571_v26  ;;  %v6828_v39 = vpop.eup %6827  ;;  %v5443_v27 = vsub.f32 1.5, %v5442_v24  ;;  %v11575_v11 = vpop.xlane.xlu2 %5731  ;;  %v5175_v45 = vmax.f32 %v5140_v49, 1e-24  ;;  %5632 = vadd.xlane.f32.xlu0 %v11571_v26  ;;  %v5704_v40 = vmul.f32 %v11571_v26, %v11571_v26 }
 0x6cc   : > { %v5450_v55 = vmul.f32 %v6828_v39, %v5174_v12  ;;  %vm5456_vm5 = vweird.f32 %v6828_v39 }
 0x6cd   : > { %6829 = vrsqrt.f32 %v5175_v45  ;;  %5761 = vadd.xlane.f32.xlu2 %v5704_v40  ;;  %v5444_v1 = vmul.f32 %v6826_v54, %v5443_v27  ;;  %vm5457_vm7 = vmor %vm5455_vm6, %vm5456_vm5  ;;  %vm5465_vm9 = vweird.f32 %v5175_v45 }
 0x6ce   : > { %v5451_v30 = vmul.f32 %v6828_v39, %v5450_v55 }
 0x6cf   : > { %v5448_v38 = vsel %vm5447_vm4, %v6826_v54, %v5444_v1 }
 0x6d0   : > { %v5452_v9 = vmul.f32 0.5, %v5451_v30  ;;  %v5525_v57 = vmul.f32 %v5448_v38, %v11374_v25 }
 0x6d2   : > { %v5453_v0 = vsub.f32 1.5, %v5452_v9  ;;  %v11581_v24 = vpop.xlane.xlu1 %5604  ;;  %v11583_v49 = vpop.xlane.xlu0 %5733  ;;  %v11585_v6 = vmax.f32 %v5525_v57, 0.0 }
 0x6d3   : > { %13324 = vst [vmem:[#allocation98_spill] sm:$0xff] %v11583_v49  ;;  %v6830_v5 = vpop.eup %6829  ;;  %v5142_v26 = vpop.xlane.xlu2 %5141 }
 0x6d4   : > { %13325 = vst [vmem:[#allocation21_spill] sm:$0xff] %v11585_v6  ;;  %v5460_v7 = vmul.f32 %v6830_v5, %v5175_v45  ;;  %v5176_v20 = vmax.f32 %v5142_v26, 1e-24  ;;  %5634 = vadd.xlane.f32.xlu1 %v11585_v6  ;;  %v5705_v54 = vmul.f32 %v11585_v6, %v11585_v6  ;;  %v5454_v27 = vmul.f32 %v6828_v39, %v5453_v0 }
 0x6d5   : > { %vm5466_vm8 = vweird.f32 %v6830_v5 }
 0x6d6   : > { %v5461_v25 = vmul.f32 %v6830_v5, %v5460_v7  ;;  %6831 = vrsqrt.f32 %v5176_v20  ;;  %5763 = vadd.xlane.f32.xlu0 %v5705_v54  ;;  %v5458_v40 = vsel %vm5457_vm7, %v6828_v39, %v5454_v27  ;;  %vm5467_vm10 = vmor %vm5465_vm9, %vm5466_vm8  ;;  %vm5475_vm12 = vweird.f32 %v5176_v20 }
 0x6d7   : > { %v5526_v1 = vmul.f32 %v5458_v40, %v11395_v50 }
 0x6d8   : > { %v5462_v55 = vmul.f32 0.5, %v5461_v25 }
 0x6d9   : > { %v11593_v9 = vmax.f32 %v5526_v1, 0.0 }
 0x6da   : > { %v5463_v30 = vsub.f32 1.5, %v5462_v55  ;;  %v11591_v38 = vpop.xlane.xlu1 %5735  ;;  %v5144_v26 = vpop.xlane.xlu0 %5143  ;;  %s6679_s17 = spop %6678 }
 0x6db   : > { %13326 = vst [vmem:[#allocation22_spill] sm:$0xff] %v11593_v9  ;;  %v5177_v57 = vmax.f32 %v5144_v26, 1e-24  ;;  %5636 = vadd.xlane.f32.xlu2 %v11593_v9  ;;  %v5706_v12 = vmul.f32 %v11593_v9, %v11593_v9  ;;  %v11598_v50 = vpop.xlane.xlu2 %5606 }
 0x6dc   : > { %v6832_v49 = vpop.eup %6831  ;;  %v5464_v0 = vmul.f32 %v6830_v5, %v5463_v30 }
 0x6dd   : > { %v5470_v39 = vmul.f32 %v6832_v49, %v5176_v20  ;;  %6833 = vrsqrt.f32 %v5177_v57  ;;  %5765 = vadd.xlane.f32.xlu1 %v5706_v12  ;;  %vm5476_vm11 = vweird.f32 %v6832_v49  ;;  %vm5485_vm15 = vweird.f32 %v5177_v57 }
 0x6de   : > { %v5468_v7 = vsel %vm5467_vm10, %v6830_v5, %v5464_v0  ;;  %vm5477_vm13 = vmor %vm5475_vm12, %vm5476_vm11 }
 0x6df   : > { %v5471_v54 = vmul.f32 %v6832_v49, %v5470_v39  ;;  %v5527_v27 = vmul.f32 %v5468_v7, %v11413_v2 }
 0x6e1   : > { %v5472_v25 = vmul.f32 0.5, %v5471_v54  ;;  %v11601_v40 = vmax.f32 %v5527_v27, 0.0 }
 0x6e2   : > { %v5146_v45 = vpop.xlane.xlu1 %5145  ;;  %v11606_v6 = vpop.xlane.xlu0 %5608 }
 0x6e3   : > { %13327 = vst [vmem:[#allocation23_spill] sm:$0xff] %v11601_v40  ;;  %v6834_v55 = vpop.eup %6833  ;;  %v5473_v1 = vsub.f32 1.5, %v5472_v25  ;;  %v5178_v26 = vmax.f32 %v5146_v45, 1e-24  ;;  %5638 = vadd.xlane.f32.xlu0 %v11601_v40  ;;  %v5707_v30 = vmul.f32 %v11601_v40, %v11601_v40  ;;  %v11608_v39 = vpop.xlane.xlu2 %5737 }
 0x6e4   : > { %v5480_v9 = vmul.f32 %v6834_v55, %v5177_v57  ;;  %13328 = vst [vmem:[#allocation29_spill] sm:$0xff] %v11606_v6  ;;  %vm5486_vm14 = vweird.f32 %v6834_v55 }
 0x6e5   : > { %6835 = vrsqrt.f32 %v5178_v26  ;;  %5767 = vadd.xlane.f32.xlu2 %v5707_v30  ;;  %v5474_v2 = vmul.f32 %v6832_v49, %v5473_v1  ;;  %13329 = vst [vmem:[#allocation28_spill] sm:$0xff] %v11608_v39  ;;  %vm5487_vm0 = vmor %vm5485_vm15, %vm5486_vm14  ;;  %vm5495_vm2 = vweird.f32 %v5178_v26 }
 0x6e6   : > { %v5481_v5 = vmul.f32 %v6834_v55, %v5480_v9 }
 0x6e7   : > { %v5478_v12 = vsel %vm5477_vm13, %v6832_v49, %v5474_v2 }
 0x6e8   : > { %v5482_v0 = vmul.f32 0.5, %v5481_v5  ;;  %v5528_v7 = vmul.f32 %v5478_v12, %v11429_v16 }
 0x6ea   : > { %v5483_v54 = vsub.f32 1.5, %v5482_v0  ;;  %v11611_v27 = vmax.f32 %v5528_v7, 0.0  ;;  %v11613_v40 = vpop.xlane.xlu1 %5610  ;;  %v11616_v49 = vpop.xlane.xlu0 %5739  ;;  %v11628_v7 = vstv %s6679_s17 }
 0x6eb   : > { %v6836_v25 = vpop.eup %6835 }
 0x6ec   : > { %13330 = vst [vmem:[#allocation33_spill] sm:$0xff] %v11611_v27  ;;  %v5490_v45 = vmul.f32 %v6836_v25, %v5178_v26  ;;  %5640 = vadd.xlane.f32.xlu1 %v11611_v27  ;;  %v5484_v20 = vmul.f32 %v6834_v55, %v5483_v54  ;;  %vm5496_vm1 = vweird.f32 %v6836_v25 }
 0x6ed   : > { %vm5497_vm3 = vmor %vm5495_vm2, %vm5496_vm1 }
 0x6ee   : > { %v5491_v9 = vmul.f32 %v6836_v25, %v5490_v45  ;;  %v5488_v1 = vsel %vm5487_vm0, %v6834_v55, %v5484_v20  ;;  %v11619_v2 = vpop.xlane.xlu2 %5612 }
 0x6ef   : > { %v5529_v30 = vmul.f32 %v5488_v1, %v11444_v43 }
 0x6f0   : > { %v5492_v16 = vmul.f32 0.5, %v5491_v9 }
 0x6f1   : > { %v11621_v5 = vmax.f32 %v5529_v30, 0.0 }
 0x6f2   : > { %v5493_v12 = vsub.f32 1.5, %v5492_v16  ;;  %v11626_v55 = vpop.xlane.xlu1 %5741 }
 0x6f3   : > { %13331 = vst [vmem:[#allocation31_spill] sm:$0xff] %v11621_v5  ;;  %5642 = vadd.xlane.f32.xlu2 %v11621_v5  ;;  %v5709_v57 = vmul.f32 %v11621_v5, %v11621_v5 }
 0x6f4   : > { %v5494_v0 = vmul.f32 %v6836_v25, %v5493_v12  ;;  %13332 = vst [vmem:[#allocation104_spill] sm:$0xff] %v11626_v55  ;;  %v12553_v55 = vmov 0.0  }
 0x6f5   : > { %5771 = vadd.xlane.f32.xlu1 %v5709_v57 }
 0x6f6   : > { %v5615_v43 = vpop.xlane.xlu0 %5614  ;;  %v5498_v54 = vsel %vm5497_vm3, %v6836_v25, %v5494_v0 }
 0x6f7   : > { %v5646_v45 = vadd.f32 %v5615_v43, %v11474_v15  ;;  %v5530_v20 = vmul.f32 %v5498_v54, %v11456_v13 }
 0x6f8   : > { %v5744_v9 = vpop.xlane.xlu2 %5743 }
 0x6f9   : > { %v11633_v1 = vmul.f32 %v11628_v7, %v5646_v45  ;;  %v5775_v30 = vadd.f32 %v5744_v9, %v11470_v59  ;;  %v11636_v26 = vmax.f32 %v5530_v20, 0.0  ;;  %v5708_v20 = vmul.f32 %v11611_v27, %v11611_v27 }
 0x6fa   : > { %v6130_v9 = vlaneseq }
 0x6fb   : > { %13333 = vst [vmem:[#allocation37_spill] sm:$0xff] %v11636_v26  ;;  %v5791_v16 = vmul.f32 %v5775_v30, %v11628_v7  ;;  %v5807_v12 = vmul.f32 %v11633_v1, %v11633_v1  ;;  %5644 = vadd.xlane.f32.xlu0 %v11636_v26  ;;  %v5710_v15 = vmul.f32 %v11636_v26, %v11636_v26 }
 0x6fd   : > { %v5823_v25 = vsub.f32 %v5791_v16, %v5807_v12  ;;  %5773 = vadd.xlane.f32.xlu2 %v5710_v15  ;;  %v11654_v15 = vshrl.u32 %v6130_v9, 7 }
 0x6fe   : > { %v5617_v13 = vpop.xlane.xlu1 %5616 }
 0x6ff   : > { %v5839_v57 = vmax.f32 %v5823_v25, 0.0  ;;  %v5647_v0 = vadd.f32 %v5617_v13, %v11482_v48 }
 0x700   : > { %v5746_v43 = vpop.xlane.xlu0 %5745 }
 0x701   : > { %v5887_v59 = vadd.f32 1e-05, %v5839_v57  ;;  %v11646_v54 = vmul.f32 %v11628_v7, %v5647_v0  ;;  %v5776_v45 = vadd.f32 %v5746_v43, %v11484_v62  ;;  %v11658_v62 = vstv %s7294_s12  ;;  %s11702_s12 = scalar_lea.vmem [#allocation2], %s6096_s29 }
 0x702   : > { %v6148_v9 = vadd.s32 %v11658_v62, %v11654_v15 }
 0x703   : > { %6837 = vrsqrt.f32 %v5887_v59  ;;  %5769 = vadd.xlane.f32.xlu0 %v5708_v20  ;;  %v5792_v30 = vmul.f32 %v5776_v45, %v11628_v7  ;;  %v5808_v48 = vmul.f32 %v11646_v54, %v11646_v54  ;;  %vm5909_vm7 = vweird.f32 %v5887_v59 }
 0x705   : > { %v5824_v16 = vsub.f32 %v5792_v30, %v5808_v48  ;;  %v11671_v48 = vstv %s6164_s8 }
 0x706   : > { %v5619_v12 = vpop.xlane.xlu2 %5618  ;;  %vm6168_vm4 = vcmp.lt.s32.totalorder %v6148_v9, %v11671_v48 }
 0x707   : > { %v5648_v25 = vadd.f32 %v5619_v12, %v11492_v33  ;;  %v5840_v13 = vmax.f32 %v5824_v16, 0.0 }
 0x708   : > { %v5748_v57 = vpop.xlane.xlu1 %5747 }
 0x709   : > { %v6838_v0 = vpop.eup %6837  ;;  %v11661_v43 = vmul.f32 %v11628_v7, %v5648_v25  ;;  %v5777_v45 = vadd.f32 %v5748_v57, %v11494_v28  ;;  %v11664_v27 = vadd.f32 1e-05, %v5840_v13  ;;  %v11675_v28 = vstv %s6635_s30 }
 0x70a   : > { %v5904_v20 = vmul.f32 %v6838_v0, %v5887_v59  ;;  %vm5910_vm5 = vweird.f32 %v6838_v0  ;;  %vm6184_vm6 = vcmp.lt.s32.totalorder %v6148_v9, %v11675_v28 }
 0x70b   : > { %v5809_v33 = vmul.f32 %v11661_v43, %v11661_v43  ;;  %v5793_v30 = vmul.f32 %v5777_v45, %v11628_v7  ;;  %6839 = vrsqrt.f32 %v11664_v27  ;;  %v6132_v45 = vadd.s32 8, %v11654_v15  ;;  %vm5911_vm8 = vmor %vm5909_vm7, %vm5910_vm5 }
 0x70c   : > { %v5905_v16 = vmul.f32 %v6838_v0, %v5904_v20  ;;  %vm5919_vm12 = vweird.f32 %v11664_v27 }
 0x70d   : > { %v5825_v12 = vsub.f32 %v5793_v30, %v5809_v33 }
 0x70e   : > { %v5906_v25 = vmul.f32 0.5, %v5905_v16  ;;  %v5621_v13 = vpop.xlane.xlu0 %5620 }
 0x70f   : > { %v5841_v57 = vmax.f32 %v5825_v12, 0.0  ;;  %v5649_v26 = vadd.f32 %v5621_v13, %v11505_v8  ;;  %v6636_v12 = vsel %vm6168_vm4, 1.0, %v12553_v55  ;;  %v5871_v13 = vsub.f32 %v11480_v29, %v11633_v1 }
 0x710   : > { %v5907_v5 = vsub.f32 1.5, %v5906_v25  ;;  %v5750_v39 = vpop.xlane.xlu2 %5749  ;;  %v5855_v25 = vsub.f32 %v11204_v58, %v11633_v1  ;;  %v6133_v1 = vadd.s32 16, %v11654_v15 }
 0x711   : > { %v11682_v20 = vadd.f32 1e-05, %v5841_v57  ;;  %v11685_v33 = vmul.f32 %v11628_v7, %v5649_v26  ;;  %v5778_v30 = vadd.f32 %v5750_v39, %v11503_v52  ;;  %v6840_v16 = vpop.eup %6839  ;;  %v6652_v52 = vsel %vm6184_vm6, 1.0, %v12553_v55 }
 0x712   : > { %v5908_v8 = vmul.f32 %v6838_v0, %v5907_v5  ;;  %v5914_v9 = vmul.f32 %v6840_v16, %v11664_v27  ;;  %v6149_v26 = vadd.s32 %v11658_v62, %v6132_v45  ;;  %vm5920_vm10 = vweird.f32 %v6840_v16 }
 0x713   : > { %6841 = vrsqrt.f32 %v11682_v20  ;;  %v5794_v5 = vmul.f32 %v5778_v30, %v11628_v7  ;;  %v5810_v29 = vmul.f32 %v11685_v33, %v11685_v33  ;;  %vm5921_vm13 = vmor %vm5919_vm12, %vm5920_vm10  ;;  %vm5929_vm1 = vweird.f32 %v11682_v20 }
 0x714   : > { %v5912_v39 = vsel %vm5911_vm8, %v6838_v0, %v5908_v8  ;;  %v5915_v58 = vmul.f32 %v6840_v16, %v5914_v9  ;;  %vm6169_vm9 = vcmp.lt.s32.totalorder %v6149_v26, %v11671_v48  ;;  %vm6185_vm11 = vcmp.lt.s32.totalorder %v6149_v26, %v11675_v28 }
 0x715   : > { %v6063_v59 = vmul.f32 %v5912_v39, %v5855_v25  ;;  %v6079_v57 = vmul.f32 %v5912_v39, %v5871_v13  ;;  %v5826_v55 = vsub.f32 %v5794_v5, %v5810_v29  ;;  %v13334_v26 = vmov 0.0  }
 0x716   : > { %v5916_v45 = vmul.f32 0.5, %v5915_v58  ;;  %v6637_v58 = vsel %vm6169_vm9, 1.0, %v13334_v26 }
 0x717   : > { %6098 = vst [vmem:[%s11702_s12] sm:$0xff] %v6063_v59  ;;  %v6264_v0 = vmul.f32 %v6636_v12, %v6063_v59  ;;  %v6280_v8 = vmul.f32 %v6652_v52, %v6079_v57  ;;  %v5623_v30 = vpop.xlane.xlu1 %5622  ;;  %v5842_v39 = vmax.f32 %v5826_v55, 0.0  ;;  %v5872_v55 = vsub.f32 %v11490_v19, %v11646_v54 }
 0x718   : > { %6114 = vst [vmem:[%s11702_s12 + $0x100] sm:$0xff] %v6079_v57  ;;  %v5650_v25 = vadd.f32 %v5623_v30, %v11513_v23  ;;  %v5917_v9 = vsub.f32 1.5, %v5916_v45  ;;  %v6150_v23 = vadd.s32 %v11658_v62, %v6133_v1  ;;  %v5856_v57 = vsub.f32 %v11226_v46, %v11646_v54 }
 0x719   : > { %v6842_v13 = vpop.eup %6841  ;;  %6296 = vst [vmem:[%s7308_s10] sm:$0xff] %v6264_v0  ;;  %v5752_v52 = vpop.xlane.xlu0 %5751  ;;  %v11717_v59 = vadd.f32 1e-05, %v5842_v39  ;;  %v6653_v0 = vsel %vm6185_vm11, 1.0, %v13334_v26 }
 0x71a   : > { %6312 = vst [vmem:[%s7308_s10 + $0x80] sm:$0xff] %v6280_v8  ;;  %v5924_v6 = vmul.f32 %v6842_v13, %v11682_v20  ;;  %v11713_v12 = vmul.f32 %v11628_v7, %v5650_v25  ;;  %v5918_v5 = vmul.f32 %v6840_v16, %v5917_v9  ;;  %v5779_v27 = vadd.f32 %v5752_v52, %v11515_v17 }
 0x71b   : > { %6843 = vrsqrt.f32 %v11717_v59  ;;  %vm6170_vm14 = vcmp.lt.s32.totalorder %v6150_v23, %v11671_v48  ;;  %vm5930_vm15 = vweird.f32 %v6842_v13  ;;  %vm6186_vm0 = vcmp.lt.s32.totalorder %v6150_v23, %v11675_v28 }
 0x71c   : > { %v5925_v29 = vmul.f32 %v6842_v13, %v5924_v6  ;;  %v5922_v8 = vsel %vm5921_vm13, %v6840_v16, %v5918_v5  ;;  %v5811_v46 = vmul.f32 %v11713_v12, %v11713_v12  ;;  %v5795_v6 = vmul.f32 %v5779_v27, %v11628_v7  ;;  %vm5931_vm2 = vmor %vm5929_vm1, %vm5930_vm15 }
 0x71d   : > { %v6064_v1 = vmul.f32 %v5922_v8, %v5856_v57  ;;  %v6080_v45 = vmul.f32 %v5922_v8, %v5872_v55  ;;  %v6134_v9 = vadd.s32 24, %v11654_v15  ;;  %v6654_v20 = vsel %vm6186_vm0, 1.0, %v13334_v26 }
 0x71e   : > { %v5926_v30 = vmul.f32 0.5, %v5925_v29  ;;  %v5625_v19 = vpop.xlane.xlu2 %5624  ;;  %v5827_v39 = vsub.f32 %v5795_v6, %v5811_v46  ;;  %v6638_v29 = vsel %vm6170_vm14, 1.0, %v13334_v26  ;;  %vm5939_vm6 = vweird.f32 %v11717_v59 }
 0x71f   : > { %6099 = vst [vmem:[%s11702_s12 + $0x8] sm:$0xff] %v6064_v1  ;;  %v6265_v54 = vmul.f32 %v6637_v58, %v6064_v1  ;;  %v6281_v16 = vmul.f32 %v6653_v0, %v6080_v45  ;;  %v5651_v17 = vadd.f32 %v5625_v19, %v11521_v63  ;;  %v5857_v58 = vsub.f32 %v11249_v3, %v11661_v43 }
 0x720   : > { %v5927_v25 = vsub.f32 1.5, %v5926_v30  ;;  %6115 = vst [vmem:[%s11702_s12 + $0x108] sm:$0xff] %v6080_v45  ;;  %v5754_v52 = vpop.xlane.xlu1 %5753  ;;  %v5873_v63 = vsub.f32 %v11501_v35, %v11661_v43  ;;  %v5843_v0 = vmax.f32 %v5827_v39, 0.0  ;;  %v6151_v35 = vadd.s32 %v11658_v62, %v6134_v9 }
 0x721   : > { %6297 = vst [vmem:[%s7308_s10 + $0x8] sm:$0xff] %v6265_v54  ;;  %v11739_v57 = vmul.f32 %v11628_v7, %v5651_v17  ;;  %v6844_v55 = vpop.eup %6843  ;;  %v5780_v1 = vadd.f32 %v5754_v52, %v11523_v31  ;;  %v6135_v52 = vadd.s32 32, %v11654_v15 }
 0x722   : > { %v5928_v5 = vmul.f32 %v6842_v13, %v5927_v25  ;;  %6313 = vst [vmem:[%s7308_s10 + $0x88] sm:$0xff] %v6281_v16  ;;  %v5934_v27 = vmul.f32 %v6844_v55, %v11717_v59  ;;  %v11754_v43 = vadd.f32 1e-05, %v5843_v0  ;;  %vm6171_vm3 = vcmp.lt.s32.totalorder %v6151_v35, %v11671_v48 }
 0x723   : > { %v5812_v30 = vmul.f32 %v11739_v57, %v11739_v57  ;;  %v5796_v19 = vmul.f32 %v5780_v1, %v11628_v7  ;;  %vm5940_vm4 = vweird.f32 %v6844_v55  ;;  %vm6187_vm5 = vcmp.lt.s32.totalorder %v6151_v35, %v11675_v28 }
 0x724   : > { %v5932_v8 = vsel %vm5931_vm2, %v6842_v13, %v5928_v5  ;;  %v5935_v23 = vmul.f32 %v6844_v55, %v5934_v27  ;;  %6845 = vrsqrt.f32 %v11754_v43  ;;  %v6639_v0 = vsel %vm6171_vm3, 1.0, %v13334_v26  ;;  %vm5941_vm7 = vmor %vm5939_vm6, %vm5940_vm4 }
 0x725   : > { %v6065_v3 = vmul.f32 %v5932_v8, %v5857_v58  ;;  %v6081_v45 = vmul.f32 %v5932_v8, %v5873_v63  ;;  %v5828_v9 = vsub.f32 %v5796_v19, %v5812_v30  ;;  %v6655_v59 = vsel %vm6187_vm5, 1.0, %v13334_v26 }
 0x726   : > { %v5627_v46 = vpop.xlane.xlu0 %5626  ;;  %v5936_v31 = vmul.f32 0.5, %v5935_v23  ;;  %vm5949_vm11 = vweird.f32 %v11754_v43 }
 0x727   : > { %6100 = vst [vmem:[%s11702_s12 + $0x10] sm:$0xff] %v6065_v3  ;;  %v6266_v6 = vmul.f32 %v6638_v29, %v6065_v3  ;;  %v6282_v13 = vmul.f32 %v6654_v20, %v6081_v45  ;;  %v5652_v54 = vadd.f32 %v5627_v46, %v11535_v42  ;;  %v5844_v42 = vmax.f32 %v5828_v9, 0.0 }
 0x728   : > { %6116 = vst [vmem:[%s11702_s12 + $0x110] sm:$0xff] %v6081_v45  ;;  %v5756_v16 = vpop.xlane.xlu2 %5755  ;;  %v5937_v17 = vsub.f32 1.5, %v5936_v31  ;;  %v5874_v29 = vsub.f32 %v11511_v32, %v11685_v33  ;;  %v6152_v32 = vadd.s32 %v11658_v62, %v6135_v52 }
 0x729   : > { %6298 = vst [vmem:[%s7308_s10 + $0x10] sm:$0xff] %v6266_v6  ;;  %v5781_v25 = vadd.f32 %v5756_v16, %v11531_v41  ;;  %v11768_v39 = vmul.f32 %v11628_v7, %v5652_v54  ;;  %v5858_v41 = vsub.f32 %v11271_v14, %v11685_v33  ;;  %v11785_v1 = vadd.f32 1e-05, %v5844_v42 }
 0x72a   : > { %6314 = vst [vmem:[%s7308_s10 + $0x90] sm:$0xff] %v6282_v13  ;;  %v5938_v5 = vmul.f32 %v6844_v55, %v5937_v17  ;;  %v6846_v63 = vpop.eup %6845  ;;  %vm6172_vm8 = vcmp.lt.s32.totalorder %v6152_v32, %v11671_v48  ;;  %v6136_v16 = vadd.s32 40, %v11654_v15  ;;  %vm6188_vm10 = vcmp.lt.s32.totalorder %v6152_v32, %v11675_v28 }
 0x72b   : > { %v5797_v58 = vmul.f32 %v5781_v25, %v11628_v7  ;;  %v5813_v20 = vmul.f32 %v11768_v39, %v11768_v39  ;;  %v5944_v27 = vmul.f32 %v6846_v63, %v11754_v43  ;;  %6847 = vrsqrt.f32 %v11785_v1 }
 0x72c   : > { %v5942_v8 = vsel %vm5941_vm7, %v6844_v55, %v5938_v5  ;;  %vm5950_vm9 = vweird.f32 %v6846_v63  ;;  %v6640_v9 = vsel %vm6172_vm8, 1.0, %v13334_v26  ;;  %v5859_v5 = vsub.f32 %v11293_v36, %v11713_v12 }
 0x72d   : > { %v6066_v14 = vmul.f32 %v5942_v8, %v5858_v41  ;;  %v6082_v3 = vmul.f32 %v5942_v8, %v5874_v29  ;;  %v5945_v45 = vmul.f32 %v6846_v63, %v5944_v27  ;;  %v5829_v35 = vsub.f32 %v5797_v58, %v5813_v20  ;;  %vm5951_vm12 = vmor %vm5949_vm11, %vm5950_vm9 }
 0x72e   : > { %v5875_v42 = vsub.f32 %v11525_v51, %v11713_v12  ;;  %v6137_v12 = vadd.s32 48, %v11654_v15  ;;  %vm5959_vm0 = vweird.f32 %v11785_v1 }
 0x72f   : > { %v5629_v33 = vpop.xlane.xlu1 %5628  ;;  %6101 = vst [vmem:[%s11702_s12 + $0x18] sm:$0xff] %v6066_v14  ;;  %v6267_v23 = vmul.f32 %v6639_v0, %v6066_v14  ;;  %v6283_v30 = vmul.f32 %v6655_v59, %v6082_v3  ;;  %v5946_v6 = vmul.f32 0.5, %v5945_v45  ;;  %v5845_v13 = vmax.f32 %v5829_v35, 0.0 }
 0x730   : > { %v5653_v55 = vadd.f32 %v5629_v33, %v11543_v47  ;;  %6117 = vst [vmem:[%s11702_s12 + $0x118] sm:$0xff] %v6082_v3  ;;  %v6656_v0 = vsel %vm6188_vm10, 1.0, %v13334_v26  ;;  %v6153_v59 = vadd.s32 %v11658_v62, %v6136_v16 }
 0x731   : > { %v5758_v46 = vpop.xlane.xlu0 %5757  ;;  %6299 = vst [vmem:[%s7308_s10 + $0x18] sm:$0xff] %v6267_v23  ;;  %v5947_v54 = vsub.f32 1.5, %v5946_v6  ;;  %v11800_v25 = vadd.f32 1e-05, %v5845_v13  ;;  %v6848_v17 = vpop.eup %6847  ;;  %v6138_v6 = vadd.s32 56, %v11654_v15 }
 0x732   : > { %v5782_v31 = vadd.f32 %v5758_v46, %v11545_v44  ;;  %v11796_v19 = vmul.f32 %v11628_v7, %v5653_v55  ;;  %6315 = vst [vmem:[%s7308_s10 + $0x98] sm:$0xff] %v6283_v30  ;;  %v5954_v58 = vmul.f32 %v6848_v17, %v11785_v1  ;;  %vm6173_vm13 = vcmp.lt.s32.totalorder %v6153_v59, %v11671_v48 }
 0x733   : > { %v5948_v52 = vmul.f32 %v6846_v63, %v5947_v54  ;;  %6849 = vrsqrt.f32 %v11800_v25  ;;  %vm6189_vm14 = vcmp.lt.s32.totalorder %v6153_v59, %v11675_v28  ;;  %vm5960_vm15 = vweird.f32 %v6848_v17 }
 0x734   : > { %v5798_v47 = vmul.f32 %v5782_v31, %v11628_v7  ;;  %v5814_v44 = vmul.f32 %v11796_v19, %v11796_v19  ;;  %v5955_v36 = vmul.f32 %v6848_v17, %v5954_v58  ;;  %v5860_v55 = vsub.f32 %v11313_v56, %v11739_v57  ;;  %vm5961_vm1 = vmor %vm5959_vm0, %vm5960_vm15 }
 0x735   : > { %v5952_v20 = vsel %vm5951_vm12, %v6846_v63, %v5948_v52  ;;  %v6154_v46 = vadd.s32 %v11658_v62, %v6137_v12  ;;  %v6641_v56 = vsel %vm6173_vm13, 1.0, %v13334_v26  ;;  %vm5969_vm5 = vweird.f32 %v11800_v25 }
 0x736   : > { %v5830_v41 = vsub.f32 %v5798_v47, %v5814_v44  ;;  %v5631_v29 = vpop.xlane.xlu2 %5630  ;;  %v6067_v8 = vmul.f32 %v5952_v20, %v5859_v5  ;;  %v6083_v27 = vmul.f32 %v5952_v20, %v5875_v42  ;;  %v5956_v45 = vmul.f32 0.5, %v5955_v36 }
 0x737   : > { %v5654_v43 = vadd.f32 %v5631_v29, %v11551_v37  ;;  %v5876_v44 = vsub.f32 %v11533_v10, %v11739_v57  ;;  %vm6174_vm2 = vcmp.lt.s32.totalorder %v6154_v46, %v11671_v48  ;;  %vm6190_vm4 = vcmp.lt.s32.totalorder %v6154_v46, %v11675_v28 }
 0x738   : > { %v5846_v14 = vmax.f32 %v5830_v41, 0.0  ;;  %v5760_v51 = vpop.xlane.xlu1 %5759  ;;  %6102 = vst [vmem:[%s11702_s12 + $0x20] sm:$0xff] %v6067_v8  ;;  %v6268_v63 = vmul.f32 %v6640_v9, %v6067_v8  ;;  %v6284_v33 = vmul.f32 %v6656_v0, %v6083_v27  ;;  %v5957_v30 = vsub.f32 1.5, %v5956_v45 }
 0x739   : > { %v11819_v3 = vmul.f32 %v11628_v7, %v5654_v43  ;;  %v5783_v32 = vadd.f32 %v5760_v51, %v11553_v4  ;;  %v6850_v37 = vpop.eup %6849  ;;  %6118 = vst [vmem:[%s11702_s12 + $0x120] sm:$0xff] %v6083_v27  ;;  %v6657_v9 = vsel %vm6189_vm14, 1.0, %v13334_v26  ;;  %v6642_v36 = vsel %vm6174_vm2, 1.0, %v13334_v26 }
 0x73a   : > { %v11823_v35 = vadd.f32 1e-05, %v5846_v14  ;;  %6300 = vst [vmem:[%s7308_s10 + $0x20] sm:$0xff] %v6268_v63  ;;  %v5964_v4 = vmul.f32 %v6850_v37, %v11800_v25  ;;  %v5958_v54 = vmul.f32 %v6848_v17, %v5957_v30  ;;  %vm5970_vm3 = vweird.f32 %v6850_v37 }
 0x73b   : > { %v5815_v23 = vmul.f32 %v11819_v3, %v11819_v3  ;;  %6316 = vst [vmem:[%s7308_s10 + $0xa0] sm:$0xff] %v6284_v33  ;;  %v5799_v13 = vmul.f32 %v5783_v32, %v11628_v7  ;;  %vm5971_vm6 = vmor %vm5969_vm5, %vm5970_vm3  ;;  %v6658_v32 = vsel %vm6190_vm4, 1.0, %v13334_v26 }
 0x73c   : > { %6851 = vrsqrt.f32 %v11823_v35  ;;  %v5965_v16 = vmul.f32 %v6850_v37, %v5964_v4  ;;  %v5962_v1 = vsel %vm5961_vm1, %v6848_v17, %v5958_v54  ;;  %v6155_v17 = vadd.s32 %v11658_v62, %v6138_v6 }
 0x73d   : > { %v5831_v52 = vsub.f32 %v5799_v13, %v5815_v23  ;;  %v6068_v57 = vmul.f32 %v5962_v1, %v5860_v55  ;;  %v6084_v58 = vmul.f32 %v5962_v1, %v5876_v44  ;;  %vm5979_vm10 = vweird.f32 %v11823_v35 }
 0x73e   : > { %v5633_v31 = vpop.xlane.xlu0 %5632  ;;  %v5966_v42 = vmul.f32 0.5, %v5965_v16  ;;  %vm6175_vm7 = vcmp.lt.s32.totalorder %v6155_v17, %v11671_v48  ;;  %vm6191_vm9 = vcmp.lt.s32.totalorder %v6155_v17, %v11675_v28  ;;  %v6139_v54 = vadd.s32 64, %v11654_v15 }
 0x73f   : > { %v5655_v47 = vadd.f32 %v5633_v31, %v11565_v21  ;;  %v5861_v21 = vsub.f32 %v11333_v22, %v11768_v39  ;;  %v5847_v41 = vmax.f32 %v5831_v52, 0.0  ;;  %6103 = vst [vmem:[%s11702_s12 + $0x28] sm:$0xff] %v6068_v57  ;;  %v6269_v22 = vmul.f32 %v6641_v56, %v6068_v57 }
 0x740   : > { %v5762_v5 = vpop.xlane.xlu2 %5761  ;;  %v5967_v20 = vsub.f32 1.5, %v5966_v42  ;;  %v6285_v59 = vmul.f32 %v6657_v9, %v6084_v58  ;;  %6119 = vst [vmem:[%s11702_s12 + $0x128] sm:$0xff] %v6084_v58  ;;  %v6643_v6 = vsel %vm6175_vm7, 1.0, %v13334_v26  ;;  %v5862_v44 = vsub.f32 %v11351_v60, %v11796_v19 }
 0x741   : > { %v11853_v10 = vmul.f32 %v11628_v7, %v5655_v47  ;;  %v5784_v29 = vadd.f32 %v5762_v5, %v11561_v34  ;;  %v5877_v34 = vsub.f32 %v11541_v53, %v11768_v39  ;;  %v11865_v27 = vadd.f32 1e-05, %v5847_v41  ;;  %6301 = vst [vmem:[%s7308_s10 + $0x28] sm:$0xff] %v6269_v22 }
 0x742   : > { %v6852_v0 = vpop.eup %6851  ;;  %v5968_v8 = vmul.f32 %v6850_v37, %v5967_v20  ;;  %6317 = vst [vmem:[%s7308_s10 + $0xa8] sm:$0xff] %v6285_v59  ;;  %v5878_v56 = vsub.f32 %v11555_v18, %v11796_v19  ;;  %v6659_v9 = vsel %vm6191_vm9, 1.0, %v13334_v26  ;;  %v13335_v59 = vld [vmem:[#allocation98_spill] sm:$0xff] }
 0x743   : > { %v5974_v43 = vmul.f32 %v6852_v0, %v11823_v35  ;;  %v5800_v51 = vmul.f32 %v5784_v29, %v11628_v7  ;;  %v5816_v12 = vmul.f32 %v11853_v10, %v11853_v10  ;;  %6853 = vrsqrt.f32 %v11865_v27 }
 0x744   : > { %v5972_v53 = vsel %vm5971_vm6, %v6850_v37, %v5968_v8  ;;  %vm5980_vm8 = vweird.f32 %v6852_v0  ;;  %v6140_v29 = vadd.s32 72, %v11654_v15  ;;  %vm5989_vm15 = vweird.f32 %v11865_v27 }
 0x745   : > { %v5975_v14 = vmul.f32 %v6852_v0, %v5974_v43  ;;  %v6069_v25 = vmul.f32 %v5972_v53, %v5861_v21  ;;  %v6085_v63 = vmul.f32 %v5972_v53, %v5877_v34  ;;  %v5832_v45 = vsub.f32 %v5800_v51, %v5816_v12  ;;  %vm5981_vm11 = vmor %vm5979_vm10, %vm5980_vm8 }
 0x746   : > { %v6156_v21 = vadd.s32 %v11658_v62, %v6139_v54 }
 0x747   : > { %v5635_v39 = vpop.xlane.xlu1 %5634  ;;  %v5976_v33 = vmul.f32 0.5, %v5975_v14  ;;  %6104 = vst [vmem:[%s11702_s12 + $0x30] sm:$0xff] %v6069_v25  ;;  %v6270_v4 = vmul.f32 %v6642_v36, %v6069_v25  ;;  %v6286_v55 = vmul.f32 %v6658_v32, %v6085_v63  ;;  %v5848_v46 = vmax.f32 %v5832_v45, 0.0 }
 0x748   : > { %v5656_v23 = vadd.f32 %v5635_v39, %v11573_v61  ;;  %6120 = vst [vmem:[%s11702_s12 + $0x130] sm:$0xff] %v6085_v63  ;;  %vm6176_vm12 = vcmp.lt.s32.totalorder %v6156_v21, %v11671_v48  ;;  %vm6192_vm14 = vcmp.lt.s32.totalorder %v6156_v21, %v11675_v28  ;;  %v6157_v14 = vadd.s32 %v11658_v62, %v6140_v29  ;;  %v13336_v39 = vld [vmem:[#allocation109_spill] sm:$0xff]  ;;  %v13337_v63 = vld [vmem:[#allocation15_spill] sm:$0xff] }
 0x749   : > { %v5764_v30 = vpop.xlane.xlu0 %5763  ;;  %v5977_v37 = vsub.f32 1.5, %v5976_v33  ;;  %6302 = vst [vmem:[%s7308_s10 + $0x30] sm:$0xff] %v6270_v4  ;;  %v11890_v16 = vadd.f32 1e-05, %v5848_v46  ;;  %v6854_v47 = vpop.eup %6853  ;;  %v5863_v25 = vsub.f32 %v13336_v39, %v11819_v3  ;;  %v5879_v33 = vsub.f32 %v13337_v63, %v11819_v3 }
 0x74a   : > { %v11884_v13 = vmul.f32 %v11628_v7, %v5656_v23  ;;  %v5785_v31 = vadd.f32 %v5764_v30, %v11575_v11  ;;  %6318 = vst [vmem:[%s7308_s10 + $0xb0] sm:$0xff] %v6286_v55  ;;  %v5984_v5 = vmul.f32 %v6854_v47, %v11865_v27  ;;  %vm5990_vm13 = vweird.f32 %v6854_v47 }
 0x74b   : > { %v5978_v61 = vmul.f32 %v6852_v0, %v5977_v37  ;;  %6855 = vrsqrt.f32 %v11890_v16  ;;  %vm5991_vm0 = vmor %vm5989_vm15, %vm5990_vm13  ;;  %v6644_v30 = vsel %vm6176_vm12, 1.0, %v13334_v26  ;;  %v6660_v27 = vsel %vm6192_vm14, 1.0, %v13334_v26 }
 0x74c   : > { %v5801_v11 = vmul.f32 %v5785_v31, %v11628_v7  ;;  %v5817_v35 = vmul.f32 %v11884_v13, %v11884_v13  ;;  %v5985_v42 = vmul.f32 %v6854_v47, %v5984_v5  ;;  %vm6177_vm1 = vcmp.lt.s32.totalorder %v6157_v14, %v11671_v48 }
 0x74d   : > { %v5982_v52 = vsel %vm5981_vm11, %v6852_v0, %v5978_v61  ;;  %v6141_v31 = vadd.s32 80, %v11654_v15  ;;  %vm6193_vm3 = vcmp.lt.s32.totalorder %v6157_v14, %v11675_v28  ;;  %vm5999_vm4 = vweird.f32 %v11890_v16 }
 0x74e   : > { %v6070_v60 = vmul.f32 %v5982_v52, %v5862_v44  ;;  %v6086_v1 = vmul.f32 %v5982_v52, %v5878_v56  ;;  %v5833_v18 = vsub.f32 %v5801_v11, %v5817_v35  ;;  %v5637_v19 = vpop.xlane.xlu2 %5636  ;;  %v5986_v17 = vmul.f32 0.5, %v5985_v42  ;;  %v13338_v52 = vld [vmem:[#allocation83_spill] sm:$0xff] }
 0x74f   : > { %v5657_v57 = vadd.f32 %v5637_v19, %v11581_v24  ;;  %v6645_v19 = vsel %vm6177_vm1, 1.0, %v13334_v26  ;;  %v6661_v42 = vsel %vm6193_vm3, 1.0, %v13334_v26  ;;  %v6142_v14 = vadd.s32 88, %v11654_v15 }
 0x750   : > { %6105 = vst [vmem:[%s11702_s12 + $0x38] sm:$0xff] %v6070_v60  ;;  %v6271_v58 = vmul.f32 %v6643_v6, %v6070_v60  ;;  %v6287_v41 = vmul.f32 %v6659_v9, %v6086_v1  ;;  %v5849_v0 = vmax.f32 %v5833_v18, 0.0  ;;  %v5766_v20 = vpop.xlane.xlu1 %5765  ;;  %v5987_v24 = vsub.f32 1.5, %v5986_v17 }
 0x751   : > { %6121 = vst [vmem:[%s11702_s12 + $0x138] sm:$0xff] %v6086_v1  ;;  %v11912_v22 = vmul.f32 %v11628_v7, %v5657_v57  ;;  %v5786_v43 = vadd.f32 %v5766_v20, %v13335_v59  ;;  %v6856_v8 = vpop.eup %6855  ;;  %v13339_v1 = vld [vmem:[#allocation60_spill] sm:$0xff]  ;;  %v6158_v57 = vadd.s32 %v11658_v62, %v6141_v31 }
 0x752   : > { %6303 = vst [vmem:[%s7308_s10 + $0x38] sm:$0xff] %v6271_v58  ;;  %v11916_v34 = vadd.f32 1e-05, %v5849_v0  ;;  %v5994_v51 = vmul.f32 %v6856_v8, %v11890_v16  ;;  %v5988_v12 = vmul.f32 %v6854_v47, %v5987_v24  ;;  %vm6000_vm2 = vweird.f32 %v6856_v8 }
 0x753   : > { %6319 = vst [vmem:[%s7308_s10 + $0xb8] sm:$0xff] %v6287_v41  ;;  %v5818_v36 = vmul.f32 %v11912_v22, %v11912_v22  ;;  %v5802_v32 = vmul.f32 %v5786_v43, %v11628_v7  ;;  %v5880_v18 = vsub.f32 %v13339_v1, %v11853_v10  ;;  %vm6001_vm5 = vmor %vm5999_vm4, %vm6000_vm2  ;;  %vm6178_vm7 = vcmp.lt.s32.totalorder %v6158_v57, %v11671_v48 }
 0x754   : > { %6857 = vrsqrt.f32 %v11916_v34  ;;  %v5995_v45 = vmul.f32 %v6856_v8, %v5994_v51  ;;  %v5992_v4 = vsel %vm5991_vm0, %v6854_v47, %v5988_v12  ;;  %vm6194_vm8 = vcmp.lt.s32.totalorder %v6158_v57, %v11675_v28  ;;  %v13340_v51 = vld [vmem:[#allocation95_spill] sm:$0xff] }
 0x755   : > { %v5834_v55 = vsub.f32 %v5802_v32, %v5818_v36  ;;  %v6071_v46 = vmul.f32 %v5992_v4, %v5863_v25  ;;  %v6087_v6 = vmul.f32 %v5992_v4, %v5879_v33  ;;  %vm6009_vm9 = vweird.f32 %v11916_v34  ;;  %v13341_v32 = vld [vmem:[#allocation21_spill] sm:$0xff] }
 0x756   : > { %v5639_v53 = vpop.xlane.xlu0 %5638  ;;  %v5996_v3 = vmul.f32 0.5, %v5995_v45  ;;  %v5865_v12 = vsub.f32 %v13340_v51, %v11884_v13  ;;  %v6646_v63 = vsel %vm6178_vm7, 1.0, %v13334_v26 }
 0x757   : > { %v5658_v23 = vadd.f32 %v5639_v53, %v11598_v50  ;;  %v5850_v50 = vmax.f32 %v5834_v55, 0.0  ;;  %6106 = vst [vmem:[%s11702_s12 + $0x40] sm:$0xff] %v6071_v46  ;;  %v6272_v44 = vmul.f32 %v6644_v30, %v6071_v46  ;;  %v6288_v47 = vmul.f32 %v6660_v27, %v6087_v6 }
 0x758   : > { %v5768_v37 = vpop.xlane.xlu2 %5767  ;;  %v5997_v56 = vsub.f32 1.5, %v5996_v3  ;;  %6122 = vst [vmem:[%s11702_s12 + $0x140] sm:$0xff] %v6087_v6  ;;  %v5881_v53 = vsub.f32 %v13341_v32, %v11884_v13  ;;  %v6159_v13 = vadd.s32 %v11658_v62, %v6142_v14  ;;  %v13346_v32 = vld [vmem:[#allocation85_spill] sm:$0xff] }
 0x759   : > { %v5787_v61 = vadd.f32 %v5768_v37, %v11591_v38  ;;  %v11942_v11 = vmul.f32 %v11628_v7, %v5658_v23  ;;  %v11947_v9 = vadd.f32 1e-05, %v5850_v50  ;;  %6304 = vst [vmem:[%s7308_s10 + $0x40] sm:$0xff] %v6272_v44  ;;  %v5864_v38 = vsub.f32 %v13338_v52, %v11853_v10 }
 0x75a   : > { %v6858_v54 = vpop.eup %6857  ;;  %v5998_v5 = vmul.f32 %v6856_v8, %v5997_v56  ;;  %6320 = vst [vmem:[%s7308_s10 + $0xc0] sm:$0xff] %v6288_v47  ;;  %vm6179_vm12 = vcmp.lt.s32.totalorder %v6159_v13, %v11671_v48  ;;  %vm6195_vm13 = vcmp.lt.s32.totalorder %v6159_v13, %v11675_v28  ;;  %v13342_v47 = vld [vmem:[#allocation114_spill] sm:$0xff] }
 0x75b   : > { %v6004_v35 = vmul.f32 %v6858_v54, %v11916_v34  ;;  %v5803_v60 = vmul.f32 %v5787_v61, %v11628_v7  ;;  %6859 = vrsqrt.f32 %v11947_v9  ;;  %v5819_v58 = vmul.f32 %v11942_v11, %v11942_v11 }
 0x75c   : > { %v6002_v16 = vsel %vm6001_vm5, %v6856_v8, %v5998_v5  ;;  %vm6010_vm6 = vweird.f32 %v6858_v54  ;;  %v6662_v34 = vsel %vm6194_vm8, 1.0, %v13334_v26  ;;  %vm6019_vm14 = vweird.f32 %v11947_v9 }
 0x75d   : > { %v6005_v21 = vmul.f32 %v6858_v54, %v6004_v35  ;;  %v6072_v10 = vmul.f32 %v6002_v16, %v5864_v38  ;;  %v6088_v41 = vmul.f32 %v6002_v16, %v5880_v18  ;;  %v5835_v20 = vsub.f32 %v5803_v60, %v5819_v58  ;;  %vm6011_vm10 = vmor %vm6009_vm9, %vm6010_vm6  ;;  %v13343_v35 = vld [vmem:[#allocation22_spill] sm:$0xff]  ;;  %v13344_v58 = vld [vmem:[#allocation29_spill] sm:$0xff] }
 0x75e   : > { %v5866_v56 = vsub.f32 %v13342_v47, %v11912_v22  ;;  %v5882_v52 = vsub.f32 %v13343_v35, %v11912_v22  ;;  %v6647_v1 = vsel %vm6179_vm12, 1.0, %v13334_v26  ;;  %v6663_v18 = vsel %vm6195_vm13, 1.0, %v13334_v26 }
 0x75f   : > { %v6006_v29 = vmul.f32 0.5, %v6005_v21  ;;  %v11966_v0 = vpop.xlane.xlu1 %5640  ;;  %6107 = vst [vmem:[%s11702_s12 + $0x48] sm:$0xff] %v6072_v10  ;;  %v6273_v17 = vmul.f32 %v6645_v19, %v6072_v10  ;;  %v6289_v59 = vmul.f32 %v6661_v42, %v6088_v41  ;;  %v5851_v8 = vmax.f32 %v5835_v20, 0.0 }
 0x760   : > { %6123 = vst [vmem:[%s11702_s12 + $0x148] sm:$0xff] %v6088_v41  ;;  %v5659_v10 = vadd.f32 %v11966_v0, %v13344_v58 }
 0x761   : > { %v6007_v43 = vsub.f32 1.5, %v6006_v29  ;;  %v6860_v24 = vpop.eup %6859  ;;  %6305 = vst [vmem:[%s7308_s10 + $0x48] sm:$0xff] %v6273_v17  ;;  %v11981_v25 = vadd.f32 1e-05, %v5851_v8  ;;  %v13345_v8 = vld [vmem:[#allocation104_spill] sm:$0xff] }
 0x762   : > { %6321 = vst [vmem:[%s7308_s10 + $0xc8] sm:$0xff] %v6289_v59  ;;  %v6014_v39 = vmul.f32 %v6860_v24, %v11947_v9  ;;  %vm6020_vm11 = vweird.f32 %v6860_v24  ;;  %v12029_v51 = vmul.f32 %v11628_v7, %v5659_v10 }
 0x763   : > { %v6008_v36 = vmul.f32 %v6858_v54, %v6007_v43  ;;  %6861 = vrsqrt.f32 %v11981_v25  ;;  %vm6021_vm15 = vmor %vm6019_vm14, %vm6020_vm11  ;;  %vm6029_vm3 = vweird.f32 %v11981_v25 }
 0x764   : > { %v6015_v27 = vmul.f32 %v6860_v24, %v6014_v39  ;;  %v13347_v39 = vld [vmem:[#allocation23_spill] sm:$0xff] }
 0x765   : > { %v6012_v33 = vsel %vm6011_vm10, %v6858_v54, %v6008_v36 }
 0x766   : > { %v5643_v45 = vpop.xlane.xlu2 %5642  ;;  %v6073_v23 = vmul.f32 %v6012_v33, %v5865_v12  ;;  %v6089_v30 = vmul.f32 %v6012_v33, %v5881_v53  ;;  %v6016_v6 = vmul.f32 0.5, %v6015_v27  ;;  %v5867_v53 = vsub.f32 %v13346_v32, %v11942_v11  ;;  %v13348_v33 = vld [vmem:[#allocation28_spill] sm:$0xff] }
 0x767   : > { %v5660_v4 = vadd.f32 %v5643_v45, %v11613_v40 }
 0x768   : > { %v5772_v55 = vpop.xlane.xlu1 %5771  ;;  %6108 = vst [vmem:[%s11702_s12 + $0x50] sm:$0xff] %v6073_v23  ;;  %v6274_v37 = vmul.f32 %v6646_v63, %v6073_v23  ;;  %v6290_v46 = vmul.f32 %v6662_v34, %v6089_v30  ;;  %v6017_v50 = vsub.f32 1.5, %v6016_v6  ;;  %v5883_v63 = vsub.f32 %v13347_v39, %v11942_v11 }
 0x769   : > { %v5789_v3 = vadd.f32 %v5772_v55, %v11616_v49  ;;  %6124 = vst [vmem:[%s11702_s12 + $0x150] sm:$0xff] %v6089_v30  ;;  %v11992_v31 = vmul.f32 %v11628_v7, %v5660_v4  ;;  %v6862_v54 = vpop.eup %6861  ;;  %v6143_v49 = vadd.s32 96, %v11654_v15 }
 0x76a   : > { %6306 = vst [vmem:[%s7308_s10 + $0x50] sm:$0xff] %v6274_v37  ;;  %v6018_v44 = vmul.f32 %v6860_v24, %v6017_v50  ;;  %v6024_v38 = vmul.f32 %v6862_v54, %v11981_v25  ;;  %vm6030_vm0 = vweird.f32 %v6862_v54  ;;  %v6145_v37 = vadd.s32 112, %v11654_v15 }
 0x76b   : > { %v5805_v61 = vmul.f32 %v5789_v3, %v11628_v7  ;;  %6322 = vst [vmem:[%s7308_s10 + $0xd0] sm:$0xff] %v6290_v46  ;;  %v5821_v40 = vmul.f32 %v11992_v31, %v11992_v31  ;;  %v6160_v22 = vadd.s32 %v11658_v62, %v6143_v49  ;;  %vm6031_vm4 = vmor %vm6029_vm3, %vm6030_vm0  ;;  %v5820_v46 = vmul.f32 %v12029_v51, %v12029_v51 }
 0x76c   : > { %v6022_v9 = vsel %vm6021_vm15, %v6860_v24, %v6018_v44  ;;  %v6025_v16 = vmul.f32 %v6862_v54, %v6024_v38  ;;  %v6162_v44 = vadd.s32 %v11658_v62, %v6145_v37 }
 0x76d   : > { %v5837_v5 = vsub.f32 %v5805_v61, %v5821_v40  ;;  %v6074_v21 = vmul.f32 %v6022_v9, %v5866_v56  ;;  %v6090_v42 = vmul.f32 %v6022_v9, %v5882_v52  ;;  %vm6180_vm1 = vcmp.lt.s32.totalorder %v6160_v22, %v11671_v48 }
 0x76e   : > { %v5645_v60 = vpop.xlane.xlu0 %5644  ;;  %v6026_v59 = vmul.f32 0.5, %v6025_v16  ;;  %vm6196_vm2 = vcmp.lt.s32.totalorder %v6160_v22, %v11675_v28  ;;  %v6648_v23 = vsel %vm6180_vm1, 1.0, %v13334_v26  ;;  %vm6182_vm6 = vcmp.lt.s32.totalorder %v6162_v44, %v11671_v48 }
 0x76f   : > { %v5661_v19 = vadd.f32 %v5645_v60, %v11619_v2  ;;  %v5853_v57 = vmax.f32 %v5837_v5, 0.0  ;;  %6109 = vst [vmem:[%s11702_s12 + $0x58] sm:$0xff] %v6074_v21  ;;  %v6275_v20 = vmul.f32 %v6647_v1, %v6074_v21  ;;  %v6291_v17 = vmul.f32 %v6663_v18, %v6090_v42  ;;  %v13349_v5 = vld [vmem:[#allocation118_spill] sm:$0xff]  ;;  %v13350_v1 = vld [vmem:[#allocation31_spill] sm:$0xff] }
 0x770   : > { %v5774_v29 = vpop.xlane.xlu2 %5773  ;;  %6125 = vst [vmem:[%s11702_s12 + $0x158] sm:$0xff] %v6090_v42  ;;  %v6027_v36 = vsub.f32 1.5, %v6026_v59  ;;  %v6664_v25 = vsel %vm6196_vm2, 1.0, %v13334_v26  ;;  %vm6198_vm7 = vcmp.lt.s32.totalorder %v6162_v44, %v11675_v28  ;;  %v6146_v52 = vadd.s32 120, %v11654_v15 }
 0x771   : > { %v12015_v41 = vmul.f32 %v11628_v7, %v5661_v19  ;;  %v5901_v2 = vadd.f32 1e-05, %v5853_v57  ;;  %v5790_v24 = vadd.f32 %v5774_v29, %v13345_v8  ;;  %6307 = vst [vmem:[%s7308_s10 + $0x58] sm:$0xff] %v6275_v20  ;;  %v5869_v60 = vsub.f32 %v13349_v5, %v11992_v31 }
 0x772   : > { %6323 = vst [vmem:[%s7308_s10 + $0xd8] sm:$0xff] %v6291_v17  ;;  %v6028_v14 = vmul.f32 %v6862_v54, %v6027_v36  ;;  %v5885_v18 = vsub.f32 %v13350_v1, %v11992_v31  ;;  %v6650_v9 = vsel %vm6182_vm6, 1.0, %v13334_v26  ;;  %v6666_v19 = vsel %vm6198_vm7, 1.0, %v13334_v26 }
 0x773   : > { %v5822_v43 = vmul.f32 %v12015_v41, %v12015_v41  ;;  %6863 = vrsqrt.f32 %v5901_v2  ;;  %v5806_v0 = vmul.f32 %v5790_v24, %v11628_v7  ;;  %vm6049_vm8 = vweird.f32 %v5901_v2 }
 0x774   : > { %v6032_v30 = vsel %vm6031_vm4, %v6862_v54, %v6028_v14  ;;  %v6163_v22 = vadd.s32 %v11658_v62, %v6146_v52  ;;  %v6144_v31 = vadd.s32 104, %v11654_v15  ;;  %v13352_v14 = vld [vmem:[#allocation37_spill] sm:$0xff] }
 0x775   : > { %v5838_v34 = vsub.f32 %v5806_v0, %v5822_v43  ;;  %v6075_v27 = vmul.f32 %v6032_v30, %v5867_v53  ;;  %v6091_v13 = vmul.f32 %v6032_v30, %v5883_v63  ;;  %v13351_v0 = vld [vmem:[#allocation18_spill] sm:$0xff] }
 0x776   : > { %v5770_v12 = vpop.xlane.xlu0 %5769  ;;  %vm6183_vm10 = vcmp.lt.s32.totalorder %v6163_v22, %v11671_v48  ;;  %vm6199_vm12 = vcmp.lt.s32.totalorder %v6163_v22, %v11675_v28  ;;  %v6161_v8 = vadd.s32 %v11658_v62, %v6144_v31  ;;  %v5870_v15 = vsub.f32 %v13351_v0, %v12015_v41 }
 0x777   : > { %v5788_v45 = vadd.f32 %v5770_v12, %v13348_v33  ;;  %v5854_v4 = vmax.f32 %v5838_v34, 0.0  ;;  %6110 = vst [vmem:[%s11702_s12 + $0x60] sm:$0xff] %v6075_v27  ;;  %v6276_v6 = vmul.f32 %v6648_v23, %v6075_v27  ;;  %v6292_v3 = vmul.f32 %v6664_v25, %v6091_v13  ;;  %v13354_v23 = vld [vmem:[#allocation33_spill] sm:$0xff] }
 0x778   : > { %6126 = vst [vmem:[%s11702_s12 + $0x160] sm:$0xff] %v6091_v13  ;;  %v5886_v12 = vsub.f32 %v13352_v14, %v12015_v41  ;;  %v6651_v32 = vsel %vm6183_vm10, 1.0, %v13334_v26  ;;  %v6667_v53 = vsel %vm6199_vm12, 1.0, %v13334_v26  ;;  %vm6181_vm0 = vcmp.lt.s32.totalorder %v6161_v8, %v11671_v48  ;;  %v13353_v41 = vld [vmem:[#allocation86_spill] sm:$0xff] }
 0x779   : > { %v6864_v55 = vpop.eup %6863  ;;  %v5804_v11 = vmul.f32 %v5788_v45, %v11628_v7  ;;  %v5902_v61 = vadd.f32 1e-05, %v5854_v4  ;;  %6308 = vst [vmem:[%s7308_s10 + $0x60] sm:$0xff] %v6276_v6  ;;  %vm6197_vm1 = vcmp.lt.s32.totalorder %v6161_v8, %v11675_v28  ;;  %v5868_v45 = vsub.f32 %v13353_v41, %v12029_v51 }
 0x77a   : > { %v6044_v50 = vmul.f32 %v6864_v55, %v5901_v2  ;;  %6324 = vst [vmem:[%s7308_s10 + $0xe0] sm:$0xff] %v6292_v3  ;;  %vm6050_vm5 = vweird.f32 %v6864_v55  ;;  %v5884_v25 = vsub.f32 %v13354_v23, %v12029_v51  ;;  %v6649_v48 = vsel %vm6181_vm0, 1.0, %v13334_v26 }
 0x77b   : > { %v5836_v40 = vsub.f32 %v5804_v11, %v5820_v46  ;;  %6865 = vrsqrt.f32 %v5902_v61  ;;  %vm6051_vm9 = vmor %vm6049_vm8, %vm6050_vm5  ;;  %vm6059_vm13 = vweird.f32 %v5902_v61  ;;  %v6665_v28 = vsel %vm6197_vm1, 1.0, %v13334_v26 }
 0x77c   : > { %v6045_v54 = vmul.f32 %v6864_v55, %v6044_v50 }
 0x77d   : > { %v5852_v49 = vmax.f32 %v5836_v40, 0.0 }
 0x77e   : > { %v6046_v47 = vmul.f32 0.5, %v6045_v54 }
 0x77f   : > { %v5900_v56 = vadd.f32 1e-05, %v5852_v49 }
 0x780   : > { %v6047_v7 = vsub.f32 1.5, %v6046_v47 }
 0x781   : > { %6867 = vrsqrt.f32 %v5900_v56  ;;  %v6866_v38 = vpop.eup %6865  ;;  %vm6039_vm2 = vweird.f32 %v5900_v56 }
 0x782   : > { %v6048_v35 = vmul.f32 %v6864_v55, %v6047_v7  ;;  %v6054_v42 = vmul.f32 %v6866_v38, %v5902_v61  ;;  %vm6060_vm11 = vweird.f32 %v6866_v38 }
 0x783   : > { %vm6061_vm14 = vmor %vm6059_vm13, %vm6060_vm11 }
 0x784   : > { %v6052_v21 = vsel %vm6051_vm9, %v6864_v55, %v6048_v35  ;;  %v6055_v58 = vmul.f32 %v6866_v38, %v6054_v42 }
 0x785   : > { %v6077_v16 = vmul.f32 %v6052_v21, %v5869_v60  ;;  %v6093_v57 = vmul.f32 %v6052_v21, %v5885_v18 }
 0x786   : > { %v6056_v17 = vmul.f32 0.5, %v6055_v58 }
 0x787   : > { %v6868_v10 = vpop.eup %6867  ;;  %6112 = vst [vmem:[%s11702_s12 + $0x70] sm:$0xff] %v6077_v16  ;;  %v6278_v29 = vmul.f32 %v6650_v9, %v6077_v16  ;;  %v6294_v20 = vmul.f32 %v6666_v19, %v6093_v57 }
 0x788   : > { %6128 = vst [vmem:[%s11702_s12 + $0x170] sm:$0xff] %v6093_v57  ;;  %v6034_v59 = vmul.f32 %v6868_v10, %v5900_v56  ;;  %v6057_v2 = vsub.f32 1.5, %v6056_v17  ;;  %vm6040_vm15 = vweird.f32 %v6868_v10 }
 0x789   : > { %6310 = vst [vmem:[%s7308_s10 + $0x70] sm:$0xff] %v6278_v29  ;;  %vm6041_vm3 = vmor %vm6039_vm2, %vm6040_vm15 }
 0x78a   : > { %6326 = vst [vmem:[%s7308_s10 + $0xf0] sm:$0xff] %v6294_v20  ;;  %v6035_v43 = vmul.f32 %v6868_v10, %v6034_v59  ;;  %v6058_v24 = vmul.f32 %v6866_v38, %v6057_v2 }
 0x78c   : > { %v6036_v36 = vmul.f32 0.5, %v6035_v43  ;;  %v6062_v39 = vsel %vm6061_vm14, %v6866_v38, %v6058_v24 }
 0x78d   : > { %v6078_v62 = vmul.f32 %v6062_v39, %v5870_v15  ;;  %v6094_v34 = vmul.f32 %v6062_v39, %v5886_v12 }
 0x78e   : > { %v6037_v63 = vsub.f32 1.5, %v6036_v36 }
 0x78f   : > { %6113 = vst [vmem:[%s11702_s12 + $0x78] sm:$0xff] %v6078_v62  ;;  %v6279_v30 = vmul.f32 %v6651_v32, %v6078_v62  ;;  %v6295_v27 = vmul.f32 %v6667_v53, %v6094_v34 }
 0x790   : > { %v6038_v33 = vmul.f32 %v6868_v10, %v6037_v63  ;;  %6129 = vst [vmem:[%s11702_s12 + $0x178] sm:$0xff] %v6094_v34 }
 0x791   : > { %6311 = vst [vmem:[%s7308_s10 + $0x78] sm:$0xff] %v6279_v30 }
 0x792   : > { %v6042_v13 = vsel %vm6041_vm3, %v6868_v10, %v6038_v33  ;;  %6327 = vst [vmem:[%s7308_s10 + $0xf8] sm:$0xff] %v6295_v27 }
 0x793   : > { %v6076_v4 = vmul.f32 %v6042_v13, %v5868_v45  ;;  %v6092_v55 = vmul.f32 %v6042_v13, %v5884_v25 }
 0x795   : > { %6111 = vst [vmem:[%s11702_s12 + $0x68] sm:$0xff] %v6076_v4  ;;  %v6277_v37 = vmul.f32 %v6649_v48, %v6076_v4  ;;  %v6293_v51 = vmul.f32 %v6665_v28, %v6092_v55 }
 0x796   : > { %6127 = vst [vmem:[%s11702_s12 + $0x168] sm:$0xff] %v6092_v55 }
 0x797   : > { %6309 = vst [vmem:[%s7308_s10 + $0x68] sm:$0xff] %v6277_v37 }
 0x798   : > { %6325 = vst [vmem:[%s7308_s10 + $0xe8] sm:$0xff] %v6293_v51 }
 0x799 PF: > { %6334 = sbr.rel (!%p7129_p1) target bundleno = 1987 (0x7c3), region = 124  ;;  %s6669_s15 = sadd.s32 (%p7129_p1), 4294967295, %s6974_s0  ;;  %v6435_v26 = vld [vmem:[%s7308_s10] sm:$0xff] (%p7129_p1)  ;;  %v6437_v11 = vld [vmem:[%s7308_s10 + $0x8] sm:$0xff] (%p7129_p1)  ;;  %v6439_v46 = vld [vmem:[%s7308_s10 + $0x10] sm:$0xff] (%p7129_p1) }
 0x79a   : > { %p6338_p0 = scmp.eq.s32.totalorder (%p7129_p1), %s6974_s0, 0  ;;  %p6336_p2 = scmp.gt.s32.totalorder (%p7129_p1), %s6669_s15, 0  ;;  %v6441_v6 = vld [vmem:[%s7308_s10 + $0x18] sm:$0xff] (%p7129_p1)  ;;  %v6443_v3 = vld [vmem:[%s7308_s10 + $0x20] sm:$0xff] (%p7129_p1)  ;;  %v6445_v50 = vld [vmem:[%s7308_s10 + $0x28] sm:$0xff] (%p7129_p1) }
 0x79b   : > { %s13355_s26 = sld [smem:[#allocation120_spill]] (%p7129_p1)  ;;  %v6447_v61 = vld [vmem:[%s7308_s10 + $0x30] sm:$0xff] (%p7129_p1)  ;;  %v6449_v40 = vld [vmem:[%s7308_s10 + $0x38] sm:$0xff] (%p7129_p1)  ;;  %v6451_v54 = vld [vmem:[%s7308_s10 + $0x40] sm:$0xff] (%p7129_p1) }
 0x79c   : > { %v6453_v44 = vld [vmem:[%s7308_s10 + $0x48] sm:$0xff] (%p7129_p1)  ;;  %v6455_v49 = vld [vmem:[%s7308_s10 + $0x50] sm:$0xff] (%p7129_p1)  ;;  %v6457_v47 = vld [vmem:[%s7308_s10 + $0x58] sm:$0xff] (%p7129_p1) }
 0x79d   : > { %v6459_v56 = vld [vmem:[%s7308_s10 + $0x60] sm:$0xff] (%p7129_p1)  ;;  %v6463_v35 = vld [vmem:[%s7308_s10 + $0x70] sm:$0xff] (%p7129_p1)  ;;  %v6465_v52 = vld [vmem:[%s7308_s10 + $0x78] sm:$0xff] (%p7129_p1) }
 0x79e   : > { %s13388_s28 = smov (%p6338_p0, %s6970_s28), 0  ;;  %s13390_s15 = smov (!%p6336_p2, %s6669_s15), 0  ;;  %v6461_v7 = vld [vmem:[%s7308_s10 + $0x68] sm:$0xff]  ;;  %v6467_v38 = vld [vmem:[%s7308_s10 + $0x80] sm:$0xff]  ;;  %v6471_v60 = vld [vmem:[%s7308_s10 + $0x90] sm:$0xff] }
 0x79f   : > { %s6670_s9 = sshll.u32 %s13388_s28, 4  ;;  %s6671_s11 = sshll.u32 %s13390_s15, 6  ;;  %v6469_v5 = vld [vmem:[%s7308_s10 + $0x88] sm:$0xff]  ;;  %v6473_v1 = vld [vmem:[%s7308_s10 + $0x98] sm:$0xff]  ;;  %v6475_v18 = vld [vmem:[%s7308_s10 + $0xa0] sm:$0xff] }
 0x7a0   : > { %s6342_s16 = sadd.s32 %s6671_s11, %s6670_s9  ;;  %v6477_v9 = vld [vmem:[%s7308_s10 + $0xa8] sm:$0xff]  ;;  %v6479_v19 = vld [vmem:[%s7308_s10 + $0xb0] sm:$0xff]  ;;  %v6481_v21 = vld [vmem:[%s7308_s10 + $0xb8] sm:$0xff] }
 0x7a1   : > { %s6672_s13 = sshll.u32 %s6342_s16, 3  ;;  %v6483_v42 = vld [vmem:[%s7308_s10 + $0xc0] sm:$0xff]  ;;  %v6485_v16 = vld [vmem:[%s7308_s10 + $0xc8] sm:$0xff]  ;;  %v6487_v57 = vld [vmem:[%s7308_s10 + $0xd0] sm:$0xff] }
 0x7a2   : > { %s12097_s24 = scalar_lea.vmem %s13355_s26, %s6672_s13  ;;  %v6489_v22 = vld [vmem:[%s7308_s10 + $0xd8] sm:$0xff]  ;;  %v6491_v58 = vld [vmem:[%s7308_s10 + $0xe0] sm:$0xff]  ;;  %v6493_v10 = vld [vmem:[%s7308_s10 + $0xe8] sm:$0xff] }
 0x7a3   : > { %6436 = vst [vmem:[%s12097_s24] sm:$0xff] %v6435_v26  ;;  %v6495_v29 = vld [vmem:[%s7308_s10 + $0xf0] sm:$0xff]  ;;  %v6497_v20 = vld [vmem:[%s7308_s10 + $0xf8] sm:$0xff] }
 0x7a4   : > { %6438 = vst [vmem:[%s12097_s24 + $0x8] sm:$0xff] %v6437_v11 }
 0x7a5   : > { %6440 = vst [vmem:[%s12097_s24 + $0x10] sm:$0xff] %v6439_v46 }
 0x7a6   : > { %6442 = vst [vmem:[%s12097_s24 + $0x18] sm:$0xff] %v6441_v6 }
 0x7a7   : > { %6444 = vst [vmem:[%s12097_s24 + $0x20] sm:$0xff] %v6443_v3 }
 0x7a8   : > { %6446 = vst [vmem:[%s12097_s24 + $0x28] sm:$0xff] %v6445_v50 }
 0x7a9   : > { %6448 = vst [vmem:[%s12097_s24 + $0x30] sm:$0xff] %v6447_v61 }
 0x7aa   : > { %6450 = vst [vmem:[%s12097_s24 + $0x38] sm:$0xff] %v6449_v40 }
 0x7ab   : > { %6452 = vst [vmem:[%s12097_s24 + $0x40] sm:$0xff] %v6451_v54 }
 0x7ac   : > { %6454 = vst [vmem:[%s12097_s24 + $0x48] sm:$0xff] %v6453_v44 }
 0x7ad   : > { %6456 = vst [vmem:[%s12097_s24 + $0x50] sm:$0xff] %v6455_v49 }
 0x7ae   : > { %6458 = vst [vmem:[%s12097_s24 + $0x58] sm:$0xff] %v6457_v47 }
 0x7af   : > { %6460 = vst [vmem:[%s12097_s24 + $0x60] sm:$0xff] %v6459_v56 }
 0x7b0   : > { %6462 = vst [vmem:[%s12097_s24 + $0x68] sm:$0xff] %v6461_v7 }
 0x7b1   : > { %6464 = vst [vmem:[%s12097_s24 + $0x70] sm:$0xff] %v6463_v35 }
 0x7b2   : > { %6466 = vst [vmem:[%s12097_s24 + $0x78] sm:$0xff] %v6465_v52 }
 0x7b3   : > { %6468 = vst [vmem:[%s12097_s24 + $0x100] sm:$0xff] %v6467_v38 }
 0x7b4   : > { %6470 = vst [vmem:[%s12097_s24 + $0x108] sm:$0xff] %v6469_v5 }
 0x7b5   : > { %6472 = vst [vmem:[%s12097_s24 + $0x110] sm:$0xff] %v6471_v60 }
 0x7b6   : > { %6474 = vst [vmem:[%s12097_s24 + $0x118] sm:$0xff] %v6473_v1 }
 0x7b7   : > { %6476 = vst [vmem:[%s12097_s24 + $0x120] sm:$0xff] %v6475_v18 }
 0x7b8   : > { %6478 = vst [vmem:[%s12097_s24 + $0x128] sm:$0xff] %v6477_v9 }
 0x7b9   : > { %6480 = vst [vmem:[%s12097_s24 + $0x130] sm:$0xff] %v6479_v19 }
 0x7ba   : > { %6482 = vst [vmem:[%s12097_s24 + $0x138] sm:$0xff] %v6481_v21 }
 0x7bb   : > { %6484 = vst [vmem:[%s12097_s24 + $0x140] sm:$0xff] %v6483_v42 }
 0x7bc   : > { %6486 = vst [vmem:[%s12097_s24 + $0x148] sm:$0xff] %v6485_v16 }
 0x7bd   : > { %6488 = vst [vmem:[%s12097_s24 + $0x150] sm:$0xff] %v6487_v57 }
 0x7be   : > { %6490 = vst [vmem:[%s12097_s24 + $0x158] sm:$0xff] %v6489_v22 }
 0x7bf   : > { %6492 = vst [vmem:[%s12097_s24 + $0x160] sm:$0xff] %v6491_v58 }
 0x7c0   : > { %6494 = vst [vmem:[%s12097_s24 + $0x168] sm:$0xff] %v6493_v10 }
 0x7c1   : > { %6496 = vst [vmem:[%s12097_s24 + $0x170] sm:$0xff] %v6495_v29 }
 0x7c2   : > { %6498 = vst [vmem:[%s12097_s24 + $0x178] sm:$0xff] %v6497_v20 }
 0x7c3 PF: > { %s23_s6 = sadd.s32 1, %s6986_s6   ;;  %s13356_s28 = sld [smem:[#allocation13_spill]] }
 0x7c4   : > { %p20_p1 = scmp.ge.s32.totalorder %s23_s6, 10   ;;  %s13357_s0 = sld [smem:[#allocation9_spill]] }
 0x7c5   : > { %s13358_s19 = sld [smem:[#allocation10_spill]]  ;;  %s13361_s22 = smov %s6950_s23 }
 0x7c6   : > { %s13359_s29 = sld [smem:[#allocation11_spill]]  ;;  %s13362_s23 = smov %s7135_s20 }
 0x7c7   : > { %s13360_s30 = sld [smem:[#allocation12_spill]]  ;;  %s13363_s24 = smov %s6958_s25 }
 0x7c8   : > { %s13364_s25 = smov %s7122_s7  ;;  %s13365_s26 = smov %s6966_s27 }
 0x7c9   : > { %s13366_s27 = smov %s13356_s28  ;;  %22 = sbr.rel (!%p20_p1) target bundleno = 12 (0xc), region = 206 }
 0x7ca   : > { %s13367_s28 = smov %s13357_s0 }
 0x7cb   : > { %s13368_s0 = smov %s13358_s19 }

</bundles_post_ra>
